<compile_context>
chip_gen: v5e
topology: v5e:2x2
jax: 0.10.0
libtpu: 0.0.40
codegen_flags: <defaults>
</compile_context>

<pallas_src>
import functools

import jax
import jax.numpy as jnp
from jax import lax
from jax.experimental import pallas as pl
from jax.experimental.pallas import tpu as pltpu

LANE = 128


# ----------------------------------------------------------------------------
# Small helpers
# ----------------------------------------------------------------------------
def _round_up(x, m):
    return (x + m - 1) // m * m


def _choose_tm(m, pref=512):
    """Row tile: large enough to amortize per-step overhead, >=2 steps (megacore)."""
    m8 = _round_up(max(m, 1), 8)
    if m8 <= 8:
        return m8
    if m8 <= pref:
        return _round_up((m8 + 1) // 2, 8)
    return pref


def _pad_rows(a, mp):
    return a if a.shape[0] == mp else jnp.pad(a, ((0, mp - a.shape[0]), (0, 0)))


def _mosaic_params(block_bytes):
    # explicit VMEM budget: 2x (double buffering) + headroom, clamped to fit v7x (64 MiB)
    limit = int(min(max(2 * block_bytes + (4 << 20), 16 << 20), 48 << 20))
    return pltpu.CompilerParams(dimension_semantics=("parallel",),
                                vmem_limit_bytes=limit)


# ----------------------------------------------------------------------------
# Pallas kernels
# ----------------------------------------------------------------------------
def _mm_bias_act_kernel(x_ref, w_ref, b_ref, o_ref, *, relu):
    acc = jnp.dot(x_ref[...], w_ref[...], preferred_element_type=jnp.float32)
    acc = acc + b_ref[...]
    if relu:
        acc = jnp.maximum(acc, 0.0)
    o_ref[...] = acc.astype(o_ref.dtype)


def _mm_bias_res_kernel(x_ref, w_ref, b_ref, r_ref, o_ref):
    acc = jnp.dot(x_ref[...], w_ref[...], preferred_element_type=jnp.float32)
    acc = acc + b_ref[...] + r_ref[...].astype(jnp.float32)
    o_ref[...] = jnp.maximum(acc, 0.0).astype(o_ref.dtype)


def _mm_bias_ds_res_kernel(x_ref, w_ref, b_ref, xd_ref, wd_ref, bd_ref, o_ref):
    # conv3 (1x1) + 1x1 downsample + residual + relu, all on the same row tile
    acc = jnp.dot(x_ref[...], w_ref[...], preferred_element_type=jnp.float32)
    acc = acc + jnp.dot(xd_ref[...], wd_ref[...],
                        preferred_element_type=jnp.float32)
    acc = acc + b_ref[...] + bd_ref[...]
    o_ref[...] = jnp.maximum(acc, 0.0).astype(o_ref.dtype)


def _conv3x3_grouped_kernel(x_ref, w_ref, b_ref, o_ref, *, groups, cpg,
                            dilation, stride, h_out, w_out):
    """3x3 grouped / dilated conv for one image, 9 in-kernel taps, per-group matmuls.

    x_ref: (Hp, Wp, Cp)       spatially padded bf16 activation (lane-padded channels)
    w_ref: (groups*9*cpg, cpg) bf16, rows ordered (group, tap, in-ch-within-group)
    b_ref: (1, Cp)            f32 folded-norm bias
    o_ref: (h_out*w_out, Cp)  flattened output rows for this image
    """
    m = h_out * w_out
    cp = o_ref.shape[-1]
    # Zero once so lane-padded channels (>= groups*cpg) stay well-defined zeros.
    o_ref[...] = jnp.zeros_like(o_ref)
    for g in range(groups):
        acc = jnp.zeros((m, cpg), jnp.float32)
        for ki in range(3):
            for kj in range(3):
                r0, c0 = ki * dilation, kj * dilation
                if stride == 1:
                    hs, ws = pl.ds(r0, h_out), pl.ds(c0, w_out)
                else:
                    hs, ws = pl.ds(r0, h_out, stride), pl.ds(c0, w_out, stride)
                xt = x_ref[hs, ws, :].reshape(m, cp)        # lane-dense tap view
                xg = xt[:, g * cpg:(g + 1) * cpg]           # this group's inputs
                row0 = (g * 9 + ki * 3 + kj) * cpg
                wt = w_ref[pl.ds(row0, cpg), :]             # (cpg, cpg)
                acc = acc + jnp.dot(xg, wt, preferred_element_type=jnp.float32)
        og = jnp.maximum(acc + b_ref[:, g * cpg:(g + 1) * cpg], 0.0)
        o_ref[:, g * cpg:(g + 1) * cpg] = og.astype(o_ref.dtype)


# ----------------------------------------------------------------------------
# pallas_call wrappers
# ----------------------------------------------------------------------------
def matmul_bias_act(x, w, b, *, relu=True, out_dtype=jnp.bfloat16):
    """act(x @ w + b).  x:(M,K) bf16, w:(K,N) bf16 (scale folded), b:(1,N) f32."""
    m, k = x.shape
    n = w.shape[1]
    tm = _choose_tm(m)
    mp = _round_up(m, tm)
    xp = _pad_rows(x, mp)
    bb = 2 * (tm * k * 2) + k * n * 2 + n * 4 + 2 * (tm * n * 2)
    out = pl.pallas_call(
        functools.partial(_mm_bias_act_kernel, relu=relu),
        out_shape=jax.ShapeDtypeStruct((mp, n), out_dtype),
        grid=(mp // tm,),
        in_specs=[pl.BlockSpec((tm, k), lambda i: (i, 0)),
                  pl.BlockSpec((k, n), lambda i: (0, 0)),
                  pl.BlockSpec((1, n), lambda i: (0, 0))],
        out_specs=pl.BlockSpec((tm, n), lambda i: (i, 0)),
        compiler_params=_mosaic_params(bb),
    )(xp, w, b)
    return out[:m] if mp != m else out


def matmul_bias_residual(x, w, b, residual, out_dtype=jnp.bfloat16):
    """relu(x @ w + b + residual)   (identity-residual last stage)."""
    m, k = x.shape
    n = w.shape[1]
    tm = _choose_tm(m)
    mp = _round_up(m, tm)
    xp = _pad_rows(x, mp)
    rp = _pad_rows(residual, mp)
    bb = 2 * (tm * k * 2) + k * n * 2 + n * 4 + 4 * (tm * n * 2)
    out = pl.pallas_call(
        _mm_bias_res_kernel,
        out_shape=jax.ShapeDtypeStruct((mp, n), out_dtype),
        grid=(mp // tm,),
        in_specs=[pl.BlockSpec((tm, k), lambda i: (i, 0)),
                  pl.BlockSpec((k, n), lambda i: (0, 0)),
                  pl.BlockSpec((1, n), lambda i: (0, 0)),
                  pl.BlockSpec((tm, n), lambda i: (i, 0))],
        out_specs=pl.BlockSpec((tm, n), lambda i: (i, 0)),
        compiler_params=_mosaic_params(bb),
    )(xp, w, b, rp)
    return out[:m] if mp != m else out


def matmul_bias_downsample_residual(x, w, b, xd, wd, bd, out_dtype=jnp.bfloat16):
    """relu(x @ w + b + xd @ wd + bd): conv3 + downsample + residual fused."""
    m, k = x.shape
    kd = xd.shape[1]
    n = w.shape[1]
    tm = _choose_tm(m)
    mp = _round_up(m, tm)
    xp = _pad_rows(x, mp)
    xdp = _pad_rows(xd, mp)
    bb = 2 * (tm * k * 2 + tm * kd * 2 + tm * n * 2) + (k * n + kd * n) * 2 + 2 * n * 4
    out = pl.pallas_call(
        _mm_bias_ds_res_kernel,
        out_shape=jax.ShapeDtypeStruct((mp, n), out_dtype),
        grid=(mp // tm,),
        in_specs=[pl.BlockSpec((tm, k), lambda i: (i, 0)),
                  pl.BlockSpec((k, n), lambda i: (0, 0)),
                  pl.BlockSpec((1, n), lambda i: (0, 0)),
                  pl.BlockSpec((tm, kd), lambda i: (i, 0)),
                  pl.BlockSpec((kd, n), lambda i: (0, 0)),
                  pl.BlockSpec((1, n), lambda i: (0, 0))],
        out_specs=pl.BlockSpec((tm, n), lambda i: (i, 0)),
        compiler_params=_mosaic_params(bb),
    )(xp, w, b, xdp, wd, bd)
    return out[:m] if mp != m else out


def conv3x3_grouped(x_pad_nhwc, w_g, b, *, groups, cpg, dilation, stride,
                    h_out, w_out, out_dtype=jnp.bfloat16):
    """Grouped/dilated 3x3 conv + folded norm + relu, one image per grid step."""
    n, hp, wp, cp = x_pad_nhwc.shape
    m = h_out * w_out
    # TODO(synk): mask ragged spatial tiles and add an H-tile grid axis (with a
    # dilation-sized halo) for feature maps too large to keep one plane in VMEM.
    assert w_out % 8 == 0 and m % 8 == 0
    kernel = functools.partial(_conv3x3_grouped_kernel, groups=groups, cpg=cpg,
                               dilation=dilation, stride=stride,
                               h_out=h_out, w_out=w_out)
    bb = 2 * (hp * wp * cp * 2) + 2 * (m * cp * 2) + groups * 9 * cpg * cpg * 2 + cp * 4
    out = pl.pallas_call(
        kernel,
        out_shape=jax.ShapeDtypeStruct((n * m, cp), out_dtype),
        grid=(n,),
        in_specs=[pl.BlockSpec((None, hp, wp, cp), lambda i: (i, 0, 0, 0)),
                  pl.BlockSpec((groups * 9 * cpg, cpg), lambda i: (0, 0)),
                  pl.BlockSpec((1, cp), lambda i: (0, 0))],
        out_specs=pl.BlockSpec((m, cp), lambda i: (i, 0)),
        compiler_params=_mosaic_params(bb),
    )(x_pad_nhwc, w_g, b)
    return out


# ----------------------------------------------------------------------------
# Parameters (kaiming_uniform(a=1) weights, frozen-BN affine folded into them)
# ----------------------------------------------------------------------------
def _kaiming_uniform(key, shape, fan_in):
    bound = (3.0 / fan_in) ** 0.5            # nn.init.kaiming_uniform_(w, a=1)
    return jax.random.uniform(key, shape, jnp.float32, -bound, bound)


def _norm_affine(key, c):
    k1, k2, k3, k4 = jax.random.split(key, 4)
    gamma = jax.random.uniform(k1, (c,), jnp.float32, 0.5, 1.5)
    beta = jax.random.uniform(k2, (c,), jnp.float32, -0.1, 0.1)
    mean = jax.random.uniform(k3, (c,), jnp.float32, -0.1, 0.1)
    var = jax.random.uniform(k4, (c,), jnp.float32, 0.5, 1.5)
    scale = gamma / jnp.sqrt(var + 1e-5)
    bias = beta - mean * scale
    return scale, bias


def init_bottleneck(key, in_c, bott_c, out_c, groups, has_downsample):
    cin_p, cb_p, co_p = (_round_up(c, LANE) for c in (in_c, bott_c, out_c))
    cpg = bott_c // groups
    ks = jax.random.split(key, 8)
    p, ref = {}, {}

    def pad2(a, rp, cp_):
        return jnp.pad(a, ((0, rp - a.shape[0]), (0, cp_ - a.shape[1])))

    # conv1 (1x1): (in_c, bott_c), fold norm scale into output columns, pad, bf16
    w1 = _kaiming_uniform(ks[0], (in_c, bott_c), in_c)
    s1, b1 = _norm_affine(ks[1], bott_c)
    w1f = (w1 * s1[None, :]).astype(jnp.bfloat16)
    p["w1"] = pad2(w1f, cin_p, cb_p)
    p["b1"] = jnp.pad(b1, (0, cb_p - bott_c)).reshape(1, cb_p)
    ref["w1"], ref["b1"] = w1f.astype(jnp.float32).reshape(1, 1, in_c, bott_c), b1

    # conv2 (3x3 grouped): HWIO grouped weight (3,3,cpg,bott_c)
    w2 = _kaiming_uniform(ks[2], (3, 3, cpg, bott_c), cpg * 9)
    s2, b2 = _norm_affine(ks[3], bott_c)
    w2f = (w2 * s2[None, None, None, :]).astype(jnp.bfloat16)
    w2k = w2f.reshape(3, 3, cpg, groups, cpg)          # [ki,kj,ci,g,co]
    w2k = jnp.transpose(w2k, (3, 0, 1, 2, 4))          # [g,ki,kj,ci,co]
    p["w2"] = w2k.reshape(groups * 9 * cpg, cpg)
    p["b2"] = jnp.pad(b2, (0, cb_p - bott_c)).reshape(1, cb_p)
    ref["w2"], ref["b2"] = w2f.astype(jnp.float32), b2

    # conv3 (1x1): (bott_c, out_c)
    w3 = _kaiming_uniform(ks[4], (bott_c, out_c), bott_c)
    s3, b3 = _norm_affine(ks[5], out_c)
    w3f = (w3 * s3[None, :]).astype(jnp.bfloat16)
    p["w3"] = pad2(w3f, cb_p, co_p)
    p["b3"] = jnp.pad(b3, (0, co_p - out_c)).reshape(1, co_p)
    ref["w3"], ref["b3"] = w3f.astype(jnp.float32).reshape(1, 1, bott_c, out_c), b3

    if has_downsample:
        wd = _kaiming_uniform(ks[6], (in_c, out_c), in_c)
        sd, bd = _norm_affine(ks[7], out_c)
        wdf = (wd * sd[None, :]).astype(jnp.bfloat16)
        p["wd"] = pad2(wdf, cin_p, co_p)
        p["bd"] = jnp.pad(bd, (0, co_p - out_c)).reshape(1, co_p)
        ref["wd"], ref["bd"] = wdf.astype(jnp.float32).reshape(1, 1, in_c, out_c), bd
    return p, ref


# ----------------------------------------------------------------------------
# Bottleneck forward (Pallas hot path)
# ----------------------------------------------------------------------------
def bottleneck_forward(x_nhwc, params, *, in_c, bott_c, out_c, groups,
                       stride, dilation, stride_in_1x1, has_downsample):
    n, h, w, _ = x_nhwc.shape
    cin_p, cb_p = params["w1"].shape
    co_p = params["w3"].shape[1]
    cpg = bott_c // groups

    down_stride = stride if dilation == 1 else 1
    if dilation > 1:
        stride = 1
    stride_1x1, stride_3x3 = (stride, 1) if stride_in_1x1 else (1, stride)

    # bf16 activations, channels lane-padded with zeros
    x_bf = jnp.pad(x_nhwc.astype(jnp.bfloat16),
                   ((0, 0), (0, 0), (0, 0), (0, cin_p - in_c)))

    # ---- conv1 (1x1) + bn1 + relu : flattened matmul, no im2col ----
    x1 = x_bf[:, ::stride_1x1, ::stride_1x1, :] if stride_1x1 > 1 else x_bf
    h1, w1_ = x1.shape[1], x1.shape[2]
    y1 = matmul_bias_act(x1.reshape(n * h1 * w1_, cin_p),
                         params["w1"], params["b1"], relu=True)

    # ---- conv2 (3x3 grouped/dilated) + bn2 + relu : in-kernel tap accumulation ----
    pad = dilation
    h2 = (h1 - 1) // stride_3x3 + 1
    w2_ = (w1_ - 1) // stride_3x3 + 1
    y1p = jnp.pad(y1.reshape(n, h1, w1_, cb_p),
                  ((0, 0), (pad, pad), (pad, pad), (0, 0)))
    y2 = conv3x3_grouped(y1p, params["w2"], params["b2"], groups=groups,
                         cpg=cpg, dilation=dilation, stride=stride_3x3,
                         h_out=h2, w_out=w2_)

    # ---- conv3 (1x1) + bn3 + (downsample|identity) + relu : one fused kernel ----
    if has_downsample:
        xd = x_bf[:, ::down_stride, ::down_stride, :] if down_stride > 1 else x_bf
        assert xd.shape[1] == h2 and xd.shape[2] == w2_
        out = matmul_bias_downsample_residual(
            y2, params["w3"], params["b3"],
            xd.reshape(n * h2 * w2_, cin_p), params["wd"], params["bd"])
    else:
        # PyTorch only attaches a downsample when in_c != out_c; without it the
        # residual add requires identical shapes (total stride 1, in_c == out_c).
        assert in_c == out_c and h2 == h and w2_ == w
        out = matmul_bias_residual(y2, params["w3"], params["b3"],
                                   x_bf.reshape(n * h * w, cin_p))

    return out.reshape(n, h2, w2_, co_p)[..., :out_c]


# ----------------------------------------------------------------------------
# Pure-JAX reference (lax.conv_general_dilated) for correctness checking
# ----------------------------------------------------------------------------
def ref_forward(x_nhwc, ref_p, *, groups, stride, dilation, stride_in_1x1,
                has_downsample):
    def conv(x, w, s, pad, d, g=1):
        return lax.conv_general_dilated(
            x, w, window_strides=(s, s), padding=[(pad, pad), (pad, pad)],
            rhs_dilation=(d, d), dimension_numbers=("NHWC", "HWIO", "NHWC"),
            feature_group_count=g)

    def bias(t, b):
        return t + b.reshape(1, 1, 1, -1)

    def q(t):  # mirror the kernel's bf16 activation storage between stages
        return t.astype(jnp.bfloat16).astype(jnp.float32)

    down_stride = stride if dilation == 1 else 1
    if dilation > 1:
        stride = 1
    stride_1x1, stride_3x3 = (stride, 1) if stride_in_1x1 else (1, stride)

    x0 = q(x_nhwc)
    out = q(jax.nn.relu(bias(conv(x0, ref_p["w1"], stride_1x1, 0, 1), ref_p["b1"])))
    out = q(jax.nn.relu(bias(conv(out, ref_p["w2"], stride_3x3, dilation,
                                  dilation, groups), ref_p["b2"])))
    out3 = bias(conv(out, ref_p["w3"], 1, 0, 1), ref_p["b3"])
    if has_downsample:
        identity = bias(conv(x0, ref_p["wd"], down_stride, 0, 1), ref_p["bd"])
    else:
        identity = x0
    return jax.nn.relu(out3 + identity)


if __name__ == "__main__":
    # Small config consistent with the PyTorch module
    in_c, bott_c, out_c = 16, 8, 32          # in_c != out_c => downsample branch
    num_groups = 2
    stride, dilation, stride_in_1x1 = 1, 1, False
    N, H, W = 2, 16, 16
    has_downsample = in_c != out_c

    key = jax.random.PRNGKey(0)
    kx, kp = jax.random.split(key)
    x_nchw = jax.random.normal(kx, (N, in_c, H, W), jnp.float32)   # PyTorch NCHW
    x_nhwc = jnp.transpose(x_nchw, (0, 2, 3, 1))                   # kernel NHWC

    params, ref_p = init_bottleneck(kp, in_c, bott_c, out_c, num_groups,
                                    has_downsample)

    fwd = jax.jit(functools.partial(
        bottleneck_forward, in_c=in_c, bott_c=bott_c, out_c=out_c,
        groups=num_groups, stride=stride, dilation=dilation,
        stride_in_1x1=stride_in_1x1, has_downsample=has_downsample))
    out = jax.block_until_ready(fwd(x_nhwc, params))

    ref = jax.block_until_ready(ref_forward(
        x_nhwc, ref_p, groups=num_groups, stride=stride, dilation=dilation,
        stride_in_1x1=stride_in_1x1, has_downsample=has_downsample))

    assert out.shape == ref.shape, (out.shape, ref.shape)
    out_f32 = out.astype(jnp.float32)
    err = float(jnp.max(jnp.abs(out_f32 - ref)))
    # bf16 activations / bf16-folded weights with f32 accumulation
    assert jnp.allclose(out_f32, ref, atol=2e-2, rtol=2e-2), err
    print("KERNEL_OK")
</pallas_src>

<mosaic_0001>
module attributes {stable_mosaic.version = 11 : i64} {
  func.func @_mm_bias_act_kernel(%arg0: i32, %arg1: memref<256x128xbf16, #tpu.memory_space<vmem>>, %arg2: memref<128x128xbf16, #tpu.memory_space<vmem>>, %arg3: memref<1x128xf32, #tpu.memory_space<vmem>>, %arg4: memref<256x128xbf16, #tpu.memory_space<vmem>>) attributes {dimension_semantics = [#tpu.dimension_semantics<parallel>], iteration_bounds = array<i64: 2>, scalar_prefetch = 0 : i64, scratch_operands = 0 : i64, tpu.core_type = #tpu.core_type<tc>, window_params = [{transform_indices = @transform_0, window_bounds = array<i64: 256, 128>}, {pipeline_mode = #tpu.pipeline_mode<synchronous>, transform_indices = @transform_1, window_bounds = array<i64: 128, 128>}, {pipeline_mode = #tpu.pipeline_mode<synchronous>, transform_indices = @transform_2, window_bounds = array<i64: 1, 128>}, {transform_indices = @transform_3, window_bounds = array<i64: 256, 128>}]} {
    %c0 = arith.constant 0 : index
    %c0_0 = arith.constant 0 : index
    %0 = vector.load %arg1[%c0, %c0_0] : memref<256x128xbf16, #tpu.memory_space<vmem>>, vector<256x128xbf16>
    %c0_1 = arith.constant 0 : index
    %c0_2 = arith.constant 0 : index
    %1 = vector.load %arg2[%c0_1, %c0_2] : memref<128x128xbf16, #tpu.memory_space<vmem>>, vector<128x128xbf16>
    %cst = arith.constant dense<0.000000e+00> : vector<256x128xf32>
    %2 = tpu.matmul %0, %1, %cst {dimension_numbers = #tpu.dot_dimension_numbers<[1], [0], [0], [1], [0, 0, 1, 1], [], []>} : vector<256x128xbf16>, vector<128x128xbf16>, vector<256x128xf32> -> vector<256x128xf32>
    %c0_3 = arith.constant 0 : index
    %c0_4 = arith.constant 0 : index
    %3 = vector.load %arg3[%c0_3, %c0_4] : memref<1x128xf32, #tpu.memory_space<vmem>>, vector<1x128xf32>
    %4 = vector.broadcast %3 : vector<1x128xf32> to vector<256x128xf32>
    %5 = arith.addf %2, %4 : vector<256x128xf32>
    %cst_5 = arith.constant 0.000000e+00 : f32
    %6 = vector.broadcast %cst_5 : f32 to vector<256x128xf32>
    %7 = arith.maximumf %5, %6 : vector<256x128xf32>
    %8 = arith.truncf %7 : vector<256x128xf32> to vector<256x128xbf16>
    %c0_6 = arith.constant 0 : index
    %c0_7 = arith.constant 0 : index
    %9 = vector.load %arg4[%c0_6, %c0_7] : memref<256x128xbf16, #tpu.memory_space<vmem>>, vector<256x128xbf16>
    tpu.vector_store %arg4[%c0_6, %c0_7], %8 {strides = array<i32>} : memref<256x128xbf16, #tpu.memory_space<vmem>>, vector<256x128xbf16>,
    return
  }
  func.func @transform_0(%arg0: i32) -> (i32, i32) {
    %c0_i32 = arith.constant 0 : i32
    %c0_i32_0 = arith.constant 0 : i32
    return %arg0, %c0_i32 : i32, i32
  }
  func.func @transform_1(%arg0: i32) -> (i32, i32) {
    %c0_i32 = arith.constant 0 : i32
    %c0_i32_0 = arith.constant 0 : i32
    %c0_i32_1 = arith.constant 0 : i32
    return %c0_i32, %c0_i32_0 : i32, i32
  }
  func.func @transform_2(%arg0: i32) -> (i32, i32) {
    %c0_i32 = arith.constant 0 : i32
    %c0_i32_0 = arith.constant 0 : i32
    %c0_i32_1 = arith.constant 0 : i32
    return %c0_i32, %c0_i32_0 : i32, i32
  }
  func.func @transform_3(%arg0: i32) -> (i32, i32) {
    %c0_i32 = arith.constant 0 : i32
    %c0_i32_0 = arith.constant 0 : i32
    return %arg0, %c0_i32 : i32, i32
  }
}

module attributes {stable_mosaic.version = 11 : i64} {
  func.func @_mm_bias_ds_res_kernel(%arg0: i32, %arg1: memref<256x128xbf16, #tpu.memory_space<vmem>>, %arg2: memref<128x128xbf16, #tpu.memory_space<vmem>>, %arg3: memref<1x128xf32, #tpu.memory_space<vmem>>, %arg4: memref<256x128xbf16, #tpu.memory_space<vmem>>, %arg5: memref<128x128xbf16, #tpu.memory_space<vmem>>, %arg6: memref<1x128xf32, #tpu.memory_space<vmem>>, %arg7: memref<256x128xbf16, #tpu.memory_space<vmem>>) attributes {dimension_semantics = [#tpu.dimension_semantics<parallel>], iteration_bounds = array<i64: 2>, scalar_prefetch = 0 : i64, scratch_operands = 0 : i64, tpu.core_type = #tpu.core_type<tc>, window_params = [{transform_indices = @transform_0, window_bounds = array<i64: 256, 128>}, {pipeline_mode = #tpu.pipeline_mode<synchronous>, transform_indices = @transform_1, window_bounds = array<i64: 128, 128>}, {pipeline_mode = #tpu.pipeline_mode<synchronous>, transform_indices = @transform_2, window_bounds = array<i64: 1, 128>}, {transform_indices = @transform_3, window_bounds = array<i64: 256, 128>}, {pipeline_mode = #tpu.pipeline_mode<synchronous>, transform_indices = @transform_4, window_bounds = array<i64: 128, 128>}, {pipeline_mode = #tpu.pipeline_mode<synchronous>, transform_indices = @transform_5, window_bounds = array<i64: 1, 128>}, {transform_indices = @transform_6, window_bounds = array<i64: 256, 128>}]} {
    %c0 = arith.constant 0 : index
    %c0_0 = arith.constant 0 : index
    %0 = vector.load %arg1[%c0, %c0_0] : memref<256x128xbf16, #tpu.memory_space<vmem>>, vector<256x128xbf16>
    %c0_1 = arith.constant 0 : index
    %c0_2 = arith.constant 0 : index
    %1 = vector.load %arg2[%c0_1, %c0_2] : memref<128x128xbf16, #tpu.memory_space<vmem>>, vector<128x128xbf16>
    %cst = arith.constant dense<0.000000e+00> : vector<256x128xf32>
    %2 = tpu.matmul %0, %1, %cst {dimension_numbers = #tpu.dot_dimension_numbers<[1], [0], [0], [1], [0, 0, 1, 1], [], []>} : vector<256x128xbf16>, vector<128x128xbf16>, vector<256x128xf32> -> vector<256x128xf32>
    %c0_3 = arith.constant 0 : index
    %c0_4 = arith.constant 0 : index
    %3 = vector.load %arg4[%c0_3, %c0_4] : memref<256x128xbf16, #tpu.memory_space<vmem>>, vector<256x128xbf16>
    %c0_5 = arith.constant 0 : index
    %c0_6 = arith.constant 0 : index
    %4 = vector.load %arg5[%c0_5, %c0_6] : memref<128x128xbf16, #tpu.memory_space<vmem>>, vector<128x128xbf16>
    %cst_7 = arith.constant dense<0.000000e+00> : vector<256x128xf32>
    %5 = tpu.matmul %3, %4, %cst_7 {dimension_numbers = #tpu.dot_dimension_numbers<[1], [0], [0], [1], [0, 0, 1, 1], [], []>} : vector<256x128xbf16>, vector<128x128xbf16>, vector<256x128xf32> -> vector<256x128xf32>
    %6 = arith.addf %2, %5 : vector<256x128xf32>
    %c0_8 = arith.constant 0 : index
    %c0_9 = arith.constant 0 : index
    %7 = vector.load %arg3[%c0_8, %c0_9] : memref<1x128xf32, #tpu.memory_space<vmem>>, vector<1x128xf32>
    %8 = vector.broadcast %7 : vector<1x128xf32> to vector<256x128xf32>
    %9 = arith.addf %6, %8 : vector<256x128xf32>
    %c0_10 = arith.constant 0 : index
    %c0_11 = arith.constant 0 : index
    %10 = vector.load %arg6[%c0_10, %c0_11] : memref<1x128xf32, #tpu.memory_space<vmem>>, vector<1x128xf32>
    %11 = vector.broadcast %10 : vector<1x128xf32> to vector<256x128xf32>
    %12 = arith.addf %9, %11 : vector<256x128xf32>
    %cst_12 = arith.constant 0.000000e+00 : f32
    %13 = vector.broadcast %cst_12 : f32 to vector<256x128xf32>
    %14 = arith.maximumf %12, %13 : vector<256x128xf32>
    %15 = arith.truncf %14 : vector<256x128xf32> to vector<256x128xbf16>
    %c0_13 = arith.constant 0 : index
    %c0_14 = arith.constant 0 : index
    %16 = vector.load %arg7[%c0_13, %c0_14] : memref<256x128xbf16, #tpu.memory_space<vmem>>, vector<256x128xbf16>
    tpu.vector_store %arg7[%c0_13, %c0_14], %15 {strides = array<i32>} : memref<256x128xbf16, #tpu.memory_space<vmem>>, vector<256x128xbf16>,
    return
  }
  func.func @transform_0(%arg0: i32) -> (i32, i32) {
    %c0_i32 = arith.constant 0 : i32
    %c0_i32_0 = arith.constant 0 : i32
    return %arg0, %c0_i32 : i32, i32
  }
  func.func @transform_1(%arg0: i32) -> (i32, i32) {
    %c0_i32 = arith.constant 0 : i32
    %c0_i32_0 = arith.constant 0 : i32
    %c0_i32_1 = arith.constant 0 : i32
    return %c0_i32, %c0_i32_0 : i32, i32
  }
  func.func @transform_2(%arg0: i32) -> (i32, i32) {
    %c0_i32 = arith.constant 0 : i32
    %c0_i32_0 = arith.constant 0 : i32
    %c0_i32_1 = arith.constant 0 : i32
    return %c0_i32, %c0_i32_0 : i32, i32
  }
  func.func @transform_3(%arg0: i32) -> (i32, i32) {
    %c0_i32 = arith.constant 0 : i32
    %c0_i32_0 = arith.constant 0 : i32
    return %arg0, %c0_i32 : i32, i32
  }
  func.func @transform_4(%arg0: i32) -> (i32, i32) {
    %c0_i32 = arith.constant 0 : i32
    %c0_i32_0 = arith.constant 0 : i32
    %c0_i32_1 = arith.constant 0 : i32
    return %c0_i32, %c0_i32_0 : i32, i32
  }
  func.func @transform_5(%arg0: i32) -> (i32, i32) {
    %c0_i32 = arith.constant 0 : i32
    %c0_i32_0 = arith.constant 0 : i32
    %c0_i32_1 = arith.constant 0 : i32
    return %c0_i32, %c0_i32_0 : i32, i32
  }
  func.func @transform_6(%arg0: i32) -> (i32, i32) {
    %c0_i32 = arith.constant 0 : i32
    %c0_i32_0 = arith.constant 0 : i32
    return %arg0, %c0_i32 : i32, i32
  }
}

module attributes {stable_mosaic.version = 11 : i64} {
  func.func @_conv3x3_grouped_kernel(%arg0: i32, %arg1: memref<1x18x18x128xbf16, #tpu.memory_space<vmem>>, %arg2: memref<72x4xbf16, #tpu.memory_space<vmem>>, %arg3: memref<1x128xf32, #tpu.memory_space<vmem>>, %arg4: memref<256x128xbf16, #tpu.memory_space<vmem>>) attributes {dimension_semantics = [#tpu.dimension_semantics<parallel>], iteration_bounds = array<i64: 2>, scalar_prefetch = 0 : i64, scratch_operands = 0 : i64, tpu.core_type = #tpu.core_type<tc>, window_params = [{transform_indices = @transform_0, window_bounds = array<i64: 1, 18, 18, 128>}, {pipeline_mode = #tpu.pipeline_mode<synchronous>, transform_indices = @transform_1, window_bounds = array<i64: 72, 4>}, {pipeline_mode = #tpu.pipeline_mode<synchronous>, transform_indices = @transform_2, window_bounds = array<i64: 1, 128>}, {transform_indices = @transform_3, window_bounds = array<i64: 256, 128>}]} {
    %cst = arith.constant 0.000000e+00 : bf16
    %0 = vector.broadcast %cst : bf16 to vector<256x128xbf16>
    %c0 = arith.constant 0 : index
    %c0_0 = arith.constant 0 : index
    %1 = vector.load %arg4[%c0, %c0_0] : memref<256x128xbf16, #tpu.memory_space<vmem>>, vector<256x128xbf16>
    tpu.vector_store %arg4[%c0, %c0_0], %0 {strides = array<i32>} : memref<256x128xbf16, #tpu.memory_space<vmem>>, vector<256x128xbf16>,
    %cst_1 = arith.constant 0.000000e+00 : f32
    %2 = vector.broadcast %cst_1 : f32 to vector<256x4xf32>
    %c0_2 = arith.constant 0 : index
    %c0_3 = arith.constant 0 : index
    %c0_4 = arith.constant 0 : index
    %c0_5 = arith.constant 0 : index
    %3 = vector.load %arg1[%c0_2, %c0_3, %c0_4, %c0_5] : memref<1x18x18x128xbf16, #tpu.memory_space<vmem>>, vector<1x16x16x128xbf16>
    %4 = vector.shape_cast %3 : vector<1x16x16x128xbf16> to vector<16x16x128xbf16>
    %5 = vector.shape_cast %4 : vector<16x16x128xbf16> to vector<256x128xbf16>
    %6 = vector.extract_strided_slice %5 {offsets = [0, 0], sizes = [256, 4], strides = [1, 1]} : vector<256x128xbf16> to vector<256x4xbf16>
    %c0_6 = arith.constant 0 : index
    %c0_7 = arith.constant 0 : index
    %7 = vector.load %arg2[%c0_6, %c0_7] : memref<72x4xbf16, #tpu.memory_space<vmem>>, vector<4x4xbf16>
    %cst_8 = arith.constant dense<0.000000e+00> : vector<256x4xf32>
    %8 = tpu.matmul %6, %7, %cst_8 {dimension_numbers = #tpu.dot_dimension_numbers<[1], [0], [0], [1], [0, 0, 1, 1], [], []>} : vector<256x4xbf16>, vector<4x4xbf16>, vector<256x4xf32> -> vector<256x4xf32>
    %9 = arith.addf %2, %8 : vector<256x4xf32>
    %c0_9 = arith.constant 0 : index
    %c0_10 = arith.constant 0 : index
    %c1 = arith.constant 1 : index
    %c0_11 = arith.constant 0 : index
    %10 = vector.load %arg1[%c0_9, %c0_10, %c1, %c0_11] : memref<1x18x18x128xbf16, #tpu.memory_space<vmem>>, vector<1x16x16x128xbf16>
    %11 = vector.shape_cast %10 : vector<1x16x16x128xbf16> to vector<16x16x128xbf16>
    %12 = vector.shape_cast %11 : vector<16x16x128xbf16> to vector<256x128xbf16>
    %13 = vector.extract_strided_slice %12 {offsets = [0, 0], sizes = [256, 4], strides = [1, 1]} : vector<256x128xbf16> to vector<256x4xbf16>
    %c4 = arith.constant 4 : index
    %c0_12 = arith.constant 0 : index
    %14 = vector.load %arg2[%c4, %c0_12] : memref<72x4xbf16, #tpu.memory_space<vmem>>, vector<4x4xbf16>
    %cst_13 = arith.constant dense<0.000000e+00> : vector<256x4xf32>
    %15 = tpu.matmul %13, %14, %cst_13 {dimension_numbers = #tpu.dot_dimension_numbers<[1], [0], [0], [1], [0, 0, 1, 1], [], []>} : vector<256x4xbf16>, vector<4x4xbf16>, vector<256x4xf32> -> vector<256x4xf32>
    %16 = arith.addf %9, %15 : vector<256x4xf32>
    %c0_14 = arith.constant 0 : index
    %c0_15 = arith.constant 0 : index
    %c2 = arith.constant 2 : index
    %c0_16 = arith.constant 0 : index
    %17 = vector.load %arg1[%c0_14, %c0_15, %c2, %c0_16] : memref<1x18x18x128xbf16, #tpu.memory_space<vmem>>, vector<1x16x16x128xbf16>
    %18 = vector.shape_cast %17 : vector<1x16x16x128xbf16> to vector<16x16x128xbf16>
    %19 = vector.shape_cast %18 : vector<16x16x128xbf16> to vector<256x128xbf16>
    %20 = vector.extract_strided_slice %19 {offsets = [0, 0], sizes = [256, 4], strides = [1, 1]} : vector<256x128xbf16> to vector<256x4xbf16>
    %c8 = arith.constant 8 : index
    %c0_17 = arith.constant 0 : index
    %21 = vector.load %arg2[%c8, %c0_17] : memref<72x4xbf16, #tpu.memory_space<vmem>>, vector<4x4xbf16>
    %cst_18 = arith.constant dense<0.000000e+00> : vector<256x4xf32>
    %22 = tpu.matmul %20, %21, %cst_18 {dimension_numbers = #tpu.dot_dimension_numbers<[1], [0], [0], [1], [0, 0, 1, 1], [], []>} : vector<256x4xbf16>, vector<4x4xbf16>, vector<256x4xf32> -> vector<256x4xf32>
    %23 = arith.addf %16, %22 : vector<256x4xf32>
    %c0_19 = arith.constant 0 : index
    %c1_20 = arith.constant 1 : index
    %c0_21 = arith.constant 0 : index
    %c0_22 = arith.constant 0 : index
    %24 = vector.load %arg1[%c0_19, %c1_20, %c0_21, %c0_22] : memref<1x18x18x128xbf16, #tpu.memory_space<vmem>>, vector<1x16x16x128xbf16>
    %25 = vector.shape_cast %24 : vector<1x16x16x128xbf16> to vector<16x16x128xbf16>
    %26 = vector.shape_cast %25 : vector<16x16x128xbf16> to vector<256x128xbf16>
    %27 = vector.extract_strided_slice %26 {offsets = [0, 0], sizes = [256, 4], strides = [1, 1]} : vector<256x128xbf16> to vector<256x4xbf16>
    %c12 = arith.constant 12 : index
    %c0_23 = arith.constant 0 : index
    %28 = vector.load %arg2[%c12, %c0_23] : memref<72x4xbf16, #tpu.memory_space<vmem>>, vector<4x4xbf16>
    %cst_24 = arith.constant dense<0.000000e+00> : vector<256x4xf32>
    %29 = tpu.matmul %27, %28, %cst_24 {dimension_numbers = #tpu.dot_dimension_numbers<[1], [0], [0], [1], [0, 0, 1, 1], [], []>} : vector<256x4xbf16>, vector<4x4xbf16>, vector<256x4xf32> -> vector<256x4xf32>
    %30 = arith.addf %23, %29 : vector<256x4xf32>
    %c0_25 = arith.constant 0 : index
    %c1_26 = arith.constant 1 : index
    %c1_27 = arith.constant 1 : index
    %c0_28 = arith.constant 0 : index
    %31 = vector.load %arg1[%c0_25, %c1_26, %c1_27, %c0_28] : memref<1x18x18x128xbf16, #tpu.memory_space<vmem>>, vector<1x16x16x128xbf16>
    %32 = vector.shape_cast %31 : vector<1x16x16x128xbf16> to vector<16x16x128xbf16>
    %33 = vector.shape_cast %32 : vector<16x16x128xbf16> to vector<256x128xbf16>
    %34 = vector.extract_strided_slice %33 {offsets = [0, 0], sizes = [256, 4], strides = [1, 1]} : vector<256x128xbf16> to vector<256x4xbf16>
    %c16 = arith.constant 16 : index
    %c0_29 = arith.constant 0 : index
    %35 = vector.load %arg2[%c16, %c0_29] : memref<72x4xbf16, #tpu.memory_space<vmem>>, vector<4x4xbf16>
    %cst_30 = arith.constant dense<0.000000e+00> : vector<256x4xf32>
    %36 = tpu.matmul %34, %35, %cst_30 {dimension_numbers = #tpu.dot_dimension_numbers<[1], [0], [0], [1], [0, 0, 1, 1], [], []>} : vector<256x4xbf16>, vector<4x4xbf16>, vector<256x4xf32> -> vector<256x4xf32>
    %37 = arith.addf %30, %36 : vector<256x4xf32>
    %c0_31 = arith.constant 0 : index
    %c1_32 = arith.constant 1 : index
    %c2_33 = arith.constant 2 : index
    %c0_34 = arith.constant 0 : index
    %38 = vector.load %arg1[%c0_31, %c1_32, %c2_33, %c0_34] : memref<1x18x18x128xbf16, #tpu.memory_space<vmem>>, vector<1x16x16x128xbf16>
    %39 = vector.shape_cast %38 : vector<1x16x16x128xbf16> to vector<16x16x128xbf16>
    %40 = vector.shape_cast %39 : vector<16x16x128xbf16> to vector<256x128xbf16>
    %41 = vector.extract_strided_slice %40 {offsets = [0, 0], sizes = [256, 4], strides = [1, 1]} : vector<256x128xbf16> to vector<256x4xbf16>
    %c20 = arith.constant 20 : index
    %c0_35 = arith.constant 0 : index
    %42 = vector.load %arg2[%c20, %c0_35] : memref<72x4xbf16, #tpu.memory_space<vmem>>, vector<4x4xbf16>
    %cst_36 = arith.constant dense<0.000000e+00> : vector<256x4xf32>
    %43 = tpu.matmul %41, %42, %cst_36 {dimension_numbers = #tpu.dot_dimension_numbers<[1], [0], [0], [1], [0, 0, 1, 1], [], []>} : vector<256x4xbf16>, vector<4x4xbf16>, vector<256x4xf32> -> vector<256x4xf32>
    %44 = arith.addf %37, %43 : vector<256x4xf32>
    %c0_37 = arith.constant 0 : index
    %c2_38 = arith.constant 2 : index
    %c0_39 = arith.constant 0 : index
    %c0_40 = arith.constant 0 : index
    %45 = vector.load %arg1[%c0_37, %c2_38, %c0_39, %c0_40] : memref<1x18x18x128xbf16, #tpu.memory_space<vmem>>, vector<1x16x16x128xbf16>
    %46 = vector.shape_cast %45 : vector<1x16x16x128xbf16> to vector<16x16x128xbf16>
    %47 = vector.shape_cast %46 : vector<16x16x128xbf16> to vector<256x128xbf16>
    %48 = vector.extract_strided_slice %47 {offsets = [0, 0], sizes = [256, 4], strides = [1, 1]} : vector<256x128xbf16> to vector<256x4xbf16>
    %c24 = arith.constant 24 : index
    %c0_41 = arith.constant 0 : index
    %49 = vector.load %arg2[%c24, %c0_41] : memref<72x4xbf16, #tpu.memory_space<vmem>>, vector<4x4xbf16>
    %cst_42 = arith.constant dense<0.000000e+00> : vector<256x4xf32>
    %50 = tpu.matmul %48, %49, %cst_42 {dimension_numbers = #tpu.dot_dimension_numbers<[1], [0], [0], [1], [0, 0, 1, 1], [], []>} : vector<256x4xbf16>, vector<4x4xbf16>, vector<256x4xf32> -> vector<256x4xf32>
    %51 = arith.addf %44, %50 : vector<256x4xf32>
    %c0_43 = arith.constant 0 : index
    %c2_44 = arith.constant 2 : index
    %c1_45 = arith.constant 1 : index
    %c0_46 = arith.constant 0 : index
    %52 = vector.load %arg1[%c0_43, %c2_44, %c1_45, %c0_46] : memref<1x18x18x128xbf16, #tpu.memory_space<vmem>>, vector<1x16x16x128xbf16>
    %53 = vector.shape_cast %52 : vector<1x16x16x128xbf16> to vector<16x16x128xbf16>
    %54 = vector.shape_cast %53 : vector<16x16x128xbf16> to vector<256x128xbf16>
    %55 = vector.extract_strided_slice %54 {offsets = [0, 0], sizes = [256, 4], strides = [1, 1]} : vector<256x128xbf16> to vector<256x4xbf16>
    %c28 = arith.constant 28 : index
    %c0_47 = arith.constant 0 : index
    %56 = vector.load %arg2[%c28, %c0_47] : memref<72x4xbf16, #tpu.memory_space<vmem>>, vector<4x4xbf16>
    %cst_48 = arith.constant dense<0.000000e+00> : vector<256x4xf32>
    %57 = tpu.matmul %55, %56, %cst_48 {dimension_numbers = #tpu.dot_dimension_numbers<[1], [0], [0], [1], [0, 0, 1, 1], [], []>} : vector<256x4xbf16>, vector<4x4xbf16>, vector<256x4xf32> -> vector<256x4xf32>
    %58 = arith.addf %51, %57 : vector<256x4xf32>
    %c0_49 = arith.constant 0 : index
    %c2_50 = arith.constant 2 : index
    %c2_51 = arith.constant 2 : index
    %c0_52 = arith.constant 0 : index
    %59 = vector.load %arg1[%c0_49, %c2_50, %c2_51, %c0_52] : memref<1x18x18x128xbf16, #tpu.memory_space<vmem>>, vector<1x16x16x128xbf16>
    %60 = vector.shape_cast %59 : vector<1x16x16x128xbf16> to vector<16x16x128xbf16>
    %61 = vector.shape_cast %60 : vector<16x16x128xbf16> to vector<256x128xbf16>
    %62 = vector.extract_strided_slice %61 {offsets = [0, 0], sizes = [256, 4], strides = [1, 1]} : vector<256x128xbf16> to vector<256x4xbf16>
    %c32 = arith.constant 32 : index
    %c0_53 = arith.constant 0 : index
    %63 = vector.load %arg2[%c32, %c0_53] : memref<72x4xbf16, #tpu.memory_space<vmem>>, vector<4x4xbf16>
    %cst_54 = arith.constant dense<0.000000e+00> : vector<256x4xf32>
    %64 = tpu.matmul %62, %63, %cst_54 {dimension_numbers = #tpu.dot_dimension_numbers<[1], [0], [0], [1], [0, 0, 1, 1], [], []>} : vector<256x4xbf16>, vector<4x4xbf16>, vector<256x4xf32> -> vector<256x4xf32>
    %65 = arith.addf %58, %64 : vector<256x4xf32>
    %c0_55 = arith.constant 0 : index
    %c0_56 = arith.constant 0 : index
    %66 = vector.load %arg3[%c0_55, %c0_56] : memref<1x128xf32, #tpu.memory_space<vmem>>, vector<1x4xf32>
    %67 = vector.broadcast %66 : vector<1x4xf32> to vector<256x4xf32>
    %68 = arith.addf %65, %67 : vector<256x4xf32>
    %cst_57 = arith.constant 0.000000e+00 : f32
    %69 = vector.broadcast %cst_57 : f32 to vector<256x4xf32>
    %70 = arith.maximumf %68, %69 : vector<256x4xf32>
    %71 = arith.truncf %70 : vector<256x4xf32> to vector<256x4xbf16>
    %c0_58 = arith.constant 0 : index
    %c0_59 = arith.constant 0 : index
    %72 = vector.load %arg4[%c0_58, %c0_59] : memref<256x128xbf16, #tpu.memory_space<vmem>>, vector<256x4xbf16>
    tpu.vector_store %arg4[%c0_58, %c0_59], %71 {strides = array<i32>} : memref<256x128xbf16, #tpu.memory_space<vmem>>, vector<256x4xbf16>,
    %cst_60 = arith.constant 0.000000e+00 : f32
    %73 = vector.broadcast %cst_60 : f32 to vector<256x4xf32>
    %c0_61 = arith.constant 0 : index
    %c0_62 = arith.constant 0 : index
    %c0_63 = arith.constant 0 : index
    %c0_64 = arith.constant 0 : index
    %74 = vector.load %arg1[%c0_61, %c0_62, %c0_63, %c0_64] : memref<1x18x18x128xbf16, #tpu.memory_space<vmem>>, vector<1x16x16x128xbf16>
    %75 = vector.shape_cast %74 : vector<1x16x16x128xbf16> to vector<16x16x128xbf16>
    %76 = vector.shape_cast %75 : vector<16x16x128xbf16> to vector<256x128xbf16>
    %77 = vector.extract_strided_slice %76 {offsets = [0, 4], sizes = [256, 4], strides = [1, 1]} : vector<256x128xbf16> to vector<256x4xbf16>
    %c36 = arith.constant 36 : index
    %c0_65 = arith.constant 0 : index
    %78 = vector.load %arg2[%c36, %c0_65] : memref<72x4xbf16, #tpu.memory_space<vmem>>, vector<4x4xbf16>
    %cst_66 = arith.constant dense<0.000000e+00> : vector<256x4xf32>
    %79 = tpu.matmul %77, %78, %cst_66 {dimension_numbers = #tpu.dot_dimension_numbers<[1], [0], [0], [1], [0, 0, 1, 1], [], []>} : vector<256x4xbf16>, vector<4x4xbf16>, vector<256x4xf32> -> vector<256x4xf32>
    %80 = arith.addf %73, %79 : vector<256x4xf32>
    %c0_67 = arith.constant 0 : index
    %c0_68 = arith.constant 0 : index
    %c1_69 = arith.constant 1 : index
    %c0_70 = arith.constant 0 : index
    %81 = vector.load %arg1[%c0_67, %c0_68, %c1_69, %c0_70] : memref<1x18x18x128xbf16, #tpu.memory_space<vmem>>, vector<1x16x16x128xbf16>
    %82 = vector.shape_cast %81 : vector<1x16x16x128xbf16> to vector<16x16x128xbf16>
    %83 = vector.shape_cast %82 : vector<16x16x128xbf16> to vector<256x128xbf16>
    %84 = vector.extract_strided_slice %83 {offsets = [0, 4], sizes = [256, 4], strides = [1, 1]} : vector<256x128xbf16> to vector<256x4xbf16>
    %c40 = arith.constant 40 : index
    %c0_71 = arith.constant 0 : index
    %85 = vector.load %arg2[%c40, %c0_71] : memref<72x4xbf16, #tpu.memory_space<vmem>>, vector<4x4xbf16>
    %cst_72 = arith.constant dense<0.000000e+00> : vector<256x4xf32>
    %86 = tpu.matmul %84, %85, %cst_72 {dimension_numbers = #tpu.dot_dimension_numbers<[1], [0], [0], [1], [0, 0, 1, 1], [], []>} : vector<256x4xbf16>, vector<4x4xbf16>, vector<256x4xf32> -> vector<256x4xf32>
    %87 = arith.addf %80, %86 : vector<256x4xf32>
    %c0_73 = arith.constant 0 : index
    %c0_74 = arith.constant 0 : index
    %c2_75 = arith.constant 2 : index
    %c0_76 = arith.constant 0 : index
    %88 = vector.load %arg1[%c0_73, %c0_74, %c2_75, %c0_76] : memref<1x18x18x128xbf16, #tpu.memory_space<vmem>>, vector<1x16x16x128xbf16>
    %89 = vector.shape_cast %88 : vector<1x16x16x128xbf16> to vector<16x16x128xbf16>
    %90 = vector.shape_cast %89 : vector<16x16x128xbf16> to vector<256x128xbf16>
    %91 = vector.extract_strided_slice %90 {offsets = [0, 4], sizes = [256, 4], strides = [1, 1]} : vector<256x128xbf16> to vector<256x4xbf16>
    %c44 = arith.constant 44 : index
    %c0_77 = arith.constant 0 : index
    %92 = vector.load %arg2[%c44, %c0_77] : memref<72x4xbf16, #tpu.memory_space<vmem>>, vector<4x4xbf16>
    %cst_78 = arith.constant dense<0.000000e+00> : vector<256x4xf32>
    %93 = tpu.matmul %91, %92, %cst_78 {dimension_numbers = #tpu.dot_dimension_numbers<[1], [0], [0], [1], [0, 0, 1, 1], [], []>} : vector<256x4xbf16>, vector<4x4xbf16>, vector<256x4xf32> -> vector<256x4xf32>
    %94 = arith.addf %87, %93 : vector<256x4xf32>
    %c0_79 = arith.constant 0 : index
    %c1_80 = arith.constant 1 : index
    %c0_81 = arith.constant 0 : index
    %c0_82 = arith.constant 0 : index
    %95 = vector.load %arg1[%c0_79, %c1_80, %c0_81, %c0_82] : memref<1x18x18x128xbf16, #tpu.memory_space<vmem>>, vector<1x16x16x128xbf16>
    %96 = vector.shape_cast %95 : vector<1x16x16x128xbf16> to vector<16x16x128xbf16>
    %97 = vector.shape_cast %96 : vector<16x16x128xbf16> to vector<256x128xbf16>
    %98 = vector.extract_strided_slice %97 {offsets = [0, 4], sizes = [256, 4], strides = [1, 1]} : vector<256x128xbf16> to vector<256x4xbf16>
    %c48 = arith.constant 48 : index
    %c0_83 = arith.constant 0 : index
    %99 = vector.load %arg2[%c48, %c0_83] : memref<72x4xbf16, #tpu.memory_space<vmem>>, vector<4x4xbf16>
    %cst_84 = arith.constant dense<0.000000e+00> : vector<256x4xf32>
    %100 = tpu.matmul %98, %99, %cst_84 {dimension_numbers = #tpu.dot_dimension_numbers<[1], [0], [0], [1], [0, 0, 1, 1], [], []>} : vector<256x4xbf16>, vector<4x4xbf16>, vector<256x4xf32> -> vector<256x4xf32>
    %101 = arith.addf %94, %100 : vector<256x4xf32>
    %c0_85 = arith.constant 0 : index
    %c1_86 = arith.constant 1 : index
    %c1_87 = arith.constant 1 : index
    %c0_88 = arith.constant 0 : index
    %102 = vector.load %arg1[%c0_85, %c1_86, %c1_87, %c0_88] : memref<1x18x18x128xbf16, #tpu.memory_space<vmem>>, vector<1x16x16x128xbf16>
    %103 = vector.shape_cast %102 : vector<1x16x16x128xbf16> to vector<16x16x128xbf16>
    %104 = vector.shape_cast %103 : vector<16x16x128xbf16> to vector<256x128xbf16>
    %105 = vector.extract_strided_slice %104 {offsets = [0, 4], sizes = [256, 4], strides = [1, 1]} : vector<256x128xbf16> to vector<256x4xbf16>
    %c52 = arith.constant 52 : index
    %c0_89 = arith.constant 0 : index
    %106 = vector.load %arg2[%c52, %c0_89] : memref<72x4xbf16, #tpu.memory_space<vmem>>, vector<4x4xbf16>
    %cst_90 = arith.constant dense<0.000000e+00> : vector<256x4xf32>
    %107 = tpu.matmul %105, %106, %cst_90 {dimension_numbers = #tpu.dot_dimension_numbers<[1], [0], [0], [1], [0, 0, 1, 1], [], []>} : vector<256x4xbf16>, vector<4x4xbf16>, vector<256x4xf32> -> vector<256x4xf32>
    %108 = arith.addf %101, %107 : vector<256x4xf32>
    %c0_91 = arith.constant 0 : index
    %c1_92 = arith.constant 1 : index
    %c2_93 = arith.constant 2 : index
    %c0_94 = arith.constant 0 : index
    %109 = vector.load %arg1[%c0_91, %c1_92, %c2_93, %c0_94] : memref<1x18x18x128xbf16, #tpu.memory_space<vmem>>, vector<1x16x16x128xbf16>
    %110 = vector.shape_cast %109 : vector<1x16x16x128xbf16> to vector<16x16x128xbf16>
    %111 = vector.shape_cast %110 : vector<16x16x128xbf16> to vector<256x128xbf16>
    %112 = vector.extract_strided_slice %111 {offsets = [0, 4], sizes = [256, 4], strides = [1, 1]} : vector<256x128xbf16> to vector<256x4xbf16>
    %c56 = arith.constant 56 : index
    %c0_95 = arith.constant 0 : index
    %113 = vector.load %arg2[%c56, %c0_95] : memref<72x4xbf16, #tpu.memory_space<vmem>>, vector<4x4xbf16>
    %cst_96 = arith.constant dense<0.000000e+00> : vector<256x4xf32>
    %114 = tpu.matmul %112, %113, %cst_96 {dimension_numbers = #tpu.dot_dimension_numbers<[1], [0], [0], [1], [0, 0, 1, 1], [], []>} : vector<256x4xbf16>, vector<4x4xbf16>, vector<256x4xf32> -> vector<256x4xf32>
    %115 = arith.addf %108, %114 : vector<256x4xf32>
    %c0_97 = arith.constant 0 : index
    %c2_98 = arith.constant 2 : index
    %c0_99 = arith.constant 0 : index
    %c0_100 = arith.constant 0 : index
    %116 = vector.load %arg1[%c0_97, %c2_98, %c0_99, %c0_100] : memref<1x18x18x128xbf16, #tpu.memory_space<vmem>>, vector<1x16x16x128xbf16>
    %117 = vector.shape_cast %116 : vector<1x16x16x128xbf16> to vector<16x16x128xbf16>
    %118 = vector.shape_cast %117 : vector<16x16x128xbf16> to vector<256x128xbf16>
    %119 = vector.extract_strided_slice %118 {offsets = [0, 4], sizes = [256, 4], strides = [1, 1]} : vector<256x128xbf16> to vector<256x4xbf16>
    %c60 = arith.constant 60 : index
    %c0_101 = arith.constant 0 : index
    %120 = vector.load %arg2[%c60, %c0_101] : memref<72x4xbf16, #tpu.memory_space<vmem>>, vector<4x4xbf16>
    %cst_102 = arith.constant dense<0.000000e+00> : vector<256x4xf32>
    %121 = tpu.matmul %119, %120, %cst_102 {dimension_numbers = #tpu.dot_dimension_numbers<[1], [0], [0], [1], [0, 0, 1, 1], [], []>} : vector<256x4xbf16>, vector<4x4xbf16>, vector<256x4xf32> -> vector<256x4xf32>
    %122 = arith.addf %115, %121 : vector<256x4xf32>
    %c0_103 = arith.constant 0 : index
    %c2_104 = arith.constant 2 : index
    %c1_105 = arith.constant 1 : index
    %c0_106 = arith.constant 0 : index
    %123 = vector.load %arg1[%c0_103, %c2_104, %c1_105, %c0_106] : memref<1x18x18x128xbf16, #tpu.memory_space<vmem>>, vector<1x16x16x128xbf16>
    %124 = vector.shape_cast %123 : vector<1x16x16x128xbf16> to vector<16x16x128xbf16>
    %125 = vector.shape_cast %124 : vector<16x16x128xbf16> to vector<256x128xbf16>
    %126 = vector.extract_strided_slice %125 {offsets = [0, 4], sizes = [256, 4], strides = [1, 1]} : vector<256x128xbf16> to vector<256x4xbf16>
    %c64 = arith.constant 64 : index
    %c0_107 = arith.constant 0 : index
    %127 = vector.load %arg2[%c64, %c0_107] : memref<72x4xbf16, #tpu.memory_space<vmem>>, vector<4x4xbf16>
    %cst_108 = arith.constant dense<0.000000e+00> : vector<256x4xf32>
    %128 = tpu.matmul %126, %127, %cst_108 {dimension_numbers = #tpu.dot_dimension_numbers<[1], [0], [0], [1], [0, 0, 1, 1], [], []>} : vector<256x4xbf16>, vector<4x4xbf16>, vector<256x4xf32> -> vector<256x4xf32>
    %129 = arith.addf %122, %128 : vector<256x4xf32>
    %c0_109 = arith.constant 0 : index
    %c2_110 = arith.constant 2 : index
    %c2_111 = arith.constant 2 : index
    %c0_112 = arith.constant 0 : index
    %130 = vector.load %arg1[%c0_109, %c2_110, %c2_111, %c0_112] : memref<1x18x18x128xbf16, #tpu.memory_space<vmem>>, vector<1x16x16x128xbf16>
    %131 = vector.shape_cast %130 : vector<1x16x16x128xbf16> to vector<16x16x128xbf16>
    %132 = vector.shape_cast %131 : vector<16x16x128xbf16> to vector<256x128xbf16>
    %133 = vector.extract_strided_slice %132 {offsets = [0, 4], sizes = [256, 4], strides = [1, 1]} : vector<256x128xbf16> to vector<256x4xbf16>
    %c68 = arith.constant 68 : index
    %c0_113 = arith.constant 0 : index
    %134 = vector.load %arg2[%c68, %c0_113] : memref<72x4xbf16, #tpu.memory_space<vmem>>, vector<4x4xbf16>
    %cst_114 = arith.constant dense<0.000000e+00> : vector<256x4xf32>
    %135 = tpu.matmul %133, %134, %cst_114 {dimension_numbers = #tpu.dot_dimension_numbers<[1], [0], [0], [1], [0, 0, 1, 1], [], []>} : vector<256x4xbf16>, vector<4x4xbf16>, vector<256x4xf32> -> vector<256x4xf32>
    %136 = arith.addf %129, %135 : vector<256x4xf32>
    %c0_115 = arith.constant 0 : index
    %c4_116 = arith.constant 4 : index
    %137 = vector.load %arg3[%c0_115, %c4_116] : memref<1x128xf32, #tpu.memory_space<vmem>>, vector<1x4xf32>
    %138 = vector.broadcast %137 : vector<1x4xf32> to vector<256x4xf32>
    %139 = arith.addf %136, %138 : vector<256x4xf32>
    %cst_117 = arith.constant 0.000000e+00 : f32
    %140 = vector.broadcast %cst_117 : f32 to vector<256x4xf32>
    %141 = arith.maximumf %139, %140 : vector<256x4xf32>
    %142 = arith.truncf %141 : vector<256x4xf32> to vector<256x4xbf16>
    %c0_118 = arith.constant 0 : index
    %c4_119 = arith.constant 4 : index
    %143 = vector.load %arg4[%c0_118, %c4_119] : memref<256x128xbf16, #tpu.memory_space<vmem>>, vector<256x4xbf16>
    tpu.vector_store %arg4[%c0_118, %c4_119], %142 {strides = array<i32>} : memref<256x128xbf16, #tpu.memory_space<vmem>>, vector<256x4xbf16>,
    return
  }
  func.func @transform_0(%arg0: i32) -> (i32, i32, i32, i32) {
    %c0_i32 = arith.constant 0 : i32
    %c0_i32_0 = arith.constant 0 : i32
    %c0_i32_1 = arith.constant 0 : i32
    %c0_i32_2 = arith.constant 0 : i32
    return %arg0, %c0_i32, %c0_i32_0, %c0_i32_1 : i32, i32, i32, i32
  }
  func.func @transform_1(%arg0: i32) -> (i32, i32) {
    %c0_i32 = arith.constant 0 : i32
    %c0_i32_0 = arith.constant 0 : i32
    %c0_i32_1 = arith.constant 0 : i32
    return %c0_i32, %c0_i32_0 : i32, i32
  }
  func.func @transform_2(%arg0: i32) -> (i32, i32) {
    %c0_i32 = arith.constant 0 : i32
    %c0_i32_0 = arith.constant 0 : i32
    %c0_i32_1 = arith.constant 0 : i32
    return %c0_i32, %c0_i32_0 : i32, i32
  }
  func.func @transform_3(%arg0: i32) -> (i32, i32) {
    %c0_i32 = arith.constant 0 : i32
    %c0_i32_0 = arith.constant 0 : i32
    return %arg0, %c0_i32 : i32, i32
  }
}

</mosaic_0001>

<bundles_post_ra>
// kernel: bottleneck_forward.3
= control target key start
LH: loop header
LB: loop body
LE: loop exit
PB: predicated region body
PF: predicated region fallthrough
CT: control target
= control target key end

     0   :  { %s898_s12 = smov 0   ;;  %s1019_s0 = inlined_call_operand.vmem [shape: bf16[512,128], index: 0, kind: input, shape index: {}]   ;;  %s1020_s1 = inlined_call_operand.vmem [shape: bf16[128,128], index: 1, kind: input, shape index: {}]   ;;  %s1021_s2 = inlined_call_operand.vmem [shape: f32[1,128], index: 2, kind: input, shape index: {}]   ;;  %s1022_s3 = inlined_call_operand.vmem [shape: bf16[512,128], index: 3, kind: output, shape index: {}]  }
   0x1 LB: > { %s611_s13 = sadd.s32 4294967295, %s876_s12   ;;  %p615_p0 = scmp.ge.s32.totalorder %s876_s12, 1  ;;  %s876_s12 = sphi %s898_s12, %s13_s12  }
   0x2   : > { %p138_p1 = scmp.lt.s32.totalorder %s876_s12, 3 }
   0x4   : > { %p139_p2 = pnand %p615_p0, %p138_p1 }
   0x5   : > { %s616_s22 = sshll.u32 (!%p139_p2), %s611_s13, 5 }
   0x6   : > { %142 = sbr.rel (%p139_p2) target bundleno = 240 (0xf0), region = 32  ;;  %p163_p3 = scmp.lt.s32.totalorder (!%p139_p2), %s616_s22, 63 }
   0xb   : > { %v741_v0 = vld [vmem:[%s1020_s1 + $0x38] sm:$0xff]  ;;  %v740_v1 = vld [vmem:[%s1020_s1 + $0x30] sm:$0xff]  ;;  %v739_v2 = vld [vmem:[%s1020_s1 + $0x28] sm:$0xff]  ;;  %s1024_s22 = smov (!%p163_p3, %s616_s22), 63 }
   0xc   : > { %370 = vmatpush.bf16.msra.mxu0 %v741_v0  ;;  %837 = vmatpush.bf16.msra.mxu1 %v741_v0  ;;  %v738_v3 = vld [vmem:[%s1020_s1 + $0x20] sm:$0xff]  ;;  %v737_v4 = vld [vmem:[%s1020_s1 + $0x18] sm:$0xff]  ;;  %v736_v5 = vld [vmem:[%s1020_s1 + $0x10] sm:$0xff]  ;;  %s617_s29 = sshll.u32 %s1024_s22, 2 }
   0xd   : > { %838 = vmatpush.bf16.msra.mxu2 %v741_v0  ;;  %839 = vmatpush.bf16.msra.mxu3 %v741_v0  ;;  %v735_v6 = vld [vmem:[%s1020_s1 + $0x8] sm:$0xff]  ;;  %v734_v7 = vld [vmem:[%s1020_s1] sm:$0xff]  ;;  %s938_s7 = scalar_lea.vmem %s1019_s0, %s617_s29  ;;  %s970_s13 = scalar_lea.vmem %s1022_s3, %s617_s29 }
   0xe   : > { %v718_v8 = vld [vmem:[%s938_s7] sm:$0xff]  ;;  %v719_v12 = vld [vmem:[%s938_s7 + $0x8] sm:$0xff]  ;;  %v720_v16 = vld [vmem:[%s938_s7 + $0x10] sm:$0xff] }
   0xf   : > { %v722_v9 = vld [vmem:[%s938_s7 + $0x20] sm:$0xff]  ;;  %v723_v13 = vld [vmem:[%s938_s7 + $0x28] sm:$0xff]  ;;  %v724_v17 = vld [vmem:[%s938_s7 + $0x30] sm:$0xff] }
  0x10   : > { %371 = vmatpush.bf16.msra.mxu0 %v740_v1  ;;  %840 = vmatpush.bf16.msra.mxu1 %v740_v1  ;;  %v726_v10 = vld [vmem:[%s938_s7 + $0x40] sm:$0xff]  ;;  %v727_v14 = vld [vmem:[%s938_s7 + $0x48] sm:$0xff]  ;;  %v728_v18 = vld [vmem:[%s938_s7 + $0x50] sm:$0xff] }
  0x11   : > { %841 = vmatpush.bf16.msra.mxu2 %v740_v1  ;;  %842 = vmatpush.bf16.msra.mxu3 %v740_v1  ;;  %v730_v11 = vld [vmem:[%s938_s7 + $0x60] sm:$0xff]  ;;  %v731_v15 = vld [vmem:[%s938_s7 + $0x68] sm:$0xff]  ;;  %v732_v19 = vld [vmem:[%s938_s7 + $0x70] sm:$0xff] }
  0x12   : > { %v721_v20 = vld [vmem:[%s938_s7 + $0x18] sm:$0xff]  ;;  %v959_v26 = vld [vmem:[%s1021_s2] ss:$0 sm:$0xff] }
  0x13   : > { %v725_v21 = vld [vmem:[%s938_s7 + $0x38] sm:$0xff] }
  0x14   : > { %372 = vmatpush.bf16.msra.mxu0 %v739_v2  ;;  %843 = vmatpush.bf16.msra.mxu1 %v739_v2  ;;  %v729_v22 = vld [vmem:[%s938_s7 + $0x58] sm:$0xff] }
  0x15   : > { %844 = vmatpush.bf16.msra.mxu2 %v739_v2  ;;  %845 = vmatpush.bf16.msra.mxu3 %v739_v2  ;;  %v733_v23 = vld [vmem:[%s938_s7 + $0x78] sm:$0xff] }
  0x18   : > { %373 = vmatpush.bf16.msra.mxu0 %v738_v3  ;;  %846 = vmatpush.bf16.msra.mxu1 %v738_v3 }
  0x19   : > { %847 = vmatpush.bf16.msra.mxu2 %v738_v3  ;;  %848 = vmatpush.bf16.msra.mxu3 %v738_v3 }
  0x1c   : > { %374 = vmatpush.bf16.msra.mxu0 %v737_v4  ;;  %849 = vmatpush.bf16.msra.mxu1 %v737_v4 }
  0x1d   : > { %850 = vmatpush.bf16.msra.mxu2 %v737_v4  ;;  %851 = vmatpush.bf16.msra.mxu3 %v737_v4 }
  0x20   : > { %375 = vmatpush.bf16.msra.mxu0 %v736_v5  ;;  %852 = vmatpush.bf16.msra.mxu1 %v736_v5 }
  0x21   : > { %853 = vmatpush.bf16.msra.mxu2 %v736_v5  ;;  %854 = vmatpush.bf16.msra.mxu3 %v736_v5 }
  0x24   : > { %376 = vmatpush.bf16.msra.mxu0 %v735_v6  ;;  %855 = vmatpush.bf16.msra.mxu1 %v735_v6 }
  0x25   : > { %856 = vmatpush.bf16.msra.mxu2 %v735_v6  ;;  %857 = vmatpush.bf16.msra.mxu3 %v735_v6 }
  0x28   : > { %377 = vmatpush.bf16.msra.mxu0 %v734_v7  ;;  %858 = vmatpush.bf16.msra.mxu1 %v734_v7 }
  0x29   : > { %859 = vmatpush.bf16.msra.mxu2 %v734_v7  ;;  %860 = vmatpush.bf16.msra.mxu3 %v734_v7 }
  0x2b   : > { %378 = vmatmul.bf16.vlgmr.msra.gmra.mxu0 %v718_v8  ;;  %398 = vmatmul.bf16.vlgmr.msra.gmra.mxu1 %v722_v9 }
  0x2c   : > { %418 = vmatmul.bf16.vlgmr.msra.gmra.mxu2 %v726_v10  ;;  %438 = vmatmul.bf16.vlgmr.msra.gmra.mxu3 %v730_v11 }
  0x3b   : > { %383 = vmatmul.bf16.gmra.mxu0 %v719_v12  ;;  %403 = vmatmul.bf16.gmra.mxu1 %v723_v13 }
  0x3c   : > { %423 = vmatmul.bf16.gmra.mxu2 %v727_v14  ;;  %443 = vmatmul.bf16.gmra.mxu3 %v731_v15 }
  0x4b   : > { %388 = vmatmul.bf16.gmra.mxu0 %v720_v16  ;;  %408 = vmatmul.bf16.gmra.mxu1 %v724_v17 }
  0x4c   : > { %428 = vmatmul.bf16.gmra.mxu2 %v728_v18  ;;  %448 = vmatmul.bf16.gmra.mxu3 %v732_v19 }
  0x5b   : > { %393 = vmatmul.bf16.gmra.mxu0 %v721_v20  ;;  %413 = vmatmul.bf16.gmra.mxu1 %v725_v21 }
  0x5c   : > { %433 = vmatmul.bf16.gmra.mxu2 %v729_v22  ;;  %453 = vmatmul.bf16.gmra.mxu3 %v733_v23 }
  0xa8   : > { %v379_v24 = vpop.f32.mrf.mxu0  ;;  %v399_v25 = vpop.f32.mrf.mxu1 }
  0xa9   : > { %v380_v27 = vadd.f32 %v959_v26, %v379_v24  ;;  %v400_v28 = vadd.f32 %v959_v26, %v399_v25 }
  0xab   : > { %v459_v35 = vmax.f32 %v380_v27, 0.0  ;;  %v467_v36 = vmax.f32 %v400_v28, 0.0 }
  0xaf   : > { %v419_v29 = vpop.f32.mrf.mxu2  ;;  %v439_v30 = vpop.f32.mrf.mxu3 }
  0xb0   : > { %v381_v31 = vpop.f32.mrf.mxu0  ;;  %v401_v32 = vpop.f32.mrf.mxu1  ;;  %v420_v41 = vadd.f32 %v959_v26, %v419_v29  ;;  %v440_v42 = vadd.f32 %v959_v26, %v439_v30 }
  0xb1   : > { %v382_v33 = vadd.f32 %v959_v26, %v381_v31  ;;  %v402_v34 = vadd.f32 %v959_v26, %v401_v32 }
  0xb2   : > { %v475_v49 = vmax.f32 %v420_v41, 0.0  ;;  %v483_v50 = vmax.f32 %v440_v42, 0.0 }
  0xb3   : > { %v460_v37 = vmax.f32 %v382_v33, 0.0  ;;  %v468_v38 = vmax.f32 %v402_v34, 0.0 }
  0xb5   : > { %v745_v39 = vpack.c.bf16 %v460_v37, %v459_v35  ;;  %v765_v40 = vpack.c.bf16 %v468_v38, %v467_v36 }
  0xb7   : > { %746 = vst [vmem:[%s970_s13] sm:$0xff] %v745_v39   ;;  %v421_v43 = vpop.f32.mrf.mxu2  ;;  %v441_v44 = vpop.f32.mrf.mxu3 }
  0xb8   : > { %825 = vst [vmem:[%s970_s13 + $0x20] sm:$0xff] %v765_v40   ;;  %v422_v45 = vadd.f32 %v959_v26, %v421_v43  ;;  %v442_v46 = vadd.f32 %v959_v26, %v441_v44  ;;  %v384_v47 = vpop.f32.mrf.mxu0  ;;  %v404_v48 = vpop.f32.mrf.mxu1 }
  0xb9   : > { %v385_v55 = vadd.f32 %v959_v26, %v384_v47  ;;  %v405_v56 = vadd.f32 %v959_v26, %v404_v48 }
  0xba   : > { %v476_v51 = vmax.f32 %v422_v45, 0.0  ;;  %v484_v52 = vmax.f32 %v442_v46, 0.0 }
  0xbb   : > { %v461_v63 = vmax.f32 %v385_v55, 0.0  ;;  %v469_v0 = vmax.f32 %v405_v56, 0.0 }
  0xbc   : > { %v785_v53 = vpack.c.bf16 %v476_v51, %v475_v49  ;;  %v805_v54 = vpack.c.bf16 %v484_v52, %v483_v50 }
  0xbe   : > { %829 = vst [vmem:[%s970_s13 + $0x40] sm:$0xff] %v785_v53  }
  0xbf   : > { %833 = vst [vmem:[%s970_s13 + $0x60] sm:$0xff] %v805_v54   ;;  %v424_v57 = vpop.f32.mrf.mxu2  ;;  %v444_v58 = vpop.f32.mrf.mxu3 }
  0xc0   : > { %v386_v59 = vpop.f32.mrf.mxu0  ;;  %v406_v60 = vpop.f32.mrf.mxu1  ;;  %v425_v5 = vadd.f32 %v959_v26, %v424_v57  ;;  %v445_v6 = vadd.f32 %v959_v26, %v444_v58 }
  0xc1   : > { %v387_v61 = vadd.f32 %v959_v26, %v386_v59  ;;  %v407_v62 = vadd.f32 %v959_v26, %v406_v60 }
  0xc2   : > { %v477_v13 = vmax.f32 %v425_v5, 0.0  ;;  %v485_v14 = vmax.f32 %v445_v6, 0.0 }
  0xc3   : > { %v462_v1 = vmax.f32 %v387_v61, 0.0  ;;  %v470_v2 = vmax.f32 %v407_v62, 0.0 }
  0xc5   : > { %v750_v3 = vpack.c.bf16 %v462_v1, %v461_v63  ;;  %v770_v4 = vpack.c.bf16 %v470_v2, %v469_v0 }
  0xc7   : > { %822 = vst [vmem:[%s970_s13 + $0x8] sm:$0xff] %v750_v3   ;;  %v426_v7 = vpop.f32.mrf.mxu2  ;;  %v446_v8 = vpop.f32.mrf.mxu3 }
  0xc8   : > { %826 = vst [vmem:[%s970_s13 + $0x28] sm:$0xff] %v770_v4   ;;  %v427_v9 = vadd.f32 %v959_v26, %v426_v7  ;;  %v447_v10 = vadd.f32 %v959_v26, %v446_v8  ;;  %v389_v11 = vpop.f32.mrf.mxu0  ;;  %v409_v12 = vpop.f32.mrf.mxu1 }
  0xc9   : > { %v390_v19 = vadd.f32 %v959_v26, %v389_v11  ;;  %v410_v20 = vadd.f32 %v959_v26, %v409_v12 }
  0xca   : > { %v478_v15 = vmax.f32 %v427_v9, 0.0  ;;  %v486_v16 = vmax.f32 %v447_v10, 0.0 }
  0xcb   : > { %v463_v28 = vmax.f32 %v390_v19, 0.0  ;;  %v471_v29 = vmax.f32 %v410_v20, 0.0 }
  0xcc   : > { %v790_v17 = vpack.c.bf16 %v478_v15, %v477_v13  ;;  %v810_v18 = vpack.c.bf16 %v486_v16, %v485_v14 }
  0xce   : > { %830 = vst [vmem:[%s970_s13 + $0x48] sm:$0xff] %v790_v17  }
  0xcf   : > { %834 = vst [vmem:[%s970_s13 + $0x68] sm:$0xff] %v810_v18   ;;  %v429_v21 = vpop.f32.mrf.mxu2  ;;  %v449_v22 = vpop.f32.mrf.mxu3 }
  0xd0   : > { %v391_v23 = vpop.f32.mrf.mxu0  ;;  %v411_v24 = vpop.f32.mrf.mxu1  ;;  %v430_v34 = vadd.f32 %v959_v26, %v429_v21  ;;  %v450_v35 = vadd.f32 %v959_v26, %v449_v22 }
  0xd1   : > { %v392_v25 = vadd.f32 %v959_v26, %v391_v23  ;;  %v412_v27 = vadd.f32 %v959_v26, %v411_v24 }
  0xd2   : > { %v479_v42 = vmax.f32 %v430_v34, 0.0  ;;  %v487_v43 = vmax.f32 %v450_v35, 0.0 }
  0xd3   : > { %v464_v30 = vmax.f32 %v392_v25, 0.0  ;;  %v472_v31 = vmax.f32 %v412_v27, 0.0 }
  0xd5   : > { %v755_v32 = vpack.c.bf16 %v464_v30, %v463_v28  ;;  %v775_v33 = vpack.c.bf16 %v472_v31, %v471_v29 }
  0xd7   : > { %823 = vst [vmem:[%s970_s13 + $0x10] sm:$0xff] %v755_v32   ;;  %v431_v36 = vpop.f32.mrf.mxu2  ;;  %v451_v37 = vpop.f32.mrf.mxu3 }
  0xd8   : > { %827 = vst [vmem:[%s970_s13 + $0x30] sm:$0xff] %v775_v33   ;;  %v432_v38 = vadd.f32 %v959_v26, %v431_v36  ;;  %v452_v39 = vadd.f32 %v959_v26, %v451_v37  ;;  %v394_v40 = vpop.f32.mrf.mxu0  ;;  %v414_v41 = vpop.f32.mrf.mxu1 }
  0xd9   : > { %v395_v48 = vadd.f32 %v959_v26, %v394_v40  ;;  %v415_v49 = vadd.f32 %v959_v26, %v414_v41 }
  0xda   : > { %v480_v44 = vmax.f32 %v432_v38, 0.0  ;;  %v488_v45 = vmax.f32 %v452_v39, 0.0 }
  0xdb   : > { %v465_v56 = vmax.f32 %v395_v48, 0.0  ;;  %v473_v57 = vmax.f32 %v415_v49, 0.0 }
  0xdc   : > { %v795_v46 = vpack.c.bf16 %v480_v44, %v479_v42  ;;  %v815_v47 = vpack.c.bf16 %v488_v45, %v487_v43 }
  0xde   : > { %831 = vst [vmem:[%s970_s13 + $0x50] sm:$0xff] %v795_v46  }
  0xdf   : > { %835 = vst [vmem:[%s970_s13 + $0x70] sm:$0xff] %v815_v47   ;;  %v434_v50 = vpop.f32.mrf.mxu2  ;;  %v454_v51 = vpop.f32.mrf.mxu3 }
  0xe0   : > { %v396_v52 = vpop.f32.mrf.mxu0  ;;  %v416_v53 = vpop.f32.mrf.mxu1  ;;  %v435_v62 = vadd.f32 %v959_v26, %v434_v50  ;;  %v455_v63 = vadd.f32 %v959_v26, %v454_v51 }
  0xe1   : > { %v397_v54 = vadd.f32 %v959_v26, %v396_v52  ;;  %v417_v55 = vadd.f32 %v959_v26, %v416_v53 }
  0xe2   : > { %v481_v4 = vmax.f32 %v435_v62, 0.0  ;;  %v489_v5 = vmax.f32 %v455_v63, 0.0 }
  0xe3   : > { %v466_v58 = vmax.f32 %v397_v54, 0.0  ;;  %v474_v59 = vmax.f32 %v417_v55, 0.0 }
  0xe5   : > { %v760_v60 = vpack.c.bf16 %v466_v58, %v465_v56  ;;  %v780_v61 = vpack.c.bf16 %v474_v59, %v473_v57 }
  0xe7   : > { %824 = vst [vmem:[%s970_s13 + $0x18] sm:$0xff] %v760_v60   ;;  %v436_v0 = vpop.f32.mrf.mxu2  ;;  %v456_v1 = vpop.f32.mrf.mxu3 }
  0xe8   : > { %828 = vst [vmem:[%s970_s13 + $0x38] sm:$0xff] %v780_v61   ;;  %v437_v2 = vadd.f32 %v959_v26, %v436_v0  ;;  %v457_v3 = vadd.f32 %v959_v26, %v456_v1 }
  0xea   : > { %v482_v6 = vmax.f32 %v437_v2, 0.0  ;;  %v490_v7 = vmax.f32 %v457_v3, 0.0 }
  0xec   : > { %v800_v8 = vpack.c.bf16 %v482_v6, %v481_v4  ;;  %v820_v9 = vpack.c.bf16 %v490_v7, %v489_v5 }
  0xee   : > { %832 = vst [vmem:[%s970_s13 + $0x58] sm:$0xff] %v800_v8  }
  0xef   : > { %836 = vst [vmem:[%s970_s13 + $0x78] sm:$0xff] %v820_v9  }
  0xf0 PF: > { %s13_s12 = sadd.s32 1, %s876_s12  }
  0xf1   : > { %p10_p4 = scmp.ge.s32.totalorder %s13_s12, 4  }
  0xf3   :  { %12 = sbr.rel (!%p10_p4) target bundleno = 1 (0x1), region = 62 }

// kernel: bottleneck_forward.5
= control target key start
LH: loop header
LB: loop body
LE: loop exit
PB: predicated region body
PF: predicated region fallthrough
CT: control target
= control target key end

     0   :  { %11 = vsyncpa [#allocation3], 0  ;;  %s1873_s0 = inlined_call_operand.vmem [shape: bf16[512,128], index: 0, kind: input, shape index: {}]   ;;  %s1874_s1 = inlined_call_operand.vmem [shape: bf16[128,128], index: 1, kind: input, shape index: {}]   ;;  %s1875_s2 = inlined_call_operand.vmem [shape: f32[1,128], index: 2, kind: input, shape index: {}]   ;;  %s1876_s3 = inlined_call_operand.vmem [shape: bf16[512,128], index: 3, kind: input, shape index: {}]   ;;  %s1877_s4 = inlined_call_operand.vmem [shape: bf16[128,128], index: 4, kind: input, shape index: {}]   ;;  %s1878_s5 = inlined_call_operand.vmem [shape: f32[1,128], index: 5, kind: input, shape index: {}]   ;;  %s1879_s6 = inlined_call_operand.hbm [shape: bf16[512,128], index: 6, kind: output, shape index: {}]  }
   0x1   :  { %13 = vsyncpa [#allocation3 + $0x1], 0  ;;  %s1605_s21 = smov 0   ;;  %s1607_s22 = smov 0  }
   0x2   :  { %s1609_s23 = smov 0   ;;  %s1611_s24 = smov 0  }
   0x3 LB: > { %s1626_s25 = sadd.s32 4294967295, %s1566_s24   ;;  %s1095_s26 = sadd.s32 4294967294, %s1566_s24   ;;  %s1566_s24 = sphi %s1611_s24, %s1885_s24   ;;  %s1562_s23 = sphi %s1609_s23, %s1884_s23   ;;  %s1558_s22 = sphi %s1607_s22, %s1883_s22   ;;  %s1554_s21 = sphi %s1605_s21, %s1882_s21  }
   0x4   : > { %s1630_s27 = sadd.s32 1, %s1566_s24   ;;  %s162_s28 = sadd.s32 1, %s1562_s23 }
   0x5   : > { %s159_s29 = ssub.s32 %s1566_s24, %s1630_s27  ;;  %p172_p0 = scmp.ne.s32.totalorder %s1562_s23, %s1558_s22 }
   0x6   : > { %p160_p1 = scmp.eq.s32.totalorder %s159_s29, 0  ;;  %p173_p2 = scmp.eq.s32.totalorder %s1626_s25, 1 }
   0x7   : > { %p178_p3 = scmp.ne.s32.totalorder %s1558_s22, %s1554_s21  ;;  %p179_p4 = scmp.eq.s32.totalorder %s1095_s26, 1 }
   0x8   : > { %s1641_s30 = scalar_select %p160_p1, %s1562_s23, %s162_s28  }
   0x9   : > { %p1643_p5 = por %p173_p2, %p172_p0  ;;  %p1647_p6 = por %p179_p4, %p178_p3 }
   0xa   : > { %p1098_p7 = scmp.ge.s32.totalorder %s1566_s24, 1  ;;  %p227_p8 = scmp.lt.s32.totalorder %s1566_s24, 3 }
   0xc   : > { %p228_p9 = pnand %p1098_p7, %p227_p8 }
   0xd   : > { %s1100_s10 = sshll.u32 (!%p228_p9), %s1626_s25, 5  ;;  %s1349_s12 = sshll.u32 (!%p228_p9), %s1626_s25, 7 }
   0xe   : > { %231 = sbr.rel (%p228_p9) target bundleno = 318 (0x13e), region = 44  ;;  %p263_p10 = scmp.lt.s32.totalorder (!%p228_p9), %s1100_s10, 63 }
   0xf   : > { %s1017_s15 = scalar_lea.hbm (!%p228_p9), %s1879_s6, %s1349_s12  ;;  %s1524_s26 = scalar_lea.hbm (!%p228_p9), %s1879_s6, 256 }
  0x10   : > { %s1020_s16 = sshll.u32 (!%p228_p9), %s1017_s15, 4  ;;  %s1021_s16 = int_to_ptr.hbm [resolvable:$true] %s1020_s16 }
  0x11   : > { %s1518_s17 = sshra.s32 (!%p228_p9), %s1021_s16, 4  ;;  %s1519_s17 = int_to_ptr.hbm [resolvable:$true] %s1518_s17 }
  0x12   : > { %p1525_p0 = scmp.lt.s32.totalorder (!%p228_p9), %s1519_s17, %s1879_s6 }
  0x13   : > { %v1348_v0 = vld [vmem:[%s1877_s4 + $0x38] sm:$0xff]  ;;  %v1347_v2 = vld [vmem:[%s1877_s4 + $0x30] sm:$0xff]  ;;  %v1346_v4 = vld [vmem:[%s1877_s4 + $0x28] sm:$0xff]  ;;  %s1887_s10 = smov (!%p263_p10, %s1100_s10), 63 }
  0x14   : > { %v1324_v1 = vld [vmem:[%s1874_s1 + $0x38] sm:$0xff]  ;;  %515 = vmatpush.bf16.msra.mxu0 %v1348_v0  ;;  %1445 = vmatpush.bf16.msra.mxu2 %v1348_v0  ;;  %v1323_v3 = vld [vmem:[%s1874_s1 + $0x30] sm:$0xff]  ;;  %v1322_v5 = vld [vmem:[%s1874_s1 + $0x28] sm:$0xff]  ;;  %s1101_s29 = sshll.u32 %s1887_s10, 2 }
  0x15   : > { %748 = vmatpush.bf16.msra.mxu1 %v1324_v1  ;;  %1453 = vmatpush.bf16.msra.mxu3 %v1324_v1  ;;  %v1345_v6 = vld [vmem:[%s1877_s4 + $0x20] sm:$0xff]  ;;  %v1344_v8 = vld [vmem:[%s1877_s4 + $0x18] sm:$0xff]  ;;  %v1343_v10 = vld [vmem:[%s1877_s4 + $0x10] sm:$0xff]  ;;  %s1702_s14 = scalar_lea.vmem %s1876_s3, %s1101_s29  ;;  %s1710_s18 = scalar_lea.vmem %s1873_s0, %s1101_s29 }
  0x16   : > { %v1321_v7 = vld [vmem:[%s1874_s1 + $0x20] sm:$0xff]  ;;  %v1320_v9 = vld [vmem:[%s1874_s1 + $0x18] sm:$0xff]  ;;  %v1319_v11 = vld [vmem:[%s1874_s1 + $0x10] sm:$0xff]  ;;  %s259_s29 = sand.u32 1, %s1558_s22  }
  0x17   : > { %v1342_v12 = vld [vmem:[%s1877_s4 + $0x8] sm:$0xff]  ;;  %v1341_v14 = vld [vmem:[%s1877_s4] sm:$0xff]  ;;  %v1327_v24 = vld [vmem:[%s1702_s14 + $0x10] sm:$0xff]  ;;  %s1099_s9 = sshll.u32 %s259_s29, 7  ;;  %s1006_s10 = scalar_lea.sflag [#allocation3], %s259_s29 }
  0x18   : > { %516 = vmatpush.bf16.msra.mxu0 %v1347_v2  ;;  %1446 = vmatpush.bf16.msra.mxu2 %v1347_v2  ;;  %v1318_v13 = vld [vmem:[%s1874_s1 + $0x8] sm:$0xff]  ;;  %v1317_v15 = vld [vmem:[%s1874_s1] sm:$0xff]  ;;  %v1335_v25 = vld [vmem:[%s1702_s14 + $0x50] sm:$0xff]  ;;  %s1764_s11 = scalar_lea.vmem [#allocation2], %s1099_s9 }
  0x19   : > { %749 = vmatpush.bf16.msra.mxu1 %v1323_v3  ;;  %1454 = vmatpush.bf16.msra.mxu3 %v1323_v3  ;;  %v1325_v16 = vld [vmem:[%s1702_s14] sm:$0xff]  ;;  %v1326_v20 = vld [vmem:[%s1702_s14 + $0x8] sm:$0xff]  ;;  %v1303_v26 = vld [vmem:[%s1710_s18 + $0x10] sm:$0xff]  ;;  %s1018_s25 = sshll.u32 %s1764_s11, 4  ;;  %s1019_s25 = int_to_ptr.vmem [resolvable:$true] %s1018_s25 }
  0x1a   : > { %v1333_v17 = vld [vmem:[%s1702_s14 + $0x40] sm:$0xff]  ;;  %v1334_v21 = vld [vmem:[%s1702_s14 + $0x48] sm:$0xff]  ;;  %v1311_v27 = vld [vmem:[%s1710_s18 + $0x50] sm:$0xff] }
  0x1b   : > { %v1301_v18 = vld [vmem:[%s1710_s18] sm:$0xff]  ;;  %v1302_v22 = vld [vmem:[%s1710_s18 + $0x8] sm:$0xff]  ;;  %v1328_v28 = vld [vmem:[%s1702_s14 + $0x18] sm:$0xff] }
  0x1c   : > { %517 = vmatpush.bf16.msra.mxu0 %v1346_v4  ;;  %1447 = vmatpush.bf16.msra.mxu2 %v1346_v4  ;;  %v1309_v19 = vld [vmem:[%s1710_s18 + $0x40] sm:$0xff]  ;;  %v1310_v23 = vld [vmem:[%s1710_s18 + $0x48] sm:$0xff]  ;;  %v1336_v29 = vld [vmem:[%s1702_s14 + $0x58] sm:$0xff] }
  0x1d   : > { %750 = vmatpush.bf16.msra.mxu1 %v1322_v5  ;;  %1455 = vmatpush.bf16.msra.mxu3 %v1322_v5  ;;  %v1304_v30 = vld [vmem:[%s1710_s18 + $0x18] sm:$0xff]  ;;  %v1329_v32 = vld [vmem:[%s1702_s14 + $0x20] sm:$0xff]  ;;  %v1330_v36 = vld [vmem:[%s1702_s14 + $0x28] sm:$0xff] }
  0x1e   : > { %v1312_v31 = vld [vmem:[%s1710_s18 + $0x58] sm:$0xff]  ;;  %v1337_v33 = vld [vmem:[%s1702_s14 + $0x60] sm:$0xff]  ;;  %v1338_v37 = vld [vmem:[%s1702_s14 + $0x68] sm:$0xff] }
  0x1f   : > { %v1305_v34 = vld [vmem:[%s1710_s18 + $0x20] sm:$0xff]  ;;  %v1306_v38 = vld [vmem:[%s1710_s18 + $0x28] sm:$0xff]  ;;  %v1331_v40 = vld [vmem:[%s1702_s14 + $0x30] sm:$0xff] }
  0x20   : > { %518 = vmatpush.bf16.msra.mxu0 %v1345_v6  ;;  %1448 = vmatpush.bf16.msra.mxu2 %v1345_v6  ;;  %v1313_v35 = vld [vmem:[%s1710_s18 + $0x60] sm:$0xff]  ;;  %v1314_v39 = vld [vmem:[%s1710_s18 + $0x68] sm:$0xff]  ;;  %v1339_v41 = vld [vmem:[%s1702_s14 + $0x70] sm:$0xff] }
  0x21   : > { %751 = vmatpush.bf16.msra.mxu1 %v1321_v7  ;;  %1456 = vmatpush.bf16.msra.mxu3 %v1321_v7  ;;  %v1307_v42 = vld [vmem:[%s1710_s18 + $0x30] sm:$0xff]  ;;  %v1332_v44 = vld [vmem:[%s1702_s14 + $0x38] sm:$0xff]  ;;  %v1747_v51 = vld [vmem:[%s1875_s2] ss:$0 sm:$0xff] }
  0x22   : > { %v1315_v43 = vld [vmem:[%s1710_s18 + $0x70] sm:$0xff]  ;;  %v1340_v45 = vld [vmem:[%s1702_s14 + $0x78] sm:$0xff]  ;;  %v1753_v55 = vld [vmem:[%s1878_s5] ss:$0 sm:$0xff] }
  0x23   : > { %v1308_v46 = vld [vmem:[%s1710_s18 + $0x38] sm:$0xff] }
  0x24   : > { %519 = vmatpush.bf16.msra.mxu0 %v1344_v8  ;;  %1449 = vmatpush.bf16.msra.mxu2 %v1344_v8  ;;  %v1316_v47 = vld [vmem:[%s1710_s18 + $0x78] sm:$0xff]  ;;  %s1520_s18 = scalar_lea.hbm %s1519_s17, 128 }
  0x25   : > { %752 = vmatpush.bf16.msra.mxu1 %v1320_v9  ;;  %1457 = vmatpush.bf16.msra.mxu3 %v1320_v9  ;;  %p1521_p11 = scmp.ne.s32.totalorder %s1519_s17, %s1520_s18  ;;  %p1526_p1 = scmp.lt.s32.totalorder %s1524_s26, %s1520_s18 }
  0x27   : > { %p1522_p12 = pnand %p1521_p11, %p1643_p5  ;;  %p1527_p2 = por %p1526_p1, %p1525_p0 }
  0x28   : > { %520 = vmatpush.bf16.msra.mxu0 %v1343_v10  ;;  %1450 = vmatpush.bf16.msra.mxu2 %v1343_v10 }
  0x29   : > { %753 = vmatpush.bf16.msra.mxu1 %v1319_v11  ;;  %1458 = vmatpush.bf16.msra.mxu3 %v1319_v11  ;;  %p1523_p13 = pneg %p1522_p12 }
  0x2b   : > { %p1528_p3 = pnand %p1527_p2, %p1523_p13 }
  0x2c   : > { %521 = vmatpush.bf16.msra.mxu0 %v1342_v12  ;;  %1451 = vmatpush.bf16.msra.mxu2 %v1342_v12 }
  0x2d   : > { %754 = vmatpush.bf16.msra.mxu1 %v1318_v13  ;;  %1459 = vmatpush.bf16.msra.mxu3 %v1318_v13 }
  0x30   : > { %522 = vmatpush.bf16.msra.mxu0 %v1341_v14  ;;  %1452 = vmatpush.bf16.msra.mxu2 %v1341_v14 }
  0x31   : > { %755 = vmatpush.bf16.msra.mxu1 %v1317_v15  ;;  %1460 = vmatpush.bf16.msra.mxu3 %v1317_v15 }
  0x33   : > { %523 = vmatmul.bf16.vlgmr.msra.gmra.mxu0 %v1325_v16  ;;  %563 = vmatmul.bf16.vlgmr.msra.gmra.mxu2 %v1333_v17 }
  0x34   : > { %756 = vmatmul.bf16.vlgmr.msra.gmra.mxu1 %v1301_v18  ;;  %796 = vmatmul.bf16.vlgmr.msra.gmra.mxu3 %v1309_v19 }
  0x43   : > { %528 = vmatmul.bf16.gmra.mxu0 %v1326_v20  ;;  %568 = vmatmul.bf16.gmra.mxu2 %v1334_v21 }
  0x44   : > { %761 = vmatmul.bf16.gmra.mxu1 %v1302_v22  ;;  %801 = vmatmul.bf16.gmra.mxu3 %v1310_v23 }
  0x53   : > { %533 = vmatmul.bf16.gmra.mxu0 %v1327_v24  ;;  %573 = vmatmul.bf16.gmra.mxu2 %v1335_v25 }
  0x54   : > { %766 = vmatmul.bf16.gmra.mxu1 %v1303_v26  ;;  %806 = vmatmul.bf16.gmra.mxu3 %v1311_v27 }
  0x63   : > { %538 = vmatmul.bf16.gmra.mxu0 %v1328_v28  ;;  %578 = vmatmul.bf16.gmra.mxu2 %v1336_v29 }
  0x64   : > { %771 = vmatmul.bf16.gmra.mxu1 %v1304_v30  ;;  %811 = vmatmul.bf16.gmra.mxu3 %v1312_v31 }
  0x73   : > { %543 = vmatmul.bf16.gmra.mxu0 %v1329_v32  ;;  %583 = vmatmul.bf16.gmra.mxu2 %v1337_v33 }
  0x74   : > { %776 = vmatmul.bf16.gmra.mxu1 %v1305_v34  ;;  %816 = vmatmul.bf16.gmra.mxu3 %v1313_v35 }
  0x83   : > { %548 = vmatmul.bf16.gmra.mxu0 %v1330_v36  ;;  %588 = vmatmul.bf16.gmra.mxu2 %v1338_v37 }
  0x84   : > { %781 = vmatmul.bf16.gmra.mxu1 %v1306_v38  ;;  %821 = vmatmul.bf16.gmra.mxu3 %v1314_v39 }
  0x93   : > { %553 = vmatmul.bf16.gmra.mxu0 %v1331_v40  ;;  %593 = vmatmul.bf16.gmra.mxu2 %v1339_v41 }
  0x94   : > { %786 = vmatmul.bf16.gmra.mxu1 %v1307_v42  ;;  %826 = vmatmul.bf16.gmra.mxu3 %v1315_v43 }
  0xa3   : > { %558 = vmatmul.bf16.gmra.mxu0 %v1332_v44  ;;  %598 = vmatmul.bf16.gmra.mxu2 %v1340_v45 }
  0xa4   : > { %791 = vmatmul.bf16.gmra.mxu1 %v1308_v46  ;;  %831 = vmatmul.bf16.gmra.mxu3 %v1316_v47 }
  0xb0   : > { %v524_v48 = vpop.f32.mrf.mxu0 }
  0xb1   : > { %v757_v49 = vpop.f32.mrf.mxu1 }
  0xb2   : > { %v758_v50 = vadd.f32 %v757_v49, %v524_v48 }
  0xb4   : > { %v841_v54 = vadd.f32 %v1747_v51, %v758_v50 }
  0xb6   : > { %v564_v52 = vpop.f32.mrf.mxu2  ;;  %v877_v60 = vadd.f32 %v1753_v55, %v841_v54 }
  0xb7   : > { %v797_v53 = vpop.f32.mrf.mxu3 }
  0xb8   : > { %v526_v56 = vpop.f32.mrf.mxu0  ;;  %v798_v58 = vadd.f32 %v797_v53, %v564_v52  ;;  %v909_v2 = vmax.f32 %v877_v60, 0.0 }
  0xb9   : > { %v759_v57 = vpop.f32.mrf.mxu1 }
  0xba   : > { %v760_v59 = vadd.f32 %v759_v57, %v526_v56  ;;  %v857_v62 = vadd.f32 %v1747_v51, %v798_v58 }
  0xbc   : > { %v842_v61 = vadd.f32 %v1747_v51, %v760_v59  ;;  %v893_v7 = vadd.f32 %v1753_v55, %v857_v62 }
  0xbe   : > { %v878_v63 = vadd.f32 %v1753_v55, %v842_v61  ;;  %v566_v0 = vpop.f32.mrf.mxu2  ;;  %v925_v12 = vmax.f32 %v893_v7, 0.0 }
  0xbf   : > { %v799_v1 = vpop.f32.mrf.mxu3 }
  0xc0   : > { %v910_v3 = vmax.f32 %v878_v63, 0.0  ;;  %v800_v4 = vadd.f32 %v799_v1, %v566_v0  ;;  %v529_v5 = vpop.f32.mrf.mxu0 }
  0xc1   : > { %v762_v6 = vpop.f32.mrf.mxu1 }
  0xc2   : > { %v1353_v8 = vpack.c.bf16 %v910_v3, %v909_v2  ;;  %v858_v9 = vadd.f32 %v1747_v51, %v800_v4  ;;  %v763_v11 = vadd.f32 %v762_v6, %v529_v5 }
  0xc4   : > { %1354 = vst [vmem:[%s1764_s11] sm:$0xff] %v1353_v8   ;;  %v894_v10 = vadd.f32 %v1753_v55, %v858_v9  ;;  %v843_v17 = vadd.f32 %v1747_v51, %v763_v11 }
  0xc6   : > { %v926_v13 = vmax.f32 %v894_v10, 0.0  ;;  %v569_v14 = vpop.f32.mrf.mxu2  ;;  %v879_v22 = vadd.f32 %v1753_v55, %v843_v17 }
  0xc7   : > { %v802_v15 = vpop.f32.mrf.mxu3 }
  0xc8   : > { %v1393_v16 = vpack.c.bf16 %v926_v13, %v925_v12  ;;  %v531_v18 = vpop.f32.mrf.mxu0  ;;  %v803_v20 = vadd.f32 %v802_v15, %v569_v14  ;;  %v911_v28 = vmax.f32 %v879_v22, 0.0 }
  0xc9   : > { %v764_v19 = vpop.f32.mrf.mxu1 }
  0xca   : > { %1437 = vst [vmem:[%s1764_s11 + $0x40] sm:$0xff] %v1393_v16   ;;  %v765_v21 = vadd.f32 %v764_v19, %v531_v18  ;;  %v859_v24 = vadd.f32 %v1747_v51, %v803_v20 }
  0xcc   : > { %v844_v23 = vadd.f32 %v1747_v51, %v765_v21  ;;  %v895_v33 = vadd.f32 %v1753_v55, %v859_v24 }
  0xce   : > { %v880_v25 = vadd.f32 %v1753_v55, %v844_v23  ;;  %v571_v26 = vpop.f32.mrf.mxu2  ;;  %v927_v38 = vmax.f32 %v895_v33, 0.0 }
  0xcf   : > { %v804_v27 = vpop.f32.mrf.mxu3 }
  0xd0   : > { %v912_v29 = vmax.f32 %v880_v25, 0.0  ;;  %v805_v30 = vadd.f32 %v804_v27, %v571_v26  ;;  %v534_v31 = vpop.f32.mrf.mxu0 }
  0xd1   : > { %v767_v32 = vpop.f32.mrf.mxu1 }
  0xd2   : > { %v1358_v34 = vpack.c.bf16 %v912_v29, %v911_v28  ;;  %v860_v35 = vadd.f32 %v1747_v51, %v805_v30  ;;  %v768_v37 = vadd.f32 %v767_v32, %v534_v31 }
  0xd4   : > { %1430 = vst [vmem:[%s1764_s11 + $0x8] sm:$0xff] %v1358_v34   ;;  %v896_v36 = vadd.f32 %v1753_v55, %v860_v35  ;;  %v845_v43 = vadd.f32 %v1747_v51, %v768_v37 }
  0xd6   : > { %v928_v39 = vmax.f32 %v896_v36, 0.0  ;;  %v574_v40 = vpop.f32.mrf.mxu2  ;;  %v881_v48 = vadd.f32 %v1753_v55, %v845_v43 }
  0xd7   : > { %v807_v41 = vpop.f32.mrf.mxu3 }
  0xd8   : > { %v1398_v42 = vpack.c.bf16 %v928_v39, %v927_v38  ;;  %v536_v44 = vpop.f32.mrf.mxu0  ;;  %v808_v46 = vadd.f32 %v807_v41, %v574_v40  ;;  %v913_v56 = vmax.f32 %v881_v48, 0.0 }
  0xd9   : > { %v769_v45 = vpop.f32.mrf.mxu1 }
  0xda   : > { %1438 = vst [vmem:[%s1764_s11 + $0x48] sm:$0xff] %v1398_v42   ;;  %v770_v47 = vadd.f32 %v769_v45, %v536_v44  ;;  %v861_v50 = vadd.f32 %v1747_v51, %v808_v46 }
  0xdc   : > { %v846_v49 = vadd.f32 %v1747_v51, %v770_v47  ;;  %v897_v61 = vadd.f32 %v1753_v55, %v861_v50 }
  0xde   : > { %v882_v52 = vadd.f32 %v1753_v55, %v846_v49  ;;  %v576_v53 = vpop.f32.mrf.mxu2  ;;  %v929_v2 = vmax.f32 %v897_v61, 0.0 }
  0xdf   : > { %v809_v54 = vpop.f32.mrf.mxu3 }
  0xe0   : > { %v914_v57 = vmax.f32 %v882_v52, 0.0  ;;  %v810_v58 = vadd.f32 %v809_v54, %v576_v53  ;;  %v539_v59 = vpop.f32.mrf.mxu0 }
  0xe1   : > { %v772_v60 = vpop.f32.mrf.mxu1 }
  0xe2   : > { %v1363_v62 = vpack.c.bf16 %v914_v57, %v913_v56  ;;  %v862_v63 = vadd.f32 %v1747_v51, %v810_v58  ;;  %v773_v1 = vadd.f32 %v772_v60, %v539_v59 }
  0xe4   : > { %1431 = vst [vmem:[%s1764_s11 + $0x10] sm:$0xff] %v1363_v62   ;;  %v898_v0 = vadd.f32 %v1753_v55, %v862_v63  ;;  %v847_v7 = vadd.f32 %v1747_v51, %v773_v1 }
  0xe6   : > { %v930_v3 = vmax.f32 %v898_v0, 0.0  ;;  %v579_v4 = vpop.f32.mrf.mxu2  ;;  %v883_v12 = vadd.f32 %v1753_v55, %v847_v7 }
  0xe7   : > { %v812_v5 = vpop.f32.mrf.mxu3 }
  0xe8   : > { %v1403_v6 = vpack.c.bf16 %v930_v3, %v929_v2  ;;  %v541_v8 = vpop.f32.mrf.mxu0  ;;  %v813_v10 = vadd.f32 %v812_v5, %v579_v4  ;;  %v915_v18 = vmax.f32 %v883_v12, 0.0 }
  0xe9   : > { %v774_v9 = vpop.f32.mrf.mxu1 }
  0xea   : > { %1439 = vst [vmem:[%s1764_s11 + $0x50] sm:$0xff] %v1403_v6   ;;  %v775_v11 = vadd.f32 %v774_v9, %v541_v8  ;;  %v863_v14 = vadd.f32 %v1747_v51, %v813_v10 }
  0xec   : > { %v848_v13 = vadd.f32 %v1747_v51, %v775_v11  ;;  %v899_v23 = vadd.f32 %v1753_v55, %v863_v14 }
  0xee   : > { %v884_v15 = vadd.f32 %v1753_v55, %v848_v13  ;;  %v581_v16 = vpop.f32.mrf.mxu2  ;;  %v931_v28 = vmax.f32 %v899_v23, 0.0 }
  0xef   : > { %v814_v17 = vpop.f32.mrf.mxu3 }
  0xf0   : > { %v916_v19 = vmax.f32 %v884_v15, 0.0  ;;  %v815_v20 = vadd.f32 %v814_v17, %v581_v16  ;;  %v544_v21 = vpop.f32.mrf.mxu0 }
  0xf1   : > { %v777_v22 = vpop.f32.mrf.mxu1 }
  0xf2   : > { %v1368_v24 = vpack.c.bf16 %v916_v19, %v915_v18  ;;  %v864_v25 = vadd.f32 %v1747_v51, %v815_v20  ;;  %v778_v27 = vadd.f32 %v777_v22, %v544_v21 }
  0xf4   : > { %1432 = vst [vmem:[%s1764_s11 + $0x18] sm:$0xff] %v1368_v24   ;;  %v900_v26 = vadd.f32 %v1753_v55, %v864_v25  ;;  %v849_v33 = vadd.f32 %v1747_v51, %v778_v27 }
  0xf6   : > { %v932_v29 = vmax.f32 %v900_v26, 0.0  ;;  %v584_v30 = vpop.f32.mrf.mxu2  ;;  %v885_v38 = vadd.f32 %v1753_v55, %v849_v33 }
  0xf7   : > { %v817_v31 = vpop.f32.mrf.mxu3 }
  0xf8   : > { %v1408_v32 = vpack.c.bf16 %v932_v29, %v931_v28  ;;  %v546_v34 = vpop.f32.mrf.mxu0  ;;  %v818_v36 = vadd.f32 %v817_v31, %v584_v30  ;;  %v917_v44 = vmax.f32 %v885_v38, 0.0 }
  0xf9   : > { %v779_v35 = vpop.f32.mrf.mxu1 }
  0xfa   : > { %1440 = vst [vmem:[%s1764_s11 + $0x58] sm:$0xff] %v1408_v32   ;;  %v780_v37 = vadd.f32 %v779_v35, %v546_v34  ;;  %v865_v40 = vadd.f32 %v1747_v51, %v818_v36 }
  0xfc   : > { %v850_v39 = vadd.f32 %v1747_v51, %v780_v37  ;;  %v901_v49 = vadd.f32 %v1753_v55, %v865_v40 }
  0xfe   : > { %v886_v41 = vadd.f32 %v1753_v55, %v850_v39  ;;  %v586_v42 = vpop.f32.mrf.mxu2  ;;  %v933_v56 = vmax.f32 %v901_v49, 0.0 }
  0xff   : > { %v819_v43 = vpop.f32.mrf.mxu3 }
 0x100   : > { %v918_v45 = vmax.f32 %v886_v41, 0.0  ;;  %v820_v46 = vadd.f32 %v819_v43, %v586_v42  ;;  %v549_v47 = vpop.f32.mrf.mxu0 }
 0x101   : > { %v782_v48 = vpop.f32.mrf.mxu1 }
 0x102   : > { %v1373_v50 = vpack.c.bf16 %v918_v45, %v917_v44  ;;  %v866_v52 = vadd.f32 %v1747_v51, %v820_v46  ;;  %v783_v54 = vadd.f32 %v782_v48, %v549_v47 }
 0x104   : > { %1433 = vst [vmem:[%s1764_s11 + $0x20] sm:$0xff] %v1373_v50   ;;  %v902_v53 = vadd.f32 %v1753_v55, %v866_v52  ;;  %v851_v61 = vadd.f32 %v1747_v51, %v783_v54 }
 0x106   : > { %v934_v57 = vmax.f32 %v902_v53, 0.0  ;;  %v589_v58 = vpop.f32.mrf.mxu2  ;;  %v887_v2 = vadd.f32 %v1753_v55, %v851_v61 }
 0x107   : > { %v822_v59 = vpop.f32.mrf.mxu3 }
 0x108   : > { %v1413_v60 = vpack.c.bf16 %v934_v57, %v933_v56  ;;  %v551_v62 = vpop.f32.mrf.mxu0  ;;  %v823_v0 = vadd.f32 %v822_v59, %v589_v58  ;;  %v919_v8 = vmax.f32 %v887_v2, 0.0 }
 0x109   : > { %v784_v63 = vpop.f32.mrf.mxu1 }
 0x10a   : > { %1441 = vst [vmem:[%s1764_s11 + $0x60] sm:$0xff] %v1413_v60   ;;  %v785_v1 = vadd.f32 %v784_v63, %v551_v62  ;;  %v867_v4 = vadd.f32 %v1747_v51, %v823_v0 }
 0x10c   : > { %v852_v3 = vadd.f32 %v1747_v51, %v785_v1  ;;  %v903_v13 = vadd.f32 %v1753_v55, %v867_v4 }
 0x10e   : > { %v888_v5 = vadd.f32 %v1753_v55, %v852_v3  ;;  %v591_v6 = vpop.f32.mrf.mxu2  ;;  %v935_v18 = vmax.f32 %v903_v13, 0.0 }
 0x10f   : > { %v824_v7 = vpop.f32.mrf.mxu3 }
 0x110   : > { %v920_v9 = vmax.f32 %v888_v5, 0.0  ;;  %v825_v10 = vadd.f32 %v824_v7, %v591_v6  ;;  %v554_v11 = vpop.f32.mrf.mxu0 }
 0x111   : > { %v787_v12 = vpop.f32.mrf.mxu1 }
 0x112   : > { %v1378_v14 = vpack.c.bf16 %v920_v9, %v919_v8  ;;  %v868_v15 = vadd.f32 %v1747_v51, %v825_v10  ;;  %v788_v17 = vadd.f32 %v787_v12, %v554_v11 }
 0x114   : > { %1434 = vst [vmem:[%s1764_s11 + $0x28] sm:$0xff] %v1378_v14   ;;  %v904_v16 = vadd.f32 %v1753_v55, %v868_v15  ;;  %v853_v23 = vadd.f32 %v1747_v51, %v788_v17 }
 0x116   : > { %v936_v19 = vmax.f32 %v904_v16, 0.0  ;;  %v594_v20 = vpop.f32.mrf.mxu2  ;;  %v889_v28 = vadd.f32 %v1753_v55, %v853_v23 }
 0x117   : > { %v827_v21 = vpop.f32.mrf.mxu3 }
 0x118   : > { %v1418_v22 = vpack.c.bf16 %v936_v19, %v935_v18  ;;  %v556_v24 = vpop.f32.mrf.mxu0  ;;  %v828_v26 = vadd.f32 %v827_v21, %v594_v20  ;;  %v921_v34 = vmax.f32 %v889_v28, 0.0 }
 0x119   : > { %v789_v25 = vpop.f32.mrf.mxu1 }
 0x11a   : > { %1442 = vst [vmem:[%s1764_s11 + $0x68] sm:$0xff] %v1418_v22   ;;  %v790_v27 = vadd.f32 %v789_v25, %v556_v24  ;;  %v869_v30 = vadd.f32 %v1747_v51, %v828_v26 }
 0x11c   : > { %v854_v29 = vadd.f32 %v1747_v51, %v790_v27  ;;  %v905_v39 = vadd.f32 %v1753_v55, %v869_v30 }
 0x11e   : > { %v890_v31 = vadd.f32 %v1753_v55, %v854_v29  ;;  %v596_v32 = vpop.f32.mrf.mxu2  ;;  %v937_v44 = vmax.f32 %v905_v39, 0.0 }
 0x11f   : > { %v829_v33 = vpop.f32.mrf.mxu3 }
 0x120   : > { %v922_v35 = vmax.f32 %v890_v31, 0.0  ;;  %v830_v36 = vadd.f32 %v829_v33, %v596_v32  ;;  %v559_v37 = vpop.f32.mrf.mxu0 }
 0x121   : > { %v792_v38 = vpop.f32.mrf.mxu1 }
 0x122   : > { %v1383_v40 = vpack.c.bf16 %v922_v35, %v921_v34  ;;  %v870_v41 = vadd.f32 %v1747_v51, %v830_v36  ;;  %v793_v43 = vadd.f32 %v792_v38, %v559_v37 }
 0x124   : > { %1435 = vst [vmem:[%s1764_s11 + $0x30] sm:$0xff] %v1383_v40   ;;  %v906_v42 = vadd.f32 %v1753_v55, %v870_v41  ;;  %v855_v49 = vadd.f32 %v1747_v51, %v793_v43 }
 0x126   : > { %v938_v45 = vmax.f32 %v906_v42, 0.0  ;;  %v599_v46 = vpop.f32.mrf.mxu2  ;;  %v891_v56 = vadd.f32 %v1753_v55, %v855_v49 }
 0x127   : > { %v832_v47 = vpop.f32.mrf.mxu3 }
 0x128   : > { %v1423_v48 = vpack.c.bf16 %v938_v45, %v937_v44  ;;  %v561_v50 = vpop.f32.mrf.mxu0  ;;  %v833_v53 = vadd.f32 %v832_v47, %v599_v46  ;;  %v923_v62 = vmax.f32 %v891_v56, 0.0 }
 0x129   : > { %v794_v52 = vpop.f32.mrf.mxu1 }
 0x12a   : > { %1443 = vst [vmem:[%s1764_s11 + $0x70] sm:$0xff] %v1423_v48   ;;  %v795_v54 = vadd.f32 %v794_v52, %v561_v50  ;;  %v871_v58 = vadd.f32 %v1747_v51, %v833_v53 }
 0x12c   : > { %v856_v57 = vadd.f32 %v1747_v51, %v795_v54  ;;  %v907_v1 = vadd.f32 %v1753_v55, %v871_v58 }
 0x12e   : > { %v892_v59 = vadd.f32 %v1753_v55, %v856_v57  ;;  %v601_v60 = vpop.f32.mrf.mxu2  ;;  %v939_v5 = vmax.f32 %v907_v1, 0.0 }
 0x12f   : > { %v834_v61 = vpop.f32.mrf.mxu3 }
 0x130   : > { %v924_v63 = vmax.f32 %v892_v59, 0.0  ;;  %v835_v0 = vadd.f32 %v834_v61, %v601_v60 }
 0x132   : > { %v1388_v2 = vpack.c.bf16 %v924_v63, %v923_v62  ;;  %v872_v3 = vadd.f32 %v1747_v51, %v835_v0 }
 0x134   : > { %1436 = vst [vmem:[%s1764_s11 + $0x38] sm:$0xff] %v1388_v2   ;;  %v908_v4 = vadd.f32 %v1753_v55, %v872_v3 }
 0x136   : > { %v940_v6 = vmax.f32 %v908_v4, 0.0 }
 0x138   : > { %v1428_v7 = vpack.c.bf16 %v940_v6, %v939_v5 }
 0x13a   : > { %1444 = vst [vmem:[%s1764_s11 + $0x78] sm:$0xff] %v1428_v7  }
 0x13b   : > { %1531 = shalt.err (!%p1528_p3)
}
 0x13c   : > { %s1568_s29 = smov 64   ;;  %s1569_s11 = smov 4  }
 0x13d   : > { %1461 = dma.vmem_to_hbm [thread:$0]  (%p1643_p5), %s1019_s25, 2048, %s1021_s16, %s1006_s10, %s1568_s29, %s1568_s29, %s1569_s11  }
 0x13e PF: > { %p1467_p4 = scmp.ge.s32.totalorder %s1566_s24, 2  ;;  %s1035_s12 = sand.u32 1, %s1554_s21  }
 0x13f   : > { %s1036_s13 = scalar_lea.sflag [#allocation3], %s1035_s12 }
 0x140   : > { %p1464_p7 = pnand %p1467_p4, %p1647_p6 }
 0x142   : > { %p1465_p8 = pneg %p1464_p7 }
 0x144   : > { %1549 = dma.done.wait (%p1465_p8), %s1036_s13, 2048  }
 0x145   : > { %1551 = vsyncadd (%p1465_p8), %s1036_s13, 4294965248  ;;  %p16_p9 = scmp.ge.s32.totalorder %s1630_s27, 4   ;;  %s1882_s21 = smov %s1558_s22 }
 0x146   : > { %s1883_s22 = smov %s1562_s23  ;;  %s1884_s23 = smov %s1641_s30 }
 0x147   : > { %s1885_s24 = smov %s1630_s27  ;;  %18 = sbr.rel (!%p16_p9) target bundleno = 3 (0x3), region = 82 }
 0x14c   :  { %1042 = vsyncpa [#allocation3], 1 }
 0x14d   :  { %1044 = vsyncpa [#allocation3 + $0x1], 1 }

// kernel: bottleneck_forward.4
= control target key start
LH: loop header
LB: loop body
LE: loop exit
PB: predicated region body
PF: predicated region fallthrough
CT: control target
= control target key end

     0   :  { %s10164_s12 = smov 0   ;;  %s14441_s0 = inlined_call_operand.vmem [shape: bf16[2,18,18,128], index: 0, kind: input, shape index: {}]   ;;  %s14442_s1 = inlined_call_operand.vmem [shape: bf16[72,4], index: 1, kind: input, shape index: {}]   ;;  %s14443_s2 = inlined_call_operand.vmem [shape: f32[1,128], index: 2, kind: input, shape index: {}]   ;;  %s14444_s3 = inlined_call_operand.vmem [shape: bf16[512,128], index: 3, kind: output, shape index: {}]  }
   0x1 LB: > { %s10170_s13 = sadd.s32 4294967295, %s10139_s12   ;;  %p8781_p0 = scmp.ge.s32.totalorder %s10139_s12, 1  ;;  %s10139_s12 = sphi %s10164_s12, %s13_s12  }
   0x2   : > { %p137_p1 = scmp.lt.s32.totalorder %s10139_s12, 3 }
   0x4   : > { %p138_p2 = pnand %p8781_p0, %p137_p1 }
   0x6   : > { %141 = sbr.rel (%p138_p2) target bundleno = 1431 (0x597), region = 32 }
   0xb   : > { %v237_v0 = vld [vmem:[%s14442_s1] sm:$0x3]  ;;  %vm743_vm0 = vcmask 1041408   ;;  %p161_p3 = scmp.lt.s32.totalorder %s10170_s13, 1  ;;  %v641_v2 = vld [vmem:[%s14442_s1] sm:$0xc] }
   0xc   : > { %v965_v1 = vsel %vm743_vm0, %v237_v0, 0  ;;  %v691_v3 = vunpack.c.l.b16 %v641_v2  ;;  %v1219_v4 = vld [vmem:[%s14442_s1 + $0x4] sm:$0x3]  ;;  %v1473_v5 = vld [vmem:[%s14442_s1 + $0x4] sm:$0xc]  ;;  %vm694_vm1 = vcmask 31744  }
   0xd   : > { %10036 = vmatpush.bf16.msra.mxu3 %v965_v1  ;;  %s162_s18 = scalar_select %p161_p3, %s10170_s13, 1  ;;  %974 = vmatpush.bf16.msra.mxu1 %v965_v1  ;;  %v2162_v6 = vld [vmem:[%s14442_s1 + $0x8] sm:$0x3]  ;;  %v2559_v8 = vld [vmem:[%s14442_s1 + $0x8] sm:$0xc]  ;;  %v1555_v9 = vunpack.c.l.b16 %v1473_v5  ;;  %v1317_v11 = vsel %vm743_vm0, %v1219_v4, 0 }
   0xe   : > { %v692_v7 = vpack.c.b16 %v691_v3, %v691_v3  ;;  %vm254_vm2 = vsmask.f32 3328  ;;  %vm255_vm3 = vsmask.f32 7440  ;;  %v2260_v15 = vsel %vm743_vm0, %v2162_v6, 0  ;;  %s10141_s14 = smov 124  }
   0xf   : > { %s10037_s25 = smul.u32 216, %s162_s18  ;;  %v2609_v16 = vunpack.c.l.b16 %v2559_v8  ;;  %v1556_v26 = vpack.c.b16 %v1555_v9, %v1555_v9  ;;  %vm10223_vm4 = vmor %vm254_vm2, %vm255_vm3  ;;  %vm1104_vm5 = vcmask 1042432   ;;  %vm1105_vm6 = vcmask 1046532  }
  0x10   : > { %v693_v10 = vrot.slane %v692_v7, 2  ;;  %vm10438_vm7 = vmor %vm1104_vm5, %vm1105_vm6  ;;  %vm4224_vm8 = vcmask 27648   ;;  %vm8688_vm9 = vcmask 60448  }
  0x11   : > { %s10198_s30 = scalar_lea.vmem %s14441_s0, %s10037_s25  ;;  %v2610_v36 = vpack.c.b16 %v2609_v16, %v2609_v16  ;;  %v1557_v50 = vrot.slane %v1556_v26, 2  ;;  %s8783_s25 = sshll.u32 %s10170_s13, 5 }
  0x12   : > { %v9947_v12 = vld [vmem:[%s10198_s30 + $0x60] sm:$0xff]  ;;  %v745_v17 = vsel %vm743_vm0, %v693_v10, 0  ;;  %v246_v18 = vld [vmem:[%s10198_s30 + $0x68] sm:$0x1]  ;;  %v223_v41 = vld [vmem:[%s10198_s30 + $0x6c] sm:$0xf] }
  0x13   : > { %v221_v13 = vld [vmem:[%s10198_s30 + $0x60] sm:$0xf]  ;;  %v222_v14 = vld [vmem:[%s10198_s30 + $0x64] sm:$0xf]  ;;  %8873 = vmatmul.msk.bf16.vlgmr.msra.gmra.mxu3 %vm694_vm1, %v9947_v12  ;;  %10035 = vmatpush.bf16.msra.mxu2 %v745_v17  ;;  %v469_v23 = vshll.u32 %v246_v18, 16  ;;  %v2611_v53 = vrot.slane %v2610_v36, 2 }
  0x14   : > { %v450_v19 = vshrl.u32 %v221_v13, 16  ;;  %v453_v20 = vshll.u32 %v221_v13, 16  ;;  %v459_v21 = vshll.u32 %v222_v14, 16  ;;  %v463_v22 = vshrl.u32 %v222_v14, 16  ;;  %v205_v24 = vld [vmem:[%s10198_s30] sm:$0xf]  ;;  %754 = vmatpush.bf16.msra.mxu0 %v745_v17 }
  0x15   : > { %v9939_v25 = vld [vmem:[%s10198_s30] sm:$0xff]  ;;  %v258_v31 = vshrl.u32 %v205_v24, 16  ;;  %v10214_v33 = vld [vmem:[%s10198_s30 + $0x8] sm:$0x1]  ;;  %v261_v34 = vshll.u32 %v205_v24, 16  ;;  %v471_v44 = vrot.slane %v469_v23, 5 }
  0x16   : > { %v452_v27 = vrot.slane %v450_v19, 4  ;;  %v455_v28 = vrot.slane %v453_v20, 5  ;;  %v461_v29 = vrot.slane %v459_v21, 5  ;;  %v10211_v30 = vld [vmem:[%s10198_s30 + $0x4] sm:$0xf]  ;;  %v465_v32 = vrot.slane %v463_v22, 4  ;;  %8865 = vmatmul.msk.bf16.vlgmr.msra.gmra.mxu1 %vm694_vm1, %v9939_v25 }
  0x17   : > { %1326 = vmatpush.bf16.msrb.mxu2 %v1317_v11  ;;  %v267_v35 = vshll.u32 %v10211_v30, 16  ;;  %v260_v38 = vrot.slane %v258_v31, 4  ;;  %v271_v39 = vshrl.u32 %v10211_v30, 16  ;;  %v277_v40 = vshll.u32 %v10214_v33, 16  ;;  %v224_v58 = vld [vmem:[%s10198_s30 + $0x70] sm:$0xf] }
  0x18   : > { %2269 = vmatpush.bf16.msrb.mxu0 %v2260_v15  ;;  %v456_v37 = vor.u32 %v455_v28, %v452_v27  ;;  %v466_v43 = vor.u32 %v465_v32, %v461_v29  ;;  %v263_v45 = vrot.slane %v261_v34, 5  ;;  %v474_v54 = vshrl.u32 %v223_v41, 16  ;;  %v247_v59 = vld [vmem:[%s10198_s30 + $0x74] sm:$0x1]  ;;  %v207_v9 = vld [vmem:[%s10198_s30 + $0xc] sm:$0xf] }
  0x19   : > { %v269_v46 = vrot.slane %v267_v35, 5  ;;  %v273_v48 = vrot.slane %v271_v39, 4  ;;  %v279_v49 = vrot.slane %v277_v40, 5  ;;  %v1607_v57 = vsel %vm743_vm0, %v1557_v50, 0  ;;  %v10241_v14 = vld [vmem:[%s10198_s30 + $0x10] sm:$0xf] }
  0x1a   : > { %v457_v47 = vrot.slane %v456_v37, 4  ;;  %v467_v51 = vrot.slane %v466_v43, 4  ;;  %v264_v52 = vor.u32 %v263_v45, %v260_v38  ;;  %v477_v60 = vshll.u32 %v223_v41, 16  ;;  %1616 = vmatpush.bf16.msrb.mxu3 %v1607_v57  ;;  %v9948_v16 = vld [vmem:[%s10198_s30 + $0x6c] sm:$0xff]  ;;  %v10245_v19 = vld [vmem:[%s10198_s30 + $0x14] sm:$0x1] }
  0x1b   : > { %v274_v56 = vor.u32 %v273_v48, %v269_v46  ;;  %v2661_v0 = vsel %vm743_vm0, %v2611_v53, 0  ;;  %v476_v3 = vrot.slane %v474_v54, 4  ;;  %v483_v6 = vshll.u32 %v224_v58, 16  ;;  %v9940_v28 = vld [vmem:[%s10198_s30 + $0xc] sm:$0xff]  ;;  %v226_v35 = vld [vmem:[%s10198_s30 + $0x7c] sm:$0xf] }
  0x1c   : > { %v462_v55 = vsel %vm10223_vm4, %v457_v47, %v461_v29  ;;  %v472_v61 = vsel %vm10223_vm4, %v467_v51, %v471_v44  ;;  %v265_v63 = vrot.slane %v264_v52, 4  ;;  %2670 = vmatpush.bf16.msrb.mxu1 %v2661_v0  ;;  %v479_v4 = vrot.slane %v477_v60, 5  ;;  %v225_v29 = vld [vmem:[%s10198_s30 + $0x78] sm:$0xf]  ;;  %v248_v50 = vld [vmem:[%s10198_s30 + $0x80] sm:$0x1] }
  0x1d   : > { %v658_v62 = vunpack.c.l.b16 %v462_v55  ;;  %v659_v1 = vunpack.c.l.b16 %v472_v61  ;;  %v275_v2 = vrot.slane %v274_v56, 4  ;;  %v487_v7 = vshrl.u32 %v224_v58, 16  ;;  %v209_v56 = vld [vmem:[%s10198_s30 + $0x18] sm:$0xf]  ;;  %v10266_v60 = vld [vmem:[%s10198_s30 + $0x1c] sm:$0xf] }
  0x1e   : > { %v270_v5 = vsel %vm10223_vm4, %v265_v63, %v269_v46  ;;  %v493_v8 = vshll.u32 %v247_v59, 16  ;;  %v480_v13 = vor.u32 %v479_v4, %v476_v3  ;;  %v485_v17 = vrot.slane %v483_v6, 5  ;;  %p12214_p4 = scmp.lt.s32.totalorder %s8783_s25, 63 }
  0x1f   : > { %v682_v10 = vpack.c.b16 %v659_v1, %v658_v62  ;;  %v280_v11 = vsel %vm10223_vm4, %v275_v2, %v279_v49  ;;  %v642_v12 = vunpack.c.l.b16 %v270_v5  ;;  %v489_v18 = vrot.slane %v487_v7, 4 }
  0x20   : > { %v643_v15 = vunpack.c.l.b16 %v280_v11  ;;  %v481_v20 = vrot.slane %v480_v13, 4  ;;  %v495_v21 = vrot.slane %v493_v8, 5  ;;  %v282_v22 = vshrl.u32 %v207_v9, 16  ;;  %s14596_s25 = smov (!%p12214_p4, %s8783_s25), 63 }
  0x21   : > { %8793 = vmatmul.msk.bf16.vlgmr.msra.gmra.mxu2 %vm694_vm1, %v682_v10  ;;  %v285_v23 = vshll.u32 %v207_v9, 16  ;;  %v490_v25 = vor.u32 %v489_v18, %v485_v17  ;;  %v291_v26 = vshll.u32 %v10241_v14, 16  ;;  %v295_v27 = vshrl.u32 %v10241_v14, 16  ;;  %v10273_v10 = vld [vmem:[%s10198_s30 + $0x20] sm:$0x1]  ;;  %s8784_s13 = sshll.u32 %s14596_s25, 2 }
  0x22   : > { %v674_v24 = vpack.c.b16 %v643_v15, %v642_v12  ;;  %v284_v31 = vrot.slane %v282_v22, 4  ;;  %v301_v34 = vshll.u32 %v10245_v19, 16  ;;  %v486_v36 = vsel %vm10223_vm4, %v481_v20, %v485_v17  ;;  %s12279_s29 = scalar_lea.vmem %s14444_s3, %s8784_s13 }
  0x23   : > { %v287_v32 = vrot.slane %v285_v23, 5  ;;  %8874 = vmatmul.msk.bf16.gmra.mxu3 %vm694_vm1, %v9948_v16  ;;  %v491_v37 = vrot.slane %v490_v25, 4  ;;  %v293_v38 = vrot.slane %v291_v26, 5  ;;  %v297_v39 = vrot.slane %v295_v27, 4  ;;  %v9949_v16 = vld [vmem:[%s10198_s30 + $0x78] sm:$0xff] }
  0x24   : > { %8785 = vmatmul.msk.bf16.vlgmr.msra.gmra.mxu0 %vm694_vm1, %v674_v24  ;;  %v303_v41 = vrot.slane %v301_v34, 5  ;;  %v498_v43 = vshrl.u32 %v225_v29, 16  ;;  %v501_v44 = vshll.u32 %v225_v29, 16  ;;  %v507_v47 = vshll.u32 %v226_v35, 16  ;;  %v228_v24 = vld [vmem:[%s10198_s30 + $0x88] sm:$0xf] }
  0x25   : > { %v288_v40 = vor.u32 %v287_v32, %v284_v31  ;;  %v496_v45 = vsel %vm10223_vm4, %v491_v37, %v495_v21  ;;  %v298_v46 = vor.u32 %v297_v39, %v293_v38  ;;  %v511_v48 = vshrl.u32 %v226_v35, 16  ;;  %v227_v21 = vld [vmem:[%s10198_s30 + $0x84] sm:$0xf]  ;;  %v9941_v25 = vld [vmem:[%s10198_s30 + $0x18] sm:$0xff] }
  0x26   : > { %8866 = vmatmul.msk.bf16.gmra.mxu1 %vm694_vm1, %v9940_v28  ;;  %v500_v51 = vrot.slane %v498_v43, 4  ;;  %v503_v52 = vrot.slane %v501_v44, 5  ;;  %v509_v54 = vrot.slane %v507_v47, 5  ;;  %v660_v57 = vunpack.c.l.b16 %v486_v36  ;;  %v211_v37 = vld [vmem:[%s10198_s30 + $0x24] sm:$0xf] }
  0x27   : > { %v289_v49 = vrot.slane %v288_v40, 4  ;;  %v299_v53 = vrot.slane %v298_v46, 4  ;;  %v513_v55 = vrot.slane %v511_v48, 4  ;;  %v661_v58 = vunpack.c.l.b16 %v496_v45  ;;  %v249_v45 = vld [vmem:[%s10198_s30 + $0x8c] sm:$0x1] }
  0x28   : > { %v517_v62 = vshll.u32 %v248_v50, 16  ;;  %v504_v0 = vor.u32 %v503_v52, %v500_v51  ;;  %v306_v1 = vshrl.u32 %v209_v56, 16  ;;  %v309_v2 = vshll.u32 %v209_v56, 16 }
  0x29   : > { %v294_v59 = vsel %vm10223_vm4, %v289_v49, %v293_v38  ;;  %v304_v61 = vsel %vm10223_vm4, %v299_v53, %v303_v41  ;;  %v514_v4 = vor.u32 %v513_v55, %v509_v54  ;;  %v315_v5 = vshll.u32 %v10266_v60, 16  ;;  %v10290_v38 = vld [vmem:[%s10198_s30 + $0x28] sm:$0xf] }
  0x2a   : > { %v644_v63 = vunpack.c.l.b16 %v294_v59  ;;  %v645_v3 = vunpack.c.l.b16 %v304_v61  ;;  %v319_v6 = vshrl.u32 %v10266_v60, 16  ;;  %v683_v7 = vpack.c.b16 %v661_v58, %v660_v57 }
  0x2b   : > { %v308_v8 = vrot.slane %v306_v1, 4  ;;  %v311_v9 = vrot.slane %v309_v2, 5  ;;  %v317_v11 = vrot.slane %v315_v5, 5  ;;  %v505_v13 = vrot.slane %v504_v0, 4  ;;  %v10300_v0 = vld [vmem:[%s10198_s30 + $0x2c] sm:$0x1] }
  0x2c   : > { %v321_v12 = vrot.slane %v319_v6, 4  ;;  %v675_v15 = vpack.c.b16 %v645_v3, %v644_v63  ;;  %v515_v17 = vrot.slane %v514_v4, 4  ;;  %v519_v18 = vrot.slane %v517_v62, 5  ;;  %v9950_v2 = vld [vmem:[%s10198_s30 + $0x84] sm:$0xff]  ;;  %v229_v5 = vld [vmem:[%s10198_s30 + $0x90] sm:$0xf] }
  0x2d   : > { %v312_v20 = vor.u32 %v311_v9, %v308_v8  ;;  %v325_v23 = vshll.u32 %v10273_v10, 16  ;;  %v510_v26 = vsel %vm10223_vm4, %v505_v13, %v509_v54  ;;  %v522_v27 = vshrl.u32 %v227_v21, 16 }
  0x2e   : > { %v322_v22 = vor.u32 %v321_v12, %v317_v11  ;;  %v525_v28 = vshll.u32 %v227_v21, 16  ;;  %v520_v29 = vsel %vm10223_vm4, %v515_v17, %v519_v18  ;;  %v531_v32 = vshll.u32 %v228_v24, 16  ;;  %v9942_v12 = vld [vmem:[%s10198_s30 + $0x24] sm:$0xff] }
  0x2f   : > { %v313_v31 = vrot.slane %v312_v20, 4  ;;  %v535_v34 = vshrl.u32 %v228_v24, 16  ;;  %v327_v36 = vrot.slane %v325_v23, 5  ;;  %v662_v39 = vunpack.c.l.b16 %v510_v26  ;;  %v213_v20 = vld [vmem:[%s10198_s30 + $0x30] sm:$0xf] }
  0x30   : > { %v323_v35 = vrot.slane %v322_v22, 4  ;;  %v663_v40 = vunpack.c.l.b16 %v520_v29  ;;  %v524_v41 = vrot.slane %v522_v27, 4  ;;  %v527_v43 = vrot.slane %v525_v28, 5 }
  0x31   : > { %8794 = vmatmul.msk.bf16.gmra.mxu2 %vm694_vm1, %v683_v7  ;;  %v318_v44 = vsel %vm10223_vm4, %v313_v31, %v317_v11  ;;  %v533_v46 = vrot.slane %v531_v32, 5  ;;  %v537_v47 = vrot.slane %v535_v34, 4  ;;  %v330_v48 = vshrl.u32 %v211_v37, 16  ;;  %v230_v11 = vld [vmem:[%s10198_s30 + $0x94] sm:$0xf] }
  0x32   : > { %v328_v49 = vsel %vm10223_vm4, %v323_v35, %v327_v36  ;;  %v333_v50 = vshll.u32 %v211_v37, 16  ;;  %v339_v51 = vshll.u32 %v10290_v38, 16  ;;  %v343_v52 = vshrl.u32 %v10290_v38, 16  ;;  %v250_v32 = vld [vmem:[%s10198_s30 + $0x98] sm:$0x1] }
  0x33   : > { %8875 = vmatmul.msk.bf16.gmra.mxu3 %vm694_vm1, %v9949_v16  ;;  %v684_v53 = vpack.c.b16 %v663_v40, %v662_v39  ;;  %v541_v54 = vshll.u32 %v249_v45, 16  ;;  %v646_v55 = vunpack.c.l.b16 %v318_v44  ;;  %v647_v56 = vunpack.c.l.b16 %v328_v49 }
  0x34   : > { %8786 = vmatmul.msk.bf16.gmra.mxu0 %vm694_vm1, %v675_v15  ;;  %v528_v57 = vor.u32 %v527_v43, %v524_v41  ;;  %v538_v58 = vor.u32 %v537_v47, %v533_v46  ;;  %v332_v59 = vrot.slane %v330_v48, 4  ;;  %v335_v61 = vrot.slane %v333_v50, 5 }
  0x35   : > { %v341_v62 = vrot.slane %v339_v51, 5  ;;  %v345_v63 = vrot.slane %v343_v52, 4  ;;  %v676_v1 = vpack.c.b16 %v647_v56, %v646_v55  ;;  %v543_v4 = vrot.slane %v541_v54, 5  ;;  %v10327_v51 = vld [vmem:[%s10198_s30 + $0x38] sm:$0x1] }
  0x36   : > { %8867 = vmatmul.msk.bf16.gmra.mxu1 %vm694_vm1, %v9941_v25  ;;  %v529_v3 = vrot.slane %v528_v57, 4  ;;  %v539_v6 = vrot.slane %v538_v58, 4  ;;  %v336_v7 = vor.u32 %v335_v61, %v332_v59  ;;  %v349_v9 = vshll.u32 %v10300_v0, 16  ;;  %v10317_v25 = vld [vmem:[%s10198_s30 + $0x34] sm:$0xf] }
  0x37   : > { %v346_v8 = vor.u32 %v345_v63, %v341_v62  ;;  %v546_v13 = vshrl.u32 %v229_v5, 16  ;;  %v549_v15 = vshll.u32 %v229_v5, 16  ;;  %v555_v17 = vshll.u32 %v230_v11, 16  ;;  %v9951_v57 = vld [vmem:[%s10198_s30 + $0x90] sm:$0xff]  ;;  %v231_v63 = vld [vmem:[%s10198_s30 + $0x9c] sm:$0xf] }
  0x38   : > { %v534_v16 = vsel %vm10223_vm4, %v529_v3, %v533_v46  ;;  %v559_v18 = vshrl.u32 %v230_v11, 16  ;;  %v544_v21 = vsel %vm10223_vm4, %v539_v6, %v543_v4  ;;  %v337_v22 = vrot.slane %v336_v7, 4  ;;  %v215_v4 = vld [vmem:[%s10198_s30 + $0x3c] sm:$0xf]  ;;  %v10339_v5 = vld [vmem:[%s10198_s30 + $0x40] sm:$0xf] }
  0x39   : > { %v347_v23 = vrot.slane %v346_v8, 4  ;;  %v351_v24 = vrot.slane %v349_v9, 5  ;;  %v664_v26 = vunpack.c.l.b16 %v534_v16  ;;  %v548_v27 = vrot.slane %v546_v13, 4 }
  0x3a   : > { %v551_v28 = vrot.slane %v549_v15, 5  ;;  %v354_v29 = vshrl.u32 %v213_v20, 16  ;;  %v665_v31 = vunpack.c.l.b16 %v544_v21  ;;  %v557_v34 = vrot.slane %v555_v17, 5 }
  0x3b   : > { %v561_v35 = vrot.slane %v559_v18, 4  ;;  %v357_v36 = vshll.u32 %v213_v20, 16  ;;  %v342_v37 = vsel %vm10223_vm4, %v337_v22, %v341_v62  ;;  %v352_v39 = vsel %vm10223_vm4, %v347_v23, %v351_v24 }
  0x3c   : > { %v363_v40 = vshll.u32 %v10317_v25, 16  ;;  %v367_v41 = vshrl.u32 %v10317_v25, 16  ;;  %v552_v43 = vor.u32 %v551_v28, %v548_v27  ;;  %v565_v44 = vshll.u32 %v250_v32, 16 }
  0x3d   : > { %v356_v45 = vrot.slane %v354_v29, 4  ;;  %v648_v46 = vunpack.c.l.b16 %v342_v37  ;;  %v649_v47 = vunpack.c.l.b16 %v352_v39  ;;  %v562_v48 = vor.u32 %v561_v35, %v557_v34  ;;  %v10354_v37 = vld [vmem:[%s10198_s30 + $0x44] sm:$0x1] }
  0x3e   : > { %v359_v49 = vrot.slane %v357_v36, 5  ;;  %v685_v50 = vpack.c.b16 %v665_v31, %v664_v26  ;;  %v365_v52 = vrot.slane %v363_v40, 5  ;;  %v553_v54 = vrot.slane %v552_v43, 4  ;;  %v251_v31 = vld [vmem:[%s10198_s30 + $0xa4] sm:$0x1] }
  0x3f   : > { %v567_v55 = vrot.slane %v565_v44, 5  ;;  %v677_v56 = vpack.c.b16 %v649_v47, %v648_v46  ;;  %v563_v58 = vrot.slane %v562_v48, 4  ;;  %v373_v61 = vshll.u32 %v10327_v51, 16 }
  0x40   : > { %v360_v59 = vor.u32 %v359_v49, %v356_v45  ;;  %v558_v3 = vsel %vm10223_vm4, %v553_v54, %v557_v34  ;;  %v570_v9 = vshrl.u32 %v231_v63, 16  ;;  %v378_v16 = vshrl.u32 %v215_v4, 16 }
  0x41   : > { %8795 = vmatmul.msk.bf16.gmra.mxu2 %vm694_vm1, %v684_v53  ;;  %v369_v53 = vrot.slane %v367_v41, 4  ;;  %v568_v6 = vsel %vm10223_vm4, %v563_v58, %v567_v55  ;;  %v375_v8 = vrot.slane %v373_v61, 5  ;;  %v381_v17 = vshll.u32 %v215_v4, 16  ;;  %v9944_v61 = vld [vmem:[%s10198_s30 + $0x3c] sm:$0xff]  ;;  %v10366_v4 = vld [vmem:[%s10198_s30 + $0x4c] sm:$0xf] }
  0x42   : > { %v361_v7 = vrot.slane %v360_v59, 4  ;;  %v387_v18 = vshll.u32 %v10339_v5, 16  ;;  %v391_v20 = vshrl.u32 %v10339_v5, 16  ;;  %v666_v21 = vunpack.c.l.b16 %v558_v3  ;;  %v217_v3 = vld [vmem:[%s10198_s30 + $0x48] sm:$0xf] }
  0x43   : > { %8876 = vmatmul.msk.bf16.gmra.mxu3 %vm694_vm1, %v9950_v2  ;;  %v370_v62 = vor.u32 %v369_v53, %v365_v52  ;;  %v232_v2 = vld [vmem:[%s10198_s30 + $0xa0] sm:$0xf]  ;;  %v667_v22 = vunpack.c.l.b16 %v568_v6  ;;  %v572_v24 = vrot.slane %v570_v9, 4  ;;  %v380_v32 = vrot.slane %v378_v16, 4  ;;  %v234_v53 = vld [vmem:[%s10198_s30 + $0xac] sm:$0xf] }
  0x44   : > { %8787 = vmatmul.msk.bf16.gmra.mxu0 %vm694_vm1, %v676_v1  ;;  %v9943_v1 = vld [vmem:[%s10198_s30 + $0x30] sm:$0xff]  ;;  %v579_v13 = vshll.u32 %v232_v2, 16  ;;  %v583_v15 = vshrl.u32 %v232_v2, 16  ;;  %v366_v23 = vsel %vm10223_vm4, %v361_v7, %v365_v52  ;;  %v383_v34 = vrot.slane %v381_v17, 5  ;;  %v233_v52 = vld [vmem:[%s10198_s30 + $0xa8] sm:$0xf] }
  0x45   : > { %v371_v11 = vrot.slane %v370_v62, 4  ;;  %v389_v35 = vrot.slane %v387_v18, 5  ;;  %v393_v36 = vrot.slane %v391_v20, 4  ;;  %v650_v39 = vunpack.c.l.b16 %v366_v23  ;;  %v252_v16 = vld [vmem:[%s10198_s30 + $0xb0] sm:$0x1] }
  0x46   : > { %8868 = vmatmul.msk.bf16.gmra.mxu1 %vm694_vm1, %v9942_v12  ;;  %v573_v12 = vshll.u32 %v231_v63, 16  ;;  %v581_v28 = vrot.slane %v579_v13, 5  ;;  %v585_v29 = vrot.slane %v583_v15, 4  ;;  %v686_v41 = vpack.c.b16 %v667_v22, %v666_v21 }
  0x47   : > { %v376_v26 = vsel %vm10223_vm4, %v371_v11, %v375_v8  ;;  %v589_v44 = vshll.u32 %v251_v31, 16  ;;  %v384_v46 = vor.u32 %v383_v34, %v380_v32  ;;  %v394_v47 = vor.u32 %v393_v36, %v389_v35  ;;  %v10381_v31 = vld [vmem:[%s10198_s30 + $0x50] sm:$0x1] }
  0x48   : > { %v575_v27 = vrot.slane %v573_v12, 5  ;;  %v651_v40 = vunpack.c.l.b16 %v376_v26  ;;  %v586_v45 = vor.u32 %v585_v29, %v581_v28  ;;  %v397_v48 = vshll.u32 %v10354_v37, 16 }
  0x49   : > { %v591_v55 = vrot.slane %v589_v44, 5  ;;  %v395_v58 = vrot.slane %v394_v47, 4  ;;  %v594_v62 = vshrl.u32 %v233_v52, 16  ;;  %v597_v63 = vshll.u32 %v233_v52, 16  ;;  %v236_v52 = vld [vmem:[%s10198_s30 + $0xb8] sm:$0xf] }
  0x4a   : > { %v576_v43 = vor.u32 %v575_v27, %v572_v24  ;;  %v678_v49 = vpack.c.b16 %v651_v40, %v650_v39  ;;  %v399_v59 = vrot.slane %v397_v48, 5  ;;  %v607_v2 = vshrl.u32 %v234_v53, 16 }
  0x4b   : > { %v596_v11 = vrot.slane %v594_v62, 4  ;;  %v599_v12 = vrot.slane %v597_v63, 5  ;;  %v402_v17 = vshrl.u32 %v217_v3, 16  ;;  %v405_v18 = vshll.u32 %v217_v3, 16 }
  0x4c   : > { %v577_v54 = vrot.slane %v576_v43, 4  ;;  %v400_v9 = vsel %vm10223_vm4, %v395_v58, %v399_v59  ;;  %v609_v15 = vrot.slane %v607_v2, 4  ;;  %v411_v20 = vshll.u32 %v10366_v4, 16 }
  0x4d   : > { %v415_v21 = vshrl.u32 %v10366_v4, 16  ;;  %v653_v26 = vunpack.c.l.b16 %v400_v9  ;;  %v600_v27 = vor.u32 %v599_v12, %v596_v11  ;;  %v613_v29 = vshll.u32 %v252_v16, 16 }
  0x4e   : > { %v582_v6 = vsel %vm10223_vm4, %v577_v54, %v581_v28  ;;  %v404_v32 = vrot.slane %v402_v17, 4  ;;  %v407_v34 = vrot.slane %v405_v18, 5  ;;  %v421_v44 = vshll.u32 %v10381_v31, 16  ;;  %v253_v18 = vld [vmem:[%s10198_s30 + $0xbc] sm:$0x1] }
  0x4f   : > { %v668_v22 = vunpack.c.l.b16 %v582_v6  ;;  %v417_v36 = vrot.slane %v415_v21, 4  ;;  %v601_v40 = vrot.slane %v600_v27, 4  ;;  %v615_v43 = vrot.slane %v613_v29, 5 }
  0x50   : > { %v408_v47 = vor.u32 %v407_v34, %v404_v32  ;;  %v627_v62 = vshll.u32 %v236_v52, 16  ;;  %v631_v63 = vshrl.u32 %v236_v52, 16  ;;  %v10408_v34 = vld [vmem:[%s10198_s30 + $0x5c] sm:$0x1] }
  0x51   : > { %8796 = vmatmul.msk.bf16.gmra.mxu2 %vm694_vm1, %v685_v50  ;;  %v9952_v50 = vld [vmem:[%s10198_s30 + $0x9c] sm:$0xff] }
  0x53   : > { %8877 = vmatmul.msk.bf16.gmra.mxu3 %vm694_vm1, %v9951_v57  ;;  %v385_v57 = vrot.slane %v384_v46, 4  ;;  %v9953_v46 = vld [vmem:[%s10198_s30 + $0xa8] sm:$0xff] }
  0x54   : > { %8788 = vmatmul.msk.bf16.gmra.mxu0 %vm694_vm1, %v677_v56  ;;  %v587_v56 = vrot.slane %v586_v45, 4 }
  0x55   : > { %v390_v8 = vsel %vm10223_vm4, %v385_v57, %v389_v35  ;;  %v413_v35 = vrot.slane %v411_v20, 5  ;;  %v409_v57 = vrot.slane %v408_v47, 4  ;;  %v9946_v47 = vld [vmem:[%s10198_s30 + $0x54] sm:$0xff] }
  0x56   : > { %8869 = vmatmul.msk.bf16.gmra.mxu1 %vm694_vm1, %v9943_v1  ;;  %v603_v1 = vshll.u32 %v234_v53, 16  ;;  %v592_v7 = vsel %vm10223_vm4, %v587_v56, %v591_v55  ;;  %v652_v24 = vunpack.c.l.b16 %v390_v8  ;;  %v423_v55 = vrot.slane %v421_v44, 5  ;;  %v219_v56 = vld [vmem:[%s10198_s30 + $0x54] sm:$0xf] }
  0x57   : > { %v669_v23 = vunpack.c.l.b16 %v592_v7  ;;  %v418_v48 = vor.u32 %v417_v36, %v413_v35  ;;  %v426_v2 = vshrl.u32 %v219_v56, 16  ;;  %v429_v3 = vshll.u32 %v219_v56, 16 }
  0x58   : > { %v605_v13 = vrot.slane %v603_v1, 5  ;;  %v679_v45 = vpack.c.b16 %v653_v26, %v652_v24  ;;  %v10398_v1 = vld [vmem:[%s10198_s30 + $0x58] sm:$0xf]  ;;  %v414_v8 = vsel %vm10223_vm4, %v409_v57, %v413_v35 }
  0x59   : > { %v687_v39 = vpack.c.b16 %v669_v23, %v668_v22  ;;  %v419_v58 = vrot.slane %v418_v48, 4  ;;  %v435_v16 = vshll.u32 %v10398_v1, 16  ;;  %v439_v17 = vshrl.u32 %v10398_v1, 16  ;;  %v2817_v48 = vld [vmem:[%s14442_s1 + $0xc] sm:$0x3] }
  0x5a   : > { %v610_v28 = vor.u32 %v609_v15, %v605_v13  ;;  %v606_v53 = vsel %vm10223_vm4, %v601_v40, %v605_v13  ;;  %v629_v13 = vrot.slane %v627_v62, 5  ;;  %v633_v15 = vrot.slane %v631_v63, 4  ;;  %v9027_v63 = vld [vmem:[%s10198_s30 + $0x14] sm:$0x1] }
  0x5b   : > { %v670_v6 = vunpack.c.l.b16 %v606_v53  ;;  %v424_v9 = vsel %vm10223_vm4, %v419_v58, %v423_v55  ;;  %v428_v20 = vrot.slane %v426_v2, 4  ;;  %v431_v21 = vrot.slane %v429_v3, 5  ;;  %v9089_v55 = vld [vmem:[%s10198_s30 + $0xc] sm:$0xe] }
  0x5c   : > { %v654_v23 = vunpack.c.l.b16 %v414_v8  ;;  %v655_v24 = vunpack.c.l.b16 %v424_v9  ;;  %v634_v27 = vor.u32 %v633_v15, %v629_v13  ;;  %v437_v29 = vrot.slane %v435_v16, 5 }
  0x5d   : > { %v441_v32 = vrot.slane %v439_v17, 4  ;;  %v432_v35 = vor.u32 %v431_v21, %v428_v20  ;;  %v9105_v3 = vrot.slane %v9089_v55, 9  ;;  %v3903_v21 = vld [vmem:[%s14442_s1 + $0x10] sm:$0x3]  ;;  %v9029_v55 = vld [vmem:[%s10198_s30 + $0x1c] sm:$0xf] }
  0x5e   : > { %v680_v36 = vpack.c.b16 %v655_v24, %v654_v23 }
  0x5f   : > { %v442_v44 = vor.u32 %v441_v32, %v437_v29 }
  0x61   : > { %8797 = vmatmul.msk.bf16.gmra.mxu2 %vm694_vm1, %v686_v41  ;;  %v611_v41 = vrot.slane %v610_v28, 4  ;;  %v637_v28 = vshll.u32 %v253_v18, 16  ;;  %v443_v57 = vrot.slane %v442_v44, 4 }
  0x63   : > { %8878 = vmatmul.msk.bf16.gmra.mxu3 %vm694_vm1, %v9952_v50  ;;  %v9945_v50 = vld [vmem:[%s10198_s30 + $0x48] sm:$0xff]  ;;  %v616_v54 = vsel %vm10223_vm4, %v611_v41, %v615_v43  ;;  %v635_v41 = vrot.slane %v634_v27, 4  ;;  %v639_v43 = vrot.slane %v637_v28, 5  ;;  %v1109_v28 = vrot.slane %v10211_v30, 5 }
  0x64   : > { %8789 = vmatmul.msk.bf16.gmra.mxu0 %vm694_vm1, %v678_v49  ;;  %v235_v49 = vld [vmem:[%s10198_s30 + $0xb4] sm:$0xf]  ;;  %v671_v7 = vunpack.c.l.b16 %v616_v54  ;;  %v3502_v54 = vld [vmem:[%s14442_s1 + $0xc] sm:$0xc]  ;;  %v1112_v30 = vrot.slane %v10214_v33, 5 }
  0x65   : > { %v618_v59 = vshrl.u32 %v235_v49, 16  ;;  %v640_v56 = vsel %vm10223_vm4, %v635_v41, %v639_v43  ;;  %v4690_v41 = vld [vmem:[%s14442_s1 + $0x14] sm:$0x3] }
  0x66   : > { %8870 = vmatmul.msk.bf16.gmra.mxu1 %vm694_vm1, %v9944_v61  ;;  %v621_v61 = vshll.u32 %v235_v49, 16  ;;  %v688_v22 = vpack.c.b16 %v671_v7, %v670_v6  ;;  %v9026_v49 = vld [vmem:[%s10198_s30 + $0x10] sm:$0xf]  ;;  %v2452_v7 = vrot.slane %v9027_v63, 5  ;;  %v673_v9 = vunpack.c.l.b16 %v640_v56 }
  0x67   : > { %v620_v11 = vrot.slane %v618_v59, 4  ;;  %v2449_v52 = vrot.slane %v9026_v49, 5  ;;  %v9025_v59 = vld [vmem:[%s10198_s30 + $0xc] sm:$0xf]  ;;  %v1788_v15 = vshll.u32 %v9026_v49, 16  ;;  %v1792_v16 = vshrl.u32 %v9026_v49, 16 }
  0x68   : > { %v623_v12 = vrot.slane %v621_v61, 5  ;;  %v3552_v61 = vunpack.c.l.b16 %v3502_v54  ;;  %v1111_v49 = vrot.slane %v1109_v28, 4 }
  0x69   : > { %v2451_v6 = vrot.slane %v2449_v52, 4  ;;  %v2450_v23 = vsel %vm10438_vm7, %v9105_v3, %v2449_v52  ;;  %v9028_v3 = vld [vmem:[%s10198_s30 + $0x18] sm:$0xf] }
  0x6a   : > { %v624_v26 = vor.u32 %v623_v12, %v620_v11  ;;  %v3553_v2 = vpack.c.b16 %v3552_v61, %v3552_v61  ;;  %v1779_v11 = vshrl.u32 %v9025_v59, 16  ;;  %v1782_v12 = vshll.u32 %v9025_v59, 16 }
  0x6b   : > { %v2453_v24 = vsel %vm10438_vm7, %v2451_v6, %v2452_v7  ;;  %v2560_v43 = vunpack.c.l.b16 %v2450_v23  ;;  %v1113_v59 = vsel %vm10438_vm7, %v1111_v49, %v1112_v30  ;;  %v9956_v30 = vld [vmem:[%s10198_s30 + $0x18] sm:$0xff] }
  0x6c   : > { %v625_v40 = vrot.slane %v624_v26, 4  ;;  %v3554_v17 = vrot.slane %v3553_v2, 2  ;;  %v4001_v26 = vsel %vm743_vm0, %v3903_v21, 0  ;;  %v1784_v32 = vrot.slane %v1782_v12, 5 }
  0x6d   : > { %4010 = vmatpush.bf16.msra.mxu0 %v4001_v26  ;;  %v2561_v44 = vunpack.c.l.b16 %v2453_v24  ;;  %v1221_v12 = vunpack.c.l.b16 %v1113_v59  ;;  %v1816_v21 = vshrl.u32 %v9029_v55, 16 }
  0x6e   : > { %v630_v53 = vsel %vm10223_vm4, %v625_v40, %v629_v13  ;;  %v1794_v40 = vrot.slane %v1792_v16, 4 }
  0x6f   : > { %v672_v8 = vunpack.c.l.b16 %v630_v53  ;;  %v1798_v53 = vshll.u32 %v9027_v63, 16  ;;  %v2592_v54 = vpack.c.b16 %v2561_v44, %v2560_v43  ;;  %v9030_v63 = vld [vmem:[%s10198_s30 + $0x20] sm:$0x1] }
  0x71   : > { %8798 = vmatmul.msk.bf16.gmra.mxu2 %vm694_vm1, %v687_v39  ;;  %v9954_v39 = vld [vmem:[%s10198_s30 + $0xb4] sm:$0xff]  ;;  %v1800_v2 = vrot.slane %v1798_v53, 5 }
  0x73   : > { %8879 = vmatmul.msk.bf16.gmra.mxu3 %vm694_vm1, %v9953_v46  ;;  %v433_v46 = vrot.slane %v432_v35, 4  ;;  %v689_v35 = vpack.c.b16 %v673_v9, %v672_v8  ;;  %v2459_v9 = vrot.slane %v9030_v63, 5 }
  0x74   : > { %8790 = vmatmul.msk.bf16.gmra.mxu0 %vm694_vm1, %v679_v45  ;;  %v445_v45 = vshll.u32 %v10408_v34, 16 }
  0x75   : > { %v438_v62 = vsel %vm10223_vm4, %v433_v46, %v437_v29  ;;  %v1781_v29 = vrot.slane %v1779_v11, 4 }
  0x76   : > { %8871 = vmatmul.msk.bf16.gmra.mxu1 %vm694_vm1, %v9945_v50  ;;  %v2947_v50 = vsel %vm743_vm0, %v2817_v48, 0  ;;  %v447_v58 = vrot.slane %v445_v45, 5  ;;  %v656_v18 = vunpack.c.l.b16 %v438_v62  ;;  %v4820_v45 = vsel %vm743_vm0, %v4690_v41, 0 }
  0x77   : > { %2956 = vmatpush.bf16.msra.mxu2 %v2947_v50  ;;  %4829 = vmatpush.bf16.msra.mxu1 %v4820_v45  ;;  %v1785_v50 = vor.u32 %v1784_v32, %v1781_v29 }
  0x78   : > { %v448_v13 = vsel %vm10223_vm4, %v443_v57, %v447_v58  ;;  %v2456_v57 = vrot.slane %v9029_v55, 5  ;;  %v9090_v58 = vld [vmem:[%s10198_s30 + $0x18] sm:$0xe] }
  0x79   : > { %v657_v27 = vunpack.c.l.b16 %v448_v13  ;;  %v1786_v61 = vrot.slane %v1785_v50, 4  ;;  %v9106_v7 = vrot.slane %v9090_v58, 9  ;;  %v1803_v13 = vshrl.u32 %v9028_v3, 16 }
  0x7a   : > { %v2458_v8 = vrot.slane %v2456_v57, 4  ;;  %v1822_v50 = vshll.u32 %v9030_v63, 16 }
  0x7b   : > { %v681_v46 = vpack.c.b16 %v657_v27, %v656_v18  ;;  %v1812_v18 = vshll.u32 %v9029_v55, 16  ;;  %v2457_v23 = vsel %vm10438_vm7, %v9106_v7, %v2456_v57  ;;  %v9032_v55 = vld [vmem:[%s10198_s30 + $0x28] sm:$0xf]  ;;  %v9033_v7 = vld [vmem:[%s10198_s30 + $0x2c] sm:$0x1] }
  0x7c   : > { %v2460_v24 = vsel %vm10438_vm7, %v2458_v8, %v2459_v9  ;;  %v2562_v41 = vunpack.c.l.b16 %v2457_v23  ;;  %v1836_v23 = vshll.u32 %v9032_v55, 16 }
  0x7d   : > { %v2563_v43 = vunpack.c.l.b16 %v2460_v24  ;;  %v1840_v24 = vshrl.u32 %v9032_v55, 16 }
  0x81   : > { %8799 = vmatmul.msk.bf16.gmra.mxu2 %vm694_vm1, %v688_v22  ;;  %v3604_v22 = vsel %vm743_vm0, %v3554_v17, 0 }
  0x82   : > { %3613 = vmatpush.bf16.msra.mxu3 %v3604_v22 }
  0x83   : > { %8880 = vmatmul.msk.bf16.gmra.mxu3 %vm694_vm1, %v9954_v39  ;;  %v1790_v39 = vrot.slane %v1788_v15, 5  ;;  %v1806_v15 = vshll.u32 %v9028_v3, 16  ;;  %v1824_v3 = vrot.slane %v1822_v50, 5 }
  0x84   : > { %8791 = vmatmul.msk.bf16.gmra.mxu0 %vm694_vm1, %v680_v36  ;;  %v1056_v36 = vld [vmem:[%s10198_s30] sm:$0xe] }
  0x85   : > { %v8881_v48 = vrot.slane %v1056_v36, 9  ;;  %v1795_v52 = vor.u32 %v1794_v40, %v1790_v39  ;;  %v1791_v16 = vsel %vm10223_vm4, %v1786_v61, %v1790_v39  ;;  %v1808_v29 = vrot.slane %v1806_v15, 5  ;;  %v1057_v39 = vld [vmem:[%s10198_s30 + $0xc] sm:$0xe]  ;;  %v9091_v61 = vld [vmem:[%s10198_s30 + $0x24] sm:$0xe] }
  0x86   : > { %8872 = vmatmul.msk.bf16.gmra.mxu1 %vm694_vm1, %v9946_v47  ;;  %v9955_v47 = vld [vmem:[%s10198_s30 + $0xc] sm:$0xff]  ;;  %v2163_v26 = vunpack.c.l.b16 %v1791_v16  ;;  %v1818_v36 = vrot.slane %v1816_v21, 4  ;;  %v1116_v40 = vrot.slane %v10241_v14, 5  ;;  %v1119_v14 = vrot.slane %v10245_v19, 5  ;;  %v9031_v19 = vld [vmem:[%s10198_s30 + $0x24] sm:$0xf] }
  0x87   : > { %v1110_v33 = vsel %vm10438_vm7, %v8881_v48, %v1109_v28  ;;  %v1796_v62 = vrot.slane %v1795_v52, 4  ;;  %v1805_v28 = vrot.slane %v1803_v13, 4  ;;  %v8882_v48 = vrot.slane %v1057_v39, 9  ;;  %v1058_v39 = vld [vmem:[%s10198_s30 + $0x18] sm:$0xe] }
  0x88   : > { %v1220_v11 = vunpack.c.l.b16 %v1110_v33  ;;  %v1118_v53 = vrot.slane %v1116_v40, 4  ;;  %v2463_v33 = vrot.slane %v9032_v55, 5  ;;  %v9107_v9 = vrot.slane %v9091_v61, 9 }
  0x89   : > { %v1801_v17 = vsel %vm10223_vm4, %v1796_v62, %v1800_v2  ;;  %v1827_v15 = vshrl.u32 %v9031_v19, 16  ;;  %v1830_v16 = vshll.u32 %v9031_v19, 16  ;;  %v8883_v50 = vrot.slane %v1058_v39, 9 }
  0x8a   : > { %v2164_v27 = vunpack.c.l.b16 %v1801_v17  ;;  %v1252_v32 = vpack.c.b16 %v1221_v12, %v1220_v11  ;;  %v1120_v63 = vsel %vm10438_vm7, %v1118_v53, %v1119_v14  ;;  %v2465_v11 = vrot.slane %v2463_v33, 4  ;;  %v9957_v14 = vld [vmem:[%s10198_s30 + $0x24] sm:$0xff] }
  0x8b   : > { %v2466_v12 = vrot.slane %v9033_v7, 5  ;;  %v1126_v55 = vrot.slane %v10273_v10, 5 }
  0x8c   : > { %v2195_v45 = vpack.c.b16 %v2164_v27, %v2163_v26 }
  0x91   : > { %8800 = vmatmul.msk.bf16.gmra.mxu2 %vm694_vm1, %v689_v35  ;;  %v1814_v35 = vrot.slane %v1812_v18, 5  ;;  %v1223_v18 = vunpack.c.l.b16 %v1120_v63 }
  0x93   : > { %v976_v56 = vpop.f32.mrf.mxu1  ;;  %9009 = vmatmul.msk.bf16.vlgmr.msrb.gmra.mxu3 %vm694_vm1, %v9955_v47  ;;  %v1819_v49 = vor.u32 %v1818_v36, %v1814_v35 }
  0x94   : > { %8792 = vmatmul.msk.bf16.gmra.mxu0 %vm694_vm1, %v681_v46  ;;  %v1809_v46 = vor.u32 %v1808_v29, %v1805_v28  ;;  %v2464_v29 = vsel %vm10438_vm7, %v9107_v9, %v2463_v33  ;;  %v9092_v9 = vld [vmem:[%s10198_s30 + $0x30] sm:$0xe] }
  0x95   : > { %v1820_v2 = vrot.slane %v1819_v49, 4 }
  0x96   : > { %9121 = vmatmul.msk.bf16.vlgmr.msrb.gmra.mxu1 %vm694_vm1, %v2592_v54  ;;  %v1016_v6 = vpop.f32.mrf.mxu3  ;;  %v2593_v54 = vpack.c.b16 %v2563_v43, %v2562_v41  ;;  %v1810_v59 = vrot.slane %v1809_v46, 4  ;;  %v1829_v41 = vrot.slane %v1827_v15, 4  ;;  %v1832_v43 = vrot.slane %v1830_v16, 5  ;;  %v9036_v15 = vld [vmem:[%s10198_s30 + $0x38] sm:$0x1] }
  0x97   : > { %v1825_v21 = vsel %vm10223_vm4, %v1820_v2, %v1824_v3  ;;  %v1842_v46 = vrot.slane %v1840_v24, 4 }
  0x98   : > { %v2166_v36 = vunpack.c.l.b16 %v1825_v21  ;;  %v1833_v33 = vor.u32 %v1832_v43, %v1829_v41 }
  0x9b   : > { %v978_v22 = vpop.f32.mrf.mxu1 }
  0x9e   : > { %v1018_v44 = vpop.f32.mrf.mxu3 }
  0xa1   : > { %v756_v47 = vpop.f32.mrf.mxu0  ;;  %8897 = vmatmul.msk.bf16.vlgmr.msrb.gmra.mxu2 %vm694_vm1, %v1252_v32  ;;  %v2467_v32 = vsel %vm10438_vm7, %v2465_v11, %v2466_v12 }
  0xa2   : > { %v10483_v52 = vadd.f32 %v976_v56, %v756_v47  ;;  %v1117_v56 = vsel %vm10438_vm7, %v8882_v48, %v1116_v40  ;;  %v1123_v40 = vrot.slane %v10266_v60, 5  ;;  %v2564_v47 = vunpack.c.l.b16 %v2464_v29 }
  0xa3   : > { %v981_v57 = vpop.f32.mrf.mxu1  ;;  %9010 = vmatmul.msk.bf16.gmra.mxu3 %vm694_vm1, %v9956_v30  ;;  %v1222_v13 = vunpack.c.l.b16 %v1117_v56  ;;  %v1838_v30 = vrot.slane %v1836_v23, 5  ;;  %v2565_v48 = vunpack.c.l.b16 %v2467_v32  ;;  %v9035_v56 = vld [vmem:[%s10198_s30 + $0x34] sm:$0xf]  ;;  %v2473_v23 = vrot.slane %v9036_v15, 5 }
  0xa4   : > { %9073 = vmatmul.msk.bf16.vlgmr.msrb.gmra.mxu0 %vm694_vm1, %v2195_v45  ;;  %v796_v58 = vpop.f32.mrf.mxu2  ;;  %v1124_v3 = vsel %vm10438_vm7, %v8883_v50, %v1123_v40  ;;  %v2470_v19 = vrot.slane %v9035_v56, 5  ;;  %v1130_v50 = vrot.slane %v10290_v38, 5 }
  0xa5   : > { %v10490_v62 = vadd.f32 %v1016_v6, %v796_v58  ;;  %v1815_v6 = vsel %vm10223_vm4, %v1810_v59, %v1814_v35  ;;  %v1846_v58 = vshll.u32 %v9033_v7, 16  ;;  %v2594_v61 = vpack.c.b16 %v2565_v48, %v2564_v47  ;;  %v1059_v48 = vld [vmem:[%s10198_s30 + $0x24] sm:$0xe] }
  0xa6   : > { %9122 = vmatmul.msk.bf16.gmra.mxu1 %vm694_vm1, %v2593_v54  ;;  %v1021_v8 = vpop.f32.mrf.mxu3  ;;  %v2165_v27 = vunpack.c.l.b16 %v1815_v6  ;;  %v1125_v54 = vrot.slane %v1123_v40, 4  ;;  %v1834_v7 = vrot.slane %v1833_v33, 4  ;;  %v1224_v6 = vunpack.c.l.b16 %v1124_v3 }
  0xa7   : > { %v1848_v12 = vrot.slane %v1846_v58, 5  ;;  %v2472_v21 = vrot.slane %v2470_v19, 4  ;;  %v8884_v58 = vrot.slane %v1059_v48, 9  ;;  %v1132_v3 = vrot.slane %v1130_v50, 4 }
  0xa8   : > { %v2196_v53 = vpack.c.b16 %v2166_v36, %v2165_v27  ;;  %v1127_v63 = vsel %vm10438_vm7, %v1125_v54, %v1126_v55  ;;  %v1839_v24 = vsel %vm10223_vm4, %v1834_v7, %v1838_v30  ;;  %v1864_v36 = vshrl.u32 %v9035_v56, 16 }
  0xa9   : > { %v758_v17 = vpop.f32.mrf.mxu0 }
  0xaa   : > { %v10503_v26 = vadd.f32 %v978_v22, %v758_v17  ;;  %v1253_v22 = vpack.c.b16 %v1223_v18, %v1222_v13  ;;  %v9034_v13 = vld [vmem:[%s10198_s30 + $0x30] sm:$0xf]  ;;  %v1225_v17 = vunpack.c.l.b16 %v1127_v63  ;;  %v9108_v18 = vrot.slane %v9092_v9, 9 }
  0xab   : > { %v983_v28 = vpop.f32.mrf.mxu1  ;;  %v1851_v27 = vshrl.u32 %v9034_v13, 16  ;;  %v1854_v32 = vshll.u32 %v9034_v13, 16  ;;  %v1866_v55 = vrot.slane %v1864_v36, 4  ;;  %v1870_v63 = vshll.u32 %v9036_v15, 16  ;;  %v9093_v15 = vld [vmem:[%s10198_s30 + $0x3c] sm:$0xe] }
  0xac   : > { %v798_v35 = vpop.f32.mrf.mxu2  ;;  %v1254_v40 = vpack.c.b16 %v1225_v17, %v1224_v6  ;;  %v2471_v43 = vsel %vm10438_vm7, %v9108_v18, %v2470_v19  ;;  %v1133_v19 = vrot.slane %v10300_v0, 5  ;;  %v1131_v13 = vsel %vm10438_vm7, %v8884_v58, %v1130_v50 }
  0xad   : > { %v10511_v45 = vadd.f32 %v1018_v44, %v798_v35  ;;  %v1843_v44 = vor.u32 %v1842_v46, %v1838_v30  ;;  %v1860_v35 = vshll.u32 %v9035_v56, 16  ;;  %v2167_v46 = vunpack.c.l.b16 %v1839_v24  ;;  %v9958_v56 = vld [vmem:[%s10198_s30 + $0x30] sm:$0xff]  ;;  %v9037_v24 = vld [vmem:[%s10198_s30 + $0x3c] sm:$0xf] }
  0xae   : > { %v1023_v49 = vpop.f32.mrf.mxu3  ;;  %v2566_v33 = vunpack.c.l.b16 %v2471_v43  ;;  %v1134_v17 = vsel %vm10438_vm7, %v1132_v3, %v1133_v19  ;;  %v1875_v43 = vshrl.u32 %v9037_v24, 16  ;;  %v1060_v19 = vld [vmem:[%s10198_s30 + $0x30] sm:$0xe] }
  0xaf   : > { %v1844_v11 = vrot.slane %v1843_v44, 4  ;;  %v1862_v54 = vrot.slane %v1860_v35, 5  ;;  %v9109_v35 = vrot.slane %v9093_v15, 9 }
  0xb1   : > { %v761_v60 = vpop.f32.mrf.mxu0  ;;  %8898 = vmatmul.msk.bf16.gmra.mxu2 %vm694_vm1, %v1253_v22  ;;  %v2474_v22 = vsel %vm10438_vm7, %v2472_v21, %v2473_v23  ;;  %v1872_v23 = vrot.slane %v1870_v63, 5 }
  0xb2   : > { %v10516_v59 = vadd.f32 %v981_v57, %v761_v60  ;;  %v2567_v60 = vunpack.c.l.b16 %v2474_v22  ;;  %v1878_v22 = vshll.u32 %v9037_v24, 16  ;;  %v9041_v24 = vld [vmem:[%s10198_s30 + $0x4c] sm:$0xf] }
  0xb3   : > { %v986_v2 = vpop.f32.mrf.mxu1  ;;  %9011 = vmatmul.msk.bf16.gmra.mxu3 %vm694_vm1, %v9957_v14 }
  0xb4   : > { %9074 = vmatmul.msk.bf16.gmra.mxu0 %vm694_vm1, %v2196_v53  ;;  %v801_v10 = vpop.f32.mrf.mxu2  ;;  %v1853_v53 = vrot.slane %v1851_v27, 4  ;;  %v2595_v9 = vpack.c.b16 %v2567_v60, %v2566_v33  ;;  %v1226_v27 = vunpack.c.l.b16 %v1131_v13  ;;  %v9959_v13 = vld [vmem:[%s10198_s30 + $0x3c] sm:$0xff] }
  0xb5   : > { %v10526_v57 = vadd.f32 %v1021_v8, %v801_v10  ;;  %v1849_v8 = vsel %vm10223_vm4, %v1844_v11, %v1848_v12  ;;  %v9038_v11 = vld [vmem:[%s10198_s30 + $0x40] sm:$0xf] }
  0xb6   : > { %9123 = vmatmul.msk.bf16.gmra.mxu1 %vm694_vm1, %v2594_v61  ;;  %v1026_v16 = vpop.f32.mrf.mxu3  ;;  %v2168_v47 = vunpack.c.l.b16 %v1849_v8  ;;  %v2477_v6 = vrot.slane %v9038_v11, 5  ;;  %v1888_v48 = vshrl.u32 %v9038_v11, 16 }
  0xb8   : > { %v2197_v61 = vpack.c.b16 %v2168_v47, %v2167_v46  ;;  %v2479_v36 = vrot.slane %v2477_v6, 4  ;;  %v1884_v47 = vshll.u32 %v9038_v11, 16 }
  0xb9   : > { %v763_v29 = vpop.f32.mrf.mxu0 }
  0xba   : > { %v10535_v39 = vadd.f32 %v983_v28, %v763_v29  ;;  %v1856_v28 = vrot.slane %v1854_v32, 5  ;;  %v9039_v29 = vld [vmem:[%s10198_s30 + $0x44] sm:$0x1]  ;;  %v1227_v32 = vunpack.c.l.b16 %v1134_v17  ;;  %v1140_v17 = vrot.slane %v10327_v51, 5 }
  0xbb   : > { %v988_v41 = vpop.f32.mrf.mxu1 }
  0xbc   : > { %v803_v30 = vpop.f32.mrf.mxu2  ;;  %v1857_v38 = vor.u32 %v1856_v28, %v1853_v53  ;;  %v1255_v53 = vpack.c.b16 %v1227_v32, %v1226_v27  ;;  %v2484_v32 = vrot.slane %v9041_v24, 5 }
  0xbd   : > { %v10543_v14 = vadd.f32 %v1023_v49, %v803_v30  ;;  %v1867_v49 = vor.u32 %v1866_v55, %v1862_v54  ;;  %v2478_v55 = vsel %vm10438_vm7, %v9109_v35, %v2477_v6  ;;  %v8885_v6 = vrot.slane %v1060_v19, 9 }
  0xbe   : > { %v1028_v44 = vpop.f32.mrf.mxu3  ;;  %v1912_v19 = vshrl.u32 %v9041_v24, 16 }
  0xbf   : > { %v1868_v21 = vrot.slane %v1867_v49, 4  ;;  %v2568_v49 = vunpack.c.l.b16 %v2478_v55 }
  0xc1   : > { %v766_v10 = vpop.f32.mrf.mxu0  ;;  %8899 = vmatmul.msk.bf16.gmra.mxu2 %vm694_vm1, %v1254_v40  ;;  %v2480_v40 = vrot.slane %v9039_v29, 5  ;;  %v1873_v46 = vsel %vm10223_vm4, %v1868_v21, %v1872_v23  ;;  %v1894_v21 = vshll.u32 %v9039_v29, 16 }
  0xc2   : > { %v10548_v7 = vadd.f32 %v986_v2, %v766_v10  ;;  %v1858_v2 = vrot.slane %v1857_v38, 4  ;;  %v1886_v10 = vrot.slane %v1884_v47, 5  ;;  %v1890_v38 = vrot.slane %v1888_v48, 4 }
  0xc3   : > { %v991_v12 = vpop.f32.mrf.mxu1  ;;  %9012 = vmatmul.msk.bf16.gmra.mxu3 %vm694_vm1, %v9958_v56  ;;  %v2481_v33 = vsel %vm10438_vm7, %v2479_v36, %v2480_v40  ;;  %v1880_v56 = vrot.slane %v1878_v22, 5  ;;  %v9094_v40 = vld [vmem:[%s10198_s30 + $0x48] sm:$0xe]  ;;  %v1896_v22 = vrot.slane %v1894_v21, 5  ;;  %v2486_v48 = vrot.slane %v2484_v32, 4 }
  0xc4   : > { %9075 = vmatmul.msk.bf16.gmra.mxu0 %vm694_vm1, %v2197_v61  ;;  %v806_v0 = vpop.f32.mrf.mxu2  ;;  %v2170_v61 = vunpack.c.l.b16 %v1873_v46  ;;  %v2569_v63 = vunpack.c.l.b16 %v2481_v33  ;;  %v9110_v47 = vrot.slane %v9094_v40, 9 }
  0xc5   : > { %v10558_v18 = vadd.f32 %v1026_v16, %v806_v0  ;;  %v1863_v16 = vsel %vm10223_vm4, %v1858_v2, %v1862_v54  ;;  %v1877_v54 = vrot.slane %v1875_v43, 4  ;;  %v1891_v2 = vor.u32 %v1890_v38, %v1886_v10 }
  0xc6   : > { %9124 = vmatmul.msk.bf16.gmra.mxu1 %vm694_vm1, %v2595_v9  ;;  %v1031_v8 = vpop.f32.mrf.mxu3  ;;  %v2169_v58 = vunpack.c.l.b16 %v1863_v16  ;;  %v2596_v23 = vpack.c.b16 %v2569_v63, %v2568_v49  ;;  %v9042_v16 = vld [vmem:[%s10198_s30 + $0x50] sm:$0x1]  ;;  %v2485_v49 = vsel %vm10438_vm7, %v9110_v47, %v2484_v32  ;;  %v1061_v32 = vld [vmem:[%s10198_s30 + $0x3c] sm:$0xe] }
  0xc7   : > { %14451 = vst [vmem:[#allocation2_spill] sm:$0xff] %v10558_v18  ;;  %v1881_v0 = vor.u32 %v1880_v56, %v1877_v54  ;;  %v1892_v29 = vrot.slane %v1891_v2, 4  ;;  %v1908_v56 = vshll.u32 %v9041_v24, 16  ;;  %v1144_v2 = vrot.slane %v10339_v5, 5 }
  0xc8   : > { %v2198_v11 = vpack.c.b16 %v2170_v61, %v2169_v58  ;;  %v2570_v21 = vunpack.c.l.b16 %v2485_v49  ;;  %v8886_v5 = vrot.slane %v1061_v32, 9 }
  0xc9   : > { %v768_v30 = vpop.f32.mrf.mxu0  ;;  %v1882_v36 = vrot.slane %v1881_v0, 4  ;;  %v1897_v61 = vsel %vm10223_vm4, %v1892_v29, %v1896_v22  ;;  %v1918_v29 = vshll.u32 %v9042_v16, 16 }
  0xca   : > { %v10567_v50 = vadd.f32 %v988_v41, %v768_v30  ;;  %v1137_v41 = vrot.slane %v10317_v25, 5  ;;  %v9040_v30 = vld [vmem:[%s10198_s30 + $0x48] sm:$0xf] }
  0xcb   : > { %v993_v28 = vpop.f32.mrf.mxu1  ;;  %v1902_v54 = vshll.u32 %v9040_v30, 16 }
  0xcc   : > { %v808_v60 = vpop.f32.mrf.mxu2  ;;  %v1138_v51 = vsel %vm10438_vm7, %v8885_v6, %v1137_v41  ;;  %v2172_v6 = vunpack.c.l.b16 %v1897_v61  ;;  %v1145_v61 = vsel %vm10438_vm7, %v8886_v5, %v1144_v2 }
  0xcd   : > { %v10573_v3 = vadd.f32 %v1028_v44, %v808_v60  ;;  %v1139_v44 = vrot.slane %v1137_v41, 4  ;;  %v1228_v55 = vunpack.c.l.b16 %v1138_v51  ;;  %v1887_v60 = vsel %vm10223_vm4, %v1882_v36, %v1886_v10  ;;  %v9960_v51 = vld [vmem:[%s10198_s30 + $0x48] sm:$0xff] }
  0xce   : > { %v1033_v9 = vpop.f32.mrf.mxu3  ;;  %v1147_v36 = vrot.slane %v10354_v37, 5 }
  0xcf   : > { %14452 = vst [vmem:[#allocation3_spill] sm:$0xff] %v10573_v3 }
  0xd1   : > { %v771_v15 = vpop.f32.mrf.mxu0  ;;  %8900 = vmatmul.msk.bf16.gmra.mxu2 %vm694_vm1, %v1255_v53  ;;  %v2487_v53 = vrot.slane %v9042_v16, 5 }
  0xd2   : > { %v10580_v25 = vadd.f32 %v991_v12, %v771_v15  ;;  %v1141_v12 = vsel %vm10438_vm7, %v1139_v44, %v1140_v17  ;;  %v1904_v15 = vrot.slane %v1902_v54, 5  ;;  %v1910_v44 = vrot.slane %v1908_v56, 5  ;;  %v9045_v56 = vld [vmem:[%s10198_s30 + $0x5c] sm:$0x1] }
  0xd3   : > { %v996_v27 = vpop.f32.mrf.mxu1  ;;  %9013 = vmatmul.msk.bf16.gmra.mxu3 %vm694_vm1, %v9959_v13  ;;  %v1229_v33 = vunpack.c.l.b16 %v1141_v12  ;;  %v2488_v63 = vsel %vm10438_vm7, %v2486_v48, %v2487_v53  ;;  %v2171_v13 = vunpack.c.l.b16 %v1887_v60  ;;  %v9044_v48 = vld [vmem:[%s10198_s30 + $0x58] sm:$0xf]  ;;  %v9095_v60 = vld [vmem:[%s10198_s30 + $0x54] sm:$0xe] }
  0xd4   : > { %9076 = vmatmul.msk.bf16.gmra.mxu0 %vm694_vm1, %v2198_v11  ;;  %v811_v35 = vpop.f32.mrf.mxu2 }
  0xd5   : > { %v10588_v43 = vadd.f32 %v1031_v8, %v811_v35  ;;  %v1899_v8 = vshrl.u32 %v9040_v30, 16  ;;  %v1256_v11 = vpack.c.b16 %v1229_v33, %v1228_v55  ;;  %v2199_v35 = vpack.c.b16 %v2172_v6, %v2171_v13  ;;  %v9043_v55 = vld [vmem:[%s10198_s30 + $0x54] sm:$0xf] }
  0xd6   : > { %9125 = vmatmul.msk.bf16.gmra.mxu1 %vm694_vm1, %v2596_v23  ;;  %v1036_v46 = vpop.f32.mrf.mxu3  ;;  %v2571_v23 = vunpack.c.l.b16 %v2488_v63  ;;  %v1146_v30 = vrot.slane %v1144_v2, 4  ;;  %v2491_v33 = vrot.slane %v9044_v48, 5  ;;  %v1926_v63 = vshll.u32 %v9043_v55, 16 }
  0xd7   : > { %14453 = vst [vmem:[#allocation4_spill] sm:$0xff] %v10588_v43  ;;  %v1901_v0 = vrot.slane %v1899_v8, 4  ;;  %v2494_v13 = vrot.slane %v9045_v56, 5  ;;  %v1936_v6 = vshrl.u32 %v9044_v48, 16 }
  0xd8   : > { %v2597_v47 = vpack.c.b16 %v2571_v23, %v2570_v21  ;;  %v1148_v54 = vsel %vm10438_vm7, %v1146_v30, %v1147_v36 }
  0xd9   : > { %v773_v58 = vpop.f32.mrf.mxu0  ;;  %v1938_v5 = vrot.slane %v1936_v6, 4 }
  0xda   : > { %v10599_v41 = vadd.f32 %v993_v28, %v773_v58  ;;  %v1914_v28 = vrot.slane %v1912_v19, 4  ;;  %v1923_v19 = vshrl.u32 %v9043_v55, 16 }
  0xdb   : > { %v998_v38 = vpop.f32.mrf.mxu1 }
  0xdc   : > { %v813_v10 = vpop.f32.mrf.mxu2  ;;  %v1915_v12 = vor.u32 %v1914_v28, %v1910_v44  ;;  %v1231_v28 = vunpack.c.l.b16 %v1148_v54  ;;  %v1154_v54 = vrot.slane %v10381_v31, 5 }
  0xdd   : > { %v10605_v17 = vadd.f32 %v1033_v9, %v813_v10  ;;  %v1905_v9 = vor.u32 %v1904_v15, %v1901_v0  ;;  %v9111_v10 = vrot.slane %v9095_v60, 9  ;;  %v1230_v15 = vunpack.c.l.b16 %v1145_v61 }
  0xde   : > { %v1038_v24 = vpop.f32.mrf.mxu3  ;;  %v1916_v16 = vrot.slane %v1915_v12, 4  ;;  %v1942_v61 = vshll.u32 %v9045_v56, 16 }
  0xdf   : > { %14454 = vst [vmem:[#allocation5_spill] sm:$0xff] %v10605_v17  ;;  %v1906_v58 = vrot.slane %v1905_v9, 4  ;;  %v2492_v36 = vsel %vm10438_vm7, %v9111_v10, %v2491_v33  ;;  %v1257_v30 = vpack.c.b16 %v1231_v28, %v1230_v15 }
  0xe0   : > { %v1944_v15 = vrot.slane %v1942_v61, 5 }
  0xe1   : > { %v776_v40 = vpop.f32.mrf.mxu0  ;;  %8901 = vmatmul.msk.bf16.gmra.mxu2 %vm694_vm1, %v1256_v11  ;;  %v2493_v11 = vrot.slane %v2491_v33, 4  ;;  %v1911_v2 = vsel %vm10223_vm4, %v1906_v58, %v1910_v44  ;;  %v1062_v33 = vld [vmem:[%s10198_s30 + $0x48] sm:$0xe] }
  0xe2   : > { %v10612_v22 = vadd.f32 %v996_v27, %v776_v40  ;;  %v1920_v27 = vrot.slane %v1918_v29, 5  ;;  %v2173_v12 = vunpack.c.l.b16 %v1911_v2  ;;  %v9096_v2 = vld [vmem:[%s10198_s30 + $0x60] sm:$0xe] }
  0xe3   : > { %v1001_v53 = vpop.f32.mrf.mxu1  ;;  %9014 = vmatmul.msk.bf16.gmra.mxu3 %vm694_vm1, %v9960_v51  ;;  %v1928_v51 = vrot.slane %v1926_v63, 5  ;;  %v2495_v40 = vsel %vm10438_vm7, %v2493_v11, %v2494_v13  ;;  %v9047_v13 = vld [vmem:[%s10198_s30 + $0x64] sm:$0xf] }
  0xe4   : > { %9077 = vmatmul.msk.bf16.gmra.mxu0 %vm694_vm1, %v2199_v35  ;;  %v816_v37 = vpop.f32.mrf.mxu2  ;;  %v1921_v21 = vsel %vm10223_vm4, %v1916_v16, %v1920_v27  ;;  %v1925_v35 = vrot.slane %v1923_v19, 4  ;;  %v2573_v55 = vunpack.c.l.b16 %v2495_v40  ;;  %v9961_v16 = vld [vmem:[%s10198_s30 + $0x54] sm:$0xff] }
  0xe5   : > { %v10619_v8 = vadd.f32 %v1036_v46, %v816_v37  ;;  %v1932_v46 = vshll.u32 %v9044_v48, 16  ;;  %v2174_v44 = vunpack.c.l.b16 %v1921_v21  ;;  %v2572_v48 = vunpack.c.l.b16 %v2492_v36 }
  0xe6   : > { %9126 = vmatmul.msk.bf16.gmra.mxu1 %vm694_vm1, %v2597_v47  ;;  %v1041_v49 = vpop.f32.mrf.mxu3  ;;  %v1151_v47 = vrot.slane %v10366_v4, 5  ;;  %v1929_v60 = vor.u32 %v1928_v51, %v1925_v35  ;;  %v8887_v4 = vrot.slane %v1062_v33, 9  ;;  %v1956_v35 = vshll.u32 %v9047_v13, 16 }
  0xe7   : > { %14455 = vst [vmem:[#allocation6_spill] sm:$0xff] %v10619_v8  ;;  %v1934_v29 = vrot.slane %v1932_v46, 5  ;;  %v2200_v58 = vpack.c.b16 %v2174_v44, %v2173_v12  ;;  %v2598_v11 = vpack.c.b16 %v2573_v55, %v2572_v48  ;;  %v1960_v51 = vshrl.u32 %v9047_v13, 16  ;;  %v1063_v55 = vld [vmem:[%s10198_s30 + $0x54] sm:$0xe] }
  0xe8   : > { %v1153_v10 = vrot.slane %v1151_v47, 4  ;;  %v1930_v6 = vrot.slane %v1929_v60, 4  ;;  %v1152_v36 = vsel %vm10438_vm7, %v8887_v4, %v1151_v47  ;;  %v1158_v47 = vrot.slane %v10398_v1, 5 }
  0xe9   : > { %v778_v0 = vpop.f32.mrf.mxu0  ;;  %v1939_v27 = vor.u32 %v1938_v5, %v1934_v29  ;;  %v9112_v5 = vrot.slane %v9096_v2, 9  ;;  %v10671_v61 = vrot.slane %v1956_v35, 5  ;;  %v9049_v2 = vld [vmem:[%s10198_s30 + $0x6c] sm:$0xf] }
  0xea   : > { %v10631_v23 = vadd.f32 %v998_v38, %v778_v0  ;;  %v2498_v0 = vrot.slane %v9047_v13, 5  ;;  %v1155_v40 = vsel %vm10438_vm7, %v1153_v10, %v1154_v54  ;;  %v1935_v44 = vsel %vm10223_vm4, %v1930_v6, %v1934_v29 }
  0xeb   : > { %v10633_v32 = vpop.f32.mrf.mxu1  ;;  %v1940_v31 = vrot.slane %v1939_v27, 4  ;;  %v1233_v27 = vunpack.c.l.b16 %v1155_v40  ;;  %v1962_v54 = vrot.slane %v1960_v51, 4  ;;  %v8888_v10 = vrot.slane %v1063_v55, 9 }
  0xec   : > { %v818_v9 = vpop.f32.mrf.mxu2  ;;  %v2499_v1 = vsel %vm10438_vm7, %v9112_v5, %v2498_v0  ;;  %v1161_v13 = vrot.slane %v10408_v34, 5 }
  0xed   : > { %v10639_v38 = vadd.f32 %v1038_v24, %v818_v9  ;;  %v9046_v24 = vld [vmem:[%s10198_s30 + $0x60] sm:$0xf]  ;;  %v9048_v9 = vld [vmem:[%s10198_s30 + $0x68] sm:$0x1]  ;;  %v1945_v48 = vsel %vm10223_vm4, %v1940_v31, %v1944_v15  ;;  %v2574_v35 = vunpack.c.l.b16 %v2499_v1  ;;  %v10694_v34 = vsel %vm10438_vm7, %v8888_v10, %v1158_v47 }
  0xee   : > { %v1043_v37 = vpop.f32.mrf.mxu3  ;;  %v1947_v28 = vshrl.u32 %v9046_v24, 16  ;;  %v1064_v10 = vld [vmem:[%s10198_s30 + $0x60] sm:$0xe] }
  0xef   : > { %14456 = vst [vmem:[#allocation7_spill] sm:$0xff] %v10639_v38 }
  0xf0   : > { %v1949_v33 = vrot.slane %v1947_v28, 4  ;;  %v1963_v28 = vor.u32 %v1962_v54, %v10671_v61 }
  0xf1   : > { %v781_v19 = vpop.f32.mrf.mxu0  ;;  %8902 = vmatmul.msk.bf16.gmra.mxu2 %vm694_vm1, %v1257_v30  ;;  %v2500_v30 = vrot.slane %v2498_v0, 4 }
  0xf2   : > { %v10647_v63 = vadd.f32 %v1001_v53, %v781_v19  ;;  %v1950_v53 = vshll.u32 %v9046_v24, 16  ;;  %v2175_v19 = vunpack.c.l.b16 %v1935_v44  ;;  %v2176_v24 = vunpack.c.l.b16 %v1945_v48  ;;  %v9962_v44 = vld [vmem:[%s10198_s30 + $0x60] sm:$0xff] }
  0xf3   : > { %v10650_v46 = vpop.f32.mrf.mxu1  ;;  %9015 = vmatmul.msk.bf16.gmra.mxu3 %vm694_vm1, %v9961_v16  ;;  %v1232_v16 = vunpack.c.l.b16 %v1152_v36  ;;  %v10688_v36 = vld [vmem:[%s10198_s30 + $0x70] sm:$0xf]  ;;  %v1964_v48 = vrot.slane %v1963_v28, 4 }
  0xf4   : > { %9078 = vmatmul.msk.bf16.gmra.mxu0 %vm694_vm1, %v2200_v58  ;;  %v821_v56 = vpop.f32.mrf.mxu2  ;;  %v1952_v60 = vrot.slane %v1950_v53, 5  ;;  %v1966_v53 = vshll.u32 %v9048_v9, 16  ;;  %v2201_v0 = vpack.c.b16 %v2176_v24, %v2175_v19  ;;  %v1234_v19 = vunpack.c.l.b16 %v10694_v34 }
  0xf5   : > { %v10655_v21 = vadd.f32 %v1041_v49, %v821_v56  ;;  %v2501_v49 = vrot.slane %v9048_v9, 5  ;;  %v1160_v56 = vrot.slane %v1158_v47, 4  ;;  %v1258_v15 = vpack.c.b16 %v1233_v27, %v1232_v16  ;;  %v10051_v16 = vld [vmem:[%s10198_s30 + $0x68] sm:$0x1] }
  0xf6   : > { %9127 = vmatmul.msk.bf16.gmra.mxu1 %vm694_vm1, %v2598_v11  ;;  %v10663_v12 = vpop.f32.mrf.mxu3  ;;  %v1953_v31 = vor.u32 %v1952_v60, %v1949_v33  ;;  %v1971_v9 = vshrl.u32 %v9049_v2, 16  ;;  %v1968_v55 = vrot.slane %v1966_v53, 5  ;;  %v1980_v33 = vshll.u32 %v10688_v36, 16 }
  0xf7   : > { %14457 = vst [vmem:[#allocation8_spill] sm:$0xff] %v10655_v21  ;;  %v2502_v11 = vsel %vm10438_vm7, %v2500_v30, %v2501_v49  ;;  %v1974_v30 = vshll.u32 %v9049_v2, 16  ;;  %v1984_v47 = vshrl.u32 %v10688_v36, 16  ;;  %v1168_v27 = vrot.slane %v10051_v16, 5 }
  0xf8   : > { %v2575_v51 = vunpack.c.l.b16 %v2502_v11  ;;  %v1954_v5 = vrot.slane %v1953_v31, 4  ;;  %v2505_v1 = vrot.slane %v10688_v36, 5  ;;  %v1969_v53 = vsel %vm10223_vm4, %v1964_v48, %v1968_v55  ;;  %v4258_v36 = vld [vmem:[%s10198_s30 + $0x4] sm:$0xf] }
  0xf9   : > { %v783_v58 = vpop.f32.mrf.mxu0  ;;  %v1976_v31 = vrot.slane %v1974_v30, 5  ;;  %v10726_v2 = vrot.slane %v1980_v33, 5 }
  0xfa   : > { %v10674_v29 = vadd.f32 %v10633_v32, %v783_v58  ;;  %v2599_v58 = vpack.c.b16 %v2575_v51, %v2574_v35  ;;  %v1986_v35 = vrot.slane %v1984_v47, 4  ;;  %v4257_v51 = vld [vmem:[%s10198_s30] sm:$0xf] }
  0xfb   : > { %v10676_v4 = vpop.f32.mrf.mxu1  ;;  %v4307_v34 = vshrl.u32 %v4257_v51, 16 }
  0xfc   : > { %v823_v6 = vpop.f32.mrf.mxu2 }
  0xfd   : > { %v10683_v32 = vadd.f32 %v1043_v37, %v823_v6  ;;  %v10699_v37 = vsel %vm10438_vm7, %v1160_v56, %v1161_v13  ;;  %v10052_v13 = vld [vmem:[%s10198_s30 + $0x64] sm:$0xf]  ;;  %v1973_v56 = vrot.slane %v1971_v9, 4  ;;  %v2507_v9 = vrot.slane %v2505_v1, 4 }
  0xfe   : > { %v10690_v40 = vpop.f32.mrf.mxu3  ;;  %v1235_v24 = vunpack.c.l.b16 %v10699_v37  ;;  %v1165_v6 = vrot.slane %v10052_v13, 5  ;;  %v4316_v37 = vshll.u32 %v4258_v36, 16  ;;  %v4309_v55 = vrot.slane %v4307_v34, 4 }
  0xff   : > { %14458 = vst [vmem:[#allocation9_spill] sm:$0xff] %v10683_v32  ;;  %v2178_v13 = vunpack.c.l.b16 %v1969_v53 }
 0x100   : > { %v1167_v48 = vrot.slane %v1165_v6, 4  ;;  %v4318_v47 = vrot.slane %v4316_v37, 5 }
 0x101   : > { %v786_v49 = vpop.f32.mrf.mxu0  ;;  %8903 = vmatmul.msk.bf16.gmra.mxu2 %vm694_vm1, %v1258_v15  ;;  %v9097_v15 = vld [vmem:[%s10198_s30 + $0x6c] sm:$0xe] }
 0x102   : > { %v10705_v60 = vadd.f32 %v10650_v46, %v786_v49  ;;  %v1959_v46 = vsel %vm10223_vm4, %v1954_v5, %v10671_v61  ;;  %v9051_v61 = vld [vmem:[%s10198_s30 + $0x74] sm:$0x1]  ;;  %v4320_v49 = vshrl.u32 %v4258_v36, 16  ;;  %v1987_v36 = vor.u32 %v1986_v35, %v10726_v2 }
 0x103   : > { %v10708_v54 = vpop.f32.mrf.mxu1  ;;  %9016 = vmatmul.msk.bf16.gmra.mxu3 %vm694_vm1, %v9962_v44  ;;  %v4310_v44 = vshll.u32 %v4257_v51, 16  ;;  %v2508_v30 = vrot.slane %v9051_v61, 5  ;;  %v1990_v51 = vshll.u32 %v9051_v61, 16  ;;  %v1169_v53 = vsel %vm10438_vm7, %v1167_v48, %v1168_v27 }
 0x104   : > { %9079 = vmatmul.msk.bf16.gmra.mxu0 %vm694_vm1, %v2201_v0  ;;  %v826_v11 = vpop.f32.mrf.mxu2  ;;  %v8889_v0 = vrot.slane %v1064_v10, 9  ;;  %v4290_v10 = vld [vmem:[%s10198_s30 + $0x8] sm:$0x1]  ;;  %v1259_v35 = vpack.c.b16 %v1235_v24, %v1234_v19  ;;  %v9963_v19 = vld [vmem:[%s10198_s30 + $0x6c] sm:$0xff]  ;;  %v1988_v24 = vrot.slane %v1987_v36, 4 }
 0x105   : > { %v10722_v28 = vadd.f32 %v10663_v12, %v826_v11  ;;  %v9113_v12 = vrot.slane %v9097_v15, 9  ;;  %v4312_v33 = vrot.slane %v4310_v44, 5  ;;  %v2177_v11 = vunpack.c.l.b16 %v1959_v46 }
 0x106   : > { %9128 = vmatmul.msk.bf16.gmra.mxu1 %vm694_vm1, %v2599_v58  ;;  %v10732_v5 = vpop.f32.mrf.mxu3  ;;  %v1977_v58 = vor.u32 %v1976_v31, %v1973_v56  ;;  %v4326_v15 = vshll.u32 %v4290_v10, 16  ;;  %v2509_v46 = vsel %vm10438_vm7, %v2507_v9, %v2508_v30  ;;  %v1992_v48 = vrot.slane %v1990_v51, 5 }
 0x107   : > { %14459 = vst [vmem:[#allocation10_spill] sm:$0xff] %v10722_v28  ;;  %v4322_v28 = vrot.slane %v4320_v49, 4  ;;  %v4313_v21 = vor.u32 %v4312_v33, %v4309_v55  ;;  %v2506_v34 = vsel %vm10438_vm7, %v9113_v12, %v2505_v1  ;;  %v2202_v49 = vpack.c.b16 %v2178_v13, %v2177_v11  ;;  %v9052_v12 = vld [vmem:[%s10198_s30 + $0x78] sm:$0xf] }
 0x108   : > { %v4328_v44 = vrot.slane %v4326_v15, 5  ;;  %v1978_v55 = vrot.slane %v1977_v58, 4  ;;  %v2577_v9 = vunpack.c.l.b16 %v2509_v46  ;;  %v1998_v13 = vshll.u32 %v9052_v12, 16 }
 0x109   : > { %v788_v16 = vpop.f32.mrf.mxu0  ;;  %v4323_v56 = vor.u32 %v4322_v28, %v4318_v47  ;;  %v4314_v61 = vrot.slane %v4313_v21, 4  ;;  %v2576_v28 = vunpack.c.l.b16 %v2506_v34  ;;  %v1237_v21 = vunpack.c.l.b16 %v1169_v53  ;;  %v10053_v34 = vld [vmem:[%s10198_s30 + $0x74] sm:$0x1] }
 0x10a   : > { %v10736_v32 = vadd.f32 %v10676_v4, %v788_v16  ;;  %v1166_v4 = vsel %vm10438_vm7, %v8889_v0, %v1165_v6  ;;  %v1995_v16 = vshrl.u32 %v9052_v12, 16  ;;  %v1983_v10 = vsel %vm10223_vm4, %v1978_v55, %v10726_v2 }
 0x10b   : > { %v10738_v38 = vpop.f32.mrf.mxu1  ;;  %v4324_v1 = vrot.slane %v4323_v56, 4  ;;  %v4319_v6 = vsel %vm10223_vm4, %v4314_v61, %v4318_v47  ;;  %v1236_v27 = vunpack.c.l.b16 %v1166_v4  ;;  %v9053_v47 = vld [vmem:[%s10198_s30 + $0x7c] sm:$0xf]  ;;  %v2600_v15 = vpack.c.b16 %v2577_v9, %v2576_v28  ;;  %v9098_v4 = vld [vmem:[%s10198_s30 + $0x78] sm:$0xe] }
 0x10c   : > { %v828_v31 = vpop.f32.mrf.mxu2  ;;  %v4691_v30 = vunpack.c.l.b16 %v4319_v6  ;;  %v1175_v51 = vrot.slane %v10053_v34, 5  ;;  %v2512_v53 = vrot.slane %v9053_v47, 5  ;;  %v1993_v2 = vsel %vm10223_vm4, %v1988_v24, %v1992_v48  ;;  %v10054_v61 = vld [vmem:[%s10198_s30 + $0x70] sm:$0xf]  ;;  %v4259_v9 = vld [vmem:[%s10198_s30 + $0xc] sm:$0xf] }
 0x10d   : > { %v10750_v37 = vadd.f32 %v10690_v40, %v828_v31  ;;  %v4329_v40 = vsel %vm10223_vm4, %v4324_v1, %v4328_v44  ;;  %v10769_v46 = vpack.c.b16 %v1237_v21, %v1236_v27  ;;  %v1065_v31 = vld [vmem:[%s10198_s30 + $0x6c] sm:$0xe]  ;;  %v1172_v44 = vrot.slane %v10054_v61, 5  ;;  %v4260_v6 = vld [vmem:[%s10198_s30 + $0x10] sm:$0xf] }
 0x10e   : > { %v10755_v0 = vpop.f32.mrf.mxu3  ;;  %v4692_v33 = vunpack.c.l.b16 %v4329_v40  ;;  %v2004_v1 = vshll.u32 %v9053_v47, 16  ;;  %v10783_v55 = vunpack.c.l.b16 %v1983_v10  ;;  %v2008_v28 = vshrl.u32 %v9053_v47, 16  ;;  %v9054_v21 = vld [vmem:[%s10198_s30 + $0x80] sm:$0x1] }
 0x10f   : > { %14460 = vst [vmem:[#allocation11_spill] sm:$0xff] %v10750_v37  ;;  %v8890_v27 = vrot.slane %v1065_v31, 9  ;;  %v9114_v40 = vrot.slane %v9098_v4, 9  ;;  %v2515_v48 = vrot.slane %v9054_v21, 5  ;;  %v1174_v10 = vrot.slane %v1172_v44, 4 }
 0x110   : > { %v4723_v36 = vpack.c.b16 %v4692_v33, %v4691_v30  ;;  %v4331_v30 = vshrl.u32 %v4259_v9, 16  ;;  %v4340_v33 = vshll.u32 %v4260_v6, 16  ;;  %v10792_v34 = vrot.slane %v2004_v1, 5  ;;  %v4291_v31 = vld [vmem:[%s10198_s30 + $0x14] sm:$0x1] }
 0x111   : > { %v791_v11 = vpop.f32.mrf.mxu0  ;;  %8904 = vmatmul.msk.bf16.gmra.mxu2 %vm694_vm1, %v1259_v35  ;;  %v1997_v35 = vrot.slane %v1995_v16, 4  ;;  %v4344_v16 = vshrl.u32 %v4260_v6, 16  ;;  %v4350_v37 = vshll.u32 %v4291_v31, 16  ;;  %v2513_v1 = vsel %vm10438_vm7, %v9114_v40, %v2512_v53  ;;  %v9055_v40 = vld [vmem:[%s10198_s30 + $0x84] sm:$0xf] }
 0x112   : > { %v10763_v58 = vadd.f32 %v10708_v54, %v791_v11  ;;  %4739 = vrot.lane.b32.xlu0 %v4723_v36, %s10141_s14  ;;  %v2180_v11 = vunpack.c.l.b16 %v1993_v2  ;;  %v1173_v2 = vsel %vm10438_vm7, %v8890_v27, %v1172_v44  ;;  %v2014_v44 = vshll.u32 %v9054_v21, 16  ;;  %v9964_v21 = vld [vmem:[%s10198_s30 + $0x78] sm:$0xff] }
 0x113   : > { %v10771_v56 = vpop.f32.mrf.mxu1  ;;  %9017 = vmatmul.msk.bf16.gmra.mxu3 %vm694_vm1, %v9963_v19  ;;  %v4334_v19 = vshll.u32 %v4259_v9, 16  ;;  %v4346_v61 = vrot.slane %v4344_v16, 4  ;;  %v2022_v31 = vshll.u32 %v9055_v40, 16 }
 0x114   : > { %9080 = vmatmul.msk.bf16.gmra.mxu0 %vm694_vm1, %v2202_v49  ;;  %v831_v54 = vpop.f32.mrf.mxu2  ;;  %v2000_v49 = vrot.slane %v1998_v13, 5  ;;  %v4333_v13 = vrot.slane %v4331_v30, 4 }
 0x115   : > { %v10781_v12 = vadd.f32 %v10732_v5, %v831_v54  ;;  %v2514_v5 = vrot.slane %v2512_v53, 4  ;;  %v4336_v47 = vrot.slane %v4334_v19, 5  ;;  %v4342_v54 = vrot.slane %v4340_v33, 5 }
 0x116   : > { %9129 = vmatmul.msk.bf16.gmra.mxu1 %vm694_vm1, %v2600_v15  ;;  %v10790_v24 = vpop.f32.mrf.mxu3  ;;  %v2010_v15 = vrot.slane %v2008_v28, 4  ;;  %v2001_v9 = vor.u32 %v2000_v49, %v1997_v35  ;;  %v1176_v35 = vsel %vm10438_vm7, %v1174_v10, %v1175_v51  ;;  %v4352_v19 = vrot.slane %v4350_v37, 5 }
 0x117   : > { %14461 = vst [vmem:[#allocation12_spill] sm:$0xff] %v10781_v12  ;;  %v4337_v12 = vor.u32 %v4336_v47, %v4333_v13  ;;  %v2516_v28 = vsel %vm10438_vm7, %v2514_v5, %v2515_v48  ;;  %v4347_v6 = vor.u32 %v4346_v61, %v4342_v54  ;;  %v1238_v5 = vunpack.c.l.b16 %v1173_v2  ;;  %v10825_v13 = vld [vmem:[%s10198_s30 + $0x7c] sm:$0xf]  ;;  %v1066_v2 = vld [vmem:[%s10198_s30 + $0x78] sm:$0xe] }
 0x118   : > { %v2011_v53 = vor.u32 %v2010_v15, %v10792_v34  ;;  %v2578_v48 = vunpack.c.l.b16 %v2513_v1  ;;  %v2579_v16 = vunpack.c.l.b16 %v2516_v28  ;;  %v1239_v51 = vunpack.c.l.b16 %v1176_v35  ;;  %v10056_v35 = vld [vmem:[%s10198_s30 + $0x80] sm:$0x1] }
 0x119   : > { %v793_v36 = vpop.f32.mrf.mxu0  ;;  %v4338_v49 = vrot.slane %v4337_v12, 4  ;;  %v4348_v27 = vrot.slane %v4347_v6, 4  ;;  %v1179_v47 = vrot.slane %v10825_v13, 5  ;;  %v2019_v15 = vshrl.u32 %v9055_v40, 16 }
 0x11a   : > { %v10796_v4 = vadd.f32 %v10738_v38, %v793_v36  ;;  %v2203_v38 = vpack.c.b16 %v2180_v11, %v10783_v55  ;;  %v10817_v11 = vld [vmem:[%s10198_s30 + $0x88] sm:$0xf]  ;;  %v2012_v61 = vrot.slane %v2011_v53, 4  ;;  %v2601_v6 = vpack.c.b16 %v2579_v16, %v2578_v48  ;;  %v9099_v53 = vld [vmem:[%s10198_s30 + $0x84] sm:$0xe] }
 0x11b   : > { %v10798_v8 = vpop.f32.mrf.mxu1  ;;  %v4343_v55 = vsel %vm10223_vm4, %v4338_v49, %v4342_v54  ;;  %v4353_v12 = vsel %vm10223_vm4, %v4348_v27, %v4352_v19  ;;  %v2028_v1 = vshll.u32 %v10817_v11, 16  ;;  %v2032_v28 = vshrl.u32 %v10817_v11, 16 }
 0x11c   : > { %v833_v30 = vpop.f32.mrf.mxu2  ;;  %v4693_v10 = vunpack.c.l.b16 %v4343_v55  ;;  %v4694_v36 = vunpack.c.l.b16 %v4353_v12  ;;  %v1182_v49 = vrot.slane %v10056_v35, 5  ;;  %v10834_v19 = vpack.c.b16 %v1239_v51, %v1238_v5  ;;  %v9057_v5 = vld [vmem:[%s10198_s30 + $0x8c] sm:$0x1] }
 0x11d   : > { %v10810_v33 = vadd.f32 %v10755_v0, %v833_v30  ;;  %v2002_v0 = vrot.slane %v2001_v9, 4  ;;  %v2016_v9 = vrot.slane %v2014_v44, 5  ;;  %v2519_v44 = vrot.slane %v10817_v11, 5 }
 0x11e   : > { %v10819_v37 = vpop.f32.mrf.mxu3  ;;  %v4724_v30 = vpack.c.b16 %v4694_v36, %v4693_v10  ;;  %v8891_v48 = vrot.slane %v1066_v2, 9  ;;  %v1181_v16 = vrot.slane %v1179_v47, 4  ;;  %v2021_v55 = vrot.slane %v2019_v15, 4  ;;  %v4261_v10 = vld [vmem:[%s10198_s30 + $0x18] sm:$0xf] }
 0x11f   : > { %14462 = vst [vmem:[#allocation13_spill] sm:$0xff] %v10810_v33  ;;  %v2024_v51 = vrot.slane %v2022_v31, 5  ;;  %v2034_v11 = vrot.slane %v2032_v28, 4  ;;  %v2522_v13 = vrot.slane %v9057_v5, 5  ;;  %v4355_v36 = vshrl.u32 %v4261_v10, 16 }
 0x120   : > { %4741 = vrot.lane.b32.xlu0 %v4724_v30, %s10141_s14  ;;  %v4358_v15 = vshll.u32 %v4261_v10, 16  ;;  %v2521_v2 = vrot.slane %v2519_v44, 4 }
 0x121   : > { %v2271_v54 = vpop.f32.mrf.mxu0  ;;  %8905 = vmatmul.msk.bf16.gmra.mxu2 %vm694_vm1, %v10769_v46  ;;  %v2007_v46 = vsel %vm10223_vm4, %v2002_v0, %v10792_v34  ;;  %v2017_v34 = vsel %vm10223_vm4, %v2012_v61, %v2016_v9  ;;  %v10850_v0 = vrot.slane %v2028_v1, 5  ;;  %v2025_v30 = vor.u32 %v2024_v51, %v2021_v55 }
 0x122   : > { %v2038_v1 = vshll.u32 %v9057_v5, 16  ;;  %v4357_v35 = vrot.slane %v4355_v36, 4  ;;  %v4360_v28 = vrot.slane %v4358_v15, 5  ;;  %v2181_v3 = vunpack.c.l.b16 %v2007_v46 }
 0x123   : > { %v10836_v27 = vpop.f32.mrf.mxu1  ;;  %9018 = vmatmul.msk.bf16.gmra.mxu3 %vm694_vm1, %v9964_v21  ;;  %v9115_v21 = vrot.slane %v9099_v53, 9  ;;  %v2035_v33 = vor.u32 %v2034_v11, %v10850_v0  ;;  %v2182_v10 = vunpack.c.l.b16 %v2017_v34  ;;  %v2523_v55 = vsel %vm10438_vm7, %v2521_v2, %v2522_v13 }
 0x124   : > { %9081 = vmatmul.msk.bf16.gmra.mxu0 %vm694_vm1, %v2203_v38  ;;  %v1328_v40 = vpop.f32.mrf.mxu2  ;;  %v4262_v38 = vld [vmem:[%s10198_s30 + $0x1c] sm:$0xf]  ;;  %v4361_v18 = vor.u32 %v4360_v28, %v4357_v35  ;;  %v2026_v46 = vrot.slane %v2025_v30, 4 }
 0x125   : > { %v1408_v12 = vadd.f32 %v1328_v40, %v10483_v52  ;;  %v4364_v61 = vshll.u32 %v4262_v38, 16  ;;  %v4368_v9 = vshrl.u32 %v4262_v38, 16  ;;  %v1180_v38 = vsel %vm10438_vm7, %v8891_v48, %v1179_v47 }
 0x126   : > { %9130 = vmatmul.msk.bf16.gmra.mxu1 %vm694_vm1, %v2601_v6  ;;  %v10856_v52 = vpop.f32.mrf.mxu3  ;;  %v4292_v6 = vld [vmem:[%s10198_s30 + $0x20] sm:$0x1]  ;;  %v2520_v5 = vsel %vm10438_vm7, %v9115_v21, %v2519_v44  ;;  %v4362_v34 = vrot.slane %v4361_v18, 4  ;;  %v2040_v47 = vrot.slane %v2038_v1, 5  ;;  %v9058_v21 = vld [vmem:[%s10198_s30 + $0x90] sm:$0xf] }
 0x127   : > { %v1698_v31 = vadd.f32 %v10790_v24, %v1408_v12  ;;  %v4366_v17 = vrot.slane %v4364_v61, 5  ;;  %v4370_v53 = vrot.slane %v4368_v9, 4  ;;  %v4374_v24 = vshll.u32 %v4292_v6, 16 }
 0x128   : > { %v2580_v61 = vunpack.c.l.b16 %v2520_v5  ;;  %v2581_v9 = vunpack.c.l.b16 %v2523_v55  ;;  %v2043_v28 = vshrl.u32 %v9058_v21, 16 }
 0x129   : > { %v2273_v40 = vpop.f32.mrf.mxu0  ;;  %v2351_v43 = vadd.f32 %v2271_v54, %v1698_v31  ;;  %v4371_v51 = vor.u32 %v4370_v53, %v4366_v17  ;;  %v1183_v54 = vsel %vm10438_vm7, %v1181_v16, %v1182_v49  ;;  %v4376_v36 = vrot.slane %v4374_v24, 5  ;;  %v9059_v53 = vld [vmem:[%s10198_s30 + $0x94] sm:$0xf]  ;;  %v10057_v24 = vld [vmem:[%s10198_s30 + $0x8c] sm:$0x1] }
 0x12a   : > { %v2036_v31 = vrot.slane %v2035_v33, 4  ;;  %v4367_v44 = vsel %vm10223_vm4, %v4362_v34, %v4366_v17  ;;  %v9965_v33 = vld [vmem:[%s10198_s30 + $0x84] sm:$0xff]  ;;  %v1240_v16 = vunpack.c.l.b16 %v1180_v38  ;;  %v1241_v30 = vunpack.c.l.b16 %v1183_v54  ;;  %v10905_v34 = vld [vmem:[%s10198_s30 + $0x98] sm:$0x1] }
 0x12b   : > { %v10860_v12 = vpop.f32.mrf.mxu1  ;;  %v4372_v48 = vrot.slane %v4371_v51, 4  ;;  %v4695_v49 = vunpack.c.l.b16 %v4367_v44  ;;  %v2031_v17 = vsel %vm10223_vm4, %v2026_v46, %v10850_v0  ;;  %v2602_v6 = vpack.c.b16 %v2581_v9, %v2580_v61  ;;  %v1067_v61 = vld [vmem:[%s10198_s30 + $0x84] sm:$0xe] }
 0x12c   : > { %v1330_v11 = vpop.f32.mrf.mxu2  ;;  %v1189_v38 = vrot.slane %v10057_v24, 5  ;;  %v2526_v55 = vrot.slane %v9059_v53, 5  ;;  %v10899_v54 = vunpack.c.l.b16 %v2031_v17  ;;  %v2529_v44 = vrot.slane %v10905_v34, 5 }
 0x12d   : > { %v1409_v15 = vadd.f32 %v1330_v11, %v10503_v26  ;;  %v4377_v18 = vsel %vm10223_vm4, %v4372_v48, %v4376_v36  ;;  %v2204_v26 = vpack.c.b16 %v2182_v10, %v2181_v3  ;;  %v10889_v10 = vadd.f32 %v10771_v56, %v2351_v43  ;;  %v10058_v56 = vld [vmem:[%s10198_s30 + $0x88] sm:$0xf] }
 0x12e   : > { %v10875_v2 = vpop.f32.mrf.mxu3  ;;  %v4696_v1 = vunpack.c.l.b16 %v4377_v18  ;;  %v10897_v11 = vpack.c.b16 %v1241_v30, %v1240_v16  ;;  %v1186_v46 = vrot.slane %v10058_v56, 5  ;;  %v2052_v16 = vshll.u32 %v9059_v53, 16 }
 0x12f   : > { %v1699_v13 = vadd.f32 %v10819_v37, %v1409_v15  ;;  %v2041_v37 = vsel %vm10223_vm4, %v2036_v31, %v2040_v47  ;;  %v2046_v15 = vshll.u32 %v9058_v21, 16  ;;  %v4263_v31 = vld [vmem:[%s10198_s30 + $0x24] sm:$0xf]  ;;  %v4264_v47 = vld [vmem:[%s10198_s30 + $0x28] sm:$0xf]  ;;  %v2056_v30 = vshrl.u32 %v9059_v53, 16 }
 0x130   : > { %v4725_v3 = vpack.c.b16 %v4696_v1, %v4695_v49  ;;  %v10901_v43 = vunpack.c.l.b16 %v2041_v37  ;;  %v4382_v18 = vshll.u32 %v4263_v31, 16  ;;  %v4388_v21 = vshll.u32 %v4264_v47, 16 }
 0x131   : > { %v2276_v35 = vpop.f32.mrf.mxu0  ;;  %8906 = vmatmul.msk.bf16.gmra.mxu2 %vm694_vm1, %v10834_v19  ;;  %v9100_v19 = vld [vmem:[%s10198_s30 + $0x90] sm:$0xe]  ;;  %v2352_v0 = vadd.f32 %v2273_v40, %v1699_v13  ;;  %v10909_v40 = vrot.slane %v2043_v28, 4  ;;  %v4379_v13 = vshrl.u32 %v4263_v31, 16  ;;  %v8892_v37 = vrot.slane %v1067_v61, 9 }
 0x132   : > { %4743 = vrot.lane.b32.xlu1 %v4725_v3, %s10141_s14  ;;  %v9116_v9 = vrot.slane %v9100_v19, 9  ;;  %v4384_v1 = vrot.slane %v4382_v18, 5  ;;  %v1188_v28 = vrot.slane %v1186_v46, 4  ;;  %v4390_v3 = vrot.slane %v4388_v21, 5 }
 0x133   : > { %v10892_v5 = vpop.f32.mrf.mxu1  ;;  %9019 = vmatmul.msk.bf16.gmra.mxu3 %vm694_vm1, %v9965_v33  ;;  %v10914_v48 = vadd.f32 %v10798_v8, %v2352_v0  ;;  %v4392_v33 = vshrl.u32 %v4264_v47, 16  ;;  %v4381_v8 = vrot.slane %v4379_v13, 4  ;;  %v2048_v19 = vrot.slane %v2046_v15, 5 }
 0x134   : > { %9082 = vmatmul.msk.bf16.gmra.mxu0 %vm694_vm1, %v2204_v26  ;;  %v1333_v51 = vpop.f32.mrf.mxu2  ;;  %v2528_v26 = vrot.slane %v2526_v55, 4  ;;  %v2205_v56 = vpack.c.b16 %v10901_v43, %v10899_v54  ;;  %v2527_v53 = vsel %vm10438_vm7, %v9116_v9, %v2526_v55  ;;  %v10931_v13 = vrot.slane %v2052_v16, 5  ;;  %v9061_v9 = vld [vmem:[%s10198_s30 + $0x9c] sm:$0xf]  ;;  %v10943_v16 = vld [vmem:[%s10198_s30 + $0xa0] sm:$0xf] }
 0x135   : > { %v1410_v36 = vadd.f32 %v1333_v51, %v10516_v59  ;;  %v4394_v24 = vrot.slane %v4392_v33, 4  ;;  %v4385_v0 = vor.u32 %v4384_v1, %v4381_v8  ;;  %v2058_v15 = vrot.slane %v2056_v30, 4  ;;  %v9966_v1 = vld [vmem:[%s10198_s30 + $0x90] sm:$0xff] }
 0x136   : > { %9131 = vmatmul.msk.bf16.gmra.mxu1 %vm694_vm1, %v2602_v6  ;;  %v10920_v49 = vpop.f32.mrf.mxu3  ;;  %v4293_v6 = vld [vmem:[%s10198_s30 + $0x2c] sm:$0x1]  ;;  %v2530_v31 = vsel %vm10438_vm7, %v2528_v26, %v2529_v44  ;;  %v1187_v54 = vsel %vm10438_vm7, %v8892_v37, %v1186_v46  ;;  %v1190_v55 = vsel %vm10438_vm7, %v1188_v28, %v1189_v38  ;;  %v2049_v44 = vor.u32 %v2048_v19, %v10909_v40 }
 0x137   : > { %v1700_v59 = vadd.f32 %v10856_v52, %v1410_v36  ;;  %v4398_v51 = vshll.u32 %v4293_v6, 16  ;;  %v4395_v47 = vor.u32 %v4394_v24, %v4390_v3  ;;  %v4386_v18 = vrot.slane %v4385_v0, 4 }
 0x138   : > { %v2583_v26 = vunpack.c.l.b16 %v2530_v31  ;;  %v2062_v46 = vshll.u32 %v10905_v34, 16  ;;  %v2059_v40 = vor.u32 %v2058_v15, %v10931_v13  ;;  %v2067_v28 = vshrl.u32 %v9061_v9, 16 }
 0x139   : > { %v2278_v17 = vpop.f32.mrf.mxu0  ;;  %v2353_v52 = vadd.f32 %v2276_v35, %v1700_v59  ;;  %v4400_v21 = vrot.slane %v4398_v51, 5  ;;  %v4396_v43 = vrot.slane %v4395_v47, 4  ;;  %v2582_v59 = vunpack.c.l.b16 %v2527_v53 }
 0x13a   : > { %v4391_v33 = vsel %vm10223_vm4, %v4386_v18, %v4390_v3  ;;  %v2070_v6 = vshll.u32 %v9061_v9, 16  ;;  %v10954_v3 = vld [vmem:[%s10198_s30 + $0x98] sm:$0x1]  ;;  %v1242_v34 = vunpack.c.l.b16 %v1187_v54  ;;  %v2076_v19 = vshll.u32 %v10943_v16, 16 }
 0x13b   : > { %v10925_v36 = vpop.f32.mrf.mxu1  ;;  %v4401_v38 = vsel %vm10223_vm4, %v4396_v43, %v4400_v21  ;;  %v4697_v8 = vunpack.c.l.b16 %v4391_v33  ;;  %v1196_v24 = vrot.slane %v10954_v3, 5  ;;  %v2080_v0 = vshrl.u32 %v10943_v16, 16  ;;  %v9101_v21 = vld [vmem:[%s10198_s30 + $0x9c] sm:$0xe]  ;;  %v10060_v43 = vld [vmem:[%s10198_s30 + $0x94] sm:$0xf] }
 0x13c   : > { %v1335_v61 = vpop.f32.mrf.mxu2  ;;  %v4698_v37 = vunpack.c.l.b16 %v4401_v38  ;;  %v1243_v51 = vunpack.c.l.b16 %v1190_v55  ;;  %v2603_v53 = vpack.c.b16 %v2583_v26, %v2582_v59  ;;  %v10962_v47 = vadd.f32 %v10836_v27, %v2353_v52  ;;  %v1068_v59 = vld [vmem:[%s10198_s30 + $0x90] sm:$0xe]  ;;  %v9063_v26 = vld [vmem:[%s10198_s30 + $0xa4] sm:$0x1]  ;;  %v9064_v38 = vld [vmem:[%s10198_s30 + $0xa8] sm:$0xf] }
 0x13d   : > { %v1411_v35 = vadd.f32 %v1335_v61, %v10535_v39  ;;  %v2050_v15 = vrot.slane %v2049_v44, 4  ;;  %v2064_v18 = vrot.slane %v2062_v46, 5  ;;  %v2060_v55 = vrot.slane %v2059_v40, 4 }
 0x13e   : > { %v10946_v30 = vpop.f32.mrf.mxu3  ;;  %v4726_v31 = vpack.c.b16 %v4698_v37, %v4697_v8  ;;  %14463 = vst [vmem:[#allocation14_spill] sm:$0xff] %v10962_v47  ;;  %v1193_v27 = vrot.slane %v10060_v43, 5  ;;  %v2069_v52 = vrot.slane %v2067_v28, 4  ;;  %v2072_v9 = vrot.slane %v2070_v6, 5  ;;  %v10983_v8 = vld [vmem:[%s10198_s30 + $0xac] sm:$0xf] }
 0x13f   : > { %v1701_v39 = vadd.f32 %v10875_v2, %v1411_v35  ;;  %v10975_v33 = vrot.slane %v2076_v19, 5  ;;  %v2536_v46 = vrot.slane %v9063_v26, 5  ;;  %v2091_v37 = vshrl.u32 %v9064_v38, 16 }
 0x140   : > { %4745 = vrot.lane.b32.xlu1 %v4726_v31, %s10141_s14  ;;  %v2094_v28 = vshll.u32 %v9064_v38, 16  ;;  %v8893_v6 = vrot.slane %v1068_v59, 9  ;;  %v2104_v19 = vshrl.u32 %v10983_v8, 16  ;;  %v2086_v31 = vshll.u32 %v9063_v26, 16 }
 0x141   : > { %v2281_v2 = vpop.f32.mrf.mxu0  ;;  %8907 = vmatmul.msk.bf16.gmra.mxu2 %vm694_vm1, %v10897_v11  ;;  %v2533_v11 = vrot.slane %v10943_v16, 5  ;;  %v2354_v35 = vadd.f32 %v2278_v17, %v1701_v39  ;;  %v2082_v17 = vrot.slane %v2080_v0, 4  ;;  %v1263_v16 = vpack.c.b16 %v1243_v51, %v1242_v34 }
 0x142   : > { %v9117_v39 = vrot.slane %v9101_v21, 9  ;;  %v2100_v34 = vshll.u32 %v10983_v8, 16  ;;  %v2065_v51 = vsel %vm10223_vm4, %v2060_v55, %v2064_v18  ;;  %v2106_v55 = vrot.slane %v2104_v19, 4 }
 0x143   : > { %v10964_v61 = vpop.f32.mrf.mxu1  ;;  %9020 = vmatmul.msk.bf16.gmra.mxu3 %vm694_vm1, %v9966_v1  ;;  %v2535_v40 = vrot.slane %v2533_v11, 4  ;;  %v2083_v21 = vor.u32 %v2082_v17, %v10975_v33  ;;  %v2186_v59 = vunpack.c.l.b16 %v2065_v51  ;;  %v1194_v26 = vsel %vm10438_vm7, %v8893_v6, %v1193_v27 }
 0x144   : > { %9083 = vmatmul.msk.bf16.gmra.mxu0 %vm694_vm1, %v2205_v56  ;;  %v1338_v54 = vpop.f32.mrf.mxu2  ;;  %v10978_v56 = vadd.f32 %v10860_v12, %v2354_v35  ;;  %v2055_v12 = vsel %vm10223_vm4, %v2050_v15, %v10931_v13  ;;  %v2093_v35 = vrot.slane %v2091_v37, 4  ;;  %v2534_v15 = vsel %vm10438_vm7, %v9117_v39, %v2533_v11 }
 0x145   : > { %v1412_v44 = vadd.f32 %v1338_v54, %v10548_v7  ;;  %v2096_v54 = vrot.slane %v2094_v28, 5  ;;  %v11002_v18 = vrot.slane %v2100_v34, 5  ;;  %v10061_v28 = vld [vmem:[%s10198_s30 + $0xa0] sm:$0xf] }
 0x146   : > { %14464 = vst [vmem:[#allocation15_spill] sm:$0xff] %v10978_v56  ;;  %9132 = vmatmul.msk.bf16.gmra.mxu1 %vm694_vm1, %v2603_v53  ;;  %v10986_v1 = vpop.f32.mrf.mxu3  ;;  %v1195_v53 = vrot.slane %v1193_v27, 4  ;;  %v1200_v27 = vrot.slane %v10061_v28, 5 }
 0x147   : > { %v1702_v7 = vadd.f32 %v10920_v49, %v1412_v44  ;;  %v2073_v49 = vor.u32 %v2072_v9, %v2069_v52  ;;  %v2537_v44 = vsel %vm10438_vm7, %v2535_v40, %v2536_v46  ;;  %v2185_v9 = vunpack.c.l.b16 %v2055_v12 }
 0x148   : > { %v1197_v11 = vsel %vm10438_vm7, %v1195_v53, %v1196_v24  ;;  %v2088_v46 = vrot.slane %v2086_v31, 5  ;;  %v2584_v40 = vunpack.c.l.b16 %v2534_v15  ;;  %v2585_v37 = vunpack.c.l.b16 %v2537_v44  ;;  %v9967_v24 = vld [vmem:[%s10198_s30 + $0x9c] sm:$0xff]  ;;  %v9102_v15 = vld [vmem:[%s10198_s30 + $0xa8] sm:$0xe] }
 0x149   : > { %v2283_v0 = vpop.f32.mrf.mxu0  ;;  %v2355_v43 = vadd.f32 %v2281_v2, %v1702_v7  ;;  %v1069_v2 = vld [vmem:[%s10198_s30 + $0x9c] sm:$0xe]  ;;  %v2074_v39 = vrot.slane %v2073_v49, 4  ;;  %v9066_v7 = vld [vmem:[%s10198_s30 + $0xb0] sm:$0x1]  ;;  %v2097_v12 = vor.u32 %v2096_v54, %v2093_v35  ;;  %v2107_v34 = vor.u32 %v2106_v55, %v11002_v18 }
 0x14a   : > { %v8894_v3 = vrot.slane %v1069_v2, 9  ;;  %v2206_v19 = vpack.c.b16 %v2186_v59, %v2185_v9  ;;  %v2110_v51 = vshll.u32 %v9066_v7, 16  ;;  %v2540_v53 = vrot.slane %v10983_v8, 5  ;;  %v10062_v49 = vld [vmem:[%s10198_s30 + $0xa4] sm:$0x1] }
 0x14b   : > { %v10996_v13 = vpop.f32.mrf.mxu1  ;;  %v11008_v17 = vadd.f32 %v10892_v5, %v2355_v43  ;;  %v1203_v31 = vrot.slane %v10062_v49, 5  ;;  %v1244_v35 = vunpack.c.l.b16 %v1194_v26  ;;  %v1245_v54 = vunpack.c.l.b16 %v1197_v11 }
 0x14c   : > { %v1340_v52 = vpop.f32.mrf.mxu2  ;;  %v2604_v44 = vpack.c.b16 %v2585_v37, %v2584_v40  ;;  %v1202_v55 = vrot.slane %v1200_v27, 4  ;;  %v2108_v59 = vrot.slane %v2107_v34, 4  ;;  %v2112_v26 = vrot.slane %v2110_v51, 5 }
 0x14d   : > { %14465 = vst [vmem:[#allocation16_spill] sm:$0xff] %v11008_v17  ;;  %v1413_v38 = vadd.f32 %v1340_v52, %v10567_v50  ;;  %v2084_v50 = vrot.slane %v2083_v21, 4  ;;  %v2079_v21 = vsel %vm10223_vm4, %v2074_v39, %v10975_v33  ;;  %v2098_v52 = vrot.slane %v2097_v12, 4  ;;  %v10063_v39 = vld [vmem:[%s10198_s30 + $0xb0] sm:$0x1] }
 0x14e   : > { %v11018_v6 = vpop.f32.mrf.mxu3  ;;  %v9118_v2 = vrot.slane %v9102_v15, 9  ;;  %v2543_v11 = vrot.slane %v9066_v7, 5  ;;  %v1264_v37 = vpack.c.b16 %v1245_v54, %v1244_v35  ;;  %v11044_v28 = vunpack.c.l.b16 %v2079_v21  ;;  %v10064_v35 = vld [vmem:[%s10198_s30 + $0xac] sm:$0xf] }
 0x14f   : > { %v1703_v5 = vadd.f32 %v10946_v30, %v1413_v38  ;;  %v2089_v8 = vsel %vm10223_vm4, %v2084_v50, %v2088_v46  ;;  %v2542_v38 = vrot.slane %v2540_v53, 4  ;;  %v1210_v46 = vrot.slane %v10063_v39, 5  ;;  %v11057_v50 = vld [vmem:[%s10198_s30 + $0xb8] sm:$0xf] }
 0x150   : > { %v2103_v7 = vsel %vm10223_vm4, %v2098_v52, %v11002_v18  ;;  %v2113_v51 = vsel %vm10223_vm4, %v2108_v59, %v2112_v26  ;;  %v2541_v49 = vsel %vm10438_vm7, %v9118_v2, %v2540_v53  ;;  %v1207_v54 = vrot.slane %v10064_v35, 5  ;;  %v1070_v52 = vld [vmem:[%s10198_s30 + $0xa8] sm:$0xe] }
 0x151   : > { %v2286_v43 = vpop.f32.mrf.mxu0  ;;  %8908 = vmatmul.msk.bf16.gmra.mxu2 %vm694_vm1, %v1263_v16  ;;  %v2356_v30 = vadd.f32 %v2283_v0, %v1703_v5  ;;  %v11035_v16 = vsel %vm10438_vm7, %v8894_v3, %v1200_v27  ;;  %v1204_v27 = vsel %vm10438_vm7, %v1202_v55, %v1203_v31  ;;  %v9067_v5 = vld [vmem:[%s10198_s30 + $0xb4] sm:$0xf]  ;;  %v2544_v18 = vsel %vm10438_vm7, %v2542_v38, %v2543_v11 }
 0x152   : > { %v1246_v12 = vunpack.c.l.b16 %v11035_v16  ;;  %v2115_v34 = vshrl.u32 %v9067_v5, 16  ;;  %v2128_v31 = vshrl.u32 %v11057_v50, 16  ;;  %v11075_v55 = vunpack.c.l.b16 %v2103_v7 }
 0x153   : > { %v11029_v9 = vpop.f32.mrf.mxu1  ;;  %v11038_v0 = vadd.f32 %v10925_v36, %v2356_v30  ;;  %9021 = vmatmul.msk.bf16.gmra.mxu3 %vm694_vm1, %v9967_v24  ;;  %v11046_v36 = vunpack.c.l.b16 %v2089_v8  ;;  %v2124_v24 = vshll.u32 %v11057_v50, 16  ;;  %v11079_v8 = vld [vmem:[%s10198_s30 + $0xbc] sm:$0x1]  ;;  %v8895_v26 = vrot.slane %v1070_v52, 9 }
 0x154   : > { %9084 = vmatmul.msk.bf16.gmra.mxu0 %vm694_vm1, %v2206_v19  ;;  %v1343_v33 = vpop.f32.mrf.mxu2  ;;  %v2118_v19 = vshll.u32 %v9067_v5, 16  ;;  %v2117_v15 = vrot.slane %v2115_v34, 4  ;;  %v2130_v53 = vrot.slane %v2128_v31, 4  ;;  %v1209_v2 = vrot.slane %v1207_v54, 4 }
 0x155   : > { %14466 = vst [vmem:[#allocation17_spill] sm:$0xff] %v11038_v0  ;;  %v1414_v40 = vadd.f32 %v1343_v33, %v10580_v25  ;;  %v11073_v21 = vrot.slane %v2124_v24, 5  ;;  %v11083_v33 = vunpack.c.l.b16 %v2113_v51  ;;  %v2586_v39 = vunpack.c.l.b16 %v2541_v49  ;;  %v9103_v49 = vld [vmem:[%s10198_s30 + $0xb4] sm:$0xe] }
 0x156   : > { %9133 = vmatmul.msk.bf16.gmra.mxu1 %vm694_vm1, %v2604_v44  ;;  %v11060_v3 = vpop.f32.mrf.mxu3  ;;  %v2120_v30 = vrot.slane %v2118_v19, 5  ;;  %v1247_v44 = vunpack.c.l.b16 %v1204_v27  ;;  %v2134_v27 = vshll.u32 %v11079_v8, 16  ;;  %v1208_v5 = vsel %vm10438_vm7, %v8895_v26, %v1207_v54  ;;  %v11096_v19 = vld [vmem:[%s10198_s30 + $0xbc] sm:$0x1]  ;;  %v4266_v54 = vld [vmem:[%s10198_s30 + $0x34] sm:$0xf] }
 0x157   : > { %v1704_v25 = vadd.f32 %v10986_v1, %v1414_v40  ;;  %v2587_v40 = vunpack.c.l.b16 %v2544_v18  ;;  %v2131_v34 = vor.u32 %v2130_v53, %v11073_v21  ;;  %v1248_v35 = vunpack.c.l.b16 %v1208_v5 }
 0x158   : > { %v2121_v38 = vor.u32 %v2120_v30, %v2117_v15  ;;  %v9968_v15 = vld [vmem:[%s10198_s30 + $0xa8] sm:$0xff]  ;;  %v11110_v30 = vpack.c.b16 %v1247_v44, %v1246_v12 }
 0x159   : > { %v11070_v1 = vpop.f32.mrf.mxu0  ;;  %v2357_v16 = vadd.f32 %v2286_v43, %v1704_v25  ;;  %v1211_v25 = vsel %vm10438_vm7, %v1209_v2, %v1210_v46  ;;  %v2605_v53 = vpack.c.b16 %v2587_v40, %v2586_v39  ;;  %v4294_v2 = vld [vmem:[%s10198_s30 + $0x38] sm:$0x1]  ;;  %v4416_v39 = vshrl.u32 %v4266_v54, 16 }
 0x15a   : > { %v11099_v51 = vrot.slane %v2121_v38, 4  ;;  %v1249_v46 = vunpack.c.l.b16 %v1211_v25  ;;  %v2550_v40 = vrot.slane %v11079_v8, 5 }
 0x15b   : > { %v11081_v59 = vpop.f32.mrf.mxu1  ;;  %v11087_v7 = vadd.f32 %v10964_v61, %v2357_v16  ;;  %v4265_v61 = vld [vmem:[%s10198_s30 + $0x30] sm:$0xf]  ;;  %v2547_v16 = vrot.slane %v11057_v50, 5 }
 0x15c   : > { %v1345_v11 = vpop.f32.mrf.mxu2  ;;  %v4403_v38 = vshrl.u32 %v4265_v61, 16  ;;  %v2127_v12 = vsel %vm10223_vm4, %v11099_v51, %v11073_v21  ;;  %v4406_v44 = vshll.u32 %v4265_v61, 16  ;;  %v4418_v51 = vrot.slane %v4416_v39, 4 }
 0x15d   : > { %14467 = vst [vmem:[#allocation18_spill] sm:$0xff] %v11087_v7  ;;  %v1415_v43 = vadd.f32 %v1345_v11, %v10599_v41  ;;  %v2207_v41 = vpack.c.b16 %v11046_v36, %v11044_v28  ;;  %v11120_v28 = vrot.slane %v2134_v27, 5  ;;  %v9119_v36 = vrot.slane %v9103_v49, 9 }
 0x15e   : > { %v11106_v31 = vpop.f32.mrf.mxu3  ;;  %v4412_v11 = vshll.u32 %v4266_v54, 16  ;;  %v4405_v27 = vrot.slane %v4403_v38, 4  ;;  %v2549_v25 = vrot.slane %v2547_v16, 4  ;;  %v4408_v21 = vrot.slane %v4406_v44, 5 }
 0x15f   : > { %v1705_v18 = vadd.f32 %v11018_v6, %v1415_v43  ;;  %v11118_v6 = vrot.slane %v2131_v34, 4  ;;  %v4422_v43 = vshll.u32 %v4294_v2, 16  ;;  %v2548_v8 = vsel %vm10438_vm7, %v9119_v36, %v2547_v16 }
 0x160   : > { %v4414_v34 = vrot.slane %v4412_v11, 5  ;;  %v4409_v54 = vor.u32 %v4408_v21, %v4405_v27  ;;  %v2551_v44 = vsel %vm10438_vm7, %v2549_v25, %v2550_v40  ;;  %v9070_v11 = vld [vmem:[%s10198_s30 + $0xc0] sm:$0xf]  ;;  %v10066_v27 = vld [vmem:[%s10198_s30 + $0xb8] sm:$0xf] }
 0x161   : > { %v11115_v26 = vpop.f32.mrf.mxu0  ;;  %8909 = vmatmul.msk.bf16.gmra.mxu2 %vm694_vm1, %v1264_v37  ;;  %v11129_v37 = vpack.c.b16 %v1249_v46, %v1248_v35  ;;  %v2137_v61 = vsel %vm10223_vm4, %v11118_v6, %v11120_v28  ;;  %v4269_v35 = vld [vmem:[%s10198_s30 + $0x48] sm:$0xf]  ;;  %v4270_v46 = vld [vmem:[%s10198_s30 + $0x4c] sm:$0xf] }
 0x162   : > { %v4451_v2 = vshrl.u32 %v4269_v35, 16  ;;  %v4454_v28 = vshll.u32 %v4269_v35, 16  ;;  %v4460_v16 = vshll.u32 %v4270_v46, 16  ;;  %v4464_v36 = vshrl.u32 %v4270_v46, 16 }
 0x163   : > { %v11127_v50 = vpop.f32.mrf.mxu1  ;;  %9022 = vmatmul.msk.bf16.gmra.mxu3 %vm694_vm1, %v9968_v15  ;;  %v4419_v15 = vor.u32 %v4418_v51, %v4414_v34 }
 0x164   : > { %14468 = vst [vmem:[#allocation19_spill] sm:$0xff] %v11127_v50  ;;  %9085 = vmatmul.msk.bf16.gmra.mxu0 %vm694_vm1, %v2207_v41  ;;  %v1348_v5 = vpop.f32.mrf.mxu2  ;;  %v2358_v41 = vadd.f32 %v11070_v1, %v1705_v18  ;;  %v4410_v1 = vrot.slane %v4409_v54, 4  ;;  %v4462_v21 = vrot.slane %v4460_v16, 5  ;;  %v4466_v25 = vrot.slane %v4464_v36, 4 }
 0x165   : > { %v1416_v49 = vadd.f32 %v1348_v5, %v10612_v22  ;;  %v4424_v22 = vrot.slane %v4422_v43, 5  ;;  %v4420_v18 = vrot.slane %v4419_v15, 4  ;;  %v1214_v43 = vrot.slane %v10066_v27, 5  ;;  %v4296_v5 = vld [vmem:[%s10198_s30 + $0x50] sm:$0x1] }
 0x166   : > { %9134 = vmatmul.msk.bf16.gmra.mxu1 %vm694_vm1, %v2605_v53  ;;  %v11148_v6 = vpop.f32.mrf.mxu3  ;;  %v4453_v53 = vrot.slane %v4451_v2, 4  ;;  %v11158_v51 = vadd.f32 %v10996_v13, %v2358_v41  ;;  %v4470_v35 = vshll.u32 %v4296_v5, 16  ;;  %v2588_v54 = vunpack.c.l.b16 %v2548_v8  ;;  %v9071_v41 = vld [vmem:[%s10198_s30 + $0xc4] sm:$0xf] }
 0x167   : > { %v11146_v38 = vadd.f32 %v11060_v3, %v1416_v49  ;;  %v4456_v3 = vrot.slane %v4454_v28, 5  ;;  %v4415_v49 = vsel %vm10223_vm4, %v4410_v1, %v4414_v34  ;;  %v4425_v40 = vsel %vm10223_vm4, %v4420_v18, %v4424_v22  ;;  %v1071_v28 = vld [vmem:[%s10198_s30 + $0xb4] sm:$0xe] }
 0x168   : > { %14469 = vst [vmem:[#allocation20_spill] sm:$0xff] %v11158_v51  ;;  %v2589_v15 = vunpack.c.l.b16 %v2551_v44  ;;  %v4699_v2 = vunpack.c.l.b16 %v4415_v49  ;;  %v4700_v27 = vunpack.c.l.b16 %v4425_v40  ;;  %v4467_v24 = vor.u32 %v4466_v25, %v4462_v21  ;;  %v9104_v40 = vld [vmem:[%s10198_s30 + $0xc0] sm:$0xe] }
 0x169   : > { %v11153_v39 = vpop.f32.mrf.mxu0  ;;  %v4457_v52 = vor.u32 %v4456_v3, %v4453_v53  ;;  %v4472_v13 = vrot.slane %v4470_v35, 5  ;;  %v2139_v51 = vshrl.u32 %v9070_v11, 16  ;;  %v11169_v22 = vunpack.c.l.b16 %v2127_v12 }
 0x16a   : > { %v11171_v36 = vunpack.c.l.b16 %v2137_v61  ;;  %v4727_v1 = vpack.c.b16 %v4700_v27, %v4699_v2  ;;  %v8896_v8 = vrot.slane %v1071_v28, 9  ;;  %v1216_v44 = vrot.slane %v1214_v43, 4  ;;  %v9969_v61 = vld [vmem:[%s10198_s30 + $0xb4] sm:$0xff] }
 0x16b   : > { %v11164_v46 = vpop.f32.mrf.mxu1  ;;  %v4458_v18 = vrot.slane %v4457_v52, 4  ;;  %v4468_v5 = vrot.slane %v4467_v24, 4  ;;  %v2142_v49 = vshll.u32 %v9070_v11, 16  ;;  %v2152_v12 = vshrl.u32 %v9071_v41, 16  ;;  %v9072_v24 = vld [vmem:[%s10198_s30 + $0xc8] sm:$0x1] }
 0x16c   : > { %14470 = vst [vmem:[#allocation21_spill] sm:$0xff] %v11164_v46  ;;  %v1350_v16 = vpop.f32.mrf.mxu2  ;;  %4747 = vrot.lane.b32.xlu2 %v4727_v1, %s10141_s14  ;;  %v2606_v25 = vpack.c.b16 %v2589_v15, %v2588_v54  ;;  %v2141_v2 = vrot.slane %v2139_v51, 4  ;;  %v9120_v15 = vrot.slane %v9104_v40, 9  ;;  %v14471_v1 = vrot.slane %v11096_v19, 5 }
 0x16d   : > { %v1417_v34 = vadd.f32 %v1350_v16, %v10631_v23  ;;  %v2148_v23 = vshll.u32 %v9071_v41, 16  ;;  %v4463_v35 = vsel %vm10223_vm4, %v4458_v18, %v4462_v21  ;;  %v4473_v52 = vsel %vm10223_vm4, %v4468_v5, %v4472_v13 }
 0x16e   : > { %v11176_v3 = vpop.f32.mrf.mxu3  ;;  %v4703_v11 = vunpack.c.l.b16 %v4463_v35  ;;  %v4704_v28 = vunpack.c.l.b16 %v4473_v52  ;;  %v2144_v16 = vrot.slane %v2142_v49, 5  ;;  %v11195_v21 = vsel %vm10438_vm7, %v8896_v8, %v1214_v43  ;;  %v4268_v49 = vld [vmem:[%s10198_s30 + $0x40] sm:$0xf] }
 0x16f   : > { %v11174_v53 = vadd.f32 %v11106_v31, %v1417_v34  ;;  %v4267_v31 = vld [vmem:[%s10198_s30 + $0x3c] sm:$0xf]  ;;  %v11191_v34 = vrot.slane %v2148_v23, 5  ;;  %v2154_v54 = vrot.slane %v2152_v12, 4  ;;  %v2554_v13 = vrot.slane %v9071_v41, 5 }
 0x170   : > { %v11203_v18 = vsel %vm10438_vm7, %v1216_v44, %v14471_v1  ;;  %v2158_v5 = vshll.u32 %v9072_v24, 16  ;;  %v4427_v23 = vshrl.u32 %v4267_v31, 16  ;;  %v14472_v35 = vpack.c.b16 %v11083_v33, %v11075_v55  ;;  %v11233_v1 = vld [vmem:[%s10198_s30 + $0x1c] sm:$0xf] }
 0x171   : > { %v11187_v27 = vpop.f32.mrf.mxu0  ;;  %8910 = vmatmul.msk.bf16.gmra.mxu2 %vm694_vm1, %v11110_v30  ;;  %v4729_v30 = vpack.c.b16 %v4704_v28, %v4703_v11  ;;  %v2145_v41 = vor.u32 %v2144_v16, %v2141_v2  ;;  %v2556_v8 = vrot.slane %v2554_v13, 4  ;;  %v2557_v19 = vrot.slane %v9072_v24, 5  ;;  %v4295_v24 = vld [vmem:[%s10198_s30 + $0x44] sm:$0x1] }
 0x172   : > { %v4430_v12 = vshll.u32 %v4267_v31, 16  ;;  %v2155_v55 = vor.u32 %v2154_v54, %v11191_v34  ;;  %v4429_v33 = vrot.slane %v4427_v23, 4  ;;  %v11220_v52 = vsel %vm10438_vm7, %v9120_v15, %v2554_v13 }
 0x173   : > { %v11197_v51 = vpop.f32.mrf.mxu1  ;;  %9023 = vmatmul.msk.bf16.gmra.mxu3 %vm694_vm1, %v9969_v61  ;;  %4751 = vrot.lane.b32.xlu0 %v4729_v30, %s10141_s14  ;;  %v4436_v2 = vshll.u32 %v4268_v49, 16  ;;  %v11229_v16 = vrot.slane %v2158_v5, 5  ;;  %v4440_v54 = vshrl.u32 %v4268_v49, 16  ;;  %v11235_v30 = vrot.slane %v2145_v41, 4 }
 0x174   : > { %9086 = vmatmul.msk.bf16.gmra.mxu0 %vm694_vm1, %v14472_v35  ;;  %v1353_v43 = vpop.f32.mrf.mxu2  ;;  %v2558_v15 = vsel %vm10438_vm7, %v2556_v8, %v2557_v19  ;;  %v11241_v35 = vrot.slane %v2155_v55, 4  ;;  %v2590_v5 = vunpack.c.l.b16 %v11220_v52  ;;  %v4446_v49 = vshll.u32 %v4295_v24, 16 }
 0x175   : > { %v1418_v44 = vadd.f32 %v1353_v43, %v10647_v63  ;;  %v4432_v63 = vrot.slane %v4430_v12, 5  ;;  %v4438_v23 = vrot.slane %v4436_v2, 5  ;;  %v4442_v43 = vrot.slane %v4440_v54, 4  ;;  %v4271_v2 = vld [vmem:[%s10198_s30 + $0x54] sm:$0xf] }
 0x176   : > { %9135 = vmatmul.msk.bf16.gmra.mxu1 %vm694_vm1, %v2606_v25  ;;  %v11226_v11 = vpop.f32.mrf.mxu3  ;;  %v9249_v25 = vld [vmem:[%s10198_s30 + $0x18] sm:$0xf]  ;;  %v3128_v28 = vshll.u32 %v11233_v1, 16  ;;  %v2591_v8 = vunpack.c.l.b16 %v2558_v15  ;;  %v3132_v55 = vshrl.u32 %v11233_v1, 16  ;;  %v4475_v56 = vshrl.u32 %v4271_v2, 16 }
 0x177   : > { %v11224_v31 = vadd.f32 %v11148_v6, %v1418_v44  ;;  %v4433_v13 = vor.u32 %v4432_v63, %v4429_v33  ;;  %v3119_v44 = vshrl.u32 %v9249_v25, 16  ;;  %v3122_v41 = vshll.u32 %v9249_v25, 16  ;;  %v11248_v63 = vld [vmem:[%s10198_s30 + $0x20] sm:$0x1] }
 0x178   : > { %v4443_v19 = vor.u32 %v4442_v43, %v4438_v23  ;;  %v4448_v33 = vrot.slane %v4446_v49, 5  ;;  %v3130_v25 = vrot.slane %v3128_v28, 5  ;;  %v3134_v49 = vrot.slane %v3132_v55, 4 }
 0x179   : > { %v11239_v6 = vpop.f32.mrf.mxu0  ;;  %v4434_v12 = vrot.slane %v4433_v13, 4  ;;  %v3121_v24 = vrot.slane %v3119_v44, 4  ;;  %v3124_v54 = vrot.slane %v3122_v41, 5  ;;  %v4272_v13 = vld [vmem:[%s10198_s30 + $0x58] sm:$0xf]  ;;  %v3138_v17 = vshll.u32 %v11248_v63, 16 }
 0x17a   : > { %v4444_v15 = vrot.slane %v4443_v19, 4  ;;  %v4478_v47 = vshll.u32 %v4271_v2, 16  ;;  %v4297_v44 = vld [vmem:[%s10198_s30 + $0x5c] sm:$0x1]  ;;  %v4484_v41 = vshll.u32 %v4272_v13, 16  ;;  %v4477_v2 = vrot.slane %v4475_v56, 4 }
 0x17b   : > { %v11245_v61 = vpop.f32.mrf.mxu1  ;;  %v4439_v52 = vsel %vm10223_vm4, %v4434_v12, %v4438_v23  ;;  %v3125_v0 = vor.u32 %v3124_v54, %v3121_v24  ;;  %v3135_v12 = vor.u32 %v3134_v49, %v3130_v25  ;;  %v4494_v54 = vshll.u32 %v4297_v44, 16 }
 0x17c   : > { %v1355_v40 = vpop.f32.mrf.mxu2  ;;  %v4701_v43 = vunpack.c.l.b16 %v4439_v52  ;;  %v4449_v28 = vsel %vm10223_vm4, %v4444_v15, %v4448_v33  ;;  %v4480_v33 = vrot.slane %v4478_v47, 5  ;;  %v4486_v24 = vrot.slane %v4484_v41, 5 }
 0x17d   : > { %v1419_v7 = vadd.f32 %v1355_v40, %v10674_v29  ;;  %v9970_v29 = vld [vmem:[%s10198_s30 + $0xc0] sm:$0xff]  ;;  %v2151_v40 = vsel %vm10223_vm4, %v11235_v30, %v11191_v34  ;;  %v4702_v19 = vunpack.c.l.b16 %v4449_v28  ;;  %v3126_v55 = vrot.slane %v3125_v0, 4 }
 0x17e   : > { %v11260_v23 = vpop.f32.mrf.mxu3  ;;  %v4488_v34 = vshrl.u32 %v4272_v13, 16  ;;  %v2607_v30 = vpack.c.b16 %v2591_v8, %v2590_v5  ;;  %v3136_v49 = vrot.slane %v3135_v12, 4  ;;  %v4481_v28 = vor.u32 %v4480_v33, %v4477_v2  ;;  %v11317_v2 = vld [vmem:[%s10198_s30 + $0x28] sm:$0xf] }
 0x17f   : > { %v11258_v46 = vadd.f32 %v11176_v3, %v1419_v7  ;;  %v2161_v7 = vsel %vm10223_vm4, %v11241_v35, %v11229_v16  ;;  %v4289_v3 = vld [vmem:[%s14442_s1 + $0x10] sm:$0xc]  ;;  %v4728_v0 = vpack.c.b16 %v4702_v19, %v4701_v43  ;;  %v14473_v16 = vpack.c.b16 %v11171_v36, %v11169_v22  ;;  %v5327_v22 = vld [vmem:[%s14442_s1 + $0x14] sm:$0xc] }
 0x180   : > { %v5024_v56 = vunpack.c.l.b16 %v4289_v3  ;;  %v4490_v50 = vrot.slane %v4488_v34, 4  ;;  %v14474_v47 = vunpack.c.l.b16 %v11195_v21  ;;  %v14475_v5 = vunpack.c.l.b16 %v11203_v18  ;;  %v9313_v34 = vld [vmem:[%s10198_s30 + $0x18] sm:$0xe] }
 0x181   : > { %v11270_v52 = vpop.f32.mrf.mxu0  ;;  %8911 = vmatmul.msk.bf16.gmra.mxu2 %vm694_vm1, %v11129_v37  ;;  %v3140_v37 = vrot.slane %v3138_v17, 5  ;;  %v3131_v17 = vsel %vm10223_vm4, %v3126_v55, %v3130_v25  ;;  %4749 = vrot.lane.b32.xlu2 %v4728_v0, %s10141_s14  ;;  %v4482_v43 = vrot.slane %v4481_v28, 4  ;;  %v4496_v21 = vrot.slane %v4494_v54, 5  ;;  %v11329_v28 = vld [vmem:[%s10198_s30 + $0x2c] sm:$0x1] }
 0x182   : > { %v11292_v8 = vpack.c.b16 %v14475_v5, %v14474_v47  ;;  %v5025_v13 = vpack.c.b16 %v5024_v56, %v5024_v56  ;;  %v4491_v12 = vor.u32 %v4490_v50, %v4486_v24  ;;  %v11301_v18 = vunpack.c.l.b16 %v2151_v40 }
 0x183   : > { %v11281_v15 = vpop.f32.mrf.mxu1  ;;  %9024 = vmatmul.msk.bf16.gmra.mxu3 %vm694_vm1, %v9970_v29  ;;  %v11303_v44 = vunpack.c.l.b16 %v2161_v7  ;;  %v5409_v41 = vunpack.c.l.b16 %v5327_v22  ;;  %v9252_v29 = vld [vmem:[%s10198_s30 + $0x24] sm:$0xf]  ;;  %v3141_v55 = vsel %vm10223_vm4, %v3136_v49, %v3140_v37  ;;  %v4487_v50 = vsel %vm10223_vm4, %v4482_v43, %v4486_v24  ;;  %v5616_v22 = vld [vmem:[%s14442_s1 + $0x18] sm:$0x3] }
 0x184   : > { %9087 = vmatmul.msk.bf16.gmra.mxu0 %vm694_vm1, %v14473_v16  ;;  %v1358_v35 = vpop.f32.mrf.mxu2  ;;  %v5026_v25 = vrot.slane %v5025_v13, 2  ;;  %v4492_v40 = vrot.slane %v4491_v12, 4  ;;  %v11319_v7 = vunpack.c.l.b16 %v3131_v17  ;;  %v4705_v33 = vunpack.c.l.b16 %v4487_v50 }
 0x185   : > { %v1420_v36 = vadd.f32 %v1358_v35, %v10705_v60  ;;  %v5410_v56 = vpack.c.b16 %v5409_v41, %v5409_v41  ;;  %v3143_v24 = vshrl.u32 %v9252_v29, 16  ;;  %v3146_v54 = vshll.u32 %v9252_v29, 16 }
 0x186   : > { %9136 = vmatmul.msk.bf16.gmra.mxu1 %vm694_vm1, %v2607_v30  ;;  %v11310_v60 = vpop.f32.mrf.mxu3  ;;  %v5076_v3 = vsel %vm743_vm0, %v5026_v25, 0  ;;  %v4497_v0 = vsel %vm10223_vm4, %v4492_v40, %v4496_v21  ;;  %v3504_v49 = vunpack.c.l.b16 %v3141_v55  ;;  %v3152_v16 = vshll.u32 %v11317_v2, 16 }
 0x187   : > { %v11308_v19 = vadd.f32 %v11226_v11, %v1420_v36  ;;  %v3793_v11 = vrot.slane %v11233_v1, 5  ;;  %5085 = vmatpush.bf16.msrb.mxu2 %v5076_v3  ;;  %v4706_v37 = vunpack.c.l.b16 %v4497_v0  ;;  %v3156_v35 = vshrl.u32 %v11317_v2, 16 }
 0x188   : > { %v9329_v1 = vrot.slane %v9313_v34, 9  ;;  %v5411_v5 = vrot.slane %v5410_v56, 2  ;;  %v3145_v17 = vrot.slane %v3143_v24, 4  ;;  %v3148_v13 = vrot.slane %v3146_v54, 5  ;;  %v6333_v34 = vld [vmem:[%s14442_s1 + $0x18] sm:$0xc] }
 0x189   : > { %v11324_v30 = vpop.f32.mrf.mxu0  ;;  %v4730_v43 = vpack.c.b16 %v4706_v37, %v4705_v33  ;;  %v3796_v12 = vrot.slane %v11248_v63, 5  ;;  %v11339_v21 = vrot.slane %v3152_v16, 5  ;;  %v3158_v25 = vrot.slane %v3156_v35, 4  ;;  %v9255_v37 = vld [vmem:[%s10198_s30 + $0x30] sm:$0xf] }
 0x18a   : > { %v3795_v29 = vrot.slane %v3793_v11, 4  ;;  %v5461_v55 = vsel %vm743_vm0, %v5411_v5, 0  ;;  %v3149_v50 = vor.u32 %v3148_v13, %v3145_v17  ;;  %v3162_v3 = vshll.u32 %v11329_v28, 16  ;;  %v11372_v5 = vld [vmem:[%s10198_s30 + $0x24] sm:$0xe] }
 0x18b   : > { %v11333_v47 = vpop.f32.mrf.mxu1  ;;  %4753 = vrot.lane.b32.xlu1 %v4730_v43, %s10141_s14  ;;  %5470 = vmatpush.bf16.msrb.mxu3 %v5461_v55  ;;  %v3159_v40 = vor.u32 %v3158_v25, %v11339_v21  ;;  %v5778_v63 = vsel %vm743_vm0, %v5616_v22, 0  ;;  %v2210_v0 = vpack.c.b16 %v11303_v44, %v11301_v18  ;;  %v3535_v56 = vpack.c.b16 %v3504_v49, %v11319_v7  ;;  %v11375_v18 = vld [vmem:[%s10198_s30 + $0x34] sm:$0xf] }
 0x18c   : > { %v1360_v36 = vpop.f32.mrf.mxu2  ;;  %5787 = vmatpush.bf16.msrb.mxu0 %v5778_v63  ;;  %v11360_v24 = vsel %vm10438_vm7, %v9329_v1, %v3793_v11  ;;  %v6415_v54 = vunpack.c.l.b16 %v6333_v34  ;;  %v11369_v16 = vsel %vm10438_vm7, %v3795_v29, %v3796_v12  ;;  %v3150_v35 = vrot.slane %v3149_v50, 4  ;;  %v4276_v63 = vld [vmem:[%s10198_s30 + $0x70] sm:$0xf] }
 0x18d   : > { %v1421_v41 = vadd.f32 %v1360_v36, %v10736_v32  ;;  %v3160_v44 = vrot.slane %v3159_v40, 4  ;;  %v3164_v7 = vrot.slane %v3162_v3, 5  ;;  %v14445_v49 = vrot.slane %v11317_v2, 5  ;;  %v4275_v3 = vld [vmem:[%s10198_s30 + $0x6c] sm:$0xf] }
 0x18e   : > { %v11350_v32 = vpop.f32.mrf.mxu3  ;;  %v6416_v11 = vpack.c.b16 %v6415_v54, %v6415_v54  ;;  %v3904_v17 = vunpack.c.l.b16 %v11360_v24  ;;  %v3167_v13 = vshrl.u32 %v9255_v37, 16  ;;  %v3170_v22 = vshll.u32 %v9255_v37, 16 }
 0x18f   : > { %v11348_v33 = vadd.f32 %v11260_v23, %v1421_v41  ;;  %v3905_v43 = vunpack.c.l.b16 %v11369_v16  ;;  %v9330_v25 = vrot.slane %v11372_v5, 9  ;;  %v3176_v41 = vshll.u32 %v11375_v18, 16 }
 0x190   : > { %v6417_v12 = vrot.slane %v6416_v11, 2  ;;  %v3155_v55 = vsel %vm10223_vm4, %v3150_v35, %v11339_v21  ;;  %v3803_v50 = vrot.slane %v11329_v28, 5  ;;  %v3180_v40 = vshrl.u32 %v11375_v18, 16  ;;  %v11410_v11 = vld [vmem:[%s10198_s30 + $0x38] sm:$0x1] }
 0x191   : > { %v11363_v23 = vpop.f32.mrf.mxu0  ;;  %8912 = vmatmul.msk.bf16.gmra.mxu2 %vm694_vm1, %v11292_v8  ;;  %v4740_v8 = vpop.permute.xlu0 %4739  ;;  %v3165_v34 = vsel %vm10223_vm4, %v3160_v44, %v3164_v7  ;;  %v3169_v24 = vrot.slane %v3167_v13, 4  ;;  %v3172_v54 = vrot.slane %v3170_v22, 5  ;;  %v4526_v37 = vshll.u32 %v4275_v3, 16 }
 0x192   : > { %v11405_v16 = vrot.slane %v3176_v41, 5  ;;  %v4532_v5 = vshll.u32 %v4276_v63, 16  ;;  %v4536_v44 = vshrl.u32 %v4276_v63, 16  ;;  %v2360_v13 = vadd.f32 %v11153_v39, %v11174_v53 }
 0x193   : > { %v11378_v1 = vpop.f32.mrf.mxu1  ;;  %9297 = vmatmul.msk.bf16.vlgmr.msra.gmra.mxu3 %vm694_vm1, %v3535_v56  ;;  %v4523_v56 = vshrl.u32 %v4275_v3, 16  ;;  %v3505_v22 = vunpack.c.l.b16 %v3155_v55  ;;  %v3506_v41 = vunpack.c.l.b16 %v3165_v34  ;;  %v11428_v53 = vadd.f32 %v11187_v27, %v11224_v31  ;;  %v9971_v34 = vld [vmem:[%s10198_s30 + $0x18] sm:$0xff] }
 0x194   : > { %9088 = vmatmul.msk.bf16.gmra.mxu0 %vm694_vm1, %v2210_v0  ;;  %v1363_v36 = vpop.f32.mrf.mxu2  ;;  %v6467_v0 = vsel %vm743_vm0, %v6417_v12, 0  ;;  %v4528_v12 = vrot.slane %v4526_v37, 5  ;;  %v4538_v3 = vrot.slane %v4536_v44, 4  ;;  %v11424_v39 = vadd.f32 %v11081_v59, %v2360_v13 }
 0x195   : > { %v1422_v29 = vadd.f32 %v1363_v36, %v10763_v58  ;;  %v3802_v58 = vrot.slane %v14445_v49, 4  ;;  %6476 = vmatpush.bf16.msrb.mxu1 %v6467_v0  ;;  %v4525_v35 = vrot.slane %v4523_v56, 4  ;;  %v4299_v36 = vld [vmem:[%s10198_s30 + $0x74] sm:$0x1]  ;;  %v3173_v0 = vor.u32 %v3172_v54, %v3169_v24  ;;  %14478 = vst [vmem:[#allocation24_spill] sm:$0xff] %v11428_v53 }
 0x196   : > { %9361 = vmatmul.msk.bf16.vlgmr.msra.gmra.mxu1 %vm694_vm1, %v4740_v8  ;;  %v11403_v28 = vpop.f32.mrf.mxu3  ;;  %v3182_v8 = vrot.slane %v3180_v40, 4  ;;  %v4542_v49 = vshll.u32 %v4299_v36, 16  ;;  %14477 = vst [vmem:[#allocation23_spill] sm:$0xff] %v11424_v39  ;;  %v14479_v44 = vrot.slane %v11317_v2, 5 }
 0x197   : > { %v11401_v21 = vadd.f32 %v11310_v60, %v1422_v29  ;;  %v2359_v60 = vadd.f32 %v11115_v26, %v11146_v38  ;;  %v4534_v29 = vrot.slane %v4532_v5, 5  ;;  %v4529_v56 = vor.u32 %v4528_v12, %v4525_v35  ;;  %v4273_v35 = vld [vmem:[%s10198_s30 + $0x60] sm:$0xf] }
 0x198   : > { %v3186_v26 = vshll.u32 %v11410_v11, 16  ;;  %v3183_v24 = vor.u32 %v3182_v8, %v11405_v16  ;;  %v3936_v5 = vpack.c.b16 %v3905_v43, %v3904_v17  ;;  %v11438_v36 = vsel %vm10438_vm7, %v9330_v25, %v14479_v44  ;;  %v4274_v17 = vld [vmem:[%s10198_s30 + $0x64] sm:$0xf] }
 0x199   : > { %v11407_v7 = vpop.f32.mrf.mxu0  ;;  %v11420_v40 = vadd.f32 %v11029_v9, %v2359_v60  ;;  %v4539_v38 = vor.u32 %v4538_v3, %v4534_v29  ;;  %v4530_v54 = vrot.slane %v4529_v56, 4  ;;  %v4544_v9 = vrot.slane %v4542_v49, 5 }
 0x19a   : > { %v4499_v2 = vshrl.u32 %v4273_v35, 16  ;;  %v3536_v43 = vpack.c.b16 %v3506_v41, %v3505_v22  ;;  %v3174_v8 = vrot.slane %v3173_v0, 4  ;;  %v3184_v60 = vrot.slane %v3183_v24, 4  ;;  %v4742_v41 = vpop.permute.xlu0 %4741 }
 0x19b   : > { %v11417_v63 = vpop.f32.mrf.mxu1  ;;  %14476 = vst [vmem:[#allocation22_spill] sm:$0xff] %v11420_v40  ;;  %v4540_v59 = vrot.slane %v4539_v38, 4  ;;  %v4535_v49 = vsel %vm10223_vm4, %v4530_v54, %v4534_v29  ;;  %v3188_v13 = vrot.slane %v3186_v26, 5  ;;  %v4502_v56 = vshll.u32 %v4273_v35, 16 }
 0x19c   : > { %v1365_v37 = vpop.f32.mrf.mxu2  ;;  %v4709_v12 = vunpack.c.l.b16 %v4535_v49  ;;  %v4501_v3 = vrot.slane %v4499_v2, 4  ;;  %v4508_v29 = vshll.u32 %v4274_v17, 16  ;;  %v3179_v26 = vsel %vm10223_vm4, %v3174_v8, %v11405_v16  ;;  %v11473_v49 = vld [vmem:[%s10198_s30 + $0x40] sm:$0xf] }
 0x19d   : > { %v1423_v55 = vadd.f32 %v1365_v37, %v10796_v4  ;;  %v11447_v4 = vsel %vm10438_vm7, %v3802_v58, %v3803_v50  ;;  %v4545_v25 = vsel %vm10223_vm4, %v4540_v59, %v4544_v9  ;;  %v4298_v58 = vld [vmem:[%s10198_s30 + $0x68] sm:$0x1]  ;;  %v4512_v37 = vshrl.u32 %v4274_v17, 16  ;;  %v4277_v17 = vld [vmem:[%s10198_s30 + $0x78] sm:$0xf] }
 0x19e   : > { %v11443_v31 = vpop.f32.mrf.mxu3  ;;  %v4710_v50 = vunpack.c.l.b16 %v4545_v25  ;;  %v4518_v38 = vshll.u32 %v4298_v58, 16  ;;  %v4510_v24 = vrot.slane %v4508_v29, 5  ;;  %v3906_v44 = vunpack.c.l.b16 %v11438_v36  ;;  %v4278_v25 = vld [vmem:[%s10198_s30 + $0x7c] sm:$0xf] }
 0x19f   : > { %v11441_v27 = vadd.f32 %v11350_v32, %v1423_v55  ;;  %v9258_v55 = vld [vmem:[%s10198_s30 + $0x3c] sm:$0xf]  ;;  %v4514_v9 = vrot.slane %v4512_v37, 4  ;;  %v3907_v59 = vunpack.c.l.b16 %v11447_v4  ;;  %v11483_v4 = vunpack.c.l.b16 %v3179_v26 }
 0x1a0   : > { %v4732_v0 = vpack.c.b16 %v4710_v50, %v4709_v12  ;;  %v3191_v8 = vshrl.u32 %v9258_v55, 16  ;;  %v3194_v12 = vshll.u32 %v9258_v55, 16  ;;  %v3200_v58 = vshll.u32 %v11473_v49, 16 }
 0x1a1   : > { %v11454_v32 = vpop.f32.mrf.mxu0  ;;  %9233 = vmatmul.msk.bf16.vlgmr.msra.gmra.mxu2 %vm694_vm1, %v9971_v34  ;;  %v4504_v34 = vrot.slane %v4502_v56, 5  ;;  %v4515_v2 = vor.u32 %v4514_v9, %v4510_v24  ;;  %v4560_v26 = vshrl.u32 %v4278_v25, 16  ;;  %v3937_v53 = vpack.c.b16 %v3907_v59, %v3906_v44 }
 0x1a2   : > { %4757 = vrot.lane.b32.xlu0 %v4732_v0, %s10141_s14  ;;  %v3193_v55 = vrot.slane %v3191_v8, 4 }
 0x1a3   : > { %v11458_v22 = vpop.f32.mrf.mxu1  ;;  %9298 = vmatmul.msk.bf16.gmra.mxu3 %vm694_vm1, %v3536_v43  ;;  %v4505_v16 = vor.u32 %v4504_v34, %v4501_v3  ;;  %v4520_v43 = vrot.slane %v4518_v38, 5  ;;  %v4516_v50 = vrot.slane %v4515_v2, 4  ;;  %v3204_v3 = vshrl.u32 %v11473_v49, 16 }
 0x1a4   : > { %9345 = vmatmul.msk.bf16.vlgmr.msra.gmra.mxu0 %vm694_vm1, %v3936_v5  ;;  %v1368_v54 = vpop.f32.mrf.mxu2  ;;  %v3189_v5 = vsel %vm10223_vm4, %v3184_v60, %v3188_v13  ;;  %v4547_v60 = vshrl.u32 %v4277_v17, 16  ;;  %v4550_v38 = vshll.u32 %v4277_v17, 16  ;;  %v11496_v17 = vrot.slane %v3200_v58, 5 }
 0x1a5   : > { %v1424_v35 = vadd.f32 %v1368_v54, %v10490_v62  ;;  %v4506_v13 = vrot.slane %v4505_v16, 4  ;;  %v3508_v29 = vunpack.c.l.b16 %v3189_v5  ;;  %v4521_v0 = vsel %vm10223_vm4, %v4516_v50, %v4520_v43  ;;  %v4300_v54 = vld [vmem:[%s10198_s30 + $0x80] sm:$0x1]  ;;  %v9972_v43 = vld [vmem:[%s10198_s30 + $0x24] sm:$0xff] }
 0x1a6   : > { %9362 = vmatmul.msk.bf16.gmra.mxu1 %vm694_vm1, %v4742_v41  ;;  %v11481_v36 = vpop.f32.mrf.mxu3  ;;  %v4549_v37 = vrot.slane %v4547_v60, 4  ;;  %v3196_v16 = vrot.slane %v3194_v12, 5  ;;  %v4552_v5 = vrot.slane %v4550_v38, 5  ;;  %v3206_v60 = vrot.slane %v3204_v3, 4  ;;  %v11501_v50 = vld [vmem:[%s10198_s30 + $0x44] sm:$0x1] }
 0x1a7   : > { %v11479_v62 = vadd.f32 %v11403_v28, %v1424_v35  ;;  %v4556_v28 = vshll.u32 %v4278_v25, 16  ;;  %v4511_v41 = vsel %vm10223_vm4, %v4506_v13, %v4510_v24  ;;  %v4708_v35 = vunpack.c.l.b16 %v4521_v0 }
 0x1a8   : > { %v4707_v9 = vunpack.c.l.b16 %v4511_v41  ;;  %v4562_v13 = vrot.slane %v4560_v26, 4  ;;  %v4553_v25 = vor.u32 %v4552_v5, %v4549_v37  ;;  %v4566_v40 = vshll.u32 %v4300_v54, 16  ;;  %v11526_v5 = vld [vmem:[%s10198_s30 + $0x4c] sm:$0xf] }
 0x1a9   : > { %v11487_v56 = vpop.f32.mrf.mxu0  ;;  %v4558_v24 = vrot.slane %v4556_v28, 5  ;;  %v3807_v41 = vrot.slane %v11375_v18, 5  ;;  %v3537_v3 = vpack.c.b16 %v3508_v29, %v11483_v4  ;;  %v9315_v28 = vld [vmem:[%s10198_s30 + $0x30] sm:$0xe]  ;;  %v3197_v26 = vor.u32 %v3196_v16, %v3193_v55 }
 0x1aa   : > { %v4731_v8 = vpack.c.b16 %v4708_v35, %v4707_v9  ;;  %v4568_v0 = vrot.slane %v4566_v40, 5  ;;  %v3207_v44 = vor.u32 %v3206_v60, %v11496_v17  ;;  %v3210_v18 = vshll.u32 %v11501_v50, 16  ;;  %v4744_v35 = vpop.permute.xlu1 %4743 }
 0x1ab   : > { %v11494_v34 = vpop.f32.mrf.mxu1  ;;  %v4563_v12 = vor.u32 %v4562_v13, %v4558_v24  ;;  %v9331_v4 = vrot.slane %v9315_v28, 9  ;;  %v3809_v54 = vrot.slane %v3807_v41, 4  ;;  %v3810_v9 = vrot.slane %v11410_v11, 5 }
 0x1ac   : > { %v1370_v2 = vpop.f32.mrf.mxu2  ;;  %4755 = vrot.lane.b32.xlu2 %v4731_v8, %s10141_s14  ;;  %v3198_v60 = vrot.slane %v3197_v26, 4  ;;  %v3212_v13 = vrot.slane %v3210_v18, 5  ;;  %v3224_v28 = vshll.u32 %v11526_v5, 16  ;;  %v2365_v26 = vadd.f32 %v11363_v23, %v11401_v21  ;;  %v9316_v23 = vld [vmem:[%s10198_s30 + $0x3c] sm:$0xe] }
 0x1ad   : > { %v1425_v39 = vadd.f32 %v1370_v2, %v10511_v45  ;;  %v4554_v45 = vrot.slane %v4553_v25, 4  ;;  %v4564_v59 = vrot.slane %v4563_v12, 4  ;;  %v3808_v11 = vsel %vm10438_vm7, %v9331_v4, %v3807_v41 }
 0x1ae   : > { %v11507_v38 = vpop.f32.mrf.mxu3  ;;  %v2363_v41 = vadd.f32 %v11270_v52, %v11308_v19  ;;  %v3814_v21 = vrot.slane %v11473_v49, 5 }
 0x1af   : > { %v11505_v58 = vadd.f32 %v11443_v31, %v1425_v39  ;;  %v4559_v39 = vsel %vm10223_vm4, %v4554_v45, %v4558_v24  ;;  %v9261_v31 = vld [vmem:[%s10198_s30 + $0x48] sm:$0xf]  ;;  %v4569_v29 = vsel %vm10223_vm4, %v4564_v59, %v4568_v0  ;;  %v3208_v24 = vrot.slane %v3207_v44, 4 }
 0x1b0   : > { %v4711_v40 = vunpack.c.l.b16 %v4559_v39  ;;  %v4712_v16 = vunpack.c.l.b16 %v4569_v29  ;;  %v3218_v12 = vshll.u32 %v9261_v31, 16  ;;  %v2364_v0 = vadd.f32 %v11324_v30, %v11348_v33 }
 0x1b1   : > { %v11514_v37 = vpop.f32.mrf.mxu0  ;;  %9234 = vmatmul.msk.bf16.gmra.mxu2 %vm694_vm1, %v9972_v43  ;;  %v3215_v43 = vshrl.u32 %v9261_v31, 16  ;;  %v11562_v19 = vadd.f32 %v11197_v51, %v2363_v41  ;;  %v11568_v33 = vadd.f32 %v11281_v15, %v2365_v26  ;;  %v3908_v59 = vunpack.c.l.b16 %v3808_v11 }
 0x1b2   : > { %v4733_v25 = vpack.c.b16 %v4712_v16, %v4711_v40  ;;  %v3220_v52 = vrot.slane %v3218_v12, 5  ;;  %v11565_v30 = vadd.f32 %v11245_v61, %v2364_v0  ;;  %v11576_v31 = vrot.slane %v3224_v28, 5  ;;  %v11603_v12 = vld [vmem:[%s10198_s30 + $0x58] sm:$0xf] }
 0x1b3   : > { %v11522_v55 = vpop.f32.mrf.mxu1  ;;  %9299 = vmatmul.msk.bf16.gmra.mxu3 %vm694_vm1, %v3537_v3  ;;  %v11538_v3 = vadd.f32 %v11239_v6, %v11258_v46  ;;  %v3811_v46 = vsel %vm10438_vm7, %v3809_v54, %v3810_v9  ;;  %v3203_v6 = vsel %vm10223_vm4, %v3198_v60, %v11496_v17  ;;  %v3217_v44 = vrot.slane %v3215_v43, 4  ;;  %v11579_v54 = vld [vmem:[%s10198_s30 + $0x50] sm:$0x1] }
 0x1b4   : > { %9346 = vmatmul.msk.bf16.gmra.mxu0 %vm694_vm1, %v3937_v53  ;;  %v1373_v2 = vpop.f32.mrf.mxu2  ;;  %v3228_v53 = vshrl.u32 %v11526_v5, 16  ;;  %4759 = vrot.lane.b32.xlu1 %v4733_v25, %s10141_s14  ;;  %v2366_v17 = vadd.f32 %v11407_v7, %v11441_v27  ;;  %v3909_v29 = vunpack.c.l.b16 %v3811_v46  ;;  %v3509_v61 = vunpack.c.l.b16 %v3203_v6  ;;  %v9973_v9 = vld [vmem:[%s10198_s30 + $0x30] sm:$0xff] }
 0x1b5   : > { %v1426_v8 = vadd.f32 %v1373_v2, %v10526_v57  ;;  %v9332_v7 = vrot.slane %v9316_v23, 9  ;;  %v3221_v27 = vor.u32 %v3220_v52, %v3217_v44  ;;  %v3817_v16 = vrot.slane %v11501_v50, 5  ;;  %v14481_v52 = vld [vmem:[#allocation2_spill] sm:$0xff] }
 0x1b6   : > { %9363 = vmatmul.msk.bf16.gmra.mxu1 %vm694_vm1, %v4744_v35  ;;  %v11543_v57 = vpop.f32.mrf.mxu3  ;;  %v3230_v51 = vrot.slane %v3228_v53, 4  ;;  %v11582_v15 = vadd.f32 %v11333_v47, %v2366_v17  ;;  %v3816_v35 = vrot.slane %v3814_v21, 4  ;;  %v3938_v47 = vpack.c.b16 %v3909_v29, %v3908_v59  ;;  %v4746_v53 = vpop.permute.xlu1 %4745  ;;  %v4281_v17 = vld [vmem:[%s10198_s30 + $0x90] sm:$0xf]  ;;  %v4282_v59 = vld [vmem:[%s10198_s30 + $0x94] sm:$0xf] }
 0x1b7   : > { %v11541_v45 = vadd.f32 %v11481_v36, %v1426_v8  ;;  %v3213_v36 = vsel %vm10223_vm4, %v3208_v24, %v3212_v13  ;;  %v3234_v13 = vshll.u32 %v11579_v54, 16  ;;  %v9264_v8 = vld [vmem:[%s10198_s30 + $0x54] sm:$0xf]  ;;  %v3815_v25 = vsel %vm10438_vm7, %v9332_v7, %v3814_v21  ;;  %v9317_v7 = vld [vmem:[%s10198_s30 + $0x48] sm:$0xe] }
 0x1b8   : > { %v3510_v40 = vunpack.c.l.b16 %v3213_v36  ;;  %v3231_v24 = vor.u32 %v3230_v51, %v11576_v31  ;;  %v3222_v50 = vrot.slane %v3221_v27, 4  ;;  %v2367_v11 = vadd.f32 %v11454_v32, %v11479_v62 }
 0x1b9   : > { %v11559_v18 = vpop.f32.mrf.mxu0  ;;  %v3236_v0 = vrot.slane %v3234_v13, 5  ;;  %v3239_v26 = vshrl.u32 %v9264_v8, 16  ;;  %v3910_v6 = vunpack.c.l.b16 %v3815_v25  ;;  %v3242_v36 = vshll.u32 %v9264_v8, 16  ;;  %v4302_v8 = vld [vmem:[%s10198_s30 + $0x98] sm:$0x1] }
 0x1ba   : > { %v3538_v43 = vpack.c.b16 %v3510_v40, %v3509_v61  ;;  %v3232_v41 = vrot.slane %v3231_v24, 4  ;;  %v11612_v44 = vadd.f32 %v11378_v1, %v2367_v11  ;;  %v3227_v23 = vsel %vm10223_vm4, %v3222_v50, %v11576_v31  ;;  %v11638_v50 = vld [vmem:[%s10198_s30 + $0x5c] sm:$0x1] }
 0x1bb   : > { %v11574_v39 = vpop.f32.mrf.mxu1  ;;  %v3248_v21 = vshll.u32 %v11603_v12, 16  ;;  %v3252_v51 = vshrl.u32 %v11603_v12, 16  ;;  %v4598_v29 = vshll.u32 %v4281_v17, 16  ;;  %v4604_v1 = vshll.u32 %v4282_v59, 16 }
 0x1bc   : > { %v1375_v4 = vpop.f32.mrf.mxu2  ;;  %14480 = vst [vmem:[#allocation25_spill] sm:$0xff] %v11612_v44  ;;  %v3237_v31 = vsel %vm10223_vm4, %v3232_v41, %v3236_v0  ;;  %v3244_v27 = vrot.slane %v3242_v36, 5  ;;  %v2368_v41 = vadd.f32 %v11487_v56, %v11505_v58  ;;  %v3258_v56 = vshll.u32 %v11638_v50, 16  ;;  %v11713_v44 = vld [vmem:[%s10198_s30 + $0x68] sm:$0x1] }
 0x1bd   : > { %v1427_v49 = vadd.f32 %v1375_v4, %v10543_v14  ;;  %v4595_v4 = vshrl.u32 %v4281_v17, 16  ;;  %v4606_v24 = vrot.slane %v4604_v1, 5  ;;  %v14483_v17 = vld [vmem:[#allocation3_spill] sm:$0xff] }
 0x1be   : > { %v11590_v60 = vpop.f32.mrf.mxu3 }
 0x1bf   : > { %v11588_v2 = vadd.f32 %v11507_v38, %v1427_v49  ;;  %v3818_v38 = vsel %vm10438_vm7, %v3816_v35, %v3817_v16  ;;  %v3241_v49 = vrot.slane %v3239_v26, 4  ;;  %v4597_v35 = vrot.slane %v4595_v4, 4 }
 0x1c0   : > { %v3911_v62 = vunpack.c.l.b16 %v3818_v38  ;;  %v4600_v16 = vrot.slane %v4598_v29, 5  ;;  %v3254_v38 = vrot.slane %v3252_v51, 4  ;;  %v3511_v26 = vunpack.c.l.b16 %v3227_v23  ;;  %v9974_v51 = vld [vmem:[%s10198_s30 + $0x3c] sm:$0xff]  ;;  %v4279_v29 = vld [vmem:[%s10198_s30 + $0x84] sm:$0xf] }
 0x1c1   : > { %v11595_v14 = vpop.f32.mrf.mxu0  ;;  %9235 = vmatmul.msk.bf16.gmra.mxu2 %vm694_vm1, %v9973_v9  ;;  %v4608_v9 = vshrl.u32 %v4282_v59, 16 }
 0x1c2   : > { %v4601_v11 = vor.u32 %v4600_v16, %v4597_v35 }
 0x1c3   : > { %v11607_v28 = vpop.f32.mrf.mxu1  ;;  %9300 = vmatmul.msk.bf16.gmra.mxu3 %vm694_vm1, %v3538_v43  ;;  %v3821_v43 = vrot.slane %v11526_v5, 5  ;;  %v4610_v25 = vrot.slane %v4608_v9, 4  ;;  %v9333_v5 = vrot.slane %v9317_v7, 9  ;;  %v4574_v9 = vshll.u32 %v4279_v29, 16 }
 0x1c4   : > { %9347 = vmatmul.msk.bf16.gmra.mxu0 %vm694_vm1, %v3938_v47  ;;  %v1378_v46 = vpop.f32.mrf.mxu2  ;;  %v3939_v47 = vpack.c.b16 %v3911_v62, %v3910_v6 }
 0x1c5   : > { %v1428_v32 = vadd.f32 %v1378_v46, %v14481_v52  ;;  %v3512_v46 = vunpack.c.l.b16 %v3237_v31  ;;  %v4611_v6 = vor.u32 %v4610_v25, %v4606_v24  ;;  %v3245_v52 = vor.u32 %v3244_v27, %v3241_v49  ;;  %v4280_v31 = vld [vmem:[%s10198_s30 + $0x88] sm:$0xf] }
 0x1c6   : > { %9364 = vmatmul.msk.bf16.gmra.mxu1 %vm694_vm1, %v4746_v53  ;;  %v11626_v40 = vpop.f32.mrf.mxu3  ;;  %v4614_v53 = vshll.u32 %v4302_v8, 16  ;;  %v3823_v4 = vrot.slane %v3821_v43, 4  ;;  %v4571_v49 = vshrl.u32 %v4279_v29, 16  ;;  %v3824_v27 = vrot.slane %v11579_v54, 5 }
 0x1c7   : > { %v11624_v61 = vadd.f32 %v11543_v57, %v1428_v32  ;;  %v11634_v57 = vrot.slane %v3248_v21, 5  ;;  %v4602_v32 = vrot.slane %v4601_v11, 4  ;;  %v11645_v21 = vadd.f32 %v11417_v63, %v2368_v41 }
 0x1c8   : > { %v4616_v62 = vrot.slane %v4614_v53, 5  ;;  %v4612_v58 = vrot.slane %v4611_v6, 4  ;;  %v3539_v8 = vpack.c.b16 %v3512_v46, %v3511_v26  ;;  %v3246_v25 = vrot.slane %v3245_v52, 4  ;;  %v4301_v53 = vld [vmem:[%s10198_s30 + $0x8c] sm:$0x1] }
 0x1c9   : > { %v11631_v13 = vpop.f32.mrf.mxu0  ;;  %14482 = vst [vmem:[#allocation2_spill] sm:$0xff] %v11645_v21  ;;  %v3255_v23 = vor.u32 %v3254_v38, %v11634_v57  ;;  %v4607_v1 = vsel %vm10223_vm4, %v4602_v32, %v4606_v24  ;;  %v4573_v11 = vrot.slane %v4571_v49, 4  ;;  %v4576_v41 = vrot.slane %v4574_v9, 5  ;;  %v11685_v9 = vld [vmem:[%s10198_s30 + $0x64] sm:$0xf] }
 0x1ca   : > { %v4617_v35 = vsel %vm10223_vm4, %v4612_v58, %v4616_v62  ;;  %v4715_v16 = vunpack.c.l.b16 %v4607_v1  ;;  %v4580_v54 = vshll.u32 %v4280_v31, 16  ;;  %v4584_v6 = vshrl.u32 %v4280_v31, 16 }
 0x1cb   : > { %v11642_v0 = vpop.f32.mrf.mxu1  ;;  %v4716_v38 = vunpack.c.l.b16 %v4617_v35  ;;  %v3260_v32 = vrot.slane %v3258_v56, 5  ;;  %v4590_v26 = vshll.u32 %v4301_v53, 16  ;;  %v3825_v52 = vsel %vm10438_vm7, %v3823_v4, %v3824_v27  ;;  %v14484_v4 = vld [vmem:[#allocation4_spill] sm:$0xff] }
 0x1cc   : > { %v1380_v36 = vpop.f32.mrf.mxu2  ;;  %v3251_v29 = vsel %vm10223_vm4, %v3246_v25, %v11634_v57  ;;  %v3913_v27 = vunpack.c.l.b16 %v3825_v52 }
 0x1cd   : > { %v1429_v59 = vadd.f32 %v1380_v36, %v14483_v17  ;;  %v3256_v36 = vrot.slane %v3255_v23, 4  ;;  %v4735_v62 = vpack.c.b16 %v4716_v38, %v4715_v16  ;;  %v4748_v17 = vpop.permute.xlu2 %4747  ;;  %v4592_v49 = vrot.slane %v4590_v26, 5 }
 0x1ce   : > { %v11658_v7 = vpop.f32.mrf.mxu3 }
 0x1cf   : > { %v11656_v63 = vadd.f32 %v11590_v60, %v1429_v59  ;;  %v11668_v60 = vsel %vm10438_vm7, %v9333_v5, %v3821_v43  ;;  %v4577_v59 = vor.u32 %v4576_v41, %v4573_v11  ;;  %v4586_v43 = vrot.slane %v4584_v6, 4  ;;  %v9267_v5 = vld [vmem:[%s10198_s30 + $0x60] sm:$0xf]  ;;  %4763 = vrot.lane.b32.xlu0 %v4735_v62, %s10141_s14 }
 0x1d0   : > { %v3912_v56 = vunpack.c.l.b16 %v11668_v60  ;;  %v3261_v35 = vsel %vm10223_vm4, %v3256_v36, %v3260_v32  ;;  %v3263_v16 = vshrl.u32 %v9267_v5, 16  ;;  %v3266_v53 = vshll.u32 %v9267_v5, 16 }
 0x1d1   : > { %v11663_v24 = vpop.f32.mrf.mxu0  ;;  %9236 = vmatmul.msk.bf16.gmra.mxu2 %vm694_vm1, %v9974_v51  ;;  %v4582_v51 = vrot.slane %v4580_v54, 5  ;;  %v4578_v1 = vrot.slane %v4577_v59, 4  ;;  %v3513_v41 = vunpack.c.l.b16 %v3251_v29  ;;  %v3272_v6 = vshll.u32 %v11685_v9, 16 }
 0x1d2   : > { %v3276_v62 = vshrl.u32 %v11685_v9, 16  ;;  %v3514_v59 = vunpack.c.l.b16 %v3261_v35  ;;  %v3265_v29 = vrot.slane %v3263_v16, 4  ;;  %v9975_v35 = vld [vmem:[%s10198_s30 + $0x48] sm:$0xff] }
 0x1d3   : > { %v11671_v46 = vpop.f32.mrf.mxu1  ;;  %9301 = vmatmul.msk.bf16.gmra.mxu3 %vm694_vm1, %v3539_v8  ;;  %v4587_v31 = vor.u32 %v4586_v43, %v4582_v51  ;;  %v4284_v8 = vld [vmem:[%s10198_s30 + $0xa0] sm:$0xf]  ;;  %v4583_v11 = vsel %vm10223_vm4, %v4578_v1, %v4582_v51 }
 0x1d4   : > { %9348 = vmatmul.msk.bf16.gmra.mxu0 %vm694_vm1, %v3939_v47  ;;  %v1383_v58 = vpop.f32.mrf.mxu2  ;;  %v4283_v47 = vld [vmem:[%s10198_s30 + $0x9c] sm:$0xf]  ;;  %v4713_v54 = vunpack.c.l.b16 %v4583_v11  ;;  %v4632_v43 = vshrl.u32 %v4284_v8, 16 }
 0x1d5   : > { %v1430_v23 = vadd.f32 %v1383_v58, %v14484_v4  ;;  %v4619_v57 = vshrl.u32 %v4283_v47, 16  ;;  %v4588_v60 = vrot.slane %v4587_v31, 4  ;;  %v4622_v52 = vshll.u32 %v4283_v47, 16 }
 0x1d6   : > { %9365 = vmatmul.msk.bf16.gmra.mxu1 %vm694_vm1, %v4748_v17  ;;  %v11695_v38 = vpop.f32.mrf.mxu3  ;;  %v4628_v17 = vshll.u32 %v4284_v8, 16  ;;  %v3268_v4 = vrot.slane %v3266_v53, 5  ;;  %v4634_v47 = vrot.slane %v4632_v43, 4 }
 0x1d7   : > { %v11693_v25 = vadd.f32 %v11626_v40, %v1430_v23  ;;  %v4593_v32 = vsel %vm10223_vm4, %v4588_v60, %v4592_v49  ;;  %v4303_v40 = vld [vmem:[%s10198_s30 + $0xa4] sm:$0x1]  ;;  %v4621_v26 = vrot.slane %v4619_v57, 4  ;;  %v4624_v23 = vrot.slane %v4622_v52, 5  ;;  %v14485_v60 = vld [vmem:[#allocation5_spill] sm:$0xff] }
 0x1d8   : > { %v4714_v51 = vunpack.c.l.b16 %v4593_v32  ;;  %v4638_v5 = vshll.u32 %v4303_v40, 16  ;;  %v4630_v1 = vrot.slane %v4628_v17, 5  ;;  %v11708_v49 = vrot.slane %v3272_v6, 5  ;;  %v9318_v6 = vld [vmem:[%s10198_s30 + $0x54] sm:$0xe] }
 0x1d9   : > { %v11701_v36 = vpop.f32.mrf.mxu0  ;;  %v3278_v57 = vrot.slane %v3276_v62, 4  ;;  %v4625_v8 = vor.u32 %v4624_v23, %v4621_v26  ;;  %v3940_v32 = vpack.c.b16 %v3913_v27, %v3912_v56  ;;  %v3828_v62 = vrot.slane %v11603_v12, 5 }
 0x1da   : > { %v4734_v11 = vpack.c.b16 %v4714_v51, %v4713_v54  ;;  %v4635_v16 = vor.u32 %v4634_v47, %v4630_v1  ;;  %v4640_v53 = vrot.slane %v4638_v5, 5  ;;  %v3269_v52 = vor.u32 %v3268_v4, %v3265_v29  ;;  %v9270_v29 = vld [vmem:[%s10198_s30 + $0x6c] sm:$0xf] }
 0x1db   : > { %v11706_v58 = vpop.f32.mrf.mxu1  ;;  %v4626_v17 = vrot.slane %v4625_v8, 4  ;;  %v3540_v51 = vpack.c.b16 %v3514_v59, %v3513_v41  ;;  %v3279_v43 = vor.u32 %v3278_v57, %v11708_v49  ;;  %v3282_v56 = vshll.u32 %v11713_v44, 16  ;;  %v4750_v23 = vpop.permute.xlu2 %4749  ;;  %v14486_v8 = vld [vmem:[#allocation6_spill] sm:$0xff] }
 0x1dc   : > { %v1385_v31 = vpop.f32.mrf.mxu2  ;;  %4761 = vrot.lane.b32.xlu2 %v4734_v11, %s10141_s14  ;;  %v4636_v27 = vrot.slane %v4635_v16, 4  ;;  %v3830_v59 = vrot.slane %v3828_v62, 4  ;;  %v3831_v4 = vrot.slane %v11638_v50, 5 }
 0x1dd   : > { %v1431_v21 = vadd.f32 %v1385_v31, %v14485_v60  ;;  %v3270_v31 = vrot.slane %v3269_v52, 4  ;;  %v3284_v47 = vrot.slane %v3282_v56, 5  ;;  %v2369_v60 = vadd.f32 %v11514_v37, %v11541_v45 }
 0x1de   : > { %v11719_v54 = vpop.f32.mrf.mxu3  ;;  %v4641_v5 = vsel %vm10223_vm4, %v4636_v27, %v4640_v53  ;;  %v11744_v53 = vld [vmem:[%s10198_s30 + $0x70] sm:$0xf]  ;;  %v3290_v52 = vshll.u32 %v9270_v29, 16  ;;  %v2371_v37 = vadd.f32 %v11595_v14, %v11624_v61  ;;  %v3835_v56 = vrot.slane %v11685_v9, 5 }
 0x1df   : > { %v11717_v40 = vadd.f32 %v11658_v7, %v1431_v21  ;;  %v4631_v21 = vsel %vm10223_vm4, %v4626_v17, %v4630_v1  ;;  %v9334_v7 = vrot.slane %v9318_v6, 9  ;;  %v4718_v11 = vunpack.c.l.b16 %v4641_v5 }
 0x1e0   : > { %v4717_v12 = vunpack.c.l.b16 %v4631_v21  ;;  %v3280_v1 = vrot.slane %v3279_v43, 4  ;;  %v3287_v6 = vshrl.u32 %v9270_v29, 16  ;;  %v3296_v14 = vshll.u32 %v11744_v53, 16 }
 0x1e1   : > { %v11725_v26 = vpop.f32.mrf.mxu0  ;;  %9237 = vmatmul.msk.bf16.gmra.mxu2 %vm694_vm1, %v9975_v35  ;;  %v2370_v35 = vadd.f32 %v11559_v18, %v11588_v2  ;;  %v3829_v2 = vsel %vm10438_vm7, %v9334_v7, %v3828_v62  ;;  %v3300_v61 = vshrl.u32 %v11744_v53, 16  ;;  %v3292_v21 = vrot.slane %v3290_v52, 5 }
 0x1e2   : > { %v4736_v50 = vpack.c.b16 %v4718_v11, %v4717_v12  ;;  %v3285_v62 = vsel %vm10223_vm4, %v3280_v1, %v3284_v47  ;;  %v3289_v27 = vrot.slane %v3287_v6, 4  ;;  %v3914_v7 = vunpack.c.l.b16 %v3829_v2  ;;  %v14487_v11 = vld [vmem:[#allocation7_spill] sm:$0xff]  ;;  %v9976_v1 = vld [vmem:[%s10198_s30 + $0x54] sm:$0xff]  ;;  %v11804_v2 = vld [vmem:[%s10198_s30 + $0x7c] sm:$0xf] }
 0x1e3   : > { %v11733_v41 = vpop.f32.mrf.mxu1  ;;  %9302 = vmatmul.msk.bf16.gmra.mxu3 %vm694_vm1, %v3540_v51  ;;  %v11751_v17 = vadd.f32 %v11494_v34, %v2370_v35  ;;  %v3832_v51 = vsel %vm10438_vm7, %v3830_v59, %v3831_v4  ;;  %v9319_v34 = vld [vmem:[%s10198_s30 + $0x60] sm:$0xe]  ;;  %v3516_v4 = vunpack.c.l.b16 %v3285_v62  ;;  %v3837_v47 = vrot.slane %v3835_v56, 4  ;;  %v9273_v35 = vld [vmem:[%s10198_s30 + $0x78] sm:$0xf] }
 0x1e4   : > { %9349 = vmatmul.msk.bf16.gmra.mxu0 %vm694_vm1, %v3940_v32  ;;  %v1388_v57 = vpop.f32.mrf.mxu2  ;;  %v11748_v32 = vadd.f32 %v11458_v22, %v2369_v60  ;;  %4765 = vrot.lane.b32.xlu1 %v4736_v50, %s10141_s14  ;;  %v3275_v22 = vsel %vm10223_vm4, %v3270_v31, %v11708_v49  ;;  %v2372_v49 = vadd.f32 %v11631_v13, %v11656_v63  ;;  %v3915_v5 = vunpack.c.l.b16 %v3832_v51  ;;  %v11790_v63 = vld [vmem:[%s10198_s30 + $0x74] sm:$0x1] }
 0x1e5   : > { %v1432_v16 = vadd.f32 %v1388_v57, %v14486_v8  ;;  %v9335_v29 = vrot.slane %v9319_v34, 9  ;;  %v3302_v31 = vrot.slane %v3300_v61, 4  ;;  %v3838_v13 = vrot.slane %v11713_v44, 5 }
 0x1e6   : > { %9366 = vmatmul.msk.bf16.gmra.mxu1 %vm694_vm1, %v4750_v23  ;;  %v11758_v18 = vpop.f32.mrf.mxu3  ;;  %v3298_v23 = vrot.slane %v3296_v14, 5  ;;  %v11784_v9 = vadd.f32 %v11574_v39, %v2372_v49  ;;  %v3293_v60 = vor.u32 %v3292_v21, %v3289_v27  ;;  %v3314_v34 = vshll.u32 %v9273_v35, 16 }
 0x1e7   : > { %v11756_v45 = vadd.f32 %v11695_v38, %v1432_v16  ;;  %v11772_v38 = vadd.f32 %v11522_v55, %v2371_v37  ;;  %v3515_v55 = vunpack.c.l.b16 %v3275_v22  ;;  %v3941_v16 = vpack.c.b16 %v3915_v5, %v3914_v7 }
 0x1e8   : > { %v11800_v39 = vsel %vm10438_vm7, %v9335_v29, %v3835_v56  ;;  %v3303_v52 = vor.u32 %v3302_v31, %v3298_v23  ;;  %v3306_v37 = vshll.u32 %v11790_v63, 16  ;;  %v3294_v51 = vrot.slane %v3293_v60, 4  ;;  %v4752_v56 = vpop.permute.xlu0 %4751 }
 0x1e9   : > { %v11774_v43 = vpop.f32.mrf.mxu0  ;;  %v3541_v6 = vpack.c.b16 %v3516_v4, %v3515_v55  ;;  %v3311_v22 = vshrl.u32 %v9273_v35, 16  ;;  %v2373_v14 = vadd.f32 %v11663_v24, %v11693_v25  ;;  %v3916_v62 = vunpack.c.l.b16 %v11800_v39  ;;  %v14489_v55 = vld [vmem:[#allocation8_spill] sm:$0xff] }
 0x1ea   : > { %v3320_v27 = vshll.u32 %v11804_v2, 16  ;;  %v3324_v21 = vshrl.u32 %v11804_v2, 16  ;;  %v3304_v24 = vrot.slane %v3303_v52, 4  ;;  %v3308_v25 = vrot.slane %v3306_v37, 5 }
 0x1eb   : > { %v11781_v12 = vpop.f32.mrf.mxu1  ;;  %v11824_v5 = vadd.f32 %v11607_v28, %v2373_v14  ;;  %v3313_v4 = vrot.slane %v3311_v22, 4  ;;  %v3316_v31 = vrot.slane %v3314_v34, 5 }
 0x1ec   : > { %v1390_v59 = vpop.f32.mrf.mxu2  ;;  %v3326_v52 = vrot.slane %v3324_v21, 4  ;;  %v2374_v21 = vadd.f32 %v11701_v36, %v11717_v40 }
 0x1ed   : > { %v1433_v57 = vadd.f32 %v1390_v59, %v14487_v11  ;;  %14488 = vst [vmem:[#allocation3_spill] sm:$0xff] %v11824_v5  ;;  %v3299_v59 = vsel %vm10223_vm4, %v3294_v51, %v3298_v23  ;;  %v4287_v11 = vld [vmem:[%s10198_s30 + $0xb4] sm:$0xf]  ;;  %v11842_v23 = vrot.slane %v3320_v27, 5 }
 0x1ee   : > { %v11796_v50 = vpop.f32.mrf.mxu3  ;;  %v4670_v60 = vshll.u32 %v4287_v11, 16  ;;  %v3517_v51 = vunpack.c.l.b16 %v3299_v59 }
 0x1ef   : > { %v11794_v8 = vadd.f32 %v11719_v54, %v1433_v57  ;;  %v11811_v54 = vsel %vm10438_vm7, %v3837_v47, %v3838_v13  ;;  %v4288_v57 = vld [vmem:[%s10198_s30 + $0xb8] sm:$0xf]  ;;  %v3842_v47 = vrot.slane %v11744_v53, 5  ;;  %v4667_v13 = vshrl.u32 %v4287_v11, 16 }
 0x1f0   : > { %v3917_v7 = vunpack.c.l.b16 %v11811_v54  ;;  %v4676_v35 = vshll.u32 %v4288_v57, 16  ;;  %v4680_v37 = vshrl.u32 %v4288_v57, 16  ;;  %v3309_v54 = vsel %vm10223_vm4, %v3304_v24, %v3308_v25 }
 0x1f1   : > { %v11806_v44 = vpop.f32.mrf.mxu0  ;;  %9238 = vmatmul.msk.bf16.gmra.mxu2 %vm694_vm1, %v9976_v1  ;;  %v9320_v1 = vld [vmem:[%s10198_s30 + $0x6c] sm:$0xe]  ;;  %v4669_v53 = vrot.slane %v4667_v13, 4  ;;  %v4672_v22 = vrot.slane %v4670_v60, 5  ;;  %v3518_v24 = vunpack.c.l.b16 %v3309_v54  ;;  %v3844_v25 = vrot.slane %v3842_v47, 4 }
 0x1f2   : > { %v9336_v14 = vrot.slane %v9320_v1, 9  ;;  %v3327_v59 = vor.u32 %v3326_v52, %v11842_v23 }
 0x1f3   : > { %v11815_v61 = vpop.f32.mrf.mxu1  ;;  %9303 = vmatmul.msk.bf16.gmra.mxu3 %vm694_vm1, %v3541_v6  ;;  %v11840_v6 = vld [vmem:[%s10198_s30 + $0x80] sm:$0x1]  ;;  %v4673_v27 = vor.u32 %v4672_v22, %v4669_v53 }
 0x1f4   : > { %9350 = vmatmul.msk.bf16.gmra.mxu0 %vm694_vm1, %v3941_v16  ;;  %v1393_v49 = vpop.f32.mrf.mxu2  ;;  %v9977_v22 = vld [vmem:[%s10198_s30 + $0x60] sm:$0xff]  ;;  %v3843_v36 = vsel %vm10438_vm7, %v9336_v14, %v3842_v47  ;;  %v3942_v47 = vpack.c.b16 %v3917_v7, %v3916_v62  ;;  %v3542_v14 = vpack.c.b16 %v3518_v24, %v3517_v51  ;;  %v14446_v24 = vrot.slane %v11804_v2, 5 }
 0x1f5   : > { %v1434_v29 = vadd.f32 %v1393_v49, %v14489_v55  ;;  %v4678_v49 = vrot.slane %v4676_v35, 5  ;;  %v4682_v55 = vrot.slane %v4680_v37, 4  ;;  %v11857_v35 = vadd.f32 %v11642_v0, %v2374_v21  ;;  %v14492_v37 = vld [vmem:[#allocation9_spill] sm:$0xff] }
 0x1f6   : > { %9367 = vmatmul.msk.bf16.gmra.mxu1 %vm694_vm1, %v4752_v56  ;;  %v11837_v16 = vpop.f32.mrf.mxu3  ;;  %v3317_v56 = vor.u32 %v3316_v31, %v3313_v4  ;;  %v3845_v4 = vrot.slane %v11790_v63, 5  ;;  %v4674_v31 = vrot.slane %v4673_v27, 4  ;;  %v3328_v0 = vrot.slane %v3327_v59, 4 }
 0x1f7   : > { %v11835_v28 = vadd.f32 %v11758_v18, %v1434_v29  ;;  %v4305_v18 = vld [vmem:[%s10198_s30 + $0xbc] sm:$0x1]  ;;  %v3330_v29 = vshll.u32 %v11840_v6, 16  ;;  %v4683_v13 = vor.u32 %v4682_v55, %v4678_v49  ;;  %14491 = vst [vmem:[#allocation5_spill] sm:$0xff] %v11857_v35  ;;  %v2375_v59 = vadd.f32 %v11725_v26, %v11756_v45 }
 0x1f8   : > { %v4686_v11 = vshll.u32 %v4305_v18, 16  ;;  %v3318_v40 = vrot.slane %v3317_v56, 4  ;;  %v4679_v52 = vsel %vm10223_vm4, %v4674_v31, %v4678_v49  ;;  %v3846_v56 = vsel %vm10438_vm7, %v3844_v25, %v3845_v4  ;;  %v4285_v25 = vld [vmem:[%s10198_s30 + $0xa8] sm:$0xf] }
 0x1f9   : > { %v11846_v34 = vpop.f32.mrf.mxu0  ;;  %v4684_v18 = vrot.slane %v4683_v13, 4  ;;  %v11863_v54 = vrot.slane %v3330_v29, 5  ;;  %v3919_v39 = vunpack.c.l.b16 %v3846_v56  ;;  %v4643_v45 = vshrl.u32 %v4285_v25, 16 }
 0x1fa   : > { %v4688_v60 = vrot.slane %v4686_v11, 5  ;;  %v4721_v11 = vunpack.c.l.b16 %v4679_v52  ;;  %v3323_v7 = vsel %vm10223_vm4, %v3318_v40, %v11842_v23  ;;  %v4646_v4 = vshll.u32 %v4285_v25, 16  ;;  %v14493_v23 = vld [vmem:[#allocation10_spill] sm:$0xff]  ;;  %v9321_v25 = vld [vmem:[%s10198_s30 + $0x78] sm:$0xe] }
 0x1fb   : > { %v11852_v57 = vpop.f32.mrf.mxu1  ;;  %v3333_v51 = vsel %vm10223_vm4, %v3328_v0, %v11863_v54  ;;  %v11903_v40 = vadd.f32 %v11671_v46, %v2375_v59  ;;  %v4645_v54 = vrot.slane %v4643_v45, 4 }
 0x1fc   : > { %14490 = vst [vmem:[#allocation4_spill] sm:$0xff] %v11852_v57  ;;  %v1395_v1 = vpop.f32.mrf.mxu2  ;;  %v4689_v27 = vsel %vm10223_vm4, %v4684_v18, %v4688_v60  ;;  %v4648_v52 = vrot.slane %v4646_v4, 5 }
 0x1fd   : > { %v1435_v53 = vadd.f32 %v1395_v1, %v14492_v37  ;;  %v4722_v49 = vunpack.c.l.b16 %v4689_v27  ;;  %v4754_v62 = vpop.permute.xlu1 %4753  ;;  %v4286_v1 = vld [vmem:[%s10198_s30 + $0xac] sm:$0xf]  ;;  %v9276_v37 = vld [vmem:[%s10198_s30 + $0x84] sm:$0xf]  ;;  %14494 = vst [vmem:[#allocation6_spill] sm:$0xff] %v11903_v40 }
 0x1fe   : > { %v11870_v55 = vpop.f32.mrf.mxu3  ;;  %v4652_v31 = vshll.u32 %v4286_v1, 16  ;;  %v4656_v60 = vshrl.u32 %v4286_v1, 16  ;;  %v3335_v18 = vshrl.u32 %v9276_v37, 16  ;;  %v4649_v46 = vor.u32 %v4648_v52, %v4645_v54  ;;  %v9603_v40 = vld [vmem:[%s10198_s30 + $0x14] sm:$0x1] }
 0x1ff   : > { %v11868_v63 = vadd.f32 %v11796_v50, %v1435_v53  ;;  %v3918_v50 = vunpack.c.l.b16 %v3843_v36  ;;  %v4738_v21 = vpack.c.b16 %v4722_v49, %v4721_v11  ;;  %v3338_v36 = vshll.u32 %v9276_v37, 16 }
 0x200   : > { %v4654_v0 = vrot.slane %v4652_v31, 5  ;;  %v4658_v27 = vrot.slane %v4656_v60, 4  ;;  %v3337_v56 = vrot.slane %v3335_v18, 4  ;;  %v4650_v60 = vrot.slane %v4649_v46, 4 }
 0x201   : > { %v11878_v29 = vpop.f32.mrf.mxu0  ;;  %9239 = vmatmul.msk.bf16.gmra.mxu2 %vm694_vm1, %v9977_v22  ;;  %4769 = vrot.lane.b32.xlu0 %v4738_v21, %s10141_s14  ;;  %v11900_v22 = vld [vmem:[%s10198_s30 + $0x88] sm:$0xf]  ;;  %v3340_v49 = vrot.slane %v3338_v36, 5  ;;  %v3943_v45 = vpack.c.b16 %v3919_v39, %v3918_v50  ;;  %v3520_v54 = vunpack.c.l.b16 %v3333_v51  ;;  %v9337_v52 = vrot.slane %v9321_v25, 9  ;;  %v9601_v50 = vld [vmem:[%s10198_s30 + $0xc] sm:$0xf] }
 0x202   : > { %v3344_v21 = vshll.u32 %v11900_v22, 16  ;;  %v4659_v59 = vor.u32 %v4658_v27, %v4654_v0  ;;  %v3851_v27 = vrot.slane %v14446_v24, 4  ;;  %v2376_v39 = vadd.f32 %v11774_v43, %v11794_v8  ;;  %v9602_v51 = vld [vmem:[%s10198_s30 + $0x10] sm:$0xf]  ;;  %v14495_v25 = vld [vmem:[#allocation11_spill] sm:$0xff] }
 0x203   : > { %v11883_v13 = vpop.f32.mrf.mxu1  ;;  %9304 = vmatmul.msk.bf16.gmra.mxu3 %vm694_vm1, %v3542_v14  ;;  %v4304_v14 = vld [vmem:[%s10198_s30 + $0xb0] sm:$0x1]  ;;  %v3341_v4 = vor.u32 %v3340_v49, %v3337_v56  ;;  %v4655_v56 = vsel %vm10223_vm4, %v4650_v60, %v4654_v0  ;;  %v5953_v57 = vshll.u32 %v9601_v50, 16  ;;  %v5959_v35 = vshll.u32 %v9602_v51, 16 }
 0x204   : > { %9351 = vmatmul.msk.bf16.gmra.mxu0 %vm694_vm1, %v3942_v47  ;;  %v1398_v26 = vpop.f32.mrf.mxu2  ;;  %v4662_v1 = vshll.u32 %v4304_v14, 16  ;;  %v11917_v31 = vrot.slane %v3344_v21, 5  ;;  %v4660_v37 = vrot.slane %v4659_v59, 4  ;;  %v3852_v14 = vrot.slane %v11840_v6, 5  ;;  %v9978_v59 = vld [vmem:[%s10198_s30 + $0x6c] sm:$0xff] }
 0x205   : > { %v1436_v53 = vadd.f32 %v1398_v26, %v14493_v23  ;;  %v5950_v21 = vshrl.u32 %v9601_v50, 16  ;;  %v3342_v8 = vrot.slane %v3341_v4, 4  ;;  %v11947_v5 = vadd.f32 %v11706_v58, %v2376_v39 }
 0x206   : > { %9368 = vmatmul.msk.bf16.gmra.mxu1 %vm694_vm1, %v4754_v62  ;;  %v11909_v47 = vpop.f32.mrf.mxu3  ;;  %v3348_v62 = vshrl.u32 %v11900_v22, 16  ;;  %v4664_v23 = vrot.slane %v4662_v1, 5  ;;  %v4719_v1 = vunpack.c.l.b16 %v4655_v56  ;;  %v5955_v56 = vrot.slane %v5953_v57, 5  ;;  %v4756_v39 = vpop.permute.xlu2 %4755 }
 0x207   : > { %v11907_v11 = vadd.f32 %v11837_v16, %v1436_v53  ;;  %v3519_v16 = vunpack.c.l.b16 %v3323_v7  ;;  %v11920_v53 = vld [vmem:[%s10198_s30 + $0x8c] sm:$0x1]  ;;  %v5952_v24 = vrot.slane %v5950_v21, 4  ;;  %v11960_v50 = vsel %vm10438_vm7, %v3851_v27, %v3852_v14 }
 0x208   : > { %v3350_v18 = vrot.slane %v3348_v62, 4  ;;  %v4665_v49 = vsel %vm10223_vm4, %v4660_v37, %v4664_v23  ;;  %v3354_v43 = vshll.u32 %v11920_v53, 16  ;;  %v9987_v23 = vld [vmem:[%s10198_s30] sm:$0xff]  ;;  %v5961_v57 = vrot.slane %v5959_v35, 5 }
 0x209   : > { %v11915_v26 = vpop.f32.mrf.mxu0  ;;  %v4720_v62 = vunpack.c.l.b16 %v4665_v49  ;;  %v5969_v49 = vshll.u32 %v9603_v40, 16  ;;  %4991 = vrot.lane.b32.xlu1 %v9987_v23, %s10141_s14  ;;  %v3347_v27 = vsel %vm10223_vm4, %v3342_v8, %v11917_v31  ;;  %v11990_v23 = vld [vmem:[%s10198_s30 + $0x94] sm:$0xf] }
 0x20a   : > { %v3351_v6 = vor.u32 %v3350_v18, %v11917_v31  ;;  %v3921_v31 = vunpack.c.l.b16 %v11960_v50  ;;  %v11984_v8 = vunpack.c.l.b16 %v3347_v27 }
 0x20b   : > { %v11922_v36 = vpop.f32.mrf.mxu1  ;;  %v4737_v37 = vpack.c.b16 %v4720_v62, %v4719_v1  ;;  %v5971_v35 = vrot.slane %v5969_v49, 5  ;;  %v10003_v1 = vld [vmem:[%s10198_s30 + $0xc] sm:$0xff] }
 0x20c   : > { %v1400_v7 = vpop.f32.mrf.mxu2  ;;  %v3352_v58 = vrot.slane %v3351_v6, 4  ;;  %v10067_v6 = vld [vmem:[%s10198_s30 + $0x10] sm:$0xf]  ;;  %5697 = vrot.lane.b32.xlu0 %v10003_v1, %s10141_s14 }
 0x20d   : > { %v1437_v46 = vadd.f32 %v1400_v7, %v14495_v25  ;;  %v5963_v7 = vshrl.u32 %v9602_v51, 16  ;;  %v3543_v25 = vpack.c.b16 %v3520_v54, %v3519_v16  ;;  %4767 = vrot.lane.b32.xlu2 %v4737_v37, %s10141_s14  ;;  %v3356_v16 = vrot.slane %v3354_v43, 5 }
 0x20e   : > { %v11942_v60 = vpop.f32.mrf.mxu3  ;;  %v5956_v54 = vor.u32 %v5955_v56, %v5952_v24  ;;  %v5224_v37 = vrot.slane %v10067_v6, 5 }
 0x20f   : > { %v11940_v0 = vadd.f32 %v11870_v55, %v1437_v46  ;;  %v14496_v55 = vrot.slane %v11804_v2, 5  ;;  %v5965_v40 = vrot.slane %v5963_v7, 4  ;;  %v2377_v2 = vadd.f32 %v11806_v44, %v11835_v28  ;;  %v9279_v44 = vld [vmem:[%s10198_s30 + $0x90] sm:$0xf] }
 0x210   : > { %v5957_v21 = vrot.slane %v5956_v54, 4  ;;  %v14498_v46 = vld [vmem:[#allocation12_spill] sm:$0xff]  ;;  %v3357_v43 = vsel %vm10223_vm4, %v3352_v58, %v3356_v16  ;;  %v3362_v27 = vshll.u32 %v9279_v44, 16 }
 0x211   : > { %v11949_v4 = vpop.f32.mrf.mxu0  ;;  %9240 = vmatmul.msk.bf16.gmra.mxu2 %vm694_vm1, %v9978_v59  ;;  %v11956_v18 = vsel %vm10438_vm7, %v9337_v52, %v14496_v55  ;;  %v5966_v14 = vor.u32 %v5965_v40, %v5961_v57  ;;  %v11976_v28 = vadd.f32 %v11733_v41, %v2377_v2  ;;  %v3856_v55 = vrot.slane %v11900_v22, 5  ;;  %v10068_v58 = vld [vmem:[%s10198_s30 + $0x14] sm:$0x1]  ;;  %v9322_v2 = vld [vmem:[%s10198_s30 + $0x84] sm:$0xe] }
 0x212   : > { %v3920_v24 = vunpack.c.l.b16 %v11956_v18  ;;  %v5962_v41 = vsel %vm10223_vm4, %v5957_v21, %v5961_v57  ;;  %v5168_v18 = vld [vmem:[%s10198_s30 + $0xc] sm:$0xe]  ;;  %v5226_v40 = vrot.slane %v5224_v37, 4  ;;  %v5227_v16 = vrot.slane %v10068_v58, 5 }
 0x213   : > { %v11966_v52 = vpop.f32.mrf.mxu1  ;;  %9305 = vmatmul.msk.bf16.gmra.mxu3 %vm694_vm1, %v3543_v25  ;;  %v5967_v62 = vrot.slane %v5966_v14, 4  ;;  %v6334_v49 = vunpack.c.l.b16 %v5962_v41  ;;  %v9458_v57 = vrot.slane %v5168_v18, 9  ;;  %v3368_v14 = vshll.u32 %v11990_v23, 16 }
 0x214   : > { %14497 = vst [vmem:[#allocation7_spill] sm:$0xff] %v11966_v52  ;;  %9352 = vmatmul.msk.bf16.gmra.mxu0 %vm694_vm1, %v3943_v45  ;;  %v1403_v51 = vpop.f32.mrf.mxu2  ;;  %v3359_v45 = vshrl.u32 %v9279_v44, 16  ;;  %v5228_v22 = vsel %vm10438_vm7, %v5226_v40, %v5227_v16  ;;  %v3372_v21 = vshrl.u32 %v11990_v23, 16  ;;  %v3364_v44 = vrot.slane %v3362_v27, 5  ;;  %v9611_v52 = vld [vmem:[%s10198_s30 + $0x34] sm:$0xf] }
 0x215   : > { %v1438_v59 = vadd.f32 %v1403_v51, %v14498_v46  ;;  %v5972_v56 = vsel %vm10223_vm4, %v5967_v62, %v5971_v35  ;;  %v5225_v35 = vsel %vm10438_vm7, %v9458_v57, %v5224_v37  ;;  %v5331_v1 = vunpack.c.l.b16 %v5228_v22  ;;  %v12015_v62 = vld [vmem:[%s10198_s30 + $0x98] sm:$0x1]  ;;  %v5167_v22 = vld [vmem:[%s10198_s30] sm:$0xe] }
 0x216   : > { %9369 = vmatmul.msk.bf16.gmra.mxu1 %vm694_vm1, %v4756_v39  ;;  %v11995_v25 = vpop.f32.mrf.mxu3  ;;  %v6335_v50 = vunpack.c.l.b16 %v5972_v56  ;;  %v3361_v39 = vrot.slane %v3359_v45, 4  ;;  %v3370_v45 = vrot.slane %v3368_v14, 5  ;;  %v9338_v41 = vrot.slane %v9322_v2, 9  ;;  %v10069_v14 = vld [vmem:[%s10198_s30 + $0x4] sm:$0xf] }
 0x217   : > { %v11993_v7 = vadd.f32 %v11909_v47, %v1438_v59  ;;  %v3522_v47 = vunpack.c.l.b16 %v3357_v43  ;;  %v5330_v59 = vunpack.c.l.b16 %v5225_v35  ;;  %v3858_v6 = vrot.slane %v3856_v55, 4 }
 0x218   : > { %v6366_v51 = vpack.c.b16 %v6335_v50, %v6334_v49  ;;  %v3374_v37 = vrot.slane %v3372_v21, 4  ;;  %v2378_v56 = vadd.f32 %v11846_v34, %v11868_v63  ;;  %v14500_v49 = vld [vmem:[#allocation13_spill] sm:$0xff]  ;;  %v3859_v57 = vrot.slane %v11920_v53, 5 }
 0x219   : > { %v12003_v54 = vpop.f32.mrf.mxu0  ;;  %v9979_v50 = vld [vmem:[%s10198_s30 + $0x78] sm:$0xff]  ;;  %v5361_v40 = vpack.c.b16 %v5331_v1, %v5330_v59  ;;  %v3365_v58 = vor.u32 %v3364_v44, %v3361_v39  ;;  %v3378_v27 = vshll.u32 %v12015_v62, 16  ;;  %v3944_v34 = vpack.c.b16 %v3921_v31, %v3920_v24  ;;  %v10070_v1 = vld [vmem:[%s10198_s30 + $0x8] sm:$0x1] }
 0x21a   : > { %6382 = vrot.lane.b32.xlu1 %v6366_v51, %s10141_s14  ;;  %v3375_v16 = vor.u32 %v3374_v37, %v3370_v45  ;;  %v5217_v51 = vrot.slane %v10069_v14, 5  ;;  %v12026_v2 = vadd.f32 %v11781_v12, %v2378_v56  ;;  %v3544_v39 = vpack.c.b16 %v3522_v47, %v11984_v8  ;;  %v4758_v56 = vpop.permute.xlu0 %4757  ;;  %v10004_v14 = vld [vmem:[%s10198_s30 + $0x18] sm:$0xff] }
 0x21b   : > { %v12012_v46 = vpop.f32.mrf.mxu1  ;;  %5378 = vrot.lane.b32.xlu0 %v5361_v40, %s10141_s14  ;;  %v3366_v53 = vrot.slane %v3365_v58, 4  ;;  %v9457_v21 = vrot.slane %v5167_v22, 9  ;;  %v5220_v44 = vrot.slane %v10070_v1, 5  ;;  %v12040_v12 = vsel %vm10438_vm7, %v9338_v41, %v3856_v55  ;;  %v12060_v40 = vld [vmem:[%s10198_s30 + $0xa0] sm:$0xf] }
 0x21c   : > { %14499 = vst [vmem:[#allocation8_spill] sm:$0xff] %v12012_v46  ;;  %v1405_v43 = vpop.f32.mrf.mxu2  ;;  %v5219_v59 = vrot.slane %v5217_v51, 4  ;;  %v3376_v24 = vrot.slane %v3375_v16, 4  ;;  %v3380_v31 = vrot.slane %v3378_v27, 5  ;;  %v12064_v58 = vadd.f32 %v11878_v29, %v11907_v11  ;;  %v10071_v22 = vld [vmem:[%s10198_s30 + $0x1c] sm:$0xf] }
 0x21d   : > { %v1439_v18 = vadd.f32 %v1405_v43, %v14500_v49  ;;  %v5218_v8 = vsel %vm10438_vm7, %v9457_v21, %v5217_v51  ;;  %v3371_v55 = vsel %vm10223_vm4, %v3366_v53, %v3370_v45  ;;  %v3863_v51 = vrot.slane %v11990_v23, 5  ;;  %v5169_v21 = vld [vmem:[%s10198_s30 + $0x18] sm:$0xe] }
 0x21e   : > { %v12031_v63 = vpop.f32.mrf.mxu3  ;;  %v5221_v47 = vsel %vm10438_vm7, %v5219_v59, %v5220_v44  ;;  %v5328_v41 = vunpack.c.l.b16 %v5218_v8  ;;  %v12073_v53 = vunpack.c.l.b16 %v3371_v55  ;;  %v5231_v29 = vrot.slane %v10071_v22, 5  ;;  %v9607_v22 = vld [vmem:[%s10198_s30 + $0x24] sm:$0xf] }
 0x21f   : > { %v12029_v35 = vadd.f32 %v11942_v60, %v1439_v18  ;;  %v12044_v60 = vsel %vm10438_vm7, %v3858_v6, %v3859_v57  ;;  %v5329_v49 = vunpack.c.l.b16 %v5221_v47  ;;  %v3922_v18 = vunpack.c.l.b16 %v12040_v12  ;;  %v9282_v57 = vld [vmem:[%s10198_s30 + $0x9c] sm:$0xf] }
 0x220   : > { %v3923_v16 = vunpack.c.l.b16 %v12044_v60  ;;  %v3383_v11 = vshrl.u32 %v9282_v57, 16  ;;  %v3386_v59 = vshll.u32 %v9282_v57, 16  ;;  %v3392_v1 = vshll.u32 %v12060_v40, 16  ;;  %v10072_v60 = vld [vmem:[%s10198_s30 + $0x20] sm:$0x1] }
 0x221   : > { %v4012_v43 = vpop.f32.mrf.mxu0  ;;  %9241 = vmatmul.msk.bf16.gmra.mxu2 %vm694_vm1, %v9979_v50  ;;  %v9323_v50 = vld [vmem:[%s10198_s30 + $0x90] sm:$0xe]  ;;  %v5360_v27 = vpack.c.b16 %v5329_v49, %v5328_v41  ;;  %v9459_v44 = vrot.slane %v5169_v21, 9  ;;  %v5233_v12 = vrot.slane %v5231_v29, 4  ;;  %v3865_v47 = vrot.slane %v3863_v51, 4 }
 0x222   : > { %5699 = vrot.lane.b32.xlu1 %v10004_v14, %s10141_s14  ;;  %v9339_v23 = vrot.slane %v9323_v50, 9  ;;  %v3388_v55 = vrot.slane %v3386_v59, 5  ;;  %v12094_v50 = vrot.slane %v3392_v1, 5  ;;  %v5998_v59 = vshrl.u32 %v9607_v22, 16 }
 0x223   : > { %v12050_v37 = vpop.f32.mrf.mxu1  ;;  %9306 = vmatmul.msk.bf16.gmra.mxu3 %vm694_vm1, %v3544_v39  ;;  %5376 = vrot.lane.b32.xlu2 %v5360_v27, %s10141_s14  ;;  %v5232_v41 = vsel %vm10438_vm7, %v9459_v44, %v5231_v29  ;;  %v9608_v29 = vld [vmem:[%s10198_s30 + $0x28] sm:$0xf]  ;;  %v6001_v44 = vshll.u32 %v9607_v22, 16 }
 0x224   : > { %14501 = vst [vmem:[#allocation9_spill] sm:$0xff] %v12050_v37  ;;  %9353 = vmatmul.msk.bf16.gmra.mxu0 %vm694_vm1, %v3944_v34  ;;  %v2958_v6 = vpop.f32.mrf.mxu2  ;;  %v3381_v34 = vsel %vm10223_vm4, %v3376_v24, %v3380_v31  ;;  %v5234_v24 = vrot.slane %v10072_v60, 5  ;;  %v3385_v31 = vrot.slane %v3383_v11, 4  ;;  %v5332_v27 = vunpack.c.l.b16 %v5232_v41 }
 0x225   : > { %v3038_v45 = vadd.f32 %v2958_v6, %v10889_v10  ;;  %v12092_v6 = vld [vmem:[%s10198_s30 + $0xa4] sm:$0x1]  ;;  %v6003_v41 = vrot.slane %v6001_v44, 5 }
 0x226   : > { %9370 = vmatmul.msk.bf16.gmra.mxu1 %vm694_vm1, %v4758_v56  ;;  %v12077_v39 = vpop.f32.mrf.mxu3  ;;  %v3866_v56 = vrot.slane %v12015_v62, 5  ;;  %v5235_v49 = vsel %vm10438_vm7, %v5233_v12, %v5234_v24  ;;  %v3864_v62 = vsel %vm10438_vm7, %v9339_v23, %v3863_v51  ;;  %v9980_v12 = vld [vmem:[%s10198_s30 + $0x84] sm:$0xff]  ;;  %v3402_v51 = vshll.u32 %v12092_v6, 16 }
 0x227   : > { %v3695_v10 = vadd.f32 %v11995_v25, %v3038_v45  ;;  %v3524_v45 = vunpack.c.l.b16 %v3381_v34  ;;  %v5333_v14 = vunpack.c.l.b16 %v5235_v49  ;;  %v6000_v24 = vrot.slane %v5998_v59, 4 }
 0x228   : > { %v3867_v34 = vsel %vm10438_vm7, %v3865_v47, %v3866_v56  ;;  %v6007_v49 = vshll.u32 %v9608_v29, 16  ;;  %v3924_v22 = vunpack.c.l.b16 %v3864_v62 }
 0x229   : > { %v12084_v8 = vadd.f32 %v4012_v43, %v3695_v10  ;;  %v4014_v25 = vpop.f32.mrf.mxu0  ;;  %v3396_v43 = vshrl.u32 %v12060_v40, 16  ;;  %v3389_v10 = vor.u32 %v3388_v55, %v3385_v31  ;;  %v5362_v60 = vpack.c.b16 %v5333_v14, %v5332_v27 }
 0x22a   : > { %v3945_v31 = vpack.c.b16 %v3923_v16, %v3922_v18  ;;  %v6004_v27 = vor.u32 %v6003_v41, %v6000_v24  ;;  %v6009_v14 = vrot.slane %v6007_v49, 5  ;;  %v3925_v18 = vunpack.c.l.b16 %v3867_v34  ;;  %v9604_v34 = vld [vmem:[%s10198_s30 + $0x18] sm:$0xf] }
 0x22b   : > { %v12097_v57 = vpop.f32.mrf.mxu1  ;;  %v3398_v21 = vrot.slane %v3396_v43, 4  ;;  %v3545_v43 = vpack.c.b16 %v3524_v45, %v12073_v53  ;;  %5380 = vrot.lane.b32.xlu1 %v5362_v60, %s10141_s14  ;;  %v3390_v56 = vrot.slane %v3389_v10, 4  ;;  %v3404_v16 = vrot.slane %v3402_v51, 5  ;;  %v12131_v10 = vld [vmem:[%s14443_s2] ss:$0 sm:$0xff]  ;;  %v14505_v51 = vld [vmem:[#allocation24_spill] sm:$0xff] }
 0x22c   : > { %14502 = vst [vmem:[#allocation10_spill] sm:$0xff] %v12097_v57  ;;  %v2960_v11 = vpop.f32.mrf.mxu2  ;;  %v6011_v57 = vshrl.u32 %v9608_v29, 16  ;;  %v6005_v59 = vrot.slane %v6004_v27, 4  ;;  %v12122_v29 = vadd.f32 %v11815_v61, %v12064_v58  ;;  %v12151_v49 = vpack.c.b16 %v3925_v18, %v3924_v22  ;;  %v9606_v18 = vld [vmem:[%s10198_s30 + $0x20] sm:$0x1] }
 0x22d   : > { %v3039_v1 = vadd.f32 %v2960_v11, %v10914_v48  ;;  %v3399_v23 = vor.u32 %v3398_v21, %v12094_v50  ;;  %v9989_v48 = vld [vmem:[%s10198_s30 + $0x18] sm:$0xff]  ;;  %v9609_v11 = vld [vmem:[%s10198_s30 + $0x2c] sm:$0x1] }
 0x22e   : > { %v12109_v55 = vpop.f32.mrf.mxu3  ;;  %4995 = vrot.lane.b32.xlu0 %v9989_v48, %s10141_s14  ;;  %v6013_v53 = vrot.slane %v6011_v57, 4  ;;  %v6017_v45 = vshll.u32 %v9609_v11, 16  ;;  %v9605_v48 = vld [vmem:[%s10198_s30 + $0x1c] sm:$0xf]  ;;  %v5974_v11 = vshrl.u32 %v9604_v34, 16 }
 0x22f   : > { %v3696_v47 = vadd.f32 %v12031_v63, %v3039_v1  ;;  %v3400_v62 = vrot.slane %v3399_v23, 4  ;;  %v12126_v63 = vadd.f32 %v11915_v26, %v11940_v0  ;;  %v4760_v1 = vpop.permute.xlu1 %4759  ;;  %v3395_v26 = vsel %vm10223_vm4, %v3390_v56, %v12094_v50  ;;  %v14506_v23 = vld [vmem:[#allocation19_spill] sm:$0xff] }
 0x230   : > { %v6014_v57 = vor.u32 %v6013_v53, %v6009_v14  ;;  %v6010_v0 = vsel %vm10223_vm4, %v6005_v59, %v6009_v14  ;;  %v12145_v24 = vadd.f32 %v14506_v23, %v14505_v51  ;;  %v12164_v27 = vunpack.c.l.b16 %v3395_v26 }
 0x231   : > { %v12116_v21 = vpop.f32.mrf.mxu0  ;;  %9242 = vmatmul.msk.bf16.gmra.mxu2 %vm694_vm1, %v9980_v12  ;;  %14503 = vst [vmem:[#allocation11_spill] sm:$0xff] %v12126_v63  ;;  %v6019_v12 = vrot.slane %v6017_v45, 5  ;;  %v4093_v60 = vadd.f32 %v4014_v25, %v3696_v47  ;;  %v14507_v25 = vld [vmem:[#allocation21_spill] sm:$0xff]  ;;  %v3405_v50 = vsel %vm10223_vm4, %v3400_v62, %v3404_v16  ;;  %v12160_v47 = vadd.f32 %v12131_v10, %v12084_v8  ;;  %v9285_v16 = vld [vmem:[%s10198_s30 + $0xa8] sm:$0xf] }
 0x232   : > { %v6015_v58 = vrot.slane %v6014_v57, 4  ;;  %v12149_v41 = vadd.f32 %v14507_v25, %v11538_v3  ;;  %v9988_v3 = vld [vmem:[%s10198_s30 + $0xc] sm:$0xff]  ;;  %v3870_v14 = vrot.slane %v12060_v40, 5  ;;  %v5976_v62 = vrot.slane %v5974_v11, 4 }
 0x233   : > { %v12133_v44 = vpop.f32.mrf.mxu1  ;;  %9307 = vmatmul.msk.bf16.gmra.mxu3 %vm694_vm1, %v3545_v43  ;;  %v9324_v43 = vld [vmem:[%s10198_s30 + $0x9c] sm:$0xe]  ;;  %v12173_v53 = vadd.f32 %v12131_v10, %v4093_v60  ;;  %v5977_v8 = vshll.u32 %v9604_v34, 16  ;;  %4993 = vrot.lane.b32.xlu2 %v9988_v3, %s10141_s14  ;;  %v5983_v57 = vshll.u32 %v9605_v48, 16  ;;  %v5987_v26 = vshrl.u32 %v9605_v48, 16 }
 0x234   : > { %14504 = vst [vmem:[#allocation12_spill] sm:$0xff] %v12133_v44  ;;  %9354 = vmatmul.msk.bf16.gmra.mxu0 %vm694_vm1, %v3945_v31  ;;  %v2963_v61 = vpop.f32.mrf.mxu2  ;;  %v6338_v31 = vunpack.c.l.b16 %v6010_v0  ;;  %v6020_v22 = vsel %vm10223_vm4, %v6015_v58, %v6019_v12  ;;  %v5993_v12 = vshll.u32 %v9606_v18, 16  ;;  %v12181_v0 = vld [vmem:[%s10198_s30 + $0xac] sm:$0xf]  ;;  %v9340_v58 = vrot.slane %v9324_v43, 9 }
 0x235   : > { %v6339_v45 = vunpack.c.l.b16 %v6020_v22  ;;  %v5979_v60 = vrot.slane %v5977_v8, 5  ;;  %v3407_v51 = vshrl.u32 %v9285_v16, 16  ;;  %v3872_v34 = vrot.slane %v3870_v14, 4  ;;  %v12187_v3 = vld [vmem:[%s10198_s30 + $0xb0] sm:$0x1] }
 0x236   : > { %9371 = vmatmul.msk.bf16.gmra.mxu1 %vm694_vm1, %v4760_v1  ;;  %v12162_v56 = vpop.f32.mrf.mxu3  ;;  %v12177_v1 = vunpack.c.l.b16 %v3405_v50  ;;  %v3873_v25 = vrot.slane %v12092_v6, 5  ;;  %v5985_v50 = vrot.slane %v5983_v57, 5  ;;  %v5989_v11 = vrot.slane %v5987_v26, 4  ;;  %v9610_v57 = vld [vmem:[%s10198_s30 + $0x30] sm:$0xf] }
 0x237   : > { %v6368_v40 = vpack.c.b16 %v6339_v45, %v6338_v31  ;;  %v5980_v22 = vor.u32 %v5979_v60, %v5976_v62  ;;  %v3409_v31 = vrot.slane %v3407_v51, 4  ;;  %v3410_v43 = vshll.u32 %v9285_v16, 16  ;;  %v14509_v45 = vld [vmem:[#allocation14_spill] sm:$0xff] }
 0x238   : > { %v3416_v18 = vshll.u32 %v12181_v0, 16  ;;  %v3040_v8 = vadd.f32 %v2963_v61, %v14509_v45  ;;  %v5990_v44 = vor.u32 %v5989_v11, %v5985_v50  ;;  %v5995_v37 = vrot.slane %v5993_v12, 5  ;;  %v9990_v51 = vld [vmem:[%s10198_s30 + $0x24] sm:$0xff] }
 0x239   : > { %v12175_v59 = vpop.f32.mrf.mxu0  ;;  %6386 = vrot.lane.b32.xlu0 %v6368_v40, %s10141_s14  ;;  %v3420_v6 = vshrl.u32 %v12181_v0, 16  ;;  %v5981_v26 = vrot.slane %v5980_v22, 4  ;;  %v3412_v46 = vrot.slane %v3410_v43, 5  ;;  %v3426_v16 = vshll.u32 %v12187_v3, 16  ;;  %v14510_v45 = vld [vmem:[#allocation15_spill] sm:$0xff]  ;;  %4997 = vrot.lane.b32.xlu1 %v9990_v51, %s10141_s14 }
 0x23a   : > { %v12196_v40 = vrot.slane %v3416_v18, 5  ;;  %v3546_v61 = vpack.c.b16 %v12177_v1, %v12164_v27  ;;  %v12205_v12 = vsel %vm10438_vm7, %v9340_v58, %v3870_v14  ;;  %v5991_v60 = vrot.slane %v5990_v44, 4  ;;  %v9612_v58 = vld [vmem:[%s10198_s30 + $0x38] sm:$0x1] }
 0x23b   : > { %v12183_v23 = vpop.f32.mrf.mxu1  ;;  %v3422_v11 = vrot.slane %v3420_v6, 4  ;;  %v5986_v43 = vsel %vm10223_vm4, %v5981_v26, %v5985_v50  ;;  %v3413_v18 = vor.u32 %v3412_v46, %v3409_v31  ;;  %v6022_v63 = vshrl.u32 %v9610_v57, 16 }
 0x23c   : > { %14508 = vst [vmem:[#allocation13_spill] sm:$0xff] %v12183_v23  ;;  %v2965_v48 = vpop.f32.mrf.mxu2  ;;  %v9981_v23 = vld [vmem:[%s10198_s30 + $0x90] sm:$0xff]  ;;  %v5996_v44 = vsel %vm10223_vm4, %v5991_v60, %v5995_v37  ;;  %v6336_v14 = vunpack.c.l.b16 %v5986_v43  ;;  %v3428_v46 = vrot.slane %v3426_v16, 5  ;;  %v6025_v6 = vshll.u32 %v9610_v57, 16 }
 0x23d   : > { %v3041_v22 = vadd.f32 %v2965_v48, %v14510_v45  ;;  %v3423_v1 = vor.u32 %v3422_v11, %v12196_v40  ;;  %v6337_v50 = vunpack.c.l.b16 %v5996_v44  ;;  %v3414_v48 = vrot.slane %v3413_v18, 4  ;;  %v10006_v18 = vld [vmem:[%s10198_s30 + $0x30] sm:$0xff] }
 0x23e   : > { %v12199_v62 = vpop.f32.mrf.mxu3  ;;  %v6024_v31 = vrot.slane %v6022_v63, 4  ;;  %v3697_v26 = vadd.f32 %v12077_v39, %v3040_v8  ;;  %v6031_v60 = vshll.u32 %v9611_v52, 16  ;;  %v6035_v43 = vshrl.u32 %v9611_v52, 16  ;;  %v14512_v8 = vld [vmem:[#allocation16_spill] sm:$0xff] }
 0x23f   : > { %v3424_v37 = vrot.slane %v3423_v1, 4  ;;  %v3874_v51 = vsel %vm10438_vm7, %v3872_v34, %v3873_v25  ;;  %v6367_v63 = vpack.c.b16 %v6337_v50, %v6336_v14  ;;  %v6027_v57 = vrot.slane %v6025_v6, 5  ;;  %v9325_v50 = vld [vmem:[%s10198_s30 + $0xa8] sm:$0xe] }
 0x240   : > { %v6041_v11 = vshll.u32 %v9612_v58, 16  ;;  %v4160_v39 = vmax.f32 %v12160_v47, 0.0  ;;  %v3698_v52 = vadd.f32 %v12109_v55, %v3041_v22  ;;  %v6033_v44 = vrot.slane %v6031_v60, 5 }
 0x241   : > { %v12218_v27 = vpop.f32.mrf.mxu0  ;;  %9243 = vmatmul.msk.bf16.gmra.mxu2 %vm694_vm1, %v9981_v23  ;;  %v4762_v23 = vpop.permute.xlu2 %4761  ;;  %6384 = vrot.lane.b32.xlu2 %v6367_v63, %s10141_s14  ;;  %v3429_v34 = vsel %vm10223_vm4, %v3424_v37, %v3428_v46  ;;  %v6028_v25 = vor.u32 %v6027_v57, %v6024_v31  ;;  %v6037_v14 = vrot.slane %v6035_v43, 4  ;;  %v4161_v55 = vmax.f32 %v12173_v53, 0.0 }
 0x242   : > { %v4094_v22 = vadd.f32 %v12116_v21, %v3697_v26  ;;  %v3927_v58 = vunpack.c.l.b16 %v3874_v51  ;;  %5703 = vrot.lane.b32.xlu0 %v10006_v18, %s10141_s14  ;;  %v3877_v46 = vrot.slane %v12181_v0, 5  ;;  %v4095_v31 = vadd.f32 %v12175_v59, %v3698_v52 }
 0x243   : > { %v12227_v45 = vpop.f32.mrf.mxu1  ;;  %9308 = vmatmul.msk.bf16.gmra.mxu3 %vm694_vm1, %v3546_v61  ;;  %v3419_v61 = vsel %vm10223_vm4, %v3414_v48, %v12196_v40  ;;  %v3926_v40 = vunpack.c.l.b16 %v12205_v12  ;;  %v6029_v48 = vrot.slane %v6028_v25, 4  ;;  %v6038_v6 = vor.u32 %v6037_v14, %v6033_v44 }
 0x244   : > { %9355 = vmatmul.msk.bf16.gmra.mxu0 %vm694_vm1, %v12151_v49  ;;  %v2968_v16 = vpop.f32.mrf.mxu2  ;;  %v12261_v53 = vunpack.c.l.b16 %v3419_v61  ;;  %v12263_v21 = vunpack.c.l.b16 %v3429_v34  ;;  %v2381_v12 = vadd.f32 %v11949_v4, %v11993_v7  ;;  %v3879_v59 = vrot.slane %v3877_v46, 4 }
 0x245   : > { %v3042_v49 = vadd.f32 %v2968_v16, %v14512_v8  ;;  %v6034_v60 = vsel %vm10223_vm4, %v6029_v48, %v6033_v44  ;;  %v6039_v43 = vrot.slane %v6038_v6, 4  ;;  %v9341_v16 = vrot.slane %v9325_v50, 9  ;;  %v9982_v8 = vld [vmem:[%s10198_s30 + $0x9c] sm:$0xff]  ;;  %v10073_v48 = vld [vmem:[%s10198_s30 + $0x34] sm:$0xf] }
 0x246   : > { %9372 = vmatmul.msk.bf16.gmra.mxu1 %vm694_vm1, %v4762_v23  ;;  %v12253_v1 = vpop.f32.mrf.mxu3  ;;  %v6043_v23 = vrot.slane %v6041_v11, 5  ;;  %v6340_v51 = vunpack.c.l.b16 %v6034_v60  ;;  %v3880_v63 = vrot.slane %v12187_v3, 5  ;;  %v12274_v57 = vadd.f32 %v11883_v13, %v2381_v12  ;;  %v14513_v13 = vld [vmem:[#allocation17_spill] sm:$0xff] }
 0x247   : > { %v3699_v26 = vadd.f32 %v12162_v56, %v3042_v49  ;;  %v4193_v4 = vpack.c.bf16 %v4161_v55, %v4161_v55  ;;  %v2382_v11 = vadd.f32 %v12003_v54, %v12029_v35  ;;  %v12286_v3 = vadd.f32 %v12131_v10, %v4094_v22 }
 0x248   : > { %v6044_v56 = vsel %vm10223_vm4, %v6039_v43, %v6043_v23  ;;  %v3947_v49 = vpack.c.b16 %v3927_v58, %v3926_v40  ;;  %v10142_v18 = vmov 0   ;;  %v12293_v34 = vadd.f32 %v12131_v10, %v4095_v31  ;;  %v10005_v40 = vld [vmem:[%s10198_s30 + $0x24] sm:$0xff]  ;;  %v5171_v58 = vld [vmem:[%s10198_s30 + $0x30] sm:$0xe]  ;;  %v10074_v23 = vld [vmem:[%s10198_s30 + $0x38] sm:$0x1] }
 0x249   : > { %v4024_v37 = vpop.f32.mrf.mxu0  ;;  %v6341_v61 = vunpack.c.l.b16 %v6044_v56  ;;  %174 = vst [vmem:[%s12279_s29 + $0x4] sm:$0xf] %v10142_v18  ;;  %v4096_v54 = vadd.f32 %v12218_v27, %v3699_v26  ;;  %v3547_v35 = vpack.c.b16 %v12263_v21, %v12261_v53  ;;  %v12299_v25 = vadd.f32 %v11922_v36, %v2382_v11  ;;  %v9288_v36 = vld [vmem:[%s10198_s30 + $0xb4] sm:$0xf]  ;;  %v12320_v31 = vld [vmem:[%s10198_s30 + $0xb8] sm:$0xf]  ;;  %5701 = vrot.lane.b32.xlu2 %v10005_v40, %s10141_s14  ;;  %v4764_v56 = vpop.permute.xlu0 %4763 }
 0x24a   : > { %173 = vst [vmem:[%s12279_s29] sm:$0xf] %v10142_v18  ;;  %v12308_v22 = vsel %vm10438_vm7, %v9341_v16, %v3877_v46  ;;  %v12312_v27 = vsel %vm10438_vm7, %v3879_v59, %v3880_v63  ;;  %v9461_v50 = vrot.slane %v5171_v58, 9  ;;  %v5245_v6 = vrot.slane %v10073_v48, 5  ;;  %v12325_v46 = vld [vmem:[%s10198_s30 + $0xbc] sm:$0x1]  ;;  %v14514_v40 = vld [vmem:[#allocation18_spill] sm:$0xff] }
 0x24b   : > { %v12270_v0 = vpop.f32.mrf.mxu1  ;;  %v6369_v55 = vpack.c.b16 %v6341_v61, %v6340_v51  ;;  %v3431_v53 = vshrl.u32 %v9288_v36, 16  ;;  %v3434_v12 = vshll.u32 %v9288_v36, 16  ;;  %v3440_v26 = vshll.u32 %v12320_v31, 16  ;;  %4226 = vst.msk [vmem:[%s12279_s29 + $0x4] sm:$0xf] %vm4224_vm8, %v4193_v4 }
 0x24c   : > { %v2970_v7 = vpop.f32.mrf.mxu2  ;;  %v3444_v60 = vshrl.u32 %v12320_v31, 16  ;;  %v5246_v43 = vsel %vm10438_vm7, %v9461_v50, %v5245_v6  ;;  %v5247_v16 = vrot.slane %v5245_v6, 4  ;;  %v3450_v59 = vshll.u32 %v12325_v46, 16  ;;  %175 = vst [vmem:[%s12279_s29 + $0x8] sm:$0xf] %v10142_v18 }
 0x24d   : > { %v3043_v52 = vadd.f32 %v2970_v7, %v14513_v13  ;;  %6388 = vrot.lane.b32.xlu1 %v6369_v55, %s10141_s14  ;;  %v3433_v51 = vrot.slane %v3431_v53, 4  ;;  %v5336_v11 = vunpack.c.l.b16 %v5246_v43  ;;  %v3436_v13 = vrot.slane %v3434_v12, 5  ;;  %176 = vst [vmem:[%s12279_s29 + $0xc] sm:$0xf] %v10142_v18  ;;  %v10076_v43 = vld [vmem:[%s10198_s30 + $0x2c] sm:$0x1] }
 0x24e   : > { %v12304_v14 = vpop.f32.mrf.mxu3  ;;  %v4163_v61 = vmax.f32 %v12293_v34, 0.0  ;;  %v3446_v4 = vrot.slane %v3444_v60, 4  ;;  %177 = vst [vmem:[%s12279_s29 + $0x10] sm:$0xf] %v10142_v18 }
 0x24f   : > { %v3700_v44 = vadd.f32 %v12199_v62, %v3043_v52  ;;  %v5248_v62 = vrot.slane %v10074_v23, 5  ;;  %v3442_v52 = vrot.slane %v3440_v26, 5  ;;  %v3437_v58 = vor.u32 %v3436_v13, %v3433_v51  ;;  %178 = vst [vmem:[%s12279_s29 + $0x14] sm:$0xf] %v10142_v18  ;;  %v10075_v26 = vld [vmem:[%s10198_s30 + $0x28] sm:$0xf] }
 0x250   : > { %v5238_v60 = vrot.slane %v10075_v26, 5  ;;  %v9326_v51 = vld [vmem:[%s10198_s30 + $0xb4] sm:$0xe]  ;;  %179 = vst [vmem:[%s12279_s29 + $0x18] sm:$0xf] %v10142_v18 }
 0x251   : > { %v4027_v21 = vpop.f32.mrf.mxu0  ;;  %9244 = vmatmul.msk.bf16.gmra.mxu2 %vm694_vm1, %v9982_v8  ;;  %v4097_v63 = vadd.f32 %v4024_v37, %v3700_v44  ;;  %v4162_v8 = vmax.f32 %v12286_v3, 0.0  ;;  %v5249_v37 = vsel %vm10438_vm7, %v5247_v16, %v5248_v62  ;;  %v12348_v44 = vadd.f32 %v12131_v10, %v4096_v54  ;;  %180 = vst [vmem:[%s12279_s29 + $0x1c] sm:$0xf] %v10142_v18 }
 0x252   : > { %v5337_v34 = vunpack.c.l.b16 %v5249_v37  ;;  %v3447_v36 = vor.u32 %v3446_v4, %v3442_v52  ;;  %v3452_v54 = vrot.slane %v3450_v59, 5  ;;  %v3438_v62 = vrot.slane %v3437_v58, 4  ;;  %181 = vst [vmem:[%s12279_s29 + $0x20] sm:$0xf] %v10142_v18 }
 0x253   : > { %v12335_v7 = vpop.f32.mrf.mxu1  ;;  %9309 = vmatmul.msk.bf16.gmra.mxu3 %vm694_vm1, %v3547_v35  ;;  %v3929_v35 = vunpack.c.l.b16 %v12312_v27  ;;  %v12359_v50 = vadd.f32 %v12131_v10, %v4097_v63  ;;  %v10007_v27 = vld [vmem:[%s10198_s30 + $0x3c] sm:$0xff]  ;;  %v5241_v16 = vrot.slane %v10076_v43, 5  ;;  %v5240_v37 = vrot.slane %v5238_v60, 4  ;;  %182 = vst [vmem:[%s12279_s29 + $0x24] sm:$0xf] %v10142_v18 }
 0x254   : > { %9356 = vmatmul.msk.bf16.gmra.mxu0 %vm694_vm1, %v3947_v49  ;;  %v2973_v55 = vpop.f32.mrf.mxu2  ;;  %v3928_v49 = vunpack.c.l.b16 %v12308_v22  ;;  %v5364_v23 = vpack.c.b16 %v5337_v34, %v5336_v11  ;;  %v5170_v22 = vld [vmem:[%s10198_s30 + $0x24] sm:$0xe]  ;;  %v3448_v53 = vrot.slane %v3447_v36, 4  ;;  %v3884_v11 = vrot.slane %v12320_v31, 5  ;;  %183 = vst [vmem:[%s12279_s29 + $0x28] sm:$0xf] %v10142_v18 }
 0x255   : > { %v3044_v3 = vadd.f32 %v2973_v55, %v14514_v40  ;;  %v9460_v12 = vrot.slane %v5170_v22, 9  ;;  %5705 = vrot.lane.b32.xlu1 %v10007_v27, %s10141_s14  ;;  %v12398_v34 = vpack.c.bf16 %v4160_v39, %v4160_v39  ;;  %v12400_v58 = vpack.c.bf16 %v4162_v8, %v4162_v8  ;;  %v9983_v22 = vld [vmem:[%s10198_s30 + $0xa8] sm:$0xff]  ;;  %184 = vst [vmem:[%s12279_s29 + $0x2c] sm:$0xf] %v10142_v18 }
 0x256   : > { %9373 = vmatmul.msk.bf16.gmra.mxu1 %vm694_vm1, %v4764_v56  ;;  %v12362_v6 = vpop.f32.mrf.mxu3  ;;  %5384 = vrot.lane.b32.xlu0 %v5364_v23, %s10141_s14  ;;  %v9342_v56 = vrot.slane %v9326_v51, 9  ;;  %v3453_v13 = vsel %vm10223_vm4, %v3448_v53, %v3452_v54  ;;  %v12402_v36 = vpack.c.bf16 %v4163_v61, %v4163_v61  ;;  %v14515_v23 = vld [vmem:[#allocation20_spill] sm:$0xff]  ;;  %v3886_v39 = vrot.slane %v3884_v11, 4  ;;  %v9992_v51 = vld [vmem:[%s10198_s30 + $0x3c] sm:$0xff]  ;;  %185 = vst [vmem:[%s12279_s29 + $0x30] sm:$0xf] %v10142_v18 }
 0x257   : > { %v3701_v48 = vadd.f32 %v12253_v1, %v3044_v3  ;;  %v3443_v1 = vsel %vm10223_vm4, %v3438_v62, %v3442_v52  ;;  %v3530_v31 = vunpack.c.l.b16 %v3453_v13  ;;  %v3887_v27 = vrot.slane %v12325_v46, 5  ;;  %186 = vst [vmem:[%s12279_s29 + $0x34] sm:$0xf] %v10142_v18 }
 0x258   : > { %v12378_v55 = vunpack.c.l.b16 %v3443_v1  ;;  %v12391_v3 = vsel %vm10438_vm7, %v9342_v56, %v3884_v11  ;;  %v4164_v8 = vmax.f32 %v12348_v44, 0.0  ;;  %v4165_v61 = vmax.f32 %v12359_v50, 0.0  ;;  %v5172_v44 = vld [vmem:[%s10198_s30 + $0x3c] sm:$0xe]  ;;  %v10078_v1 = vld [vmem:[%s10198_s30 + $0x44] sm:$0x1] }
 0x259   : > { %v4098_v59 = vadd.f32 %v4027_v21, %v3701_v48  ;;  %v4029_v63 = vpop.f32.mrf.mxu0  ;;  %v5239_v21 = vsel %vm10438_vm7, %v9460_v12, %v5238_v60  ;;  %v5242_v48 = vsel %vm10438_vm7, %v5240_v37, %v5241_v16  ;;  %v3948_v53 = vpack.c.b16 %v3929_v35, %v3928_v49  ;;  %v10077_v35 = vld [vmem:[%s10198_s30 + $0x40] sm:$0xf]  ;;  %v12429_v11 = vld [vmem:[%s10198_s30 + $0xc4] sm:$0xf]  ;;  %v12436_v37 = vld [vmem:[%s10198_s30 + $0xc8] sm:$0x1] }
 0x25a   : > { %v5334_v40 = vunpack.c.l.b16 %v5239_v21  ;;  %v5335_v47 = vunpack.c.l.b16 %v5242_v48  ;;  %v3930_v12 = vunpack.c.l.b16 %v12391_v3  ;;  %v3548_v46 = vpack.c.b16 %v3530_v31, %v12378_v55  ;;  %187 = vst [vmem:[%s12279_s29 + $0x38] sm:$0xf] %v10142_v18  ;;  %v9327_v3 = vld [vmem:[%s10198_s30 + $0xc0] sm:$0xe] }
 0x25b   : > { %v12385_v52 = vadd.f32 %v12131_v10, %v4098_v59  ;;  %v12387_v4 = vpop.f32.mrf.mxu1  ;;  %v9291_v59 = vld [vmem:[%s10198_s30 + $0xc0] sm:$0xf]  ;;  %v9462_v49 = vrot.slane %v5172_v44, 9  ;;  %v5252_v50 = vrot.slane %v10077_v35, 5  ;;  %v5255_v56 = vrot.slane %v10078_v1, 5 }
 0x25c   : > { %v2975_v54 = vpop.f32.mrf.mxu2  ;;  %v5363_v16 = vpack.c.b16 %v5335_v47, %v5334_v40  ;;  %v3455_v13 = vshrl.u32 %v9291_v59, 16  ;;  %v3888_v55 = vsel %vm10438_vm7, %v3886_v39, %v3887_v27  ;;  %v3464_v31 = vshll.u32 %v12429_v11, 16  ;;  %188 = vst [vmem:[%s12279_s29 + $0x3c] sm:$0xf] %v10142_v18  ;;  %v14516_v35 = vld [vmem:[#allocation22_spill] sm:$0xff] }
 0x25d   : > { %v3045_v62 = vadd.f32 %v2975_v54, %v14515_v23  ;;  %v4166_v26 = vmax.f32 %v12385_v52, 0.0  ;;  %v3458_v52 = vshll.u32 %v9291_v59, 16  ;;  %v5253_v40 = vsel %vm10438_vm7, %v9462_v49, %v5252_v50  ;;  %189 = vst [vmem:[%s12279_s29 + $0x40] sm:$0xf] %v10142_v18 }
 0x25e   : > { %v12420_v43 = vpop.f32.mrf.mxu3  ;;  %5382 = vrot.lane.b32.xlu2 %v5363_v16, %s10141_s14  ;;  %5001 = vrot.lane.b32.xlu0 %v9992_v51, %s10141_s14  ;;  %v3457_v54 = vrot.slane %v3455_v13, 4  ;;  %v3468_v48 = vshrl.u32 %v12429_v11, 16  ;;  %v5338_v47 = vunpack.c.l.b16 %v5253_v40  ;;  %v3466_v27 = vrot.slane %v3464_v31, 5  ;;  %190 = vst [vmem:[%s12279_s29 + $0x44] sm:$0xf] %v10142_v18 }
 0x25f   : > { %v3702_v60 = vadd.f32 %v12304_v14, %v3045_v62  ;;  %v3460_v39 = vrot.slane %v3458_v52, 5  ;;  %v3931_v16 = vunpack.c.l.b16 %v3888_v55  ;;  %v3474_v59 = vshll.u32 %v12436_v37, 16  ;;  %191 = vst [vmem:[%s12279_s29 + $0x48] sm:$0xf] %v10142_v18 }
 0x260   : > { %v3470_v51 = vrot.slane %v3468_v48, 4  ;;  %v12464_v13 = vpack.c.bf16 %v4165_v61, %v4165_v61  ;;  %v12469_v55 = vpack.c.bf16 %v4166_v26, %v4166_v26  ;;  %v9616_v61 = vld [vmem:[%s10198_s30 + $0x48] sm:$0xf]  ;;  %v9618_v26 = vld [vmem:[%s10198_s30 + $0x50] sm:$0x1] }
 0x261   : > { %v4099_v14 = vadd.f32 %v4029_v63, %v3702_v60  ;;  %v4032_v21 = vpop.f32.mrf.mxu0  ;;  %9245 = vmatmul.msk.bf16.gmra.mxu2 %vm694_vm1, %v9983_v22  ;;  %v5254_v63 = vrot.slane %v5252_v50, 4  ;;  %v4766_v22 = vpop.permute.xlu1 %4765  ;;  %v12480_v48 = vpack.c.b16 %v3931_v16, %v3930_v12  ;;  %192 = vst [vmem:[%s12279_s29 + $0x4c] sm:$0xf] %v10142_v18 }
 0x262   : > { %193 = vst [vmem:[%s12279_s29 + $0x50] sm:$0xf] %v10142_v18 }
 0x263   : > { %v4135_v23 = vadd.f32 %v12131_v10, %v4099_v14  ;;  %v12448_v62 = vpop.f32.mrf.mxu1  ;;  %9310 = vmatmul.msk.bf16.gmra.mxu3 %vm694_vm1, %v3548_v46  ;;  %v5256_v44 = vsel %vm10438_vm7, %v5254_v63, %v5255_v56  ;;  %v12462_v46 = vpack.c.bf16 %v4164_v8, %v4164_v8  ;;  %v3471_v56 = vor.u32 %v3470_v51, %v3466_v27  ;;  %v9991_v8 = vld [vmem:[%s10198_s30 + $0x30] sm:$0xff] }
 0x264   : > { %9357 = vmatmul.msk.bf16.gmra.mxu0 %vm694_vm1, %v3948_v53  ;;  %v2978_v60 = vpop.f32.mrf.mxu2  ;;  %v5339_v1 = vunpack.c.l.b16 %v5256_v44  ;;  %v3461_v53 = vor.u32 %v3460_v39, %v3457_v54  ;;  %v3476_v14 = vrot.slane %v3474_v59, 5  ;;  %v6070_v39 = vshrl.u32 %v9616_v61, 16  ;;  %194 = vst [vmem:[%s12279_s29 + $0x54] sm:$0xf] %v10142_v18 }
 0x265   : > { %v4167_v49 = vmax.f32 %v4135_v23, 0.0  ;;  %v3046_v50 = vadd.f32 %v2978_v60, %v14516_v35  ;;  %v3472_v23 = vrot.slane %v3471_v56, 4  ;;  %v6073_v44 = vshll.u32 %v9616_v61, 16  ;;  %195 = vst [vmem:[%s12279_s29 + $0x58] sm:$0xf] %v10142_v18 }
 0x266   : > { %9374 = vmatmul.msk.bf16.gmra.mxu1 %vm694_vm1, %v4766_v22  ;;  %v12472_v31 = vpop.f32.mrf.mxu3  ;;  %v5365_v40 = vpack.c.b16 %v5339_v1, %v5338_v47  ;;  %v3462_v63 = vrot.slane %v3461_v53, 4  ;;  %v9617_v22 = vld [vmem:[%s10198_s30 + $0x4c] sm:$0xf]  ;;  %4999 = vrot.lane.b32.xlu2 %v9991_v8, %s10141_s14  ;;  %196 = vst [vmem:[%s12279_s29 + $0x5c] sm:$0xf] %v10142_v18 }
 0x267   : > { %v3703_v52 = vadd.f32 %v12362_v6, %v3046_v50  ;;  %v12476_v54 = vpack.c.bf16 %v4167_v49, %v4167_v49  ;;  %v6079_v51 = vshll.u32 %v9617_v22, 16  ;;  %v3477_v12 = vsel %vm10223_vm4, %v3472_v23, %v3476_v14  ;;  %v14517_v8 = vld [vmem:[#allocation23_spill] sm:$0xff]  ;;  %v9984_v23 = vld [vmem:[%s10198_s30 + $0xb4] sm:$0xff]  ;;  %197 = vst [vmem:[%s12279_s29 + $0x60] sm:$0xf] %v10142_v18 }
 0x268   : > { %5386 = vrot.lane.b32.xlu1 %v5365_v40, %s10141_s14  ;;  %v3467_v47 = vsel %vm10223_vm4, %v3462_v63, %v3466_v27  ;;  %v6083_v59 = vshrl.u32 %v9617_v22, 16  ;;  %v3532_v35 = vunpack.c.l.b16 %v3477_v12  ;;  %v6075_v50 = vrot.slane %v6073_v44, 5  ;;  %198 = vst [vmem:[%s12279_s29 + $0x64] sm:$0xf] %v10142_v18 }
 0x269   : > { %v4100_v6 = vadd.f32 %v4032_v21, %v3703_v52  ;;  %v4034_v60 = vpop.f32.mrf.mxu0  ;;  %v12493_v16 = vunpack.c.l.b16 %v3467_v47  ;;  %v6072_v21 = vrot.slane %v6070_v39, 4  ;;  %v6081_v1 = vrot.slane %v6079_v51, 5  ;;  %199 = vst [vmem:[%s12279_s29 + $0x68] sm:$0xf] %v10142_v18 }
 0x26a   : > { %v6085_v56 = vrot.slane %v6083_v59, 4  ;;  %v6089_v14 = vshll.u32 %v9618_v26, 16  ;;  %v9343_v52 = vrot.slane %v9327_v3, 9  ;;  %v3891_v40 = vrot.slane %v12429_v11, 5  ;;  %v9614_v59 = vld [vmem:[%s10198_s30 + $0x40] sm:$0xf] }
 0x26b   : > { %v4136_v27 = vadd.f32 %v12131_v10, %v4100_v6  ;;  %v12498_v49 = vpop.f32.mrf.mxu1  ;;  %v3549_v22 = vpack.c.b16 %v3532_v35, %v12493_v16  ;;  %v6076_v39 = vor.u32 %v6075_v50, %v6072_v21  ;;  %v3894_v16 = vrot.slane %v12436_v37, 5  ;;  %v9613_v21 = vld [vmem:[%s10198_s30 + $0x3c] sm:$0xf]  ;;  %v9615_v37 = vld [vmem:[%s10198_s30 + $0x44] sm:$0x1] }
 0x26c   : > { %v2980_v53 = vpop.f32.mrf.mxu2  ;;  %v6086_v6 = vor.u32 %v6085_v56, %v6081_v1  ;;  %v6091_v47 = vrot.slane %v6089_v14, 5  ;;  %v3892_v26 = vsel %vm10438_vm7, %v9343_v52, %v3891_v40  ;;  %v3893_v11 = vrot.slane %v3891_v40, 4  ;;  %v9993_v56 = vld [vmem:[%s10198_s30 + $0x48] sm:$0xff]  ;;  %200 = vst [vmem:[%s12279_s29 + $0x6c] sm:$0xf] %v10142_v18 }
 0x26d   : > { %v4168_v63 = vmax.f32 %v4136_v27, 0.0  ;;  %v3047_v61 = vadd.f32 %v2980_v53, %v14517_v8  ;;  %v6077_v12 = vrot.slane %v6076_v39, 4  ;;  %v3932_v35 = vunpack.c.l.b16 %v3892_v26  ;;  %v9294_v8 = vld [vmem:[%s10198_s30 + $0xcc] sm:$0xf]  ;;  %201 = vst [vmem:[%s12279_s29 + $0x70] sm:$0xf] %v10142_v18 }
 0x26e   : > { %v12517_v3 = vpop.f32.mrf.mxu3  ;;  %v6087_v27 = vrot.slane %v6086_v6, 4  ;;  %v6046_v50 = vshrl.u32 %v9613_v21, 16  ;;  %v6049_v53 = vshll.u32 %v9613_v21, 16  ;;  %v3895_v40 = vsel %vm10438_vm7, %v3893_v11, %v3894_v16  ;;  %v4768_v11 = vpop.permute.xlu2 %4767  ;;  %v12539_v16 = vld [vmem:[%s10198_s30 + $0xd0] sm:$0xf] }
 0x26f   : > { %v12514_v44 = vpack.c.bf16 %v4168_v63, %v4168_v63  ;;  %v3704_v51 = vadd.f32 %v12420_v43, %v3047_v61  ;;  %v6082_v43 = vsel %vm10223_vm4, %v6077_v12, %v6081_v1  ;;  %v6055_v63 = vshll.u32 %v9614_v59, 16  ;;  %202 = vst [vmem:[%s12279_s29 + $0x74] sm:$0xf] %v10142_v18 }
 0x270   : > { %v6092_v61 = vsel %vm10223_vm4, %v6087_v27, %v6091_v47  ;;  %v6344_v39 = vunpack.c.l.b16 %v6082_v43  ;;  %v3933_v6 = vunpack.c.l.b16 %v3895_v40  ;;  %5003 = vrot.lane.b32.xlu1 %v9993_v56, %s10141_s14  ;;  %v6059_v27 = vshrl.u32 %v9614_v59, 16  ;;  %203 = vst [vmem:[%s12279_s29 + $0x78] sm:$0xf] %v10142_v18 }
 0x271   : > { %v4101_v14 = vadd.f32 %v4034_v60, %v3704_v51  ;;  %v4037_v52 = vpop.f32.mrf.mxu0  ;;  %9246 = vmatmul.msk.bf16.gmra.mxu2 %vm694_vm1, %v9984_v23  ;;  %v6048_v60 = vrot.slane %v6046_v50, 4  ;;  %v6345_v23 = vunpack.c.l.b16 %v6092_v61  ;;  %v6051_v51 = vrot.slane %v6049_v53, 5  ;;  %204 = vst [vmem:[%s12279_s29 + $0x7c] sm:$0xf] %v10142_v18 }
 0x272   : > { %v6057_v12 = vrot.slane %v6055_v63, 5  ;;  %v12546_v21 = vpack.c.b16 %v3933_v6, %v3932_v35  ;;  %v6065_v50 = vshll.u32 %v9615_v37, 16  ;;  %v3479_v56 = vshrl.u32 %v9294_v8, 16  ;;  %v12552_v63 = vld [vmem:[%s10198_s30 + $0xd4] sm:$0x1] }
 0x273   : > { %v4137_v1 = vadd.f32 %v12131_v10, %v4101_v14  ;;  %v12536_v26 = vpop.f32.mrf.mxu1  ;;  %9311 = vmatmul.msk.bf16.gmra.mxu3 %vm694_vm1, %v3549_v22  ;;  %v6371_v43 = vpack.c.b16 %v6345_v23, %v6344_v39  ;;  %v6052_v40 = vor.u32 %v6051_v51, %v6048_v60  ;;  %v3482_v59 = vshll.u32 %v9294_v8, 16  ;;  %v9619_v60 = vld [vmem:[%s10198_s30 + $0x54] sm:$0xf]  ;;  %4225 = vst.msk [vmem:[%s12279_s29] sm:$0xf] %vm4224_vm8, %v12398_v34 }
 0x274   : > { %14518 = vst [vmem:[#allocation24_spill] sm:$0xff] %v12536_v26  ;;  %9358 = vmatmul.msk.bf16.gmra.mxu0 %vm694_vm1, %v12480_v48  ;;  %v2983_v47 = vpop.f32.mrf.mxu2  ;;  %v6061_v48 = vrot.slane %v6059_v27, 4  ;;  %v6067_v22 = vrot.slane %v6065_v50, 5  ;;  %v3481_v35 = vrot.slane %v3479_v56, 4  ;;  %v3488_v6 = vshll.u32 %v12539_v16, 16 }
 0x275   : > { %v4169_v53 = vmax.f32 %v4137_v1, 0.0  ;;  %v3048_v14 = vadd.f32 %v2983_v47, %v12145_v24  ;;  %6392 = vrot.lane.b32.xlu0 %v6371_v43, %s10141_s14  ;;  %v6053_v39 = vrot.slane %v6052_v40, 4  ;;  %v3484_v23 = vrot.slane %v3482_v59, 5  ;;  %v9620_v50 = vld [vmem:[%s10198_s30 + $0x58] sm:$0xf]  ;;  %v9985_v59 = vld [vmem:[%s10198_s30 + $0xc0] sm:$0xff] }
 0x276   : > { %9375 = vmatmul.msk.bf16.gmra.mxu1 %vm694_vm1, %v4768_v11  ;;  %v12562_v61 = vpop.f32.mrf.mxu3  ;;  %v6062_v1 = vor.u32 %v6061_v48, %v6057_v12  ;;  %v3492_v8 = vshrl.u32 %v12539_v16, 16  ;;  %v3498_v11 = vshll.u32 %v12552_v63, 16  ;;  %v3490_v27 = vrot.slane %v3488_v6, 5  ;;  %4227 = vst.msk [vmem:[%s12279_s29 + $0x8] sm:$0xf] %vm4224_vm8, %v12400_v58 }
 0x277   : > { %v12559_v37 = vpack.c.bf16 %v4169_v53, %v4169_v53  ;;  %v3705_v24 = vadd.f32 %v12472_v31, %v3048_v14  ;;  %v6058_v31 = vsel %vm10223_vm4, %v6053_v39, %v6057_v12  ;;  %v6094_v56 = vshrl.u32 %v9619_v60, 16  ;;  %v10009_v12 = vld [vmem:[%s10198_s30 + $0x54] sm:$0xff]  ;;  %4228 = vst.msk [vmem:[%s12279_s29 + $0xc] sm:$0xf] %vm4224_vm8, %v12402_v36 }
 0x278   : > { %v6063_v53 = vrot.slane %v6062_v1, 4  ;;  %v6342_v14 = vunpack.c.l.b16 %v6058_v31  ;;  %v3485_v43 = vor.u32 %v3484_v23, %v3481_v35  ;;  %v3494_v40 = vrot.slane %v3492_v8, 4  ;;  %v9621_v31 = vld [vmem:[%s10198_s30 + $0x5c] sm:$0x1]  ;;  %4229 = vst.msk [vmem:[%s12279_s29 + $0x10] sm:$0xf] %vm4224_vm8, %v12462_v46 }
 0x279   : > { %v4102_v51 = vadd.f32 %v4037_v52, %v3705_v24  ;;  %v4039_v47 = vpop.f32.mrf.mxu0  ;;  %v3500_v24 = vrot.slane %v3498_v11, 5  ;;  %v6096_v39 = vrot.slane %v6094_v56, 4  ;;  %v6097_v6 = vshll.u32 %v9619_v60, 16  ;;  %v9328_v60 = vld [vmem:[%s10198_s30 + $0xcc] sm:$0xe] }
 0x27a   : > { %v6068_v35 = vsel %vm10223_vm4, %v6063_v53, %v6067_v22  ;;  %v3486_v23 = vrot.slane %v3485_v43, 4  ;;  %v3495_v8 = vor.u32 %v3494_v40, %v3490_v27  ;;  %v6107_v40 = vshrl.u32 %v9620_v50, 16  ;;  %4230 = vst.msk [vmem:[%s12279_s29 + $0x14] sm:$0xf] %vm4224_vm8, %v12464_v13 }
 0x27b   : > { %v4138_v48 = vadd.f32 %v12131_v10, %v4102_v51  ;;  %v12576_v52 = vpop.f32.mrf.mxu1  ;;  %v6103_v51 = vshll.u32 %v9620_v50, 16  ;;  %v6343_v26 = vunpack.c.l.b16 %v6068_v35  ;;  %v6099_v56 = vrot.slane %v6097_v6, 5  ;;  %4231 = vst.msk [vmem:[%s12279_s29 + $0x18] sm:$0xf] %vm4224_vm8, %v12469_v55 }
 0x27c   : > { %14519 = vst [vmem:[#allocation19_spill] sm:$0xff] %v12576_v52  ;;  %v2985_v1 = vpop.f32.mrf.mxu2  ;;  %v3491_v22 = vsel %vm10223_vm4, %v3486_v23, %v3490_v27  ;;  %v3496_v53 = vrot.slane %v3495_v8, 4  ;;  %v6109_v50 = vrot.slane %v6107_v40, 4  ;;  %v6113_v58 = vshll.u32 %v9621_v31, 16  ;;  %v4770_v8 = vpop.permute.xlu0 %4769 }
 0x27d   : > { %v4170_v52 = vmax.f32 %v4138_v48, 0.0  ;;  %v3049_v11 = vadd.f32 %v2985_v1, %v12149_v41  ;;  %v6105_v43 = vrot.slane %v6103_v51, 5  ;;  %v6370_v6 = vpack.c.b16 %v6343_v26, %v6342_v14  ;;  %5709 = vrot.lane.b32.xlu0 %v10009_v12, %s10141_s14  ;;  %v5174_v12 = vld [vmem:[%s10198_s30 + $0x54] sm:$0xe]  ;;  %4232 = vst.msk [vmem:[%s12279_s29 + $0x1c] sm:$0xf] %vm4224_vm8, %v12476_v54 }
 0x27e   : > { %v12597_v48 = vpop.f32.mrf.mxu3  ;;  %v3533_v1 = vunpack.c.l.b16 %v3491_v22  ;;  %v3501_v34 = vsel %vm10223_vm4, %v3496_v53, %v3500_v24  ;;  %v6100_v27 = vor.u32 %v6099_v56, %v6096_v39  ;;  %v3898_v36 = vrot.slane %v12539_v16, 5  ;;  %4233 = vst.msk [vmem:[%s12279_s29 + $0x20] sm:$0xf] %vm4224_vm8, %v12514_v44  ;;  %v10008_v56 = vld [vmem:[%s10198_s30 + $0x48] sm:$0xff]  ;;  %v10080_v53 = vld [vmem:[%s10198_s30 + $0x5c] sm:$0x1] }
 0x27f   : > { %v4202_v18 = vpack.c.bf16 %v4170_v52, %v4170_v52  ;;  %v3706_v41 = vadd.f32 %v12517_v3, %v3049_v11  ;;  %6390 = vrot.lane.b32.xlu2 %v6370_v6, %s10141_s14  ;;  %v3534_v14 = vunpack.c.l.b16 %v3501_v34  ;;  %v9344_v52 = vrot.slane %v9328_v60, 9  ;;  %4234 = vst.msk [vmem:[%s12279_s29 + $0x24] sm:$0xf] %vm4224_vm8, %v12559_v37  ;;  %v5173_v37 = vld [vmem:[%s10198_s30 + $0x48] sm:$0xe] }
 0x280   : > { %v6101_v24 = vrot.slane %v6100_v27, 4  ;;  %v6110_v39 = vor.u32 %v6109_v50, %v6105_v43  ;;  %v6115_v35 = vrot.slane %v6113_v58, 5  ;;  %v3901_v46 = vrot.slane %v12552_v63, 5  ;;  %v10081_v34 = vld [vmem:[%s10198_s30 + $0x4c] sm:$0xf] }
 0x281   : > { %v4103_v3 = vadd.f32 %v4039_v47, %v3706_v41  ;;  %v4042_v26 = vpop.f32.mrf.mxu0  ;;  %9247 = vmatmul.msk.bf16.gmra.mxu2 %vm694_vm1, %v9985_v59  ;;  %v3550_v59 = vpack.c.b16 %v3534_v14, %v3533_v1  ;;  %v12624_v16 = vsel %vm10438_vm7, %v9344_v52, %v3898_v36  ;;  %v3900_v13 = vrot.slane %v3898_v36, 4  ;;  %4235 = vst.msk [vmem:[%s12279_s29 + $0x28] sm:$0xf] %vm4224_vm8, %v4202_v18  ;;  %v6766_v50 = vld [vmem:[%s14442_s1 + $0x1c] sm:$0x3] }
 0x282   : > { %v6111_v63 = vrot.slane %v6110_v39, 4  ;;  %v9464_v31 = vrot.slane %v5174_v12, 9  ;;  %v3934_v44 = vunpack.c.l.b16 %v12624_v16  ;;  %v5259_v27 = vrot.slane %v10081_v34, 5  ;;  %v12666_v39 = vpop.permute.xlu1 %4991  ;;  %v5175_v34 = vld [vmem:[%s10198_s30 + $0x60] sm:$0xe] }
 0x283   : > { %v4139_v47 = vadd.f32 %v12131_v10, %v4103_v3  ;;  %v12620_v23 = vpop.f32.mrf.mxu1  ;;  %v6106_v10 = vsel %vm10223_vm4, %v6101_v24, %v6105_v43  ;;  %9312 = vmatmul.msk.bf16.gmra.mxu3 %vm694_vm1, %v3550_v59  ;;  %v5269_v43 = vrot.slane %v10080_v53, 5  ;;  %v9463_v14 = vrot.slane %v5173_v37, 9  ;;  %v10082_v59 = vld [vmem:[%s10198_s30 + $0x50] sm:$0x1]  ;;  %v10010_v37 = vld [vmem:[%s10198_s30 + $0x60] sm:$0xff] }
 0x284   : > { %9359 = vmatmul.msk.bf16.gmra.mxu0 %vm694_vm1, %v12546_v21  ;;  %v2988_v55 = vpop.f32.mrf.mxu2  ;;  %v6346_v54 = vunpack.c.l.b16 %v6106_v10  ;;  %v3902_v21 = vsel %vm10438_vm7, %v3900_v13, %v3901_v46  ;;  %v6116_v60 = vsel %vm10223_vm4, %v6111_v63, %v6115_v35  ;;  %v5261_v35 = vrot.slane %v5259_v27, 4  ;;  %v12679_v13 = vld [vmem:[%s14443_s2] ss:$0 sm:$0xff] }
 0x285   : > { %v4171_v51 = vmax.f32 %v4139_v47, 0.0  ;;  %v3050_v11 = vadd.f32 %v2988_v55, %v11562_v19  ;;  %v10079_v19 = vld [vmem:[%s10198_s30 + $0x58] sm:$0xf]  ;;  %v6347_v1 = vunpack.c.l.b16 %v6116_v60  ;;  %v3935_v58 = vunpack.c.l.b16 %v3902_v21 }
 0x286   : > { %9376 = vmatmul.msk.bf16.gmra.mxu1 %vm694_vm1, %v4770_v8  ;;  %v5266_v22 = vrot.slane %v10079_v19, 5  ;;  %v12653_v6 = vpop.f32.mrf.mxu3  ;;  %v5260_v47 = vsel %vm10438_vm7, %v9463_v14, %v5259_v27  ;;  %v5262_v16 = vrot.slane %v10082_v59, 5  ;;  %v10084_v27 = vld [vmem:[%s10198_s30 + $0x64] sm:$0xf] }
 0x287   : > { %v4203_v40 = vpack.c.bf16 %v4171_v51, %v4171_v51  ;;  %v3707_v41 = vadd.f32 %v12562_v61, %v3050_v11  ;;  %v7051_v61 = vld [vmem:[%s14442_s1 + $0x1c] sm:$0xc]  ;;  %v6372_v12 = vpack.c.b16 %v6347_v1, %v6346_v54  ;;  %5707 = vrot.lane.b32.xlu2 %v10008_v56, %s10141_s14  ;;  %v5340_v63 = vunpack.c.l.b16 %v5260_v47  ;;  %v9986_v56 = vld [vmem:[%s10198_s30 + $0xcc] sm:$0xff] }
 0x288   : > { %v5267_v3 = vsel %vm10438_vm7, %v9464_v31, %v5266_v22  ;;  %v5268_v18 = vrot.slane %v5266_v22, 4  ;;  %v7165_v31 = vunpack.c.l.b16 %v7051_v61  ;;  %v5263_v11 = vsel %vm10438_vm7, %v5261_v35, %v5262_v16 }
 0x289   : > { %v4104_v52 = vadd.f32 %v4042_v26, %v3707_v41  ;;  %v4044_v36 = vpop.f32.mrf.mxu0  ;;  %v5342_v24 = vunpack.c.l.b16 %v5267_v3  ;;  %4236 = vst.msk [vmem:[%s12279_s29 + $0x2c] sm:$0xf] %vm4224_vm8, %v4203_v40  ;;  %v6896_v26 = vsel %vm743_vm0, %v6766_v50, 0  ;;  %6394 = vrot.lane.b32.xlu1 %v6372_v12, %s10141_s14  ;;  %v5341_v19 = vunpack.c.l.b16 %v5263_v11 }
 0x28a   : > { %v5270_v46 = vsel %vm10438_vm7, %v5268_v18, %v5269_v43  ;;  %6905 = vmatpush.bf16.msra.mxu2 %v6896_v26  ;;  %v3951_v22 = vpack.c.b16 %v3935_v58, %v3934_v44  ;;  %v7166_v53 = vpack.c.b16 %v7165_v31, %v7165_v31  ;;  %v5273_v50 = vrot.slane %v10084_v27, 5  ;;  %v10085_v58 = vld [vmem:[%s10198_s30 + $0x68] sm:$0x1]  ;;  %v9995_v26 = vld [vmem:[%s10198_s30 + $0x60] sm:$0xff] }
 0x28b   : > { %v4140_v8 = vadd.f32 %v12679_v13, %v4104_v52  ;;  %v5343_v55 = vunpack.c.l.b16 %v5270_v46  ;;  %v12683_v10 = vpop.f32.mrf.mxu1  ;;  %v5366_v1 = vpack.c.b16 %v5341_v19, %v5340_v63  ;;  %v9465_v44 = vrot.slane %v5175_v34, 9  ;;  %v5377_v52 = vpop.permute.xlu2 %5376  ;;  %v9625_v19 = vld [vmem:[%s10198_s30 + $0x6c] sm:$0xf] }
 0x28c   : > { %v2990_v51 = vpop.f32.mrf.mxu2  ;;  %v7167_v3 = vrot.slane %v7166_v53, 2  ;;  %v5276_v18 = vrot.slane %v10085_v58, 5  ;;  %v5275_v12 = vrot.slane %v5273_v50, 4  ;;  %v6383_v47 = vpop.permute.xlu1 %6382  ;;  %v9626_v53 = vld [vmem:[%s10198_s30 + $0x70] sm:$0xf] }
 0x28d   : > { %v4172_v54 = vmax.f32 %v4140_v8, 0.0  ;;  %v3051_v21 = vadd.f32 %v2990_v51, %v11565_v30  ;;  %v5367_v60 = vpack.c.b16 %v5343_v55, %v5342_v24  ;;  %v7772_v30 = vld [vmem:[%s14442_s1 + $0x20] sm:$0x3]  ;;  %v5274_v35 = vsel %vm10438_vm7, %v9465_v44, %v5273_v50 }
 0x28e   : > { %v12690_v41 = vpop.f32.mrf.mxu3  ;;  %v7217_v24 = vsel %vm743_vm0, %v7167_v3, 0  ;;  %v5277_v59 = vsel %vm10438_vm7, %v5275_v12, %v5276_v18  ;;  %v5344_v16 = vunpack.c.l.b16 %v5274_v35  ;;  %v6151_v27 = vshll.u32 %v9626_v53, 16 }
 0x28f   : > { %v4204_v43 = vpack.c.bf16 %v4172_v54, %v4172_v54  ;;  %v3708_v40 = vadd.f32 %v12597_v48, %v3051_v21  ;;  %5390 = vrot.lane.b32.xlu0 %v5367_v60, %s10141_s14  ;;  %v7902_v48 = vsel %vm743_vm0, %v7772_v30, 0  ;;  %5388 = vrot.lane.b32.xlu2 %v5366_v1, %s10141_s14  ;;  %v5345_v55 = vunpack.c.l.b16 %v5277_v59  ;;  %v12722_v21 = vpop.permute.xlu0 %5697  ;;  %v8201_v60 = vld [vmem:[%s14442_s1 + $0x20] sm:$0xc] }
 0x290   : > { %7911 = vmatpush.bf16.msra.mxu0 %v7902_v48  ;;  %7226 = vmatpush.bf16.msra.mxu3 %v7217_v24  ;;  %v6145_v1 = vshll.u32 %v9625_v19, 16  ;;  %v6155_v50 = vshrl.u32 %v9626_v53, 16 }
 0x291   : > { %v4105_v14 = vadd.f32 %v4044_v36, %v3708_v40  ;;  %v4047_v61 = vpop.f32.mrf.mxu0  ;;  %9248 = vmatmul.msk.bf16.gmra.mxu2 %vm694_vm1, %v9986_v56  ;;  %4237 = vst.msk [vmem:[%s12279_s29 + $0x30] sm:$0xf] %vm4224_vm8, %v4204_v43  ;;  %5711 = vrot.lane.b32.xlu1 %v10010_v37, %s10141_s14  ;;  %v5368_v56 = vpack.c.b16 %v5345_v55, %v5344_v16  ;;  %v9627_v43 = vld [vmem:[%s10198_s30 + $0x74] sm:$0x1]  ;;  %v6142_v40 = vshrl.u32 %v9625_v19, 16 }
 0x292   : > { %v6161_v30 = vshll.u32 %v9627_v43, 16  ;;  %v6147_v58 = vrot.slane %v6145_v1, 5 }
 0x293   : > { %v4141_v46 = vadd.f32 %v12679_v13, %v4105_v14  ;;  %v12710_v36 = vpop.f32.mrf.mxu1  ;;  %9473 = vmatmul.msk.bf16.vlgmr.msrb.gmra.mxu3 %vm694_vm1, %v5377_v52  ;;  %v12732_v34 = vpop.permute.xlu2 %4993  ;;  %v6144_v44 = vrot.slane %v6142_v40, 4  ;;  %v6153_v14 = vrot.slane %v6151_v27, 5 }
 0x294   : > { %14520 = vst [vmem:[#allocation21_spill] sm:$0xff] %v12710_v36  ;;  %9360 = vmatmul.msk.bf16.gmra.mxu0 %vm694_vm1, %v3951_v22  ;;  %v2993_v8 = vpop.f32.mrf.mxu2  ;;  %v8283_v22 = vunpack.c.l.b16 %v8201_v60  ;;  %v6163_v59 = vrot.slane %v6161_v30, 5 }
 0x295   : > { %v4173_v63 = vmax.f32 %v4141_v46, 0.0  ;;  %v3052_v31 = vadd.f32 %v2993_v8, %v11568_v33  ;;  %v9994_v33 = vld [vmem:[%s10198_s30 + $0x54] sm:$0xff]  ;;  %v6148_v24 = vor.u32 %v6147_v58, %v6144_v44 }
 0x296   : > { %9649 = vmatmul.msk.bf16.vlgmr.msrb.gmra.mxu1 %vm694_vm1, %v6383_v47  ;;  %v12720_v54 = vpop.f32.mrf.mxu3  ;;  %v8284_v3 = vpack.c.b16 %v8283_v22, %v8283_v22 }
 0x297   : > { %v4205_v51 = vpack.c.bf16 %v4173_v63, %v4173_v63  ;;  %v3709_v11 = vadd.f32 %v12653_v6, %v3052_v31  ;;  %5007 = vrot.lane.b32.xlu0 %v9995_v26, %s10141_s14  ;;  %5005 = vrot.lane.b32.xlu2 %v9994_v33, %s10141_s14  ;;  %v6149_v26 = vrot.slane %v6148_v24, 4  ;;  %v14523_v24 = vld [vmem:[#allocation25_spill] sm:$0xff] }
 0x298   : > { %v8285_v12 = vrot.slane %v8284_v3, 2 }
 0x299   : > { %v4106_v6 = vadd.f32 %v4047_v61, %v3709_v11  ;;  %v4049_v37 = vpop.f32.mrf.mxu0  ;;  %4238 = vst.msk [vmem:[%s12279_s29 + $0x34] sm:$0xf] %vm4224_vm8, %v4205_v51  ;;  %5392 = vrot.lane.b32.xlu1 %v5368_v56, %s10141_s14  ;;  %v6157_v61 = vrot.slane %v6155_v50, 4  ;;  %v9622_v51 = vld [vmem:[%s10198_s30 + $0x60] sm:$0xf]  ;;  %v9996_v56 = vld [vmem:[%s10198_s30 + $0x6c] sm:$0xff]  ;;  %v6154_v60 = vsel %vm10223_vm4, %v6149_v26, %v6153_v14 }
 0x29a   : > { %v8335_v16 = vsel %vm743_vm0, %v8285_v12, 0  ;;  %v9623_v11 = vld [vmem:[%s10198_s30 + $0x64] sm:$0xf]  ;;  %v6118_v33 = vshrl.u32 %v9622_v51, 16  ;;  %v6121_v19 = vshll.u32 %v9622_v51, 16  ;;  %v6350_v1 = vunpack.c.l.b16 %v6154_v60 }
 0x29b   : > { %v4142_v18 = vadd.f32 %v12679_v13, %v4106_v6  ;;  %v12739_v48 = vpop.f32.mrf.mxu1  ;;  %v6158_v47 = vor.u32 %v6157_v61, %v6153_v14  ;;  %8344 = vmatpush.bf16.msra.mxu1 %v8335_v16  ;;  %v6127_v22 = vshll.u32 %v9623_v11, 16  ;;  %v6131_v6 = vshrl.u32 %v9623_v11, 16  ;;  %v9629_v51 = vld [vmem:[%s10198_s30 + $0x7c] sm:$0xf] }
 0x29c   : > { %14521 = vst [vmem:[#allocation14_spill] sm:$0xff] %v12739_v48  ;;  %v2995_v52 = vpop.f32.mrf.mxu2  ;;  %v6120_v50 = vrot.slane %v6118_v33, 4  ;;  %v6123_v30 = vrot.slane %v6121_v19, 5  ;;  %v6175_v33 = vshll.u32 %v9629_v51, 16 }
 0x29d   : > { %v4174_v35 = vmax.f32 %v4142_v18, 0.0  ;;  %v3053_v46 = vadd.f32 %v2995_v52, %v11582_v15  ;;  %v6159_v31 = vrot.slane %v6158_v47, 4  ;;  %v9624_v15 = vld [vmem:[%s10198_s30 + $0x68] sm:$0x1]  ;;  %v6129_v3 = vrot.slane %v6127_v22, 5 }
 0x29e   : > { %v12744_v63 = vpop.f32.mrf.mxu3  ;;  %v6133_v18 = vrot.slane %v6131_v6, 4  ;;  %v6137_v14 = vshll.u32 %v9624_v15, 16  ;;  %v6124_v52 = vor.u32 %v6123_v30, %v6120_v50  ;;  %v10012_v6 = vld [vmem:[%s10198_s30 + $0x78] sm:$0xff]  ;;  %v6177_v30 = vrot.slane %v6175_v33, 5 }
 0x29f   : > { %v4206_v8 = vpack.c.bf16 %v4174_v35, %v4174_v35  ;;  %v3710_v55 = vadd.f32 %v12690_v41, %v3053_v46  ;;  %v5379_v41 = vpop.permute.xlu0 %5378  ;;  %v6164_v40 = vsel %vm10223_vm4, %v6159_v31, %v6163_v59  ;;  %v9628_v31 = vld [vmem:[%s10198_s30 + $0x78] sm:$0xf] }
 0x2a0   : > { %v6351_v27 = vunpack.c.l.b16 %v6164_v40  ;;  %v6134_v46 = vor.u32 %v6133_v18, %v6129_v3  ;;  %v6139_v47 = vrot.slane %v6137_v14, 5  ;;  %v6125_v59 = vrot.slane %v6124_v52, 4  ;;  %v14525_v52 = vld [vmem:[#allocation2_spill] sm:$0xff] }
 0x2a1   : > { %v4107_v53 = vadd.f32 %v4049_v37, %v3710_v55  ;;  %v4052_v43 = vpop.f32.mrf.mxu0  ;;  %9441 = vmatmul.msk.bf16.vlgmr.msrb.gmra.mxu2 %vm694_vm1, %v12666_v39  ;;  %4239 = vst.msk [vmem:[%s12279_s29 + $0x38] sm:$0xf] %vm4224_vm8, %v4206_v8  ;;  %v6385_v37 = vpop.permute.xlu2 %6384  ;;  %5009 = vrot.lane.b32.xlu1 %v9996_v56, %s10141_s14  ;;  %v9630_v56 = vld [vmem:[%s10198_s30 + $0x80] sm:$0x1]  ;;  %v6166_v60 = vshrl.u32 %v9628_v31, 16  ;;  %v6169_v15 = vshll.u32 %v9628_v31, 16 }
 0x2a2   : > { %v6374_v61 = vpack.c.b16 %v6351_v27, %v6350_v1  ;;  %v5700_v8 = vpop.permute.xlu1 %5699  ;;  %v6135_v55 = vrot.slane %v6134_v46, 4  ;;  %v6130_v11 = vsel %vm10223_vm4, %v6125_v59, %v6129_v3  ;;  %v6179_v40 = vshrl.u32 %v9629_v51, 16  ;;  %v10086_v31 = vld [vmem:[%s10198_s30 + $0x7c] sm:$0xf] }
 0x2a3   : > { %v4143_v44 = vadd.f32 %v12679_v13, %v4107_v53  ;;  %v12759_v58 = vpop.f32.mrf.mxu1  ;;  %9474 = vmatmul.msk.bf16.gmra.mxu3 %vm694_vm1, %v5379_v41  ;;  %v6348_v53 = vunpack.c.l.b16 %v6130_v11  ;;  %v6168_v27 = vrot.slane %v6166_v60, 4  ;;  %v6171_v50 = vrot.slane %v6169_v15, 5  ;;  %v10087_v60 = vld [vmem:[%s10198_s30 + $0x80] sm:$0x1] }
 0x2a4   : > { %14522 = vst [vmem:[#allocation15_spill] sm:$0xff] %v12759_v58  ;;  %9585 = vmatmul.msk.bf16.vlgmr.msrb.gmra.mxu0 %vm694_vm1, %v12722_v21  ;;  %v2998_v39 = vpop.f32.mrf.mxu2  ;;  %6398 = vrot.lane.b32.xlu0 %v6374_v61, %s10141_s14  ;;  %v5287_v51 = vrot.slane %v10086_v31, 5  ;;  %v5290_v15 = vrot.slane %v10087_v60, 5  ;;  %v14549_v58 = vld [vmem:[#allocation13_spill] sm:$0xff] }
 0x2a5   : > { %v4175_v12 = vmax.f32 %v4143_v44, 0.0  ;;  %v3054_v35 = vadd.f32 %v2998_v39, %v14523_v24  ;;  %v6172_v39 = vor.u32 %v6171_v50, %v6168_v27 }
 0x2a6   : > { %9650 = vmatmul.msk.bf16.gmra.mxu1 %vm694_vm1, %v6385_v37  ;;  %v12769_v26 = vpop.f32.mrf.mxu3  ;;  %v6185_v37 = vshll.u32 %v9630_v56, 16 }
 0x2a7   : > { %v4207_v16 = vpack.c.bf16 %v4175_v12, %v4175_v12  ;;  %v3711_v21 = vadd.f32 %v12720_v54, %v3054_v35  ;;  %v6140_v54 = vsel %vm10223_vm4, %v6135_v55, %v6139_v47  ;;  %v12778_v41 = vpop.permute.xlu0 %4995  ;;  %v6173_v46 = vrot.slane %v6172_v39, 4  ;;  %v5177_v55 = vld [vmem:[%s10198_s30 + $0x78] sm:$0xe] }
 0x2a8   : > { %v6349_v1 = vunpack.c.l.b16 %v6140_v54  ;;  %v6187_v35 = vrot.slane %v6185_v37, 5  ;;  %v9467_v56 = vrot.slane %v5177_v55, 9 }
 0x2a9   : > { %v4108_v19 = vadd.f32 %v4052_v43, %v3711_v21  ;;  %v4054_v22 = vpop.f32.mrf.mxu0  ;;  %4240 = vst.msk [vmem:[%s12279_s29 + $0x3c] sm:$0xf] %vm4224_vm8, %v4207_v16  ;;  %v6181_v43 = vrot.slane %v6179_v40, 4  ;;  %v6178_v11 = vsel %vm10223_vm4, %v6173_v46, %v6177_v30  ;;  %v5289_v40 = vrot.slane %v5287_v51, 4 }
 0x2aa   : > { %v6373_v14 = vpack.c.b16 %v6349_v1, %v6348_v53  ;;  %v6352_v53 = vunpack.c.l.b16 %v6178_v11 }
 0x2ab   : > { %v4144_v3 = vadd.f32 %v12679_v13, %v4108_v19  ;;  %v12784_v44 = vpop.f32.mrf.mxu1  ;;  %v6182_v24 = vor.u32 %v6181_v43, %v6177_v30  ;;  %v10011_v30 = vld [vmem:[%s10198_s30 + $0x6c] sm:$0xff] }
 0x2ac   : > { %14524 = vst [vmem:[#allocation16_spill] sm:$0xff] %v12784_v44  ;;  %v3000_v18 = vpop.f32.mrf.mxu2  ;;  %6396 = vrot.lane.b32.xlu2 %v6373_v14, %s10141_s14  ;;  %5715 = vrot.lane.b32.xlu0 %v10012_v6, %s10141_s14  ;;  %v5288_v6 = vsel %vm10438_vm7, %v9467_v56, %v5287_v51  ;;  %v10013_v56 = vld [vmem:[%s10198_s30 + $0x84] sm:$0xff] }
 0x2ad   : > { %v4176_v61 = vmax.f32 %v4144_v3, 0.0  ;;  %v3055_v12 = vadd.f32 %v3000_v18, %v14525_v52  ;;  %v6183_v21 = vrot.slane %v6182_v24, 4  ;;  %v5348_v3 = vunpack.c.l.b16 %v5288_v6 }
 0x2ae   : > { %v12790_v16 = vpop.f32.mrf.mxu3 }
 0x2af   : > { %v4208_v47 = vpack.c.bf16 %v4176_v61, %v4176_v61  ;;  %v3712_v59 = vadd.f32 %v12744_v63, %v3055_v12  ;;  %v5381_v63 = vpop.permute.xlu1 %5380  ;;  %v6188_v54 = vsel %vm10223_vm4, %v6183_v21, %v6187_v35  ;;  %v10088_v35 = vld [vmem:[%s10198_s30 + $0x70] sm:$0xf] }
 0x2b0   : > { %v6353_v1 = vunpack.c.l.b16 %v6188_v54  ;;  %v5280_v46 = vrot.slane %v10088_v35, 5 }
 0x2b1   : > { %v4109_v33 = vadd.f32 %v4054_v22, %v3712_v59  ;;  %v4057_v19 = vpop.f32.mrf.mxu0  ;;  %9442 = vmatmul.msk.bf16.gmra.mxu2 %vm694_vm1, %v12732_v34  ;;  %4241 = vst.msk [vmem:[%s12279_s29 + $0x40] sm:$0xf] %vm4224_vm8, %v4208_v47  ;;  %v6387_v22 = vpop.permute.xlu0 %6386  ;;  %v5291_v34 = vsel %vm10438_vm7, %v5289_v40, %v5290_v15  ;;  %v10089_v47 = vld [vmem:[%s10198_s30 + $0x74] sm:$0x1] }
 0x2b2   : > { %v6375_v37 = vpack.c.b16 %v6353_v1, %v6352_v53  ;;  %v5349_v18 = vunpack.c.l.b16 %v5291_v34  ;;  %v5702_v59 = vpop.permute.xlu2 %5701  ;;  %v5282_v11 = vrot.slane %v5280_v46, 4  ;;  %v10090_v34 = vld [vmem:[%s10198_s30 + $0x88] sm:$0xf] }
 0x2b3   : > { %v4145_v27 = vadd.f32 %v12679_v13, %v4109_v33  ;;  %v12806_v50 = vpop.f32.mrf.mxu1  ;;  %9475 = vmatmul.msk.bf16.gmra.mxu3 %vm694_vm1, %v5381_v63 }
 0x2b4   : > { %14526 = vst [vmem:[#allocation17_spill] sm:$0xff] %v12806_v50  ;;  %9586 = vmatmul.msk.bf16.gmra.mxu0 %vm694_vm1, %v5700_v8  ;;  %v3003_v43 = vpop.f32.mrf.mxu2  ;;  %6400 = vrot.lane.b32.xlu1 %v6375_v37, %s10141_s14  ;;  %v5370_v61 = vpack.c.b16 %v5349_v18, %v5348_v3  ;;  %v5176_v8 = vld [vmem:[%s10198_s30 + $0x6c] sm:$0xe]  ;;  %v5294_v3 = vrot.slane %v10090_v34, 5  ;;  %v9998_v18 = vld [vmem:[%s10198_s30 + $0x84] sm:$0xff] }
 0x2b5   : > { %v4177_v14 = vmax.f32 %v4145_v27, 0.0  ;;  %v3056_v39 = vadd.f32 %v3003_v43, %v11748_v32  ;;  %5713 = vrot.lane.b32.xlu2 %v10011_v30, %s10141_s14  ;;  %v5283_v32 = vrot.slane %v10089_v47, 5  ;;  %v9466_v21 = vrot.slane %v5176_v8, 9  ;;  %v5178_v30 = vld [vmem:[%s10198_s30 + $0x84] sm:$0xe] }
 0x2b6   : > { %9651 = vmatmul.msk.bf16.gmra.mxu1 %vm694_vm1, %v6387_v22  ;;  %v3665_v24 = vpop.f32.mrf.mxu3  ;;  %5396 = vrot.lane.b32.xlu0 %v5370_v61, %s10141_s14  ;;  %v10091_v43 = vld [vmem:[%s10198_s30 + $0x8c] sm:$0x1]  ;;  %v5296_v61 = vrot.slane %v5294_v3, 4  ;;  %v13343_v50 = vld [vmem:[%s10198_s30 + $0x74] sm:$0x1] }
 0x2b7   : > { %v4209_v52 = vpack.c.bf16 %v4177_v14, %v4177_v14  ;;  %v3713_v12 = vadd.f32 %v12769_v26, %v3056_v39  ;;  %v12822_v51 = vpop.permute.xlu1 %4997  ;;  %v5281_v26 = vsel %vm10438_vm7, %v9466_v21, %v5280_v46  ;;  %v5284_v33 = vsel %vm10438_vm7, %v5282_v11, %v5283_v32 }
 0x2b8   : > { %v5347_v54 = vunpack.c.l.b16 %v5284_v33  ;;  %v5297_v37 = vrot.slane %v10091_v43, 5  ;;  %v9468_v14 = vrot.slane %v5178_v30, 9  ;;  %v9634_v33 = vld [vmem:[%s10198_s30 + $0x90] sm:$0xf] }
 0x2b9   : > { %v4110_v55 = vadd.f32 %v4057_v19, %v3713_v12  ;;  %v4059_v31 = vpop.f32.mrf.mxu0  ;;  %4242 = vst.msk [vmem:[%s12279_s29 + $0x44] sm:$0xf] %vm4224_vm8, %v4209_v52  ;;  %v5346_v19 = vunpack.c.l.b16 %v5281_v26 }
 0x2ba   : > { %v5295_v52 = vsel %vm10438_vm7, %v9468_v14, %v5294_v3 }
 0x2bb   : > { %v4146_v60 = vadd.f32 %v12679_v13, %v4110_v55  ;;  %v12830_v15 = vpop.f32.mrf.mxu1  ;;  %v5369_v1 = vpack.c.b16 %v5347_v54, %v5346_v19  ;;  %v5350_v46 = vunpack.c.l.b16 %v5295_v52  ;;  %v9635_v19 = vld [vmem:[%s10198_s30 + $0x94] sm:$0xf]  ;;  %v6214_v54 = vshrl.u32 %v9634_v33, 16 }
 0x2bc   : > { %14527 = vst [vmem:[#allocation18_spill] sm:$0xff] %v12830_v15  ;;  %v3005_v63 = vpop.f32.mrf.mxu2  ;;  %5717 = vrot.lane.b32.xlu1 %v10013_v56, %s10141_s14 }
 0x2bd   : > { %v4178_v53 = vmax.f32 %v4146_v60, 0.0  ;;  %v3057_v40 = vadd.f32 %v3005_v63, %v11751_v17  ;;  %5394 = vrot.lane.b32.xlu2 %v5369_v1, %s10141_s14  ;;  %v9997_v60 = vld [vmem:[%s10198_s30 + $0x78] sm:$0xff] }
 0x2be   : > { %v12837_v22 = vpop.f32.mrf.mxu3  ;;  %5013 = vrot.lane.b32.xlu0 %v9998_v18, %s10141_s14  ;;  %v9636_v63 = vld [vmem:[%s10198_s30 + $0x98] sm:$0x1] }
 0x2bf   : > { %v4210_v6 = vpack.c.bf16 %v4178_v53, %v4178_v53  ;;  %v3714_v27 = vadd.f32 %v12790_v16, %v3057_v40  ;;  %v5383_v16 = vpop.permute.xlu2 %5382  ;;  %v6389_v35 = vpop.permute.xlu1 %6388  ;;  %v6217_v53 = vshll.u32 %v9634_v33, 16  ;;  %v6227_v40 = vshrl.u32 %v9635_v19, 16 }
 0x2c1   : > { %v4111_v39 = vadd.f32 %v4059_v31, %v3714_v27  ;;  %v4062_v17 = vpop.f32.mrf.mxu0  ;;  %9443 = vmatmul.msk.bf16.gmra.mxu2 %vm694_vm1, %v12778_v41  ;;  %4243 = vst.msk [vmem:[%s12279_s29 + $0x48] sm:$0xf] %vm4224_vm8, %v4210_v6  ;;  %v5298_v41 = vsel %vm10438_vm7, %v5296_v61, %v5297_v37  ;;  %v6233_v27 = vshll.u32 %v9636_v63, 16  ;;  %v6219_v30 = vrot.slane %v6217_v53, 5 }
 0x2c2   : > { %v5351_v32 = vunpack.c.l.b16 %v5298_v41  ;;  %v6229_v3 = vrot.slane %v6227_v40, 4 }
 0x2c3   : > { %v4147_v12 = vadd.f32 %v12679_v13, %v4111_v39  ;;  %v12852_v8 = vpop.f32.mrf.mxu1  ;;  %9476 = vmatmul.msk.bf16.gmra.mxu3 %vm694_vm1, %v5383_v16 }
 0x2c4   : > { %14528 = vst [vmem:[#allocation20_spill] sm:$0xff] %v12852_v8  ;;  %9587 = vmatmul.msk.bf16.gmra.mxu0 %vm694_vm1, %v5702_v59  ;;  %v3008_v47 = vpop.f32.mrf.mxu2  ;;  %v5371_v31 = vpack.c.b16 %v5351_v32, %v5350_v46  ;;  %v5704_v59 = vpop.permute.xlu0 %5703  ;;  %v9632_v32 = vld [vmem:[%s10198_s30 + $0x88] sm:$0xf]  ;;  %v9896_v8 = vld [vmem:[%s10198_s30 + $0x6c] sm:$0xe] }
 0x2c5   : > { %v4179_v21 = vmax.f32 %v4147_v12, 0.0  ;;  %v3058_v55 = vadd.f32 %v3008_v47, %v11772_v38  ;;  %v6223_v38 = vshll.u32 %v9635_v19, 16  ;;  %5011 = vrot.lane.b32.xlu2 %v9997_v60, %s10141_s14  ;;  %v9631_v47 = vld [vmem:[%s10198_s30 + $0x84] sm:$0xf] }
 0x2c6   : > { %9652 = vmatmul.msk.bf16.gmra.mxu1 %vm694_vm1, %v6389_v35  ;;  %v12860_v56 = vpop.f32.mrf.mxu3  ;;  %5398 = vrot.lane.b32.xlu1 %v5371_v31, %s10141_s14 }
 0x2c7   : > { %v4211_v11 = vpack.c.bf16 %v4179_v21, %v4179_v21  ;;  %v3715_v26 = vadd.f32 %v3665_v24, %v3058_v55  ;;  %v6216_v24 = vrot.slane %v6214_v54, 4  ;;  %v6225_v34 = vrot.slane %v6223_v38, 5  ;;  %v9633_v21 = vld [vmem:[%s10198_s30 + $0x8c] sm:$0x1] }
 0x2c8   : > { %v6199_v54 = vshll.u32 %v9632_v32, 16 }
 0x2c9   : > { %v4112_v1 = vadd.f32 %v4062_v17, %v3715_v26  ;;  %v4064_v6 = vpop.f32.mrf.mxu0  ;;  %4244 = vst.msk [vmem:[%s12279_s29 + $0x4c] sm:$0xf] %vm4224_vm8, %v4211_v11  ;;  %v6220_v14 = vor.u32 %v6219_v30, %v6216_v24  ;;  %v6230_v39 = vor.u32 %v6229_v3, %v6225_v34  ;;  %v6235_v17 = vrot.slane %v6233_v27, 5 }
 0x2ca   : > { %v6190_v11 = vshrl.u32 %v9631_v47, 16  ;;  %v6193_v26 = vshll.u32 %v9631_v47, 16  ;;  %v6209_v27 = vshll.u32 %v9633_v21, 16  ;;  %v9639_v47 = vld [vmem:[%s10198_s30 + $0xa4] sm:$0x1] }
 0x2cb   : > { %v4148_v43 = vadd.f32 %v12679_v13, %v4112_v1  ;;  %v12871_v37 = vpop.f32.mrf.mxu1  ;;  %v6221_v52 = vrot.slane %v6220_v14, 4  ;;  %v6231_v12 = vrot.slane %v6230_v39, 4  ;;  %v6203_v1 = vshrl.u32 %v9632_v32, 16  ;;  %v14531_v14 = vld [vmem:[#allocation3_spill] sm:$0xff]  ;;  %v5706_v32 = vpop.permute.xlu1 %5705 }
 0x2cc   : > { %14529 = vst [vmem:[#allocation22_spill] sm:$0xff] %v12871_v37  ;;  %v3010_v18 = vpop.f32.mrf.mxu2  ;;  %v5385_v53 = vpop.permute.xlu0 %5384  ;;  %v6192_v38 = vrot.slane %v6190_v11, 4  ;;  %v6195_v40 = vrot.slane %v6193_v26, 5 }
 0x2cd   : > { %v4180_v61 = vmax.f32 %v4148_v43, 0.0  ;;  %v3059_v16 = vadd.f32 %v3010_v18, %v11784_v9  ;;  %v6226_v55 = vsel %vm10223_vm4, %v6221_v52, %v6225_v34  ;;  %v6236_v31 = vsel %vm10223_vm4, %v6231_v12, %v6235_v17  ;;  %v9999_v9 = vld [vmem:[%s10198_s30 + $0x90] sm:$0xff] }
 0x2ce   : > { %v12875_v46 = vpop.f32.mrf.mxu3  ;;  %v6356_v19 = vunpack.c.l.b16 %v6226_v55  ;;  %v6357_v63 = vunpack.c.l.b16 %v6236_v31  ;;  %5015 = vrot.lane.b32.xlu1 %v9999_v9, %s10141_s14  ;;  %v6196_v3 = vor.u32 %v6195_v40, %v6192_v38  ;;  %v6205_v43 = vrot.slane %v6203_v1, 4  ;;  %v10015_v31 = vld [vmem:[%s10198_s30 + $0x9c] sm:$0xff] }
 0x2cf   : > { %v4212_v35 = vpack.c.bf16 %v4180_v61, %v4180_v61  ;;  %v3716_v41 = vadd.f32 %v12837_v22, %v3059_v16  ;;  %v12887_v22 = vpop.permute.xlu2 %4999  ;;  %v6211_v16 = vrot.slane %v6209_v27, 5  ;;  %v6257_v1 = vshll.u32 %v9639_v47, 16 }
 0x2d0   : > { %v6377_v24 = vpack.c.b16 %v6357_v63, %v6356_v19  ;;  %v6197_v17 = vrot.slane %v6196_v3, 4 }
 0x2d1   : > { %v4113_v60 = vadd.f32 %v4064_v6, %v3716_v41  ;;  %v4067_v33 = vpop.f32.mrf.mxu0  ;;  %9444 = vmatmul.msk.bf16.gmra.mxu2 %vm694_vm1, %v12822_v51  ;;  %4245 = vst.msk [vmem:[%s12279_s29 + $0x50] sm:$0xf] %vm4224_vm8, %v4212_v35  ;;  %v6201_v51 = vrot.slane %v6199_v54, 5  ;;  %v9637_v35 = vld [vmem:[%s10198_s30 + $0x9c] sm:$0xf] }
 0x2d2   : > { %6404 = vrot.lane.b32.xlu0 %v6377_v24, %s10141_s14  ;;  %v9638_v41 = vld [vmem:[%s10198_s30 + $0xa0] sm:$0xf]  ;;  %v6238_v11 = vshrl.u32 %v9637_v35, 16  ;;  %v6241_v26 = vshll.u32 %v9637_v35, 16  ;;  %v5180_v54 = vld [vmem:[%s10198_s30 + $0x9c] sm:$0xe] }
 0x2d3   : > { %v4149_v6 = vadd.f32 %v12679_v13, %v4113_v60  ;;  %v12893_v30 = vpop.f32.mrf.mxu1  ;;  %9477 = vmatmul.msk.bf16.gmra.mxu3 %vm694_vm1, %v5385_v53  ;;  %v6206_v61 = vor.u32 %v6205_v43, %v6201_v51  ;;  %v6202_v21 = vsel %vm10223_vm4, %v6197_v17, %v6201_v51  ;;  %v6247_v63 = vshll.u32 %v9638_v41, 16 }
 0x2d4   : > { %14530 = vst [vmem:[#allocation23_spill] sm:$0xff] %v12893_v30  ;;  %9588 = vmatmul.msk.bf16.gmra.mxu0 %vm694_vm1, %v5704_v59  ;;  %v3013_v34 = vpop.f32.mrf.mxu2  ;;  %v6354_v19 = vunpack.c.l.b16 %v6202_v21  ;;  %v6240_v38 = vrot.slane %v6238_v11, 4  ;;  %v6243_v40 = vrot.slane %v6241_v26, 5 }
 0x2d5   : > { %v4181_v18 = vmax.f32 %v4149_v6, 0.0  ;;  %v3060_v39 = vadd.f32 %v3013_v34, %v14531_v14  ;;  %v6207_v55 = vrot.slane %v6206_v61, 4  ;;  %v6249_v51 = vrot.slane %v6247_v63, 5 }
 0x2d6   : > { %v12900_v59 = vpop.f32.mrf.mxu3  ;;  %v6244_v43 = vor.u32 %v6243_v40, %v6240_v38  ;;  %v9470_v14 = vrot.slane %v5180_v54, 9 }
 0x2d7   : > { %v4213_v52 = vpack.c.bf16 %v4181_v18, %v4181_v18  ;;  %v3717_v12 = vadd.f32 %v12860_v56, %v3060_v39  ;;  %v6251_v56 = vshrl.u32 %v9638_v41, 16  ;;  %v6212_v53 = vsel %vm10223_vm4, %v6207_v55, %v6211_v16  ;;  %v10092_v39 = vld [vmem:[%s10198_s30 + $0xa0] sm:$0xf]  ;;  %v14533_v16 = vld [vmem:[#allocation5_spill] sm:$0xff]  ;;  %v10093_v55 = vld [vmem:[%s10198_s30 + $0xa4] sm:$0x1] }
 0x2d8   : > { %v6355_v24 = vunpack.c.l.b16 %v6212_v53  ;;  %v6259_v18 = vrot.slane %v6257_v1, 5  ;;  %v5308_v17 = vrot.slane %v10092_v39, 5  ;;  %v6245_v41 = vrot.slane %v6244_v43, 4 }
 0x2d9   : > { %v4114_v9 = vadd.f32 %v4067_v33, %v3717_v12  ;;  %v4069_v60 = vpop.f32.mrf.mxu0  ;;  %4246 = vst.msk [vmem:[%s12279_s29 + $0x54] sm:$0xf] %vm4224_vm8, %v4213_v52  ;;  %v6391_v6 = vpop.permute.xlu2 %6390  ;;  %v6253_v33 = vrot.slane %v6251_v56, 4  ;;  %v5311_v11 = vrot.slane %v10093_v55, 5  ;;  %v9643_v55 = vld [vmem:[%s10198_s30 + $0xb4] sm:$0xf] }
 0x2da   : > { %9653 = vmatmul.msk.bf16.gmra.mxu1 %vm694_vm1, %v6391_v6  ;;  %v6376_v12 = vpack.c.b16 %v6355_v24, %v6354_v19  ;;  %5721 = vrot.lane.b32.xlu0 %v10015_v31, %s10141_s14  ;;  %v5309_v47 = vsel %vm10438_vm7, %v9470_v14, %v5308_v17  ;;  %v5310_v21 = vrot.slane %v5308_v17, 4  ;;  %v12927_v56 = vpop.permute.xlu0 %5001  ;;  %v6250_v54 = vsel %vm10223_vm4, %v6245_v41, %v6249_v51  ;;  %v5387_v6 = vpop.permute.xlu1 %5386  ;;  %v14535_v14 = vld [vmem:[#allocation6_spill] sm:$0xff] }
 0x2db   : > { %v4150_v27 = vadd.f32 %v12679_v13, %v4114_v9  ;;  %v12915_v3 = vpop.f32.mrf.mxu1  ;;  %v6254_v35 = vor.u32 %v6253_v33, %v6249_v51  ;;  %v5354_v19 = vunpack.c.l.b16 %v5309_v47  ;;  %v6358_v1 = vunpack.c.l.b16 %v6250_v54  ;;  %v9645_v54 = vld [vmem:[%s10198_s30 + $0xbc] sm:$0x1] }
 0x2dc   : > { %v3015_v34 = vpop.f32.mrf.mxu2  ;;  %14532 = vst [vmem:[#allocation25_spill] sm:$0xff] %v12915_v3  ;;  %6402 = vrot.lane.b32.xlu2 %v6376_v12, %s10141_s14  ;;  %v5312_v53 = vsel %vm10438_vm7, %v5310_v21, %v5311_v11  ;;  %v9644_v11 = vld [vmem:[%s10198_s30 + $0xb8] sm:$0xf] }
 0x2dd   : > { %v4182_v61 = vmax.f32 %v4150_v27, 0.0  ;;  %v3061_v52 = vadd.f32 %v3015_v34, %v14533_v16  ;;  %v6255_v31 = vrot.slane %v6254_v35, 4  ;;  %v5355_v27 = vunpack.c.l.b16 %v5312_v53  ;;  %v10014_v34 = vld [vmem:[%s10198_s30 + $0x90] sm:$0xff]  ;;  %v10095_v35 = vld [vmem:[%s10198_s30 + $0x98] sm:$0x1] }
 0x2de   : > { %v12924_v63 = vpop.f32.mrf.mxu3  ;;  %v5179_v16 = vld [vmem:[%s10198_s30 + $0x90] sm:$0xe]  ;;  %v5304_v41 = vrot.slane %v10095_v35, 5  ;;  %v6286_v53 = vshrl.u32 %v9643_v55, 16 }
 0x2df   : > { %v4214_v26 = vpack.c.bf16 %v4182_v61, %v4182_v61  ;;  %v3718_v9 = vadd.f32 %v12875_v46, %v3061_v52  ;;  %v6260_v46 = vsel %vm10223_vm4, %v6255_v31, %v6259_v18  ;;  %v5373_v51 = vpack.c.b16 %v5355_v27, %v5354_v19  ;;  %v10094_v52 = vld [vmem:[%s10198_s30 + $0x94] sm:$0xf]  ;;  %v10001_v31 = vld [vmem:[%s10198_s30 + $0xa8] sm:$0xff] }
 0x2e0   : > { %v6359_v24 = vunpack.c.l.b16 %v6260_v46  ;;  %v5301_v12 = vrot.slane %v10094_v52, 5  ;;  %v9469_v21 = vrot.slane %v5179_v16, 9  ;;  %v6295_v27 = vshll.u32 %v9644_v11, 16 }
 0x2e1   : > { %v4115_v38 = vadd.f32 %v4069_v60, %v3718_v9  ;;  %v4072_v40 = vpop.f32.mrf.mxu0  ;;  %9445 = vmatmul.msk.bf16.gmra.mxu2 %vm694_vm1, %v12887_v22  ;;  %4247 = vst.msk [vmem:[%s12279_s29 + $0x58] sm:$0xf] %vm4224_vm8, %v4214_v26  ;;  %v12955_v47 = vpop.permute.xlu2 %5707 }
 0x2e2   : > { %v6378_v22 = vpack.c.b16 %v6359_v24, %v6358_v1  ;;  %5402 = vrot.lane.b32.xlu0 %v5373_v51, %s10141_s14  ;;  %v5303_v19 = vrot.slane %v5301_v12, 4  ;;  %v5302_v46 = vsel %vm10438_vm7, %v9469_v21, %v5301_v12  ;;  %v10016_v1 = vld [vmem:[%s10198_s30 + $0xa8] sm:$0xff]  ;;  %v6305_v24 = vshll.u32 %v9645_v54, 16  ;;  %v10097_v54 = vld [vmem:[%s10198_s30 + $0xb0] sm:$0x1] }
 0x2e3   : > { %v4151_v33 = vadd.f32 %v12679_v13, %v4115_v38  ;;  %v12942_v43 = vpop.f32.mrf.mxu1  ;;  %9478 = vmatmul.msk.bf16.gmra.mxu3 %vm694_vm1, %v5387_v6  ;;  %v6289_v38 = vshll.u32 %v9643_v55, 16  ;;  %v6299_v6 = vshrl.u32 %v9644_v11, 16  ;;  %v5352_v51 = vunpack.c.l.b16 %v5302_v46 }
 0x2e4   : > { %9589 = vmatmul.msk.bf16.gmra.mxu0 %vm694_vm1, %v5706_v32  ;;  %v3018_v60 = vpop.f32.mrf.mxu2  ;;  %14534 = vst [vmem:[#allocation2_spill] sm:$0xff] %v12942_v43  ;;  %6406 = vrot.lane.b32.xlu1 %v6378_v22, %s10141_s14 }
 0x2e5   : > { %v4183_v18 = vmax.f32 %v4151_v33, 0.0  ;;  %v3062_v39 = vadd.f32 %v3018_v60, %v14535_v14  ;;  %5719 = vrot.lane.b32.xlu2 %v10014_v34, %s10141_s14  ;;  %v6288_v34 = vrot.slane %v6286_v53, 4  ;;  %v6291_v14 = vrot.slane %v6289_v38, 5 }
 0x2e6   : > { %v12949_v61 = vpop.f32.mrf.mxu3  ;;  %v5318_v53 = vrot.slane %v10097_v54, 5 }
 0x2e7   : > { %v4215_v17 = vpack.c.bf16 %v4183_v18, %v4183_v18  ;;  %v3719_v32 = vadd.f32 %v12900_v59, %v3062_v39  ;;  %v6393_v59 = vpop.permute.xlu0 %6392  ;;  %v6297_v39 = vrot.slane %v6295_v27, 5  ;;  %v6292_v12 = vor.u32 %v6291_v14, %v6288_v34 }
 0x2e9   : > { %v4116_v26 = vadd.f32 %v4072_v40, %v3719_v32  ;;  %v4074_v9 = vpop.f32.mrf.mxu0  ;;  %4248 = vst.msk [vmem:[%s12279_s29 + $0x5c] sm:$0xf] %vm4224_vm8, %v4215_v17  ;;  %v5305_v40 = vsel %vm10438_vm7, %v5303_v19, %v5304_v41  ;;  %v6301_v32 = vrot.slane %v6299_v6, 4  ;;  %v6307_v41 = vrot.slane %v6305_v24, 5 }
 0x2ea   : > { %9654 = vmatmul.msk.bf16.gmra.mxu1 %vm694_vm1, %v6393_v59  ;;  %v5353_v18 = vunpack.c.l.b16 %v5305_v40  ;;  %5019 = vrot.lane.b32.xlu0 %v10001_v31, %s10141_s14  ;;  %v10096_v59 = vld [vmem:[%s10198_s30 + $0xac] sm:$0xf] }
 0x2eb   : > { %v4152_v33 = vadd.f32 %v12679_v13, %v4116_v26  ;;  %v12970_v22 = vpop.f32.mrf.mxu1  ;;  %v6302_v35 = vor.u32 %v6301_v32, %v6297_v39  ;;  %v5181_v26 = vld [vmem:[%s10198_s30 + $0xa8] sm:$0xe]  ;;  %v5315_v19 = vrot.slane %v10096_v59, 5 }
 0x2ec   : > { %v3020_v60 = vpop.f32.mrf.mxu2  ;;  %14536 = vst [vmem:[#allocation3_spill] sm:$0xff] %v12970_v22  ;;  %v5372_v52 = vpack.c.b16 %v5353_v18, %v5352_v51  ;;  %5723 = vrot.lane.b32.xlu1 %v10016_v1, %s10141_s14  ;;  %v9471_v38 = vrot.slane %v5181_v26, 9 }
 0x2ed   : > { %v4184_v17 = vmax.f32 %v4152_v33, 0.0  ;;  %v3063_v16 = vadd.f32 %v3020_v60, %v11947_v5  ;;  %v6293_v5 = vrot.slane %v6292_v12, 4  ;;  %v6303_v31 = vrot.slane %v6302_v35, 4 }
 0x2ee   : > { %v3682_v11 = vpop.f32.mrf.mxu3  ;;  %5400 = vrot.lane.b32.xlu2 %v5372_v52, %s10141_s14  ;;  %v5317_v27 = vrot.slane %v5315_v19, 4  ;;  %v5316_v33 = vsel %vm10438_vm7, %v9471_v38, %v5315_v19 }
 0x2ef   : > { %v4216_v21 = vpack.c.bf16 %v4184_v17, %v4184_v17  ;;  %v3720_v55 = vadd.f32 %v12924_v63, %v3063_v16  ;;  %v5389_v63 = vpop.permute.xlu2 %5388  ;;  %v6298_v6 = vsel %vm10223_vm4, %v6293_v5, %v6297_v39  ;;  %v6308_v24 = vsel %vm10223_vm4, %v6303_v31, %v6307_v41 }
 0x2f0   : > { %v6362_v51 = vunpack.c.l.b16 %v6298_v6  ;;  %v6363_v34 = vunpack.c.l.b16 %v6308_v24  ;;  %v5356_v14 = vunpack.c.l.b16 %v5316_v33 }
 0x2f1   : > { %v4117_v46 = vadd.f32 %v4074_v9, %v3720_v55  ;;  %v4077_v1 = vpop.f32.mrf.mxu0  ;;  %9446 = vmatmul.msk.bf16.gmra.mxu2 %vm694_vm1, %v12927_v56  ;;  %4249 = vst.msk [vmem:[%s12279_s29 + $0x60] sm:$0xf] %vm4224_vm8, %v4216_v21  ;;  %v5004_v9 = vpop.permute.xlu1 %5003  ;;  %v5319_v56 = vsel %vm10438_vm7, %v5317_v27, %v5318_v53  ;;  %v9642_v27 = vld [vmem:[%s10198_s30 + $0xb0] sm:$0x1] }
 0x2f2   : > { %v5357_v39 = vunpack.c.l.b16 %v5319_v56  ;;  %v6380_v16 = vpack.c.b16 %v6363_v34, %v6362_v51  ;;  %v5710_v21 = vpop.permute.xlu0 %5709  ;;  %v6281_v34 = vshll.u32 %v9642_v27, 16  ;;  %v9666_v56 = vld [vmem:[%s10198_s30 + $0x18] sm:$0xe] }
 0x2f3   : > { %v4153_v40 = vadd.f32 %v12679_v13, %v4117_v46  ;;  %v12995_v18 = vpop.f32.mrf.mxu1  ;;  %9479 = vmatmul.msk.bf16.gmra.mxu3 %vm694_vm1, %v5389_v63 }
 0x2f4   : > { %9590 = vmatmul.msk.bf16.gmra.mxu0 %vm694_vm1, %v12955_v47  ;;  %v3023_v60 = vpop.f32.mrf.mxu2  ;;  %14537 = vst [vmem:[#allocation5_spill] sm:$0xff] %v12995_v18  ;;  %v5374_v52 = vpack.c.b16 %v5357_v39, %v5356_v14  ;;  %6410 = vrot.lane.b32.xlu0 %v6380_v16, %s10141_s14  ;;  %v10000_v47 = vld [vmem:[%s10198_s30 + $0x9c] sm:$0xff] }
 0x2f5   : > { %v4185_v32 = vmax.f32 %v4153_v40, 0.0  ;;  %v3064_v17 = vadd.f32 %v3023_v60, %v11976_v28  ;;  %v10098_v60 = vld [vmem:[%s10198_s30 + $0x1c] sm:$0xf]  ;;  %v10099_v39 = vld [vmem:[%s10198_s30 + $0x20] sm:$0x1] }
 0x2f6   : > { %v13000_v41 = vpop.f32.mrf.mxu3  ;;  %5404 = vrot.lane.b32.xlu1 %v5374_v52, %s10141_s14  ;;  %5017 = vrot.lane.b32.xlu2 %v10000_v47, %s10141_s14  ;;  %v6663_v14 = vrot.slane %v10098_v60, 5  ;;  %v9648_v60 = vld [vmem:[%s10198_s30 + $0xc8] sm:$0x1]  ;;  %v13236_v18 = vld [vmem:[%s10198_s30 + $0x5c] sm:$0x1] }
 0x2f7   : > { %v4217_v12 = vpack.c.bf16 %v4185_v32, %v4185_v32  ;;  %v3721_v35 = vadd.f32 %v12949_v61, %v3064_v17  ;;  %v10018_v61 = vld [vmem:[%s10198_s30 + $0xc0] sm:$0xff]  ;;  %v6666_v32 = vrot.slane %v10099_v39, 5 }
 0x2f9   : > { %v4118_v55 = vadd.f32 %v4077_v1, %v3721_v35  ;;  %v4079_v26 = vpop.f32.mrf.mxu0  ;;  %4250 = vst.msk [vmem:[%s12279_s29 + $0x64] sm:$0xf] %vm4224_vm8, %v4217_v12  ;;  %v9641_v1 = vld [vmem:[%s10198_s30 + $0xac] sm:$0xf] }
 0x2fa   : > { %v6271_v24 = vshll.u32 %v9641_v1, 16  ;;  %v6275_v33 = vshrl.u32 %v9641_v1, 16 }
 0x2fb   : > { %v4154_v28 = vadd.f32 %v12679_v13, %v4118_v55  ;;  %v13010_v19 = vpop.f32.mrf.mxu1  ;;  %v6395_v5 = vpop.permute.xlu1 %6394  ;;  %v9640_v13 = vld [vmem:[%s10198_s30 + $0xa8] sm:$0xf]  ;;  %v10019_v55 = vld [vmem:[%s10198_s30 + $0x18] sm:$0xff] }
 0x2fc   : > { %v3025_v59 = vpop.f32.mrf.mxu2  ;;  %14538 = vst [vmem:[#allocation6_spill] sm:$0xff] %v13010_v19  ;;  %9655 = vmatmul.msk.bf16.gmra.mxu1 %vm694_vm1, %v6395_v5  ;;  %5727 = vrot.lane.b32.xlu0 %v10018_v61, %s10141_s14  ;;  %v6262_v63 = vshrl.u32 %v9640_v13, 16  ;;  %v6265_v6 = vshll.u32 %v9640_v13, 16  ;;  %v6273_v12 = vrot.slane %v6271_v24, 5  ;;  %v6277_v35 = vrot.slane %v6275_v33, 4  ;;  %v10020_v19 = vld [vmem:[%s10198_s30 + $0x24] sm:$0xff] }
 0x2fd   : > { %v4186_v54 = vmax.f32 %v4154_v28, 0.0  ;;  %v3065_v53 = vadd.f32 %v3025_v59, %v12026_v2  ;;  %v10002_v2 = vld [vmem:[%s10198_s30 + $0xb4] sm:$0xff]  ;;  %v6665_v28 = vrot.slane %v6663_v14, 4  ;;  %v6283_v5 = vrot.slane %v6281_v34, 5 }
 0x2fe   : > { %v13014_v46 = vpop.f32.mrf.mxu3  ;;  %v6264_v16 = vrot.slane %v6262_v63, 4  ;;  %v6267_v52 = vrot.slane %v6265_v6, 5  ;;  %5021 = vrot.lane.b32.xlu1 %v10002_v2, %s10141_s14  ;;  %v14540_v2 = vld [vmem:[#allocation11_spill] sm:$0xff] }
 0x2ff   : > { %v4218_v31 = vpack.c.bf16 %v4186_v54, %v4186_v54  ;;  %v3722_v38 = vadd.f32 %v3682_v11, %v3065_v53  ;;  %v13022_v11 = vpop.permute.xlu2 %5005  ;;  %v6278_v53 = vor.u32 %v6277_v35, %v6273_v12 }
 0x300   : > { %v6268_v54 = vor.u32 %v6267_v52, %v6264_v16 }
 0x301   : > { %v4119_v40 = vadd.f32 %v4079_v26, %v3722_v38  ;;  %v4082_v51 = vpop.f32.mrf.mxu0  ;;  %9447 = vmatmul.msk.bf16.gmra.mxu2 %vm694_vm1, %v5004_v9  ;;  %v5391_v17 = vpop.permute.xlu0 %5390  ;;  %4251 = vst.msk [vmem:[%s12279_s29 + $0x68] sm:$0xf] %vm4224_vm8, %v4218_v31  ;;  %v13033_v9 = vld [vmem:[%s14443_s2] ss:$0 sm:$0xff]  ;;  %v9682_v26 = vrot.slane %v9666_v56, 9  ;;  %v6279_v27 = vrot.slane %v6278_v53, 4 }
 0x302   : > { %v6269_v1 = vrot.slane %v6268_v54, 4  ;;  %v9647_v56 = vld [vmem:[%s10198_s30 + $0xc4] sm:$0xf] }
 0x303   : > { %v4155_v47 = vadd.f32 %v13033_v9, %v4119_v40  ;;  %v13038_v59 = vpop.f32.mrf.mxu1  ;;  %9480 = vmatmul.msk.bf16.gmra.mxu3 %vm694_vm1, %v5391_v17  ;;  %v6664_v13 = vsel %vm10438_vm7, %v9682_v26, %v6663_v14  ;;  %v14541_v40 = vld [vmem:[#allocation4_spill] sm:$0xff]  ;;  %v13055_v39 = vpop.permute.xlu1 %5711  ;;  %v6319_v53 = vshll.u32 %v9647_v56, 16 }
 0x304   : > { %9591 = vmatmul.msk.bf16.gmra.mxu0 %vm694_vm1, %v5710_v21  ;;  %v3028_v61 = vpop.f32.mrf.mxu2  ;;  %14539 = vst [vmem:[#allocation26_spill] sm:$0xff] %v13038_v59  ;;  %v6667_v21 = vsel %vm10438_vm7, %v6665_v28, %v6666_v32  ;;  %v6769_v63 = vunpack.c.l.b16 %v6664_v13  ;;  %v2781_v34 = vadd.f32 %v14541_v40, %v14540_v2  ;;  %7132 = vrot.lane.b32.xlu0 %v10019_v55, %s10141_s14  ;;  %v13062_v28 = vld [vmem:[%s10198_s30 + $0x28] sm:$0xf] }
 0x305   : > { %v4187_v31 = vmax.f32 %v4155_v47, 0.0  ;;  %v3066_v38 = vadd.f32 %v3028_v61, %v12122_v29  ;;  %v6770_v6 = vunpack.c.l.b16 %v6667_v21  ;;  %v9646_v29 = vld [vmem:[%s10198_s30 + $0xc0] sm:$0xf]  ;;  %v6274_v32 = vsel %vm10223_vm4, %v6269_v1, %v6273_v12  ;;  %v9890_v61 = vld [vmem:[%s10198_s30 + $0x24] sm:$0xe] }
 0x306   : > { %v13053_v14 = vpop.f32.mrf.mxu3  ;;  %v6310_v16 = vshrl.u32 %v9646_v29, 16  ;;  %v6360_v47 = vunpack.c.l.b16 %v6274_v32  ;;  %v6313_v26 = vshll.u32 %v9646_v29, 16  ;;  %v13066_v12 = vld [vmem:[%s10198_s30 + $0x2c] sm:$0x1]  ;;  %v9906_v1 = vrot.slane %v9890_v61, 9 }
 0x307   : > { %v4219_v24 = vpack.c.bf16 %v4187_v31, %v4187_v31  ;;  %v3723_v33 = vadd.f32 %v13000_v41, %v3066_v38  ;;  %v6284_v41 = vsel %vm10223_vm4, %v6279_v27, %v6283_v5  ;;  %v6800_v17 = vpack.c.b16 %v6770_v6, %v6769_v63  ;;  %v6397_v13 = vpop.permute.xlu2 %6396  ;;  %v9831_v27 = vld [vmem:[%s10198_s30 + $0x30] sm:$0xf] }
 0x308   : > { %v6361_v55 = vunpack.c.l.b16 %v6284_v41  ;;  %v6312_v54 = vrot.slane %v6310_v16, 4  ;;  %v6323_v31 = vshrl.u32 %v9647_v56, 16  ;;  %v6329_v38 = vshll.u32 %v9648_v60, 16 }
 0x309   : > { %v4120_v52 = vadd.f32 %v4082_v51, %v3723_v33  ;;  %v4084_v35 = vpop.f32.mrf.mxu0  ;;  %v6315_v51 = vrot.slane %v6313_v26, 5  ;;  %4252 = vst.msk [vmem:[%s12279_s29 + $0x6c] sm:$0xf] %vm4224_vm8, %v4219_v24  ;;  %v6321_v33 = vrot.slane %v6319_v53, 5  ;;  %v8098_v29 = vrot.slane %v13062_v28, 5 }
 0x30a   : > { %v6379_v21 = vpack.c.b16 %v6361_v55, %v6360_v47  ;;  %v6325_v2 = vrot.slane %v6323_v31, 4  ;;  %v6331_v40 = vrot.slane %v6329_v38, 5  ;;  %v8101_v41 = vrot.slane %v13066_v12, 5  ;;  %v13081_v47 = vld [vmem:[%s10198_s30 + $0x34] sm:$0xf] }
 0x30b   : > { %v4156_v5 = vadd.f32 %v13033_v9, %v4120_v52  ;;  %v13072_v6 = vpop.f32.mrf.mxu1  ;;  %v6316_v32 = vor.u32 %v6315_v51, %v6312_v54  ;;  %v8099_v16 = vsel %vm10438_vm7, %v9906_v1, %v8098_v29  ;;  %v8100_v52 = vrot.slane %v8098_v29, 4 }
 0x30c   : > { %v3030_v63 = vpop.f32.mrf.mxu2  ;;  %14542 = vst [vmem:[#allocation11_spill] sm:$0xff] %v13072_v6  ;;  %6408 = vrot.lane.b32.xlu2 %v6379_v21, %s10141_s14  ;;  %9656 = vmatmul.msk.bf16.gmra.mxu1 %vm694_vm1, %v6397_v13  ;;  %v6326_v24 = vor.u32 %v6325_v2, %v6321_v33  ;;  %v7437_v55 = vshrl.u32 %v9831_v27, 16  ;;  %v8204_v54 = vunpack.c.l.b16 %v8099_v16  ;;  %v7440_v21 = vshll.u32 %v9831_v27, 16  ;;  %v10017_v2 = vld [vmem:[%s10198_s30 + $0xb4] sm:$0xff] }
 0x30d   : > { %v4188_v56 = vmax.f32 %v4156_v5, 0.0  ;;  %v3067_v60 = vadd.f32 %v3030_v63, %v2781_v34  ;;  %6817 = vrot.lane.b32.xlu0 %v6800_v17, %s10141_s14  ;;  %v6317_v34 = vrot.slane %v6316_v32, 4  ;;  %v8102_v38 = vsel %vm10438_vm7, %v8100_v52, %v8101_v41  ;;  %v13090_v5 = vld [vmem:[%s10198_s30 + $0x38] sm:$0x1] }
 0x30e   : > { %v13085_v53 = vpop.f32.mrf.mxu3  ;;  %v6327_v31 = vrot.slane %v6326_v24, 4  ;;  %v7439_v13 = vrot.slane %v7437_v55, 4  ;;  %v8205_v63 = vunpack.c.l.b16 %v8102_v38  ;;  %v7446_v29 = vshll.u32 %v13081_v47, 16 }
 0x30f   : > { %v4220_v26 = vpack.c.bf16 %v4188_v56, %v4188_v56  ;;  %v3724_v61 = vadd.f32 %v13014_v46, %v3067_v60  ;;  %v13094_v46 = vpop.permute.xlu0 %5007  ;;  %v6322_v17 = vsel %vm10223_vm4, %v6317_v34, %v6321_v33  ;;  %v5182_v56 = vld [vmem:[%s10198_s30 + $0xb4] sm:$0xe]  ;;  %v5393_v60 = vpop.permute.xlu1 %5392  ;;  %v7442_v32 = vrot.slane %v7440_v21, 5  ;;  %v10101_v21 = vld [vmem:[%s10198_s30 + $0xb8] sm:$0xf] }
 0x310   : > { %v6364_v27 = vunpack.c.l.b16 %v6322_v17  ;;  %v8235_v33 = vpack.c.b16 %v8205_v63, %v8204_v54  ;;  %v7448_v16 = vrot.slane %v7446_v29, 5  ;;  %v9472_v34 = vrot.slane %v5182_v56, 9 }
 0x311   : > { %v4121_v51 = vadd.f32 %v4084_v35, %v3724_v61  ;;  %v4087_v1 = vpop.f32.mrf.mxu0  ;;  %9448 = vmatmul.msk.bf16.gmra.mxu2 %vm694_vm1, %v13022_v11  ;;  %4253 = vst.msk [vmem:[%s12279_s29 + $0x70] sm:$0xf] %vm4224_vm8, %v4220_v26  ;;  %v6332_v35 = vsel %vm10223_vm4, %v6327_v31, %v6331_v40  ;;  %v7450_v11 = vshrl.u32 %v13081_v47, 16  ;;  %v7443_v26 = vor.u32 %v7442_v32, %v7439_v13  ;;  %v10102_v13 = vld [vmem:[%s10198_s30 + $0xbc] sm:$0x1] }
 0x312   : > { %v6365_v24 = vunpack.c.l.b16 %v6332_v35  ;;  %v7456_v61 = vshll.u32 %v13090_v5, 16  ;;  %v5325_v35 = vrot.slane %v10102_v13, 5 }
 0x313   : > { %v4157_v41 = vadd.f32 %v13033_v9, %v4121_v51  ;;  %v13109_v55 = vpop.f32.mrf.mxu1  ;;  %v7452_v40 = vrot.slane %v7450_v11, 4  ;;  %9481 = vmatmul.msk.bf16.gmra.mxu3 %vm694_vm1, %v5393_v60  ;;  %v9825_v51 = vld [vmem:[%s10198_s30 + $0x18] sm:$0xf]  ;;  %v7444_v17 = vrot.slane %v7443_v26, 4  ;;  %v13124_v60 = vld [vmem:[%s10198_s30 + $0x1c] sm:$0xf]  ;;  %v13128_v11 = vpop.permute.xlu2 %5713 }
 0x314   : > { %9592 = vmatmul.msk.bf16.gmra.mxu0 %vm694_vm1, %v13055_v39  ;;  %v3033_v52 = vpop.f32.mrf.mxu2  ;;  %v6381_v54 = vpack.c.b16 %v6365_v24, %v6364_v27  ;;  %5725 = vrot.lane.b32.xlu2 %v10017_v2, %s10141_s14  ;;  %v5322_v39 = vrot.slane %v10101_v21, 5  ;;  %v7458_v29 = vrot.slane %v7456_v61, 5  ;;  %v7398_v21 = vshll.u32 %v13124_v60, 16 }
 0x315   : > { %v4189_v31 = vmax.f32 %v4157_v41, 0.0  ;;  %v3068_v38 = vadd.f32 %v3033_v52, %v12274_v57  ;;  %v7453_v63 = vor.u32 %v7452_v40, %v7448_v16  ;;  %8252 = vrot.lane.b32.xlu0 %v8235_v33, %s10141_s14  ;;  %v7449_v41 = vsel %vm10223_vm4, %v7444_v17, %v7448_v16 }
 0x316   : > { %6412 = vrot.lane.b32.xlu1 %v6381_v54, %s10141_s14  ;;  %v5323_v57 = vsel %vm10438_vm7, %v9472_v34, %v5322_v39  ;;  %v5324_v2 = vrot.slane %v5322_v39, 4  ;;  %v13126_v27 = vpop.f32.mrf.mxu3  ;;  %v7389_v52 = vshrl.u32 %v9825_v51, 16  ;;  %v7777_v40 = vunpack.c.l.b16 %v7449_v41  ;;  %v13135_v34 = vld [vmem:[%s10198_s30 + $0x20] sm:$0x1] }
 0x317   : > { %v4221_v32 = vpack.c.bf16 %v4189_v31, %v4189_v31  ;;  %v3725_v56 = vadd.f32 %v13053_v14, %v3068_v38  ;;  %v7454_v14 = vrot.slane %v7453_v63, 4  ;;  %v5358_v24 = vunpack.c.l.b16 %v5323_v57  ;;  %v6399_v39 = vpop.permute.xlu0 %6398 }
 0x318   : > { %v5326_v61 = vsel %vm10438_vm7, %v5324_v2, %v5325_v35  ;;  %v7392_v31 = vshll.u32 %v9825_v51, 16  ;;  %v7391_v16 = vrot.slane %v7389_v52, 4  ;;  %v7402_v13 = vshrl.u32 %v13124_v60, 16  ;;  %v9669_v35 = vld [vmem:[%s10198_s30 + $0x3c] sm:$0xe] }
 0x319   : > { %v4122_v26 = vadd.f32 %v4087_v1, %v3725_v56  ;;  %v4089_v33 = vpop.f32.mrf.mxu0  ;;  %4254 = vst.msk [vmem:[%s12279_s29 + $0x74] sm:$0xf] %vm4224_vm8, %v4221_v32  ;;  %v7459_v38 = vsel %vm10223_vm4, %v7454_v14, %v7458_v29  ;;  %v5359_v54 = vunpack.c.l.b16 %v5326_v61  ;;  %v7400_v57 = vrot.slane %v7398_v21, 5 }
 0x31a   : > { %v7778_v17 = vunpack.c.l.b16 %v7459_v38  ;;  %v7394_v63 = vrot.slane %v7392_v31, 5  ;;  %v7408_v29 = vshll.u32 %v13135_v34, 16  ;;  %v9685_v61 = vrot.slane %v9669_v35, 9  ;;  %v10103_v31 = vld [vmem:[%s10198_s30 + $0x40] sm:$0xf] }
 0x31b   : > { %v4158_v1 = vadd.f32 %v13033_v9, %v4122_v26  ;;  %v13145_v51 = vpop.f32.mrf.mxu1  ;;  %v5375_v32 = vpack.c.b16 %v5359_v54, %v5358_v24  ;;  %v7404_v26 = vrot.slane %v7402_v13, 4  ;;  %v6684_v38 = vrot.slane %v10103_v31, 5  ;;  %v9665_v35 = vld [vmem:[%s10198_s30 + $0xc] sm:$0xe] }
 0x31c   : > { %v3035_v56 = vpop.f32.mrf.mxu2  ;;  %v7807_v14 = vpack.c.b16 %v7778_v17, %v7777_v40  ;;  %v7395_v52 = vor.u32 %v7394_v63, %v7391_v16  ;;  %9657 = vmatmul.msk.bf16.gmra.mxu1 %vm694_vm1, %v6399_v39 }
 0x31d   : > { %v4190_v2 = vmax.f32 %v4158_v1, 0.0  ;;  %v3069_v41 = vadd.f32 %v3035_v56, %v12299_v25  ;;  %5406 = vrot.lane.b32.xlu2 %v5375_v32, %s10141_s14  ;;  %v10104_v25 = vld [vmem:[%s10198_s30 + $0x44] sm:$0x1]  ;;  %v7405_v21 = vor.u32 %v7404_v26, %v7400_v57  ;;  %v7410_v1 = vrot.slane %v7408_v29, 5  ;;  %v10105_v56 = vld [vmem:[%s10198_s30 + $0x10] sm:$0xf]  ;;  %v5395_v29 = vpop.permute.xlu2 %5394 }
 0x31e   : > { %7825 = vrot.lane.b32.xlu0 %v7807_v14, %s10141_s14  ;;  %v7396_v54 = vrot.slane %v7395_v52, 4  ;;  %v6687_v40 = vrot.slane %v10104_v25, 5  ;;  %v13155_v16 = vpop.f32.mrf.mxu3  ;;  %v6686_v39 = vrot.slane %v6684_v38, 4  ;;  %v6656_v32 = vrot.slane %v10105_v56, 5  ;;  %v10022_v14 = vld [vmem:[%s10198_s30 + $0x3c] sm:$0xff] }
 0x31f   : > { %v4222_v6 = vpack.c.bf16 %v4190_v2, %v4190_v2  ;;  %v3726_v24 = vadd.f32 %v13085_v53, %v3069_v41  ;;  %v13161_v53 = vpop.permute.xlu1 %5009  ;;  %v13168_v2 = vld [vmem:[%s10198_s30 + $0x4c] sm:$0xf]  ;;  %v9681_v52 = vrot.slane %v9665_v35, 9  ;;  %v9893_v25 = vld [vmem:[%s10198_s30 + $0x48] sm:$0xe] }
 0x320   : > { %v7401_v13 = vsel %vm10223_vm4, %v7396_v54, %v7400_v57  ;;  %v6688_v57 = vsel %vm10438_vm7, %v6686_v39, %v6687_v40  ;;  %v6658_v31 = vrot.slane %v6656_v32, 4  ;;  %v8119_v40 = vrot.slane %v13168_v2, 5  ;;  %v13192_v56 = vld [vmem:[%s10198_s30 + $0x50] sm:$0x1] }
 0x321   : > { %v4123_v17 = vadd.f32 %v4089_v33, %v3726_v24  ;;  %v13157_v63 = vpop.f32.mrf.mxu0  ;;  %9449 = vmatmul.msk.bf16.gmra.mxu2 %vm694_vm1, %v13094_v46  ;;  %v7406_v33 = vrot.slane %v7405_v21, 4  ;;  %v7773_v41 = vunpack.c.l.b16 %v7401_v13  ;;  %v6685_v46 = vsel %vm10438_vm7, %v9685_v61, %v6684_v38  ;;  %v10106_v24 = vld [vmem:[%s10198_s30 + $0x14] sm:$0x1]  ;;  %4255 = vst.msk [vmem:[%s12279_s29 + $0x78] sm:$0xf] %vm4224_vm8, %v4222_v6 }
 0x322   : > { %v6659_v54 = vrot.slane %v10106_v24, 5  ;;  %v6775_v35 = vunpack.c.l.b16 %v6685_v46  ;;  %v9909_v24 = vrot.slane %v9893_v25, 9  ;;  %v8094_v25 = vrot.slane %v13135_v34, 5 }
 0x323   : > { %v4159_v26 = vadd.f32 %v13033_v9, %v4123_v17  ;;  %v7411_v61 = vsel %vm10223_vm4, %v7406_v33, %v7410_v1  ;;  %v13184_v38 = vpop.f32.mrf.mxu1  ;;  %v6657_v9 = vsel %vm10438_vm7, %v9681_v52, %v6656_v32  ;;  %v14543_v17 = vld [vmem:[#allocation7_spill] sm:$0xff]  ;;  %9482 = vmatmul.msk.bf16.gmra.mxu3 %vm694_vm1, %v5395_v29  ;;  %v8121_v29 = vrot.slane %v8119_v40, 4 }
 0x324   : > { %9593 = vmatmul.msk.bf16.gmra.mxu0 %vm694_vm1, %v13128_v11  ;;  %v5087_v21 = vpop.f32.mrf.mxu2  ;;  %v7774_v6 = vunpack.c.l.b16 %v7411_v61  ;;  %v6776_v11 = vunpack.c.l.b16 %v6688_v57  ;;  %v6660_v1 = vsel %vm10438_vm7, %v6658_v31, %v6659_v54  ;;  %v6767_v33 = vunpack.c.l.b16 %v6657_v9  ;;  %v13202_v57 = vpop.permute.xlu0 %5715  ;;  %v9667_v61 = vld [vmem:[%s10198_s30 + $0x24] sm:$0xe] }
 0x325   : > { %v4191_v39 = vmax.f32 %v4159_v26, 0.0  ;;  %v5088_v13 = vadd.f32 %v5087_v21, %v14543_v17  ;;  %v6768_v26 = vunpack.c.l.b16 %v6660_v1  ;;  %v8122_v31 = vrot.slane %v13192_v56, 5  ;;  %v9840_v1 = vld [vmem:[%s10198_s30 + $0x54] sm:$0xf] }
 0x326   : > { %v7805_v52 = vpack.c.b16 %v7774_v6, %v7773_v41  ;;  %7138 = vrot.lane.b32.xlu0 %v10022_v14, %s10141_s14  ;;  %v13200_v21 = vpop.f32.mrf.mxu3  ;;  %v9889_v41 = vld [vmem:[%s10198_s30 + $0x18] sm:$0xe]  ;;  %v8091_v14 = vrot.slane %v13124_v60, 5  ;;  %v6803_v9 = vpack.c.b16 %v6776_v11, %v6775_v35  ;;  %v9683_v17 = vrot.slane %v9667_v61, 9  ;;  %v10108_v35 = vld [vmem:[%s10198_s30 + $0x2c] sm:$0x1] }
 0x327   : > { %v13197_v32 = vadd.f32 %v13126_v27, %v5088_v13  ;;  %v4223_v46 = vpack.c.bf16 %v4191_v39, %v4191_v39  ;;  %v6799_v27 = vpack.c.b16 %v6768_v26, %v6767_v33  ;;  %v9905_v39 = vrot.slane %v9889_v41, 9  ;;  %v10107_v13 = vld [vmem:[%s10198_s30 + $0x28] sm:$0xf]  ;;  %v6401_v59 = vpop.permute.xlu1 %6400 }
 0x328   : > { %7821 = vrot.lane.b32.xlu1 %v7805_v52, %s10141_s14  ;;  %v6670_v6 = vrot.slane %v10107_v13, 5  ;;  %v8120_v33 = vsel %vm10438_vm7, %v9909_v24, %v8119_v40  ;;  %v8123_v60 = vsel %vm10438_vm7, %v8121_v29, %v8122_v31  ;;  %v8093_v34 = vrot.slane %v8091_v14, 4  ;;  %v13225_v13 = vld [vmem:[%s10198_s30 + $0x58] sm:$0xf]  ;;  %v14544_v40 = vld [vmem:[#allocation8_spill] sm:$0xff] }
 0x329   : > { %v13205_v54 = vpop.f32.mrf.mxu0  ;;  %6815 = vrot.lane.b32.xlu2 %v6799_v27, %s10141_s14  ;;  %v6673_v11 = vrot.slane %v10108_v35, 5  ;;  %v8092_v41 = vsel %vm10438_vm7, %v9905_v39, %v8091_v14  ;;  %v7509_v27 = vshrl.u32 %v9840_v1, 16  ;;  %4256 = vst.msk [vmem:[%s12279_s29 + $0x7c] sm:$0xf] %vm4224_vm8, %v4223_v46  ;;  %v8210_v14 = vunpack.c.l.b16 %v8120_v33 }
 0x32a   : > { %v6672_v61 = vrot.slane %v6670_v6, 4  ;;  %v8095_v29 = vsel %vm10438_vm7, %v8093_v34, %v8094_v25  ;;  %v8202_v31 = vunpack.c.l.b16 %v8092_v41  ;;  %v6671_v35 = vsel %vm10438_vm7, %v9683_v17, %v6670_v6 }
 0x32b   : > { %v13220_v26 = vpop.f32.mrf.mxu1  ;;  %v8211_v39 = vunpack.c.l.b16 %v8123_v60  ;;  %v8203_v22 = vunpack.c.l.b16 %v8095_v29  ;;  %v7511_v25 = vrot.slane %v7509_v27, 4  ;;  %v7512_v34 = vshll.u32 %v9840_v1, 16 }
 0x32c   : > { %v5089_v52 = vpop.f32.mrf.mxu2  ;;  %9658 = vmatmul.msk.bf16.gmra.mxu1 %vm694_vm1, %v6401_v59  ;;  %v6674_v46 = vsel %vm10438_vm7, %v6672_v61, %v6673_v11  ;;  %v7518_v17 = vshll.u32 %v13225_v13, 16  ;;  %v6771_v59 = vunpack.c.l.b16 %v6671_v35  ;;  %v7522_v33 = vshrl.u32 %v13225_v13, 16  ;;  %v9891_v61 = vld [vmem:[%s10198_s30 + $0x30] sm:$0xe]  ;;  %v5397_v27 = vpop.permute.xlu0 %5396 }
 0x32d   : > { %v5090_v24 = vadd.f32 %v5089_v52, %v14544_v40  ;;  %v8234_v41 = vpack.c.b16 %v8203_v22, %v8202_v31  ;;  %v7528_v60 = vshll.u32 %v13236_v18, 16  ;;  %v7514_v1 = vrot.slane %v7512_v34, 5 }
 0x32e   : > { %6823 = vrot.lane.b32.xlu0 %v6803_v9, %s10141_s14  ;;  %v13246_v6 = vpop.f32.mrf.mxu3  ;;  %v6772_v9 = vunpack.c.l.b16 %v6674_v46  ;;  %v7520_v11 = vrot.slane %v7518_v17, 5  ;;  %v8105_v22 = vrot.slane %v13081_v47, 5  ;;  %v9907_v29 = vrot.slane %v9891_v61, 9 }
 0x32f   : > { %v13242_v52 = vadd.f32 %v13155_v16, %v5090_v24  ;;  %v13255_v16 = vpop.permute.xlu2 %5011  ;;  %v7524_v24 = vrot.slane %v7522_v33, 4  ;;  %v8108_v31 = vrot.slane %v13090_v5, 5  ;;  %v8238_v35 = vpack.c.b16 %v8211_v39, %v8210_v14  ;;  %v14545_v33 = vld [vmem:[#allocation9_spill] sm:$0xff] }
 0x330   : > { %7134 = vrot.lane.b32.xlu1 %v10020_v19, %s10141_s14  ;;  %v7515_v43 = vor.u32 %v7514_v1, %v7511_v25  ;;  %v7530_v17 = vrot.slane %v7528_v60, 5  ;;  %v8106_v47 = vsel %vm10438_vm7, %v9907_v29, %v8105_v22  ;;  %v6801_v5 = vpack.c.b16 %v6772_v9, %v6771_v59  ;;  %v9828_v1 = vld [vmem:[%s10198_s30 + $0x24] sm:$0xf]  ;;  %v13282_v9 = vpop.permute.xlu1 %5717 }
 0x331   : > { %v13250_v40 = vpop.f32.mrf.mxu0  ;;  %9450 = vmatmul.msk.bf16.gmra.mxu2 %vm694_vm1, %v13161_v53  ;;  %8250 = vrot.lane.b32.xlu2 %v8234_v41, %s10141_s14  ;;  %v8107_v53 = vrot.slane %v8105_v22, 4  ;;  %v7525_v34 = vor.u32 %v7524_v24, %v7520_v11  ;;  %v7422_v22 = vshll.u32 %v13062_v28, 16  ;;  %v7426_v59 = vshrl.u32 %v13062_v28, 16 }
 0x332   : > { %v7516_v14 = vrot.slane %v7515_v43, 4  ;;  %v7413_v29 = vshrl.u32 %v9828_v1, 16  ;;  %v5869_v15 = vadd.f32 %v13157_v63, %v13197_v32 }
 0x333   : > { %v13263_v46 = vpop.f32.mrf.mxu1  ;;  %9483 = vmatmul.msk.bf16.gmra.mxu3 %vm694_vm1, %v5397_v27  ;;  %v8109_v39 = vsel %vm10438_vm7, %v8107_v53, %v8108_v31  ;;  %v7526_v25 = vrot.slane %v7525_v34, 4  ;;  %v7424_v53 = vrot.slane %v7422_v22, 5  ;;  %v7428_v28 = vrot.slane %v7426_v59, 4  ;;  %v10110_v22 = vld [vmem:[%s10198_s30 + $0x68] sm:$0x1] }
 0x334   : > { %9594 = vmatmul.msk.bf16.gmra.mxu0 %vm694_vm1, %v13202_v57  ;;  %v5092_v19 = vpop.f32.mrf.mxu2  ;;  %v8206_v57 = vunpack.c.l.b16 %v8106_v47  ;;  %v7521_v60 = vsel %vm10223_vm4, %v7516_v14, %v7520_v11  ;;  %v8207_v24 = vunpack.c.l.b16 %v8109_v39  ;;  %v7415_v34 = vrot.slane %v7413_v29, 4 }
 0x335   : > { %v5093_v61 = vadd.f32 %v5092_v19, %v14545_v33  ;;  %v7783_v27 = vunpack.c.l.b16 %v7521_v60  ;;  %v9672_v19 = vld [vmem:[%s10198_s30 + $0x60] sm:$0xe]  ;;  %v7432_v47 = vshll.u32 %v13066_v12, 16  ;;  %v10109_v33 = vld [vmem:[%s10198_s30 + $0x64] sm:$0xf]  ;;  %v7429_v39 = vor.u32 %v7428_v28, %v7424_v53  ;;  %v13296_v12 = vpop.permute.xlu0 %5013 }
 0x336   : > { %8258 = vrot.lane.b32.xlu0 %v8238_v35, %s10141_s14  ;;  %v13280_v43 = vpop.f32.mrf.mxu3  ;;  %v7416_v35 = vshll.u32 %v9828_v1, 16  ;;  %v9688_v60 = vrot.slane %v9672_v19, 9  ;;  %v6708_v59 = vrot.slane %v10110_v22, 5  ;;  %v13309_v28 = vld [vmem:[%s10198_s30 + $0x40] sm:$0xf] }
 0x337   : > { %v13272_v41 = vadd.f32 %v13200_v21, %v5093_v61  ;;  %v7531_v21 = vsel %vm10223_vm4, %v7526_v25, %v7530_v17  ;;  %v6705_v61 = vrot.slane %v10109_v33, 5  ;;  %v6403_v14 = vpop.permute.xlu2 %6402  ;;  %v7434_v1 = vrot.slane %v7432_v47, 5  ;;  %v13314_v47 = vld [vmem:[%s10198_s30 + $0x44] sm:$0x1] }
 0x338   : > { %6819 = vrot.lane.b32.xlu1 %v6801_v5, %s10141_s14  ;;  %v7784_v11 = vunpack.c.l.b16 %v7531_v21  ;;  %v7418_v25 = vrot.slane %v7416_v35, 5  ;;  %v8236_v5 = vpack.c.b16 %v8207_v24, %v8206_v57  ;;  %v14546_v21 = vld [vmem:[#allocation10_spill] sm:$0xff]  ;;  %v7430_v37 = vrot.slane %v7429_v39, 4  ;;  %v5399_v22 = vpop.permute.xlu1 %5398 }
 0x339   : > { %v13286_v31 = vpop.f32.mrf.mxu0  ;;  %v6706_v35 = vsel %vm10438_vm7, %v9688_v60, %v6705_v61  ;;  %v7474_v39 = vshrl.u32 %v13309_v28, 16  ;;  %v7480_v60 = vshll.u32 %v13314_v47, 16 }
 0x33a   : > { %v7810_v17 = vpack.c.b16 %v7784_v11, %v7783_v27  ;;  %v7419_v33 = vor.u32 %v7418_v25, %v7415_v34  ;;  %v6707_v27 = vrot.slane %v6705_v61, 4  ;;  %v7435_v24 = vsel %vm10223_vm4, %v7430_v37, %v7434_v1  ;;  %v13329_v1 = vld [vmem:[%s10198_s30 + $0x70] sm:$0xf] }
 0x33b   : > { %v13292_v30 = vpop.f32.mrf.mxu1  ;;  %v7776_v34 = vunpack.c.l.b16 %v7435_v24 }
 0x33c   : > { %v5094_v3 = vpop.f32.mrf.mxu2  ;;  %9659 = vmatmul.msk.bf16.gmra.mxu1 %vm694_vm1, %v6403_v14  ;;  %v7420_v57 = vrot.slane %v7419_v33, 4  ;;  %v6709_v61 = vsel %vm10438_vm7, %v6707_v27, %v6708_v59 }
 0x33d   : > { %v5095_v29 = vadd.f32 %v5094_v3, %v14546_v21  ;;  %v9834_v3 = vld [vmem:[%s10198_s30 + $0x3c] sm:$0xf] }
 0x33e   : > { %7831 = vrot.lane.b32.xlu0 %v7810_v17, %s10141_s14  ;;  %v13311_v19 = vpop.f32.mrf.mxu3  ;;  %v7464_v14 = vshll.u32 %v9834_v3, 16  ;;  %v7470_v17 = vshll.u32 %v13309_v28, 16  ;;  %v7425_v37 = vsel %vm10223_vm4, %v7420_v57, %v7424_v53  ;;  %v8140_v57 = vrot.slane %v13329_v1, 5 }
 0x33f   : > { %v13300_v11 = vadd.f32 %v13246_v6, %v5095_v29  ;;  %v7461_v6 = vshrl.u32 %v9834_v3, 16  ;;  %v7775_v21 = vunpack.c.l.b16 %v7425_v37  ;;  %v7476_v3 = vrot.slane %v7474_v39, 4  ;;  %v14547_v37 = vld [vmem:[#allocation12_spill] sm:$0xff] }
 0x340   : > { %8254 = vrot.lane.b32.xlu1 %v8236_v5, %s10141_s14  ;;  %v7466_v33 = vrot.slane %v7464_v14, 5  ;;  %v7472_v24 = vrot.slane %v7470_v17, 5  ;;  %v6781_v5 = vunpack.c.l.b16 %v6706_v35  ;;  %v6782_v35 = vunpack.c.l.b16 %v6709_v61 }
 0x341   : > { %v13317_v25 = vpop.f32.mrf.mxu0  ;;  %9451 = vmatmul.msk.bf16.gmra.mxu2 %vm694_vm1, %v13255_v16  ;;  %v7463_v29 = vrot.slane %v7461_v6, 4  ;;  %v10025_v16 = vld [vmem:[%s10198_s30 + $0x60] sm:$0xff]  ;;  %v7806_v59 = vpack.c.b16 %v7776_v34, %v7775_v21  ;;  %v7482_v39 = vrot.slane %v7480_v60, 5  ;;  %v9912_v34 = vrot.slane %v9896_v8, 9 }
 0x342   : > { %v7477_v17 = vor.u32 %v7476_v3, %v7472_v24  ;;  %v13347_v21 = vadd.f32 %v13109_v55, %v5869_v15  ;;  %v8142_v8 = vrot.slane %v8140_v57, 4  ;;  %v6806_v55 = vpack.c.b16 %v6782_v35, %v6781_v5 }
 0x343   : > { %v7467_v27 = vor.u32 %v7466_v33, %v7463_v29  ;;  %9484 = vmatmul.msk.bf16.gmra.mxu3 %vm694_vm1, %v5399_v22  ;;  %v13340_v14 = vpop.f32.mrf.mxu1  ;;  %7823 = vrot.lane.b32.xlu2 %v7806_v59, %s10141_s14  ;;  %v5720_v22 = vpop.permute.xlu2 %5719  ;;  %v8143_v33 = vrot.slane %v13343_v50, 5  ;;  %v13367_v59 = vld [vmem:[%s10198_s30 + $0x80] sm:$0x1] }
 0x344   : > { %9595 = vmatmul.msk.bf16.gmra.mxu0 %vm694_vm1, %v13282_v9  ;;  %v5097_v53 = vpop.f32.mrf.mxu2  ;;  %14548 = vst [vmem:[#allocation4_spill] sm:$0xff] %v13347_v21  ;;  %v6405_v32 = vpop.permute.xlu0 %6404  ;;  %v7478_v61 = vrot.slane %v7477_v17, 4  ;;  %v7600_v35 = vshll.u32 %v13367_v59, 16 }
 0x345   : > { %v5098_v6 = vadd.f32 %v5097_v53, %v14547_v37  ;;  %v7468_v9 = vrot.slane %v7467_v27, 4  ;;  %v9849_v53 = vld [vmem:[%s10198_s30 + $0x78] sm:$0xf]  ;;  %v10021_v27 = vld [vmem:[%s10198_s30 + $0x30] sm:$0xff]  ;;  %v8144_v21 = vsel %vm10438_vm7, %v8142_v8, %v8143_v33 }
 0x346   : > { %7144 = vrot.lane.b32.xlu0 %v10025_v16, %s10141_s14  ;;  %v13353_v60 = vpop.f32.mrf.mxu3  ;;  %v13364_v16 = vld [vmem:[%s10198_s30 + $0x7c] sm:$0xf]  ;;  %v7584_v17 = vshll.u32 %v9849_v53, 16 }
 0x347   : > { %v13350_v63 = vadd.f32 %v13280_v43, %v5098_v6  ;;  %v7473_v29 = vsel %vm10223_vm4, %v7468_v9, %v7472_v24  ;;  %v7483_v43 = vsel %vm10223_vm4, %v7478_v61, %v7482_v39  ;;  %v8141_v24 = vsel %vm10438_vm7, %v9912_v34, %v8140_v57 }
 0x348   : > { %v7779_v3 = vunpack.c.l.b16 %v7473_v29  ;;  %v7780_v37 = vunpack.c.l.b16 %v7483_v43  ;;  %v7581_v6 = vshrl.u32 %v9849_v53, 16  ;;  %v7590_v9 = vshll.u32 %v13364_v16, 16 }
 0x349   : > { %v13358_v15 = vpop.f32.mrf.mxu0  ;;  %v7594_v5 = vshrl.u32 %v13364_v16, 16  ;;  %v5870_v39 = vadd.f32 %v13205_v54, %v13242_v52  ;;  %v7586_v44 = vrot.slane %v7584_v17, 5  ;;  %v8216_v48 = vunpack.c.l.b16 %v8141_v24  ;;  %v10111_v24 = vld [vmem:[%s10198_s30 + $0x34] sm:$0xf]  ;;  %v10112_v17 = vld [vmem:[%s10198_s30 + $0x38] sm:$0x1] }
 0x34a   : > { %v7808_v29 = vpack.c.b16 %v7780_v37, %v7779_v3  ;;  %v7583_v43 = vrot.slane %v7581_v6, 4  ;;  %v7592_v34 = vrot.slane %v7590_v9, 5  ;;  %v9668_v37 = vld [vmem:[%s10198_s30 + $0x30] sm:$0xe]  ;;  %v6677_v6 = vrot.slane %v10111_v24, 5 }
 0x34b   : > { %v7596_v53 = vrot.slane %v7594_v5, 4  ;;  %7136 = vrot.lane.b32.xlu2 %v10021_v27, %s10141_s14  ;;  %v13383_v54 = vadd.f32 %v13145_v51, %v5870_v39  ;;  %v6680_v9 = vrot.slane %v10112_v17, 5  ;;  %v8112_v24 = vrot.slane %v13309_v28, 5  ;;  %v9670_v17 = vld [vmem:[%s10198_s30 + $0x48] sm:$0xe] }
 0x34c   : > { %v5099_v61 = vpop.f32.mrf.mxu2  ;;  %9660 = vmatmul.msk.bf16.gmra.mxu1 %vm694_vm1, %v6405_v32  ;;  %v7587_v36 = vor.u32 %v7586_v44, %v7583_v43  ;;  %v13391_v8 = vpop.permute.xlu0 %5721  ;;  %7827 = vrot.lane.b32.xlu1 %v7808_v29, %s10141_s14  ;;  %v8217_v32 = vunpack.c.l.b16 %v8144_v21  ;;  %v7602_v44 = vrot.slane %v7600_v35, 5  ;;  %v9684_v35 = vrot.slane %v9668_v37, 9 }
 0x34d   : > { %v5100_v57 = vadd.f32 %v5099_v61, %v14549_v58  ;;  %v13389_v58 = vpop.f32.mrf.mxu1  ;;  %v7597_v33 = vor.u32 %v7596_v53, %v7592_v34  ;;  %v5401_v21 = vpop.permute.xlu2 %5400  ;;  %v10023_v61 = vld [vmem:[%s10198_s30 + $0x48] sm:$0xff]  ;;  %v6679_v29 = vrot.slane %v6677_v6, 4 }
 0x34e   : > { %6829 = vrot.lane.b32.xlu0 %v6806_v55, %s10141_s14  ;;  %v13394_v3 = vpop.f32.mrf.mxu3  ;;  %v7588_v51 = vrot.slane %v7587_v36, 4  ;;  %v5871_v36 = vadd.f32 %v13250_v40, %v13272_v41  ;;  %v8241_v39 = vpack.c.b16 %v8217_v32, %v8216_v48  ;;  %v6678_v53 = vsel %vm10438_vm7, %v9684_v35, %v6677_v6 }
 0x34f   : > { %v13386_v52 = vadd.f32 %v13311_v19, %v5100_v57  ;;  %v13400_v19 = vpop.permute.xlu1 %5015  ;;  %v7598_v55 = vrot.slane %v7597_v33, 4  ;;  %v6681_v40 = vsel %vm10438_vm7, %v6679_v29, %v6680_v9  ;;  %v6773_v41 = vunpack.c.l.b16 %v6678_v53 }
 0x350   : > { %v7593_v5 = vsel %vm10223_vm4, %v7588_v51, %v7592_v34  ;;  %v13416_v33 = vadd.f32 %v13184_v38, %v5871_v36  ;;  %v8115_v6 = vrot.slane %v13314_v47, 5  ;;  %v10114_v36 = vld [vmem:[%s10198_s30 + $0x50] sm:$0x1]  ;;  %v8114_v29 = vrot.slane %v8112_v24, 4 }
 0x351   : > { %v13396_v27 = vpop.f32.mrf.mxu0  ;;  %9452 = vmatmul.msk.bf16.gmra.mxu2 %vm694_vm1, %v13296_v12  ;;  %v7603_v12 = vsel %vm10223_vm4, %v7598_v55, %v7602_v44  ;;  %v7789_v57 = vunpack.c.l.b16 %v7593_v5  ;;  %v10113_v5 = vld [vmem:[%s10198_s30 + $0x4c] sm:$0xf] }
 0x352   : > { %v7790_v48 = vunpack.c.l.b16 %v7603_v12  ;;  %v6691_v35 = vrot.slane %v10113_v5, 5 }
 0x353   : > { %9485 = vmatmul.msk.bf16.gmra.mxu3 %vm694_vm1, %v5401_v21  ;;  %v9686_v21 = vrot.slane %v9670_v17, 9 }
 0x354   : > { %9596 = vmatmul.msk.bf16.gmra.mxu0 %vm694_vm1, %v5720_v22  ;;  %v5102_v43 = vpop.f32.mrf.mxu2  ;;  %v6774_v22 = vunpack.c.l.b16 %v6681_v40  ;;  %v13426_v38 = vpop.permute.xlu0 %5402  ;;  %7140 = vrot.lane.b32.xlu1 %v10023_v61, %s10141_s14  ;;  %v7813_v37 = vpack.c.b16 %v7790_v48, %v7789_v57  ;;  %v9675_v61 = vld [vmem:[%s10198_s30 + $0x84] sm:$0xe]  ;;  %v10115_v57 = vld [vmem:[%s10198_s30 + $0x88] sm:$0xf] }
 0x355   : > { %v5103_v34 = vadd.f32 %v5102_v43, %v12227_v45  ;;  %v9691_v43 = vrot.slane %v9675_v61, 9  ;;  %v6726_v53 = vrot.slane %v10115_v57, 5  ;;  %v6692_v40 = vsel %vm10438_vm7, %v9686_v21, %v6691_v35 }
 0x356   : > { %8264 = vrot.lane.b32.xlu0 %v8241_v39, %s10141_s14  ;;  %v13429_v45 = vpop.f32.mrf.mxu3  ;;  %v6802_v44 = vpack.c.b16 %v6774_v22, %v6773_v41  ;;  %v6694_v39 = vrot.slane %v10114_v36, 5  ;;  %v6693_v41 = vrot.slane %v6691_v35, 4  ;;  %v5872_v22 = vadd.f32 %v13286_v31, %v13300_v11 }
 0x357   : > { %v13423_v32 = vadd.f32 %v13353_v60, %v5103_v34  ;;  %v13433_v55 = vpop.f32.mrf.mxu1  ;;  %v9892_v60 = vld [vmem:[%s10198_s30 + $0x3c] sm:$0xe]  ;;  %v6407_v12 = vpop.permute.xlu1 %6406  ;;  %v10116_v34 = vld [vmem:[%s10198_s30 + $0x8c] sm:$0x1]  ;;  %v6777_v5 = vunpack.c.l.b16 %v6692_v40  ;;  %v6727_v11 = vsel %vm10438_vm7, %v9691_v43, %v6726_v53  ;;  %v8126_v43 = vrot.slane %v13225_v13, 5 }
 0x358   : > { %6821 = vrot.lane.b32.xlu2 %v6802_v44, %s10141_s14  ;;  %v9908_v9 = vrot.slane %v9892_v60, 9  ;;  %v6729_v28 = vrot.slane %v10116_v34, 5  ;;  %v8116_v60 = vsel %vm10438_vm7, %v8114_v29, %v8115_v6  ;;  %v13466_v6 = vadd.f32 %v13220_v26, %v5872_v22  ;;  %v9894_v29 = vld [vmem:[%s10198_s30 + $0x54] sm:$0xe] }
 0x359   : > { %v13431_v51 = vpop.f32.mrf.mxu0  ;;  %v8209_v36 = vunpack.c.l.b16 %v8116_v60  ;;  %v8129_v57 = vrot.slane %v13236_v18, 5  ;;  %v6787_v34 = vunpack.c.l.b16 %v6727_v11  ;;  %v8128_v22 = vrot.slane %v8126_v43, 4 }
 0x35a   : > { %v8113_v47 = vsel %vm10438_vm7, %v9908_v9, %v8112_v24  ;;  %v6695_v24 = vsel %vm10438_vm7, %v6693_v41, %v6694_v39  ;;  %v6728_v9 = vrot.slane %v6726_v53, 4  ;;  %14550 = vst [vmem:[#allocation7_spill] sm:$0xff] %v13466_v6  ;;  %v13484_v53 = vld [vmem:[%s10198_s30 + $0x94] sm:$0xf]  ;;  %v10028_v41 = vld [vmem:[%s10198_s30 + $0x84] sm:$0xff] }
 0x35b   : > { %v8208_v17 = vunpack.c.l.b16 %v8113_v47  ;;  %v6778_v31 = vunpack.c.l.b16 %v6695_v24  ;;  %v9899_v47 = vld [vmem:[%s10198_s30 + $0x90] sm:$0xe]  ;;  %v8161_v40 = vrot.slane %v13484_v53, 5  ;;  %v13708_v6 = vld [vmem:[%s10198_s30 + $0xc8] sm:$0x1] }
 0x35c   : > { %v5104_v48 = vpop.f32.mrf.mxu2  ;;  %9661 = vmatmul.msk.bf16.gmra.mxu1 %vm694_vm1, %v6407_v12  ;;  %v13470_v39 = vpop.permute.xlu0 %5019  ;;  %v9915_v18 = vrot.slane %v9899_v47, 9 }
 0x35d   : > { %v5105_v44 = vadd.f32 %v5104_v48, %v12270_v0  ;;  %v13461_v0 = vpop.permute.xlu2 %5017  ;;  %v6804_v26 = vpack.c.b16 %v6778_v31, %v6777_v5  ;;  %v13488_v48 = vld [vmem:[%s10198_s30 + $0x98] sm:$0x1]  ;;  %v8163_v5 = vrot.slane %v8161_v40, 4 }
 0x35e   : > { %7837 = vrot.lane.b32.xlu0 %v7813_v37, %s10141_s14  ;;  %v13468_v35 = vpop.f32.mrf.mxu3  ;;  %v6730_v37 = vsel %vm10438_vm7, %v6728_v9, %v6729_v28  ;;  %v9910_v28 = vrot.slane %v9894_v29, 9 }
 0x35f   : > { %v13458_v21 = vadd.f32 %v13394_v3, %v5105_v44  ;;  %v8237_v3 = vpack.c.b16 %v8209_v36, %v8208_v17  ;;  %v13478_v12 = vpop.f32.mrf.mxu1  ;;  %6825 = vrot.lane.b32.xlu1 %v6804_v26, %s10141_s14  ;;  %v6788_v13 = vunpack.c.l.b16 %v6730_v37  ;;  %v8164_v44 = vrot.slane %v13488_v48, 5  ;;  %v13522_v26 = vpop.permute.xlu1 %5723 }
 0x360   : > { %v8127_v17 = vsel %vm10438_vm7, %v9910_v28, %v8126_v43 }
 0x361   : > { %v13474_v61 = vpop.f32.mrf.mxu0  ;;  %9453 = vmatmul.msk.bf16.gmra.mxu2 %vm694_vm1, %v13400_v19  ;;  %8256 = vrot.lane.b32.xlu2 %v8237_v3, %s10141_s14  ;;  %v5873_v19 = vadd.f32 %v13317_v25, %v13350_v63  ;;  %v8130_v63 = vsel %vm10438_vm7, %v8128_v22, %v8129_v57  ;;  %v8212_v24 = vunpack.c.l.b16 %v8127_v17  ;;  %v8165_v31 = vsel %vm10438_vm7, %v8163_v5, %v8164_v44  ;;  %v13536_v17 = vld [vmem:[%s10198_s30 + $0xa4] sm:$0x1] }
 0x362   : > { %v8213_v9 = vunpack.c.l.b16 %v8130_v63  ;;  %v7498_v3 = vshrl.u32 %v13168_v2, 16 }
 0x363   : > { %v13502_v36 = vadd.f32 %v13263_v46, %v5873_v19  ;;  %9486 = vmatmul.msk.bf16.gmra.mxu3 %vm694_vm1, %v13426_v38  ;;  %v9837_v46 = vld [vmem:[%s10198_s30 + $0x48] sm:$0xf]  ;;  %v7494_v38 = vshll.u32 %v13168_v2, 16  ;;  %v13531_v2 = vld [vmem:[%s10198_s30 + $0xa0] sm:$0xf] }
 0x364   : > { %9597 = vmatmul.msk.bf16.gmra.mxu0 %vm694_vm1, %v13391_v8  ;;  %v5107_v60 = vpop.f32.mrf.mxu2  ;;  %v8162_v8 = vsel %vm10438_vm7, %v9915_v18, %v8161_v40  ;;  %v8239_v29 = vpack.c.b16 %v8213_v9, %v8212_v24  ;;  %v7485_v43 = vshrl.u32 %v9837_v46, 16  ;;  %v7488_v57 = vshll.u32 %v9837_v46, 16 }
 0x365   : > { %14551 = vst [vmem:[#allocation8_spill] sm:$0xff] %v13502_v36  ;;  %v5108_v25 = vadd.f32 %v5107_v60, %v12335_v7  ;;  %v6809_v7 = vpack.c.b16 %v6788_v13, %v6787_v34  ;;  %v8222_v47 = vunpack.c.l.b16 %v8162_v8  ;;  %v8223_v40 = vunpack.c.l.b16 %v8165_v31  ;;  %v9858_v13 = vld [vmem:[%s10198_s30 + $0x9c] sm:$0xf] }
 0x366   : > { %7150 = vrot.lane.b32.xlu0 %v10028_v41, %s10141_s14  ;;  %v13520_v37 = vpop.f32.mrf.mxu3  ;;  %v7496_v19 = vrot.slane %v7494_v38, 5  ;;  %v7500_v41 = vrot.slane %v7498_v3, 4  ;;  %v13533_v22 = vpop.permute.xlu0 %6410  ;;  %v7487_v18 = vrot.slane %v7485_v43, 4  ;;  %v7490_v44 = vrot.slane %v7488_v57, 5 }
 0x367   : > { %v13514_v11 = vadd.f32 %v13429_v45, %v5108_v25  ;;  %v7504_v45 = vshll.u32 %v13192_v56, 16  ;;  %v13527_v34 = vpop.f32.mrf.mxu1  ;;  %v7653_v5 = vshrl.u32 %v9858_v13, 16  ;;  %v6409_v56 = vpop.permute.xlu2 %6408  ;;  %8260 = vrot.lane.b32.xlu1 %v8239_v29, %s10141_s14  ;;  %v7656_v63 = vshll.u32 %v9858_v13, 16 }
 0x368   : > { %v7501_v25 = vor.u32 %v7500_v41, %v7496_v19  ;;  %v7662_v24 = vshll.u32 %v13531_v2, 16  ;;  %v7666_v9 = vshrl.u32 %v13531_v2, 16  ;;  %v7491_v31 = vor.u32 %v7490_v44, %v7487_v18 }
 0x369   : > { %v13525_v28 = vpop.f32.mrf.mxu0  ;;  %v7506_v60 = vrot.slane %v7504_v45, 5  ;;  %v7655_v46 = vrot.slane %v7653_v5, 4  ;;  %v7672_v38 = vshll.u32 %v13536_v17, 16  ;;  %v5874_v3 = vadd.f32 %v13358_v15, %v13386_v52  ;;  %v9843_v5 = vld [vmem:[%s10198_s30 + $0x60] sm:$0xf] }
 0x36a   : > { %v7502_v57 = vrot.slane %v7501_v25, 4  ;;  %v7658_v29 = vrot.slane %v7656_v63, 5  ;;  %v7664_v45 = vrot.slane %v7662_v24, 5  ;;  %v8244_v41 = vpack.c.b16 %v8223_v40, %v8222_v47  ;;  %v13557_v25 = vld [vmem:[%s10198_s30 + $0x64] sm:$0xf] }
 0x36b   : > { %v7492_v13 = vrot.slane %v7491_v31, 4  ;;  %v7668_v36 = vrot.slane %v7666_v9, 4  ;;  %v13547_v18 = vadd.f32 %v13292_v30, %v5874_v3  ;;  %v7674_v52 = vrot.slane %v7672_v38, 5  ;;  %v13564_v63 = vld [vmem:[%s10198_s30 + $0x68] sm:$0x1] }
 0x36c   : > { %v5109_v8 = vpop.f32.mrf.mxu2  ;;  %9662 = vmatmul.msk.bf16.gmra.mxu1 %vm694_vm1, %v6409_v56  ;;  %v7659_v15 = vor.u32 %v7658_v29, %v7655_v46  ;;  %v7542_v31 = vshll.u32 %v13557_v25, 16  ;;  %v5405_v46 = vpop.permute.xlu1 %5404  ;;  %v7546_v3 = vshrl.u32 %v13557_v25, 16 }
 0x36d   : > { %v5110_v43 = vadd.f32 %v5109_v8, %v12387_v4  ;;  %14552 = vst [vmem:[#allocation9_spill] sm:$0xff] %v13547_v18  ;;  %v7507_v4 = vsel %vm10223_vm4, %v7502_v57, %v7506_v60  ;;  %v7497_v47 = vsel %vm10223_vm4, %v7492_v13, %v7496_v19  ;;  %v7669_v40 = vor.u32 %v7668_v36, %v7664_v45 }
 0x36e   : > { %6835 = vrot.lane.b32.xlu0 %v6809_v7, %s10141_s14  ;;  %v13559_v56 = vpop.f32.mrf.mxu3  ;;  %v7782_v30 = vunpack.c.l.b16 %v7507_v4  ;;  %v7781_v60 = vunpack.c.l.b16 %v7497_v47  ;;  %v7660_v9 = vrot.slane %v7659_v15, 4  ;;  %v7536_v8 = vshll.u32 %v9843_v5, 16  ;;  %v13573_v38 = vpop.permute.xlu0 %5727 }
 0x36f   : > { %v13550_v44 = vadd.f32 %v13468_v35, %v5110_v43  ;;  %v7533_v35 = vshrl.u32 %v9843_v5, 16  ;;  %v13570_v7 = vpop.f32.mrf.mxu1  ;;  %v7670_v19 = vrot.slane %v7669_v40, 4  ;;  %v7552_v43 = vshll.u32 %v13564_v63, 16 }
 0x370   : > { %v7809_v57 = vpack.c.b16 %v7782_v30, %v7781_v60  ;;  %v7538_v29 = vrot.slane %v7536_v8, 5  ;;  %v7544_v13 = vrot.slane %v7542_v31, 5  ;;  %v7548_v5 = vrot.slane %v7546_v3, 4  ;;  %v5726_v31 = vpop.permute.xlu2 %5725 }
 0x371   : > { %v13566_v24 = vpop.f32.mrf.mxu0  ;;  %9454 = vmatmul.msk.bf16.gmra.mxu2 %vm694_vm1, %v13461_v0  ;;  %v7535_v36 = vrot.slane %v7533_v35, 4  ;;  %v7665_v0 = vsel %vm10223_vm4, %v7660_v9, %v7664_v45  ;;  %v7675_v15 = vsel %vm10223_vm4, %v7670_v19, %v7674_v52  ;;  %v5875_v45 = vadd.f32 %v13396_v27, %v13423_v32  ;;  %v10024_v27 = vld [vmem:[%s10198_s30 + $0x54] sm:$0xff] }
 0x372   : > { %7829 = vrot.lane.b32.xlu2 %v7809_v57, %s10141_s14  ;;  %v7795_v40 = vunpack.c.l.b16 %v7665_v0  ;;  %v7549_v35 = vor.u32 %v7548_v5, %v7544_v13  ;;  %v5876_v57 = vadd.f32 %v13431_v51, %v13458_v21  ;;  %v10118_v21 = vld [vmem:[%s10198_s30 + $0xb0] sm:$0x1] }
 0x373   : > { %9487 = vmatmul.msk.bf16.gmra.mxu3 %vm694_vm1, %v5405_v46  ;;  %v7539_v30 = vor.u32 %v7538_v29, %v7535_v36  ;;  %v13593_v9 = vadd.f32 %v13340_v14, %v5875_v45  ;;  %v9678_v36 = vld [vmem:[%s10198_s30 + $0xa8] sm:$0xe]  ;;  %v10117_v14 = vld [vmem:[%s10198_s30 + $0xac] sm:$0xf]  ;;  %v6750_v45 = vrot.slane %v10118_v21, 5 }
 0x374   : > { %9598 = vmatmul.msk.bf16.gmra.mxu0 %vm694_vm1, %v13522_v26  ;;  %v5112_v4 = vpop.f32.mrf.mxu2  ;;  %v7554_v26 = vrot.slane %v7552_v43, 5  ;;  %v7550_v46 = vrot.slane %v7549_v35, 4  ;;  %v6747_v43 = vrot.slane %v10117_v14, 5  ;;  %v9694_v5 = vrot.slane %v9678_v36, 9  ;;  %v13646_v14 = vld [vmem:[%s10198_s30 + $0xbc] sm:$0x1] }
 0x375   : > { %v5113_v47 = vadd.f32 %v5112_v4, %v12448_v62  ;;  %v7796_v62 = vunpack.c.l.b16 %v7675_v15  ;;  %v7540_v52 = vrot.slane %v7539_v30, 4  ;;  %14553 = vst [vmem:[#allocation10_spill] sm:$0xff] %v13593_v9 }
 0x376   : > { %8270 = vrot.lane.b32.xlu0 %v8244_v41, %s10141_s14  ;;  %v13595_v8 = vpop.f32.mrf.mxu3  ;;  %v7555_v41 = vsel %vm10223_vm4, %v7550_v46, %v7554_v26  ;;  %v6749_v51 = vrot.slane %v6747_v43, 4  ;;  %v10119_v26 = vld [vmem:[%s10198_s30 + $0x58] sm:$0xf] }
 0x377   : > { %v13589_v60 = vadd.f32 %v13520_v37, %v5113_v47  ;;  %v7545_v32 = vsel %vm10223_vm4, %v7540_v52, %v7544_v13  ;;  %v13603_v37 = vpop.permute.xlu0 %7132  ;;  %v7816_v29 = vpack.c.b16 %v7796_v62, %v7795_v40  ;;  %v7786_v4 = vunpack.c.l.b16 %v7555_v41  ;;  %v10120_v52 = vld [vmem:[%s10198_s30 + $0x5c] sm:$0x1] }
 0x378   : > { %v7785_v3 = vunpack.c.l.b16 %v7545_v32  ;;  %v13613_v13 = vadd.f32 %v13389_v58, %v5876_v57  ;;  %v6748_v58 = vsel %vm10438_vm7, %v9694_v5, %v6747_v43  ;;  %v6698_v62 = vrot.slane %v10119_v26, 5  ;;  %v5407_v32 = vpop.permute.xlu2 %5406 }
 0x379   : > { %v13597_v19 = vpop.f32.mrf.mxu0  ;;  %v13610_v0 = vpop.f32.mrf.mxu1  ;;  %v6701_v46 = vrot.slane %v10120_v52, 5  ;;  %v6751_v41 = vsel %vm10438_vm7, %v6749_v51, %v6750_v45  ;;  %v5877_v57 = vadd.f32 %v13474_v61, %v13514_v11  ;;  %v6793_v5 = vunpack.c.l.b16 %v6748_v58  ;;  %v14556_v61 = vld [vmem:[#allocation24_spill] sm:$0xff] }
 0x37a   : > { %14554 = vst [vmem:[#allocation12_spill] sm:$0xff] %v13613_v13  ;;  %7142 = vrot.lane.b32.xlu2 %v10024_v27, %s10141_s14  ;;  %v7811_v30 = vpack.c.b16 %v7786_v4, %v7785_v3  ;;  %v13639_v27 = vld [vmem:[%s10198_s30 + $0xb8] sm:$0xf]  ;;  %v10031_v4 = vld [vmem:[%s10198_s30 + $0xa8] sm:$0xff]  ;;  %v6794_v58 = vunpack.c.l.b16 %v6751_v41 }
 0x37b   : > { %v8182_v43 = vrot.slane %v13639_v27, 5  ;;  %v13661_v26 = vadd.f32 %v13433_v55, %v5877_v57 }
 0x37c   : > { %v5114_v15 = vpop.f32.mrf.mxu2  ;;  %9663 = vmatmul.msk.bf16.gmra.mxu1 %vm694_vm1, %v13533_v22  ;;  %7833 = vrot.lane.b32.xlu1 %v7811_v30, %s10141_s14  ;;  %v13633_v22 = vpop.permute.xlu1 %5021 }
 0x37d   : > { %v5115_v47 = vadd.f32 %v5114_v15, %v12498_v49  ;;  %v10026_v15 = vld [vmem:[%s10198_s30 + $0x6c] sm:$0xff]  ;;  %v8184_v45 = vrot.slane %v8182_v43, 4  ;;  %14555 = vst [vmem:[#allocation13_spill] sm:$0xff] %v13661_v26 }
 0x37e   : > { %7843 = vrot.lane.b32.xlu0 %v7816_v29, %s10141_s14  ;;  %v13625_v49 = vpop.f32.mrf.mxu3  ;;  %v14557_v26 = vld [vmem:[#allocation19_spill] sm:$0xff] }
 0x37f   : > { %v13621_v40 = vadd.f32 %v13559_v56, %v5115_v47  ;;  %v9671_v56 = vld [vmem:[%s10198_s30 + $0x54] sm:$0xe]  ;;  %v13641_v36 = vpop.permute.xlu0 %6817  ;;  %v6700_v47 = vrot.slane %v6698_v62, 4 }
 0x380   : > { %v9687_v3 = vrot.slane %v9671_v56, 9  ;;  %v8185_v56 = vrot.slane %v13646_v14, 5 }
 0x381   : > { %v13629_v35 = vpop.f32.mrf.mxu0  ;;  %9455 = vmatmul.msk.bf16.gmra.mxu2 %vm694_vm1, %v13470_v39  ;;  %v9902_v39 = vld [vmem:[%s10198_s30 + $0xb4] sm:$0xe]  ;;  %v13652_v29 = vpop.f32.mrf.mxu1  ;;  %v6702_v52 = vsel %vm10438_vm7, %v6700_v47, %v6701_v46  ;;  %v8133_v47 = vrot.slane %v13557_v25, 5 }
 0x382   : > { %v9918_v30 = vrot.slane %v9902_v39, 9  ;;  %v6699_v51 = vsel %vm10438_vm7, %v9687_v3, %v6698_v62  ;;  %v6780_v39 = vunpack.c.l.b16 %v6702_v52  ;;  %v8186_v46 = vsel %vm10438_vm7, %v8184_v45, %v8185_v56  ;;  %v10121_v45 = vld [vmem:[%s10198_s30 + $0x70] sm:$0xf] }
 0x383   : > { %9488 = vmatmul.msk.bf16.gmra.mxu3 %vm694_vm1, %v5407_v32  ;;  %v6712_v56 = vrot.slane %v10121_v45, 5  ;;  %v8229_v25 = vunpack.c.l.b16 %v8186_v46  ;;  %v13702_v45 = vld [vmem:[%s10198_s30 + $0xc4] sm:$0xf] }
 0x384   : > { %9599 = vmatmul.msk.bf16.gmra.mxu0 %vm694_vm1, %v5726_v31  ;;  %v5117_v21 = vpop.f32.mrf.mxu2  ;;  %v6779_v31 = vunpack.c.l.b16 %v6699_v51  ;;  %v13669_v62 = vsel %vm10438_vm7, %v9918_v30, %v8182_v43  ;;  %7146 = vrot.lane.b32.xlu1 %v10026_v15, %s10141_s14  ;;  %v6812_v43 = vpack.c.b16 %v6794_v58, %v6793_v5  ;;  %v9673_v30 = vld [vmem:[%s10198_s30 + $0x6c] sm:$0xe]  ;;  %v9867_v5 = vld [vmem:[%s10198_s30 + $0xc0] sm:$0xf] }
 0x385   : > { %v5118_v11 = vadd.f32 %v5117_v21, %v14556_v61  ;;  %v8228_v57 = vunpack.c.l.b16 %v13669_v62  ;;  %v9689_v51 = vrot.slane %v9673_v30, 9  ;;  %v10122_v61 = vld [vmem:[%s10198_s30 + $0x74] sm:$0x1]  ;;  %v6714_v30 = vrot.slane %v6712_v56, 4 }
 0x386   : > { %7156 = vrot.lane.b32.xlu0 %v10031_v4, %s10141_s14  ;;  %v13676_v55 = vpop.f32.mrf.mxu3  ;;  %v6805_v32 = vpack.c.b16 %v6780_v39, %v6779_v31  ;;  %v8136_v4 = vrot.slane %v13564_v63, 5  ;;  %v8135_v31 = vrot.slane %v8133_v47, 4  ;;  %v7725_v63 = vshrl.u32 %v9867_v5, 16 }
 0x387   : > { %v13672_v3 = vadd.f32 %v13595_v8, %v5118_v11  ;;  %v9895_v8 = vld [vmem:[%s10198_s30 + $0x60] sm:$0xe]  ;;  %v13687_v15 = vpop.permute.xlu0 %8252  ;;  %v6715_v11 = vrot.slane %v10122_v61, 5  ;;  %v5878_v39 = vadd.f32 %v13525_v28, %v13550_v44  ;;  %v7728_v61 = vshll.u32 %v9867_v5, 16 }
 0x388   : > { %6827 = vrot.lane.b32.xlu2 %v6805_v32, %s10141_s14  ;;  %v9911_v21 = vrot.slane %v9895_v8, 9  ;;  %v6413_v52 = vpop.permute.xlu1 %6412  ;;  %v6713_v8 = vsel %vm10438_vm7, %v9689_v51, %v6712_v56  ;;  %v8137_v46 = vsel %vm10438_vm7, %v8135_v31, %v8136_v4  ;;  %v7734_v4 = vshll.u32 %v13702_v45, 16 }
 0x389   : > { %v13680_v41 = vpop.f32.mrf.mxu0  ;;  %v13693_v58 = vpop.f32.mrf.mxu1  ;;  %v6783_v18 = vunpack.c.l.b16 %v6713_v8  ;;  %v8215_v28 = vunpack.c.l.b16 %v8137_v46  ;;  %v6716_v44 = vsel %vm10438_vm7, %v6714_v30, %v6715_v11  ;;  %v7738_v56 = vshrl.u32 %v13702_v45, 16  ;;  %v9897_v8 = vld [vmem:[%s10198_s30 + $0x78] sm:$0xe] }
 0x38a   : > { %v8134_v32 = vsel %vm10438_vm7, %v9911_v21, %v8133_v47  ;;  %v7727_v47 = vrot.slane %v7725_v63, 4  ;;  %v7730_v21 = vrot.slane %v7728_v61, 5  ;;  %v7744_v11 = vshll.u32 %v13708_v6, 16 }
 0x38b   : > { %v8214_v9 = vunpack.c.l.b16 %v8134_v32  ;;  %v13725_v63 = vadd.f32 %v13478_v12, %v5878_v39  ;;  %v7740_v32 = vrot.slane %v7738_v56, 4  ;;  %v8147_v30 = vrot.slane %v13364_v16, 5 }
 0x38c   : > { %v5119_v62 = vpop.f32.mrf.mxu2  ;;  %9664 = vmatmul.msk.bf16.gmra.mxu1 %vm694_vm1, %v6413_v52  ;;  %v13721_v52 = vpop.permute.xlu2 %6815  ;;  %v8150_v12 = vrot.slane %v13367_v59, 5 }
 0x38d   : > { %v5120_v13 = vadd.f32 %v5119_v62, %v14557_v26  ;;  %v6784_v26 = vunpack.c.l.b16 %v6716_v44  ;;  %v8240_v31 = vpack.c.b16 %v8215_v28, %v8214_v9  ;;  %v7731_v62 = vor.u32 %v7730_v21, %v7727_v47 }
 0x38e   : > { %6841 = vrot.lane.b32.xlu0 %v6812_v43, %s10141_s14  ;;  %v13719_v5 = vpop.f32.mrf.mxu3  ;;  %v7736_v43 = vrot.slane %v7734_v4, 5  ;;  %v8247_v9 = vpack.c.b16 %v8229_v25, %v8228_v57  ;;  %v9913_v28 = vrot.slane %v9897_v8, 9  ;;  %v8149_v44 = vrot.slane %v8147_v30, 4 }
 0x38f   : > { %v13714_v51 = vadd.f32 %v13625_v49, %v5120_v13  ;;  %v6807_v49 = vpack.c.b16 %v6784_v26, %v6783_v18  ;;  %v7732_v46 = vrot.slane %v7731_v62, 4  ;;  %v7746_v18 = vrot.slane %v7744_v11, 5 }
 0x390   : > { %v13733_v61 = vpop.permute.xlu0 %7825  ;;  %8262 = vrot.lane.b32.xlu2 %v8240_v31, %s10141_s14  ;;  %v5879_v47 = vadd.f32 %v13566_v24, %v13589_v60  ;;  %v8148_v59 = vsel %vm10438_vm7, %v9913_v28, %v8147_v30  ;;  %v8151_v24 = vsel %vm10438_vm7, %v8149_v44, %v8150_v12  ;;  %v9846_v31 = vld [vmem:[%s10198_s30 + $0x6c] sm:$0xf]  ;;  %v7570_v62 = vshrl.u32 %v13329_v1, 16 }
 0x391   : > { %v13727_v13 = vpop.f32.mrf.mxu0  ;;  %9456 = vmatmul.msk.bf16.gmra.mxu2 %vm694_vm1, %v13633_v22  ;;  %v13737_v39 = vpop.f32.mrf.mxu1  ;;  %6831 = vrot.lane.b32.xlu1 %v6807_v49, %s10141_s14  ;;  %v7741_v22 = vor.u32 %v7740_v32, %v7736_v43  ;;  %v7737_v57 = vsel %vm10223_vm4, %v7732_v46, %v7736_v43  ;;  %v8218_v26 = vunpack.c.l.b16 %v8148_v59  ;;  %v8219_v4 = vunpack.c.l.b16 %v8151_v24 }
 0x392   : > { %v7801_v60 = vunpack.c.l.b16 %v7737_v57  ;;  %v7557_v32 = vshrl.u32 %v9846_v31, 16  ;;  %v7572_v30 = vrot.slane %v7570_v62, 4 }
 0x393   : > { %9809 = vmatmul.msk.bf16.vlgmr.msra.gmra.mxu3 %vm694_vm1, %v13603_v37  ;;  %v7742_v21 = vrot.slane %v7741_v22, 4  ;;  %v7566_v37 = vshll.u32 %v13329_v1, 16  ;;  %v8242_v43 = vpack.c.b16 %v8219_v4, %v8218_v26  ;;  %v5880_v1 = vadd.f32 %v13597_v19, %v13621_v40  ;;  %v9852_v26 = vld [vmem:[%s10198_s30 + $0x84] sm:$0xf]  ;;  %v13790_v4 = vld [vmem:[%s10198_s30 + $0x88] sm:$0xf] }
 0x394   : > { %9600 = vmatmul.msk.bf16.gmra.mxu0 %vm694_vm1, %v13573_v38  ;;  %v5122_v16 = vpop.f32.mrf.mxu2  ;;  %v13754_v38 = vadd.f32 %v13527_v34, %v5879_v47  ;;  %v7560_v34 = vshll.u32 %v9846_v31, 16  ;;  %v8251_v46 = vpop.permute.xlu2 %8250  ;;  %v7559_v12 = vrot.slane %v7557_v32, 4  ;;  %v13795_v31 = vld [vmem:[%s10198_s30 + $0x8c] sm:$0x1]  ;;  %v7608_v62 = vshll.u32 %v9852_v26, 16 }
 0x395   : > { %v5123_v25 = vadd.f32 %v5122_v16, %v12620_v23  ;;  %v7747_v23 = vsel %vm10223_vm4, %v7742_v21, %v7746_v18  ;;  %v7618_v32 = vshrl.u32 %v13790_v4, 16 }
 0x396   : > { %8276 = vrot.lane.b32.xlu0 %v8247_v9, %s10141_s14  ;;  %v13765_v11 = vpop.f32.mrf.mxu3  ;;  %v7802_v49 = vunpack.c.l.b16 %v7747_v23  ;;  %v7576_v9 = vshll.u32 %v13343_v50, 16  ;;  %v7562_v22 = vrot.slane %v7560_v34, 5  ;;  %v7624_v34 = vshll.u32 %v13795_v31, 16 }
 0x397   : > { %v13757_v56 = vadd.f32 %v13676_v55, %v5123_v25  ;;  %v7568_v55 = vrot.slane %v7566_v37, 5  ;;  %v13778_v25 = vadd.f32 %v13570_v7, %v5880_v1  ;;  %v7605_v37 = vshrl.u32 %v9852_v26, 16  ;;  %v10034_v1 = vld [vmem:[%s10198_s30 + $0xcc] sm:$0xff] }
 0x398   : > { %v13770_v28 = vpop.permute.xlu0 %7138  ;;  %v7819_v47 = vpack.c.b16 %v7802_v49, %v7801_v60  ;;  %v7578_v57 = vrot.slane %v7576_v9, 5  ;;  %v7563_v59 = vor.u32 %v7562_v22, %v7559_v12  ;;  %v7610_v9 = vrot.slane %v7608_v62, 5 }
 0x399   : > { %v13767_v8 = vpop.f32.mrf.mxu0  ;;  %v13774_v44 = vpop.f32.mrf.mxu1  ;;  %8266 = vrot.lane.b32.xlu1 %v8242_v43, %s10141_s14  ;;  %v7573_v16 = vor.u32 %v7572_v30, %v7568_v55  ;;  %v7614_v43 = vshll.u32 %v13790_v4, 16 }
 0x39a   : > { %v7822_v18 = vpop.permute.xlu1 %7821  ;;  %v7564_v19 = vrot.slane %v7563_v59, 4 }
 0x39b   : > { %v7574_v24 = vrot.slane %v7573_v16, 4  ;;  %v7620_v16 = vrot.slane %v7618_v32, 4 }
 0x39c   : > { %v5124_v50 = vpop.f32.mrf.mxu2  ;;  %9921 = vmatmul.msk.bf16.vlgmr.msra.gmra.mxu1 %vm694_vm1, %v8251_v46  ;;  %v7569_v7 = vsel %vm10223_vm4, %v7564_v19, %v7568_v55  ;;  %v7607_v55 = vrot.slane %v7605_v37, 4  ;;  %v5881_v46 = vadd.f32 %v13629_v35, %v13672_v3  ;;  %v7626_v3 = vrot.slane %v7624_v34, 5  ;;  %v10027_v37 = vld [vmem:[%s10198_s30 + $0x78] sm:$0xff] }
 0x39d   : > { %v5125_v21 = vadd.f32 %v5124_v50, %v12683_v10  ;;  %v7579_v60 = vsel %vm10223_vm4, %v7574_v24, %v7578_v57  ;;  %v7787_v49 = vunpack.c.l.b16 %v7569_v7  ;;  %v7824_v7 = vpop.permute.xlu2 %7823 }
 0x39e   : > { %7849 = vrot.lane.b32.xlu0 %v7819_v47, %s10141_s14  ;;  %v5514_v23 = vpop.f32.mrf.mxu3  ;;  %v7788_v10 = vunpack.c.l.b16 %v7579_v60  ;;  %v7611_v50 = vor.u32 %v7610_v9, %v7607_v55  ;;  %v13813_v59 = vadd.f32 %v13610_v0, %v5881_v46  ;;  %v10050_v55 = vld [vmem:[%s14443_s2] ss:$0 sm:$0xff] }
 0x39f   : > { %v13783_v40 = vadd.f32 %v13719_v5, %v5125_v21  ;;  %v14558_v21 = vld [vmem:[#allocation21_spill] sm:$0xff] }
 0x3a0   : > { %v13804_v30 = vpop.permute.xlu0 %6823  ;;  %v7812_v47 = vpack.c.b16 %v7788_v10, %v7787_v49  ;;  %v7612_v19 = vrot.slane %v7611_v50, 4 }
 0x3a1   : > { %v13797_v5 = vpop.f32.mrf.mxu0  ;;  %9697 = vmatmul.msk.bf16.vlgmr.msra.gmra.mxu2 %vm694_vm1, %v13721_v52  ;;  %v13808_v22 = vpop.f32.mrf.mxu1  ;;  %v7616_v52 = vrot.slane %v7614_v43, 5 }
 0x3a2   : > { %v7135_v12 = vpop.permute.xlu1 %7134  ;;  %7835 = vrot.lane.b32.xlu2 %v7812_v47, %s10141_s14 }
 0x3a3   : > { %9810 = vmatmul.msk.bf16.gmra.mxu3 %vm694_vm1, %v7135_v12  ;;  %v7621_v35 = vor.u32 %v7620_v16, %v7616_v52  ;;  %v7617_v0 = vsel %vm10223_vm4, %v7612_v19, %v7616_v52  ;;  %v9674_v16 = vld [vmem:[%s10198_s30 + $0x78] sm:$0xe]  ;;  %v5883_v19 = vadd.f32 %v13727_v13, %v13757_v56 }
 0x3a4   : > { %9873 = vmatmul.msk.bf16.vlgmr.msra.gmra.mxu0 %vm694_vm1, %v7822_v18  ;;  %v5127_v57 = vpop.f32.mrf.mxu2  ;;  %v7791_v49 = vunpack.c.l.b16 %v7617_v0 }
 0x3a5   : > { %v5128_v24 = vadd.f32 %v5127_v57, %v14558_v21  ;;  %v7622_v18 = vrot.slane %v7621_v35, 4  ;;  %v10123_v57 = vld [vmem:[%s10198_s30 + $0x7c] sm:$0xf]  ;;  %v10124_v21 = vld [vmem:[%s10198_s30 + $0x80] sm:$0x1]  ;;  %v7137_v35 = vpop.permute.xlu2 %7136 }
 0x3a6   : > { %7162 = vrot.lane.b32.xlu0 %v10034_v1, %s10141_s14  ;;  %v5517_v26 = vpop.f32.mrf.mxu3  ;;  %v14560_v1 = vld [vmem:[#allocation14_spill] sm:$0xff]  ;;  %v6719_v50 = vrot.slane %v10123_v57, 5 }
 0x3a7   : > { %v13819_v60 = vadd.f32 %v13765_v11, %v5128_v24  ;;  %v7627_v62 = vsel %vm10223_vm4, %v7622_v18, %v7626_v3  ;;  %v5882_v11 = vadd.f32 %v13680_v41, %v13714_v51  ;;  %v6722_v24 = vrot.slane %v10124_v21, 5  ;;  %v10029_v3 = vld [vmem:[%s10198_s30 + $0x90] sm:$0xff] }
 0x3a8   : > { %v13829_v43 = vpop.permute.xlu0 %8258  ;;  %v7792_v32 = vunpack.c.l.b16 %v7627_v62  ;;  %v6721_v0 = vrot.slane %v6719_v50, 4  ;;  %v13867_v62 = vadd.f32 %v13693_v58, %v5883_v19  ;;  %v9898_v58 = vld [vmem:[%s10198_s30 + $0x84] sm:$0xe] }
 0x3a9   : > { %v13824_v10 = vpop.f32.mrf.mxu0  ;;  %v13833_v34 = vpop.f32.mrf.mxu1  ;;  %v13839_v12 = vadd.f32 %v13652_v29, %v5882_v11 }
 0x3aa   : > { %v7814_v46 = vpack.c.b16 %v7792_v32, %v7791_v49  ;;  %7148 = vrot.lane.b32.xlu2 %v10027_v37, %s10141_s14  ;;  %v6820_v29 = vpop.permute.xlu1 %6819  ;;  %14561 = vst [vmem:[#allocation19_spill] sm:$0xff] %v13867_v62  ;;  %v14562_v49 = vld [vmem:[#allocation15_spill] sm:$0xff]  ;;  %v6723_v13 = vsel %vm10438_vm7, %v6721_v0, %v6722_v24  ;;  %v10125_v24 = vld [vmem:[%s10198_s30 + $0x94] sm:$0xf] }
 0x3ab   : > { %14559 = vst [vmem:[#allocation24_spill] sm:$0xff] %v13839_v12 }
 0x3ac   : > { %v5129_v9 = vpop.f32.mrf.mxu2  ;;  %9922 = vmatmul.msk.bf16.gmra.mxu1 %vm694_vm1, %v13687_v15  ;;  %7839 = vrot.lane.b32.xlu1 %v7814_v46, %s10141_s14 }
 0x3ad   : > { %v5130_v47 = vadd.f32 %v5129_v9, %v14560_v1  ;;  %v8154_v1 = vrot.slane %v13790_v4, 5 }
 0x3ae   : > { %8461 = vrot.lane.b32.xlu0 %v10050_v55, %s10141_s14  ;;  %v5519_v51 = vpop.f32.mrf.mxu3 }
 0x3af   : > { %v13846_v41 = vadd.f32 %v5514_v23, %v5130_v47  ;;  %v9690_v23 = vrot.slane %v9674_v16, 9  ;;  %v8157_v47 = vrot.slane %v13795_v31, 5  ;;  %v9676_v16 = vld [vmem:[%s10198_s30 + $0x90] sm:$0xe]  ;;  %v8156_v0 = vrot.slane %v8154_v1, 4 }
 0x3b0   : > { %v13856_v15 = vpop.permute.xlu0 %7831  ;;  %v9692_v21 = vrot.slane %v9676_v16, 9 }
 0x3b1   : > { %v13849_v52 = vpop.f32.mrf.mxu0  ;;  %9698 = vmatmul.msk.bf16.gmra.mxu2 %vm694_vm1, %v13641_v36  ;;  %v13861_v18 = vpop.f32.mrf.mxu1  ;;  %v6720_v37 = vsel %vm10438_vm7, %v9690_v23, %v6719_v50  ;;  %v9914_v50 = vrot.slane %v9898_v58, 9 }
 0x3b2   : > { %v6785_v56 = vunpack.c.l.b16 %v6720_v37  ;;  %v8255_v19 = vpop.permute.xlu1 %8254 }
 0x3b3   : > { %9811 = vmatmul.msk.bf16.gmra.mxu3 %vm694_vm1, %v7137_v35  ;;  %v6733_v35 = vrot.slane %v10125_v24, 5  ;;  %v8155_v4 = vsel %vm10438_vm7, %v9914_v50, %v8154_v1 }
 0x3b4   : > { %9874 = vmatmul.msk.bf16.gmra.mxu0 %vm694_vm1, %v7824_v7  ;;  %v5132_v36 = vpop.f32.mrf.mxu2  ;;  %7152 = vrot.lane.b32.xlu1 %v10029_v3, %s10141_s14  ;;  %v6786_v7 = vunpack.c.l.b16 %v6723_v13  ;;  %v8158_v13 = vsel %vm10438_vm7, %v8156_v0, %v8157_v47  ;;  %v9900_v47 = vld [vmem:[%s10198_s30 + $0x9c] sm:$0xe]  ;;  %v8168_v0 = vrot.slane %v13531_v2, 5 }
 0x3b5   : > { %v5133_v32 = vadd.f32 %v5132_v36, %v14562_v49  ;;  %v6734_v31 = vsel %vm10438_vm7, %v9692_v21, %v6733_v35  ;;  %v6735_v37 = vrot.slane %v6733_v35, 4  ;;  %v14563_v49 = vld [vmem:[#allocation16_spill] sm:$0xff]  ;;  %v6822_v35 = vpop.permute.xlu2 %6821 }
 0x3b6   : > { %v5522_v55 = vpop.f32.mrf.mxu3  ;;  %v6808_v9 = vpack.c.b16 %v6786_v7, %v6785_v56  ;;  %v8220_v56 = vunpack.c.l.b16 %v8155_v4  ;;  %v6789_v7 = vunpack.c.l.b16 %v6734_v31  ;;  %v8170_v4 = vrot.slane %v8168_v0, 4  ;;  %v14564_v31 = vld [vmem:[#allocation17_spill] sm:$0xff] }
 0x3b7   : > { %v13874_v11 = vadd.f32 %v5517_v26, %v5133_v32  ;;  %v10126_v26 = vld [vmem:[%s10198_s30 + $0x98] sm:$0x1] }
 0x3b8   : > { %v13882_v57 = vpop.permute.xlu0 %7144  ;;  %6833 = vrot.lane.b32.xlu2 %v6808_v9, %s10141_s14  ;;  %v6736_v3 = vrot.slane %v10126_v26, 5  ;;  %v8221_v9 = vunpack.c.l.b16 %v8158_v13 }
 0x3b9   : > { %v13876_v46 = vpop.f32.mrf.mxu0  ;;  %v13887_v23 = vpop.f32.mrf.mxu1 }
 0x3ba   : > { %v6737_v58 = vsel %vm10438_vm7, %v6735_v37, %v6736_v3  ;;  %v8243_v21 = vpack.c.b16 %v8221_v9, %v8220_v56  ;;  %v9855_v56 = vld [vmem:[%s10198_s30 + $0x90] sm:$0xf]  ;;  %v7648_v9 = vshll.u32 %v13488_v48, 16 }
 0x3bb   : > { %v6790_v1 = vunpack.c.l.b16 %v6737_v58 }
 0x3bc   : > { %v5134_v36 = vpop.f32.mrf.mxu2  ;;  %9923 = vmatmul.msk.bf16.gmra.mxu1 %vm694_vm1, %v8255_v19  ;;  %v8171_v19 = vrot.slane %v13536_v17, 5 }
 0x3bd   : > { %v5135_v32 = vadd.f32 %v5134_v36, %v14563_v49  ;;  %v6810_v26 = vpack.c.b16 %v6790_v1, %v6789_v7  ;;  %v7638_v7 = vshll.u32 %v13484_v53, 16 }
 0x3be   : > { %v5524_v50 = vpop.f32.mrf.mxu3  ;;  %v8172_v37 = vsel %vm10438_vm7, %v8170_v4, %v8171_v19  ;;  %v7828_v1 = vpop.permute.xlu1 %7827 }
 0x3bf   : > { %v13899_v16 = vadd.f32 %v5519_v51, %v5135_v32  ;;  %v9916_v51 = vrot.slane %v9900_v47, 9  ;;  %6837 = vrot.lane.b32.xlu1 %v6810_v26, %s10141_s14  ;;  %v8225_v32 = vunpack.c.l.b16 %v8172_v37  ;;  %v7629_v26 = vshrl.u32 %v9855_v56, 16  ;;  %v14565_v37 = vld [vmem:[#allocation18_spill] sm:$0xff] }
 0x3c0   : > { %v13907_v36 = vpop.permute.xlu0 %6829  ;;  %8268 = vrot.lane.b32.xlu2 %v8243_v21, %s10141_s14  ;;  %v7632_v47 = vshll.u32 %v9855_v56, 16  ;;  %v5884_v56 = vadd.f32 %v13767_v8, %v13783_v40  ;;  %v13953_v8 = vld [vmem:[%s10198_s30 + $0xb0] sm:$0x1] }
 0x3c1   : > { %v13901_v24 = vpop.f32.mrf.mxu0  ;;  %9699 = vmatmul.msk.bf16.gmra.mxu2 %vm694_vm1, %v6820_v29  ;;  %v13910_v3 = vpop.f32.mrf.mxu1  ;;  %v8169_v2 = vsel %vm10438_vm7, %v9916_v51, %v8168_v0  ;;  %v7640_v0 = vrot.slane %v7638_v7, 5 }
 0x3c2   : > { %v8224_v49 = vunpack.c.l.b16 %v8169_v2  ;;  %v7634_v4 = vrot.slane %v7632_v47, 5  ;;  %v7650_v2 = vrot.slane %v7648_v9, 5  ;;  %v13945_v47 = vld [vmem:[%s10198_s30 + $0xac] sm:$0xf]  ;;  %v13948_v9 = vadd.f32 %v13737_v39, %v5884_v56 }
 0x3c3   : > { %9812 = vmatmul.msk.bf16.gmra.mxu3 %vm694_vm1, %v13770_v28  ;;  %v7696_v39 = vshll.u32 %v13953_v8, 16 }
 0x3c4   : > { %9875 = vmatmul.msk.bf16.gmra.mxu0 %vm694_vm1, %v13733_v61  ;;  %v5137_v29 = vpop.f32.mrf.mxu2  ;;  %v7642_v61 = vshrl.u32 %v13484_v53, 16  ;;  %v8245_v21 = vpack.c.b16 %v8225_v32, %v8224_v49  ;;  %v8257_v53 = vpop.permute.xlu2 %8256  ;;  %14566 = vst [vmem:[#allocation21_spill] sm:$0xff] %v13948_v9 }
 0x3c5   : > { %v5138_v17 = vadd.f32 %v5137_v29, %v14564_v31  ;;  %v7698_v12 = vrot.slane %v7696_v39, 5 }
 0x3c6   : > { %v5527_v58 = vpop.f32.mrf.mxu3  ;;  %v7644_v19 = vrot.slane %v7642_v61, 4 }
 0x3c7   : > { %v13922_v13 = vadd.f32 %v5522_v55, %v5138_v17  ;;  %v7631_v55 = vrot.slane %v7629_v26, 4  ;;  %8272 = vrot.lane.b32.xlu1 %v8245_v21, %s10141_s14  ;;  %v9861_v21 = vld [vmem:[%s10198_s30 + $0xa8] sm:$0xf] }
 0x3c8   : > { %v13930_v51 = vpop.permute.xlu0 %8264  ;;  %v7645_v48 = vor.u32 %v7644_v19, %v7640_v0  ;;  %v7677_v40 = vshrl.u32 %v9861_v21, 16 }
 0x3c9   : > { %v13928_v28 = vpop.f32.mrf.mxu0  ;;  %v13932_v29 = vpop.f32.mrf.mxu1  ;;  %v7635_v17 = vor.u32 %v7634_v4, %v7631_v55 }
 0x3ca   : > { %v7646_v32 = vrot.slane %v7645_v48, 4 }
 0x3cb   : > { %v7636_v7 = vrot.slane %v7635_v17, 4  ;;  %v7141_v17 = vpop.permute.xlu1 %7140 }
 0x3cc   : > { %v5139_v31 = vpop.f32.mrf.mxu2  ;;  %9924 = vmatmul.msk.bf16.gmra.mxu1 %vm694_vm1, %v8257_v53  ;;  %v7651_v26 = vsel %vm10223_vm4, %v7646_v32, %v7650_v2  ;;  %v7680_v53 = vshll.u32 %v9861_v21, 16  ;;  %v7686_v2 = vshll.u32 %v13945_v47, 16 }
 0x3cd   : > { %v5140_v49 = vadd.f32 %v5139_v31, %v14565_v37  ;;  %v7641_v55 = vsel %vm10223_vm4, %v7636_v7, %v7640_v0  ;;  %v7794_v4 = vunpack.c.l.b16 %v7651_v26  ;;  %v7690_v31 = vshrl.u32 %v13945_v47, 16 }
 0x3ce   : > { %v5529_v19 = vpop.f32.mrf.mxu3  ;;  %v7793_v48 = vunpack.c.l.b16 %v7641_v55  ;;  %v7679_v0 = vrot.slane %v7677_v40, 4  ;;  %v7688_v7 = vrot.slane %v7686_v2, 5  ;;  %v14567_v55 = vld [vmem:[#allocation20_spill] sm:$0xff]  ;;  %v5885_v40 = vadd.f32 %v13797_v5, %v13819_v60 }
 0x3cf   : > { %v13939_v61 = vadd.f32 %v5524_v50, %v5140_v49  ;;  %v7682_v49 = vrot.slane %v7680_v53, 5  ;;  %v7692_v26 = vrot.slane %v7690_v31, 4  ;;  %v7830_v31 = vpop.permute.xlu2 %7829 }
 0x3d0   : > { %v13961_v37 = vpop.permute.xlu0 %7837  ;;  %v7815_v56 = vpack.c.b16 %v7794_v4, %v7793_v48 }
 0x3d1   : > { %v13955_v50 = vpop.f32.mrf.mxu0  ;;  %9700 = vmatmul.msk.bf16.gmra.mxu2 %vm694_vm1, %v6822_v35  ;;  %v13963_v32 = vpop.f32.mrf.mxu1  ;;  %v7683_v21 = vor.u32 %v7682_v49, %v7679_v0  ;;  %v7693_v62 = vor.u32 %v7692_v26, %v7688_v7  ;;  %v10030_v49 = vld [vmem:[%s10198_s30 + $0x9c] sm:$0xff] }
 0x3d2   : > { %7841 = vrot.lane.b32.xlu2 %v7815_v56, %s10141_s14 }
 0x3d3   : > { %9813 = vmatmul.msk.bf16.gmra.mxu3 %vm694_vm1, %v7141_v17  ;;  %v7684_v53 = vrot.slane %v7683_v21, 4  ;;  %v7694_v48 = vrot.slane %v7693_v62, 4 }
 0x3d4   : > { %9876 = vmatmul.msk.bf16.gmra.mxu0 %vm694_vm1, %v7828_v1  ;;  %v5142_v35 = vpop.f32.mrf.mxu2  ;;  %v13974_v1 = vadd.f32 %v13774_v44, %v5885_v40  ;;  %v6826_v40 = vpop.permute.xlu1 %6825 }
 0x3d5   : > { %v5143_v9 = vadd.f32 %v5142_v35, %v14567_v55  ;;  %v7689_v0 = vsel %vm10223_vm4, %v7684_v53, %v7688_v7  ;;  %v7699_v39 = vsel %vm10223_vm4, %v7694_v48, %v7698_v12  ;;  %v5886_v7 = vadd.f32 %v13824_v10, %v13846_v41  ;;  %v9677_v53 = vld [vmem:[%s10198_s30 + $0x9c] sm:$0xe]  ;;  %v10127_v10 = vld [vmem:[%s10198_s30 + $0xa0] sm:$0xf]  ;;  %v10128_v48 = vld [vmem:[%s10198_s30 + $0xa4] sm:$0x1] }
 0x3d6   : > { %v5532_v2 = vpop.f32.mrf.mxu3  ;;  %v7797_v56 = vunpack.c.l.b16 %v7689_v0  ;;  %v7798_v60 = vunpack.c.l.b16 %v7699_v39  ;;  %v6740_v41 = vrot.slane %v10127_v10, 5  ;;  %v6743_v0 = vrot.slane %v10128_v48, 5 }
 0x3d7   : > { %v13971_v4 = vadd.f32 %v5527_v58, %v5143_v9  ;;  %v14568_v9 = vld [vmem:[#allocation22_spill] sm:$0xff]  ;;  %v13997_v35 = vadd.f32 %v13808_v22, %v5886_v7  ;;  %v9693_v39 = vrot.slane %v9677_v53, 9  ;;  %v5887_v7 = vadd.f32 %v13849_v52, %v13874_v11  ;;  %v9679_v52 = vld [vmem:[%s10198_s30 + $0xb4] sm:$0xe] }
 0x3d8   : > { %v13983_v5 = vpop.permute.xlu0 %7150  ;;  %v7817_v58 = vpack.c.b16 %v7798_v60, %v7797_v56  ;;  %v6742_v22 = vrot.slane %v6740_v41, 4 }
 0x3d9   : > { %v13978_v17 = vpop.f32.mrf.mxu0  ;;  %v13985_v62 = vpop.f32.mrf.mxu1  ;;  %14569 = vst [vmem:[#allocation14_spill] sm:$0xff] %v13997_v35  ;;  %v14024_v10 = vadd.f32 %v13833_v34, %v5887_v7  ;;  %v10130_v34 = vld [vmem:[%s10198_s30 + $0xbc] sm:$0x1] }
 0x3da   : > { %7154 = vrot.lane.b32.xlu2 %v10030_v49, %s10141_s14  ;;  %7845 = vrot.lane.b32.xlu1 %v7817_v58, %s10141_s14 }
 0x3db   : > { %14571 = vst [vmem:[#allocation15_spill] sm:$0xff] %v14024_v10  ;;  %v14572_v10 = vld [vmem:[#allocation25_spill] sm:$0xff] }
 0x3dc   : > { %v5144_v44 = vpop.f32.mrf.mxu2  ;;  %9925 = vmatmul.msk.bf16.gmra.mxu1 %vm694_vm1, %v13829_v43  ;;  %v7143_v43 = vpop.permute.xlu2 %7142 }
 0x3dd   : > { %v5145_v26 = vadd.f32 %v5144_v44, %v14568_v9  ;;  %v14570_v44 = vld [vmem:[#allocation23_spill] sm:$0xff]  ;;  %v6744_v9 = vsel %vm10438_vm7, %v6742_v22, %v6743_v0  ;;  %v8175_v0 = vrot.slane %v13945_v47, 5  ;;  %v8178_v22 = vrot.slane %v13953_v8, 5 }
 0x3de   : > { %v5534_v21 = vpop.f32.mrf.mxu3 }
 0x3df   : > { %v13994_v12 = vadd.f32 %v5529_v19, %v5145_v26  ;;  %v10032_v19 = vld [vmem:[%s10198_s30 + $0xb4] sm:$0xff] }
 0x3e0   : > { %v14006_v49 = vpop.permute.xlu0 %6835 }
 0x3e1   : > { %v13999_v55 = vpop.f32.mrf.mxu0  ;;  %9701 = vmatmul.msk.bf16.gmra.mxu2 %vm694_vm1, %v13804_v30  ;;  %v14009_v56 = vpop.f32.mrf.mxu1  ;;  %v6741_v30 = vsel %vm10438_vm7, %v9693_v39, %v6740_v41  ;;  %v9901_v39 = vld [vmem:[%s10198_s30 + $0xa8] sm:$0xe] }
 0x3e2   : > { %v6791_v26 = vunpack.c.l.b16 %v6741_v30  ;;  %7158 = vrot.lane.b32.xlu1 %v10032_v19, %s10141_s14  ;;  %v9917_v19 = vrot.slane %v9901_v39, 9 }
 0x3e3   : > { %9814 = vmatmul.msk.bf16.gmra.mxu3 %vm694_vm1, %v7143_v43 }
 0x3e4   : > { %9877 = vmatmul.msk.bf16.gmra.mxu0 %vm694_vm1, %v7830_v31  ;;  %v5147_v60 = vpop.f32.mrf.mxu2  ;;  %v6792_v31 = vunpack.c.l.b16 %v6744_v9  ;;  %v8261_v9 = vpop.permute.xlu1 %8260  ;;  %v8176_v47 = vsel %vm10438_vm7, %v9917_v19, %v8175_v0 }
 0x3e5   : > { %v5148_v58 = vadd.f32 %v5147_v60, %v14570_v44  ;;  %v10129_v60 = vld [vmem:[%s10198_s30 + $0xb8] sm:$0xf]  ;;  %v6757_v44 = vrot.slane %v10130_v34, 5 }
 0x3e6   : > { %v5537_v41 = vpop.f32.mrf.mxu3  ;;  %v6811_v48 = vpack.c.b16 %v6792_v31, %v6791_v26  ;;  %v6754_v30 = vrot.slane %v10129_v60, 5  ;;  %v8177_v26 = vrot.slane %v8175_v0, 4  ;;  %v5888_v0 = vadd.f32 %v13876_v46, %v13899_v16 }
 0x3e7   : > { %v14021_v53 = vadd.f32 %v5532_v2, %v5148_v58  ;;  %v9695_v2 = vrot.slane %v9679_v52, 9  ;;  %v8226_v52 = vunpack.c.l.b16 %v8176_v47  ;;  %v9903_v47 = vld [vmem:[%s10198_s30 + $0xc0] sm:$0xe] }
 0x3e8   : > { %v14032_v11 = vpop.permute.xlu0 %8270  ;;  %6839 = vrot.lane.b32.xlu2 %v6811_v48, %s10141_s14  ;;  %v6756_v31 = vrot.slane %v6754_v30, 4  ;;  %v8179_v39 = vsel %vm10438_vm7, %v8177_v26, %v8178_v22  ;;  %v9919_v16 = vrot.slane %v9903_v47, 9 }
 0x3e9   : > { %v14026_v43 = vpop.f32.mrf.mxu0  ;;  %v14037_v58 = vpop.f32.mrf.mxu1  ;;  %v6755_v8 = vsel %vm10438_vm7, %v9695_v2, %v6754_v30  ;;  %v8227_v34 = vunpack.c.l.b16 %v8179_v39  ;;  %v5889_v39 = vadd.f32 %v13901_v24, %v13922_v13 }
 0x3ea   : > { %v6795_v60 = vunpack.c.l.b16 %v6755_v8  ;;  %v6758_v35 = vsel %vm10438_vm7, %v6756_v31, %v6757_v44  ;;  %v8189_v44 = vrot.slane %v13702_v45, 5  ;;  %v8192_v8 = vrot.slane %v13708_v6, 5 }
 0x3eb   : > { %v6796_v2 = vunpack.c.l.b16 %v6758_v35 }
 0x3ec   : > { %v5149_v7 = vpop.f32.mrf.mxu2  ;;  %9926 = vmatmul.msk.bf16.gmra.mxu1 %vm694_vm1, %v8261_v9  ;;  %v6828_v9 = vpop.permute.xlu2 %6827  ;;  %v8190_v45 = vsel %vm10438_vm7, %v9919_v16, %v8189_v44 }
 0x3ed   : > { %v5150_v48 = vadd.f32 %v5149_v7, %v14572_v10  ;;  %v8246_v10 = vpack.c.b16 %v8227_v34, %v8226_v52  ;;  %v14054_v7 = vadd.f32 %v13861_v18, %v5888_v0  ;;  %v6813_v26 = vpack.c.b16 %v6796_v2, %v6795_v60 }
 0x3ee   : > { %v5539_v30 = vpop.f32.mrf.mxu3  ;;  %v8191_v18 = vrot.slane %v8189_v44, 4  ;;  %v7710_v34 = vshll.u32 %v13639_v27, 16  ;;  %v7714_v0 = vshrl.u32 %v13639_v27, 16  ;;  %v7720_v2 = vshll.u32 %v13646_v14, 16 }
 0x3ef   : > { %v14051_v19 = vadd.f32 %v5534_v21, %v5150_v48  ;;  %6843 = vrot.lane.b32.xlu1 %v6813_v26, %s10141_s14  ;;  %v8230_v48 = vunpack.c.l.b16 %v8190_v45  ;;  %v7834_v26 = vpop.permute.xlu1 %7833 }
 0x3f0   : > { %v14062_v46 = vpop.permute.xlu0 %7843  ;;  %8274 = vrot.lane.b32.xlu2 %v8246_v10, %s10141_s14  ;;  %v8193_v31 = vsel %vm10438_vm7, %v8191_v18, %v8192_v8  ;;  %v14086_v8 = vadd.f32 %v13887_v23, %v5889_v39  ;;  %v7712_v24 = vrot.slane %v7710_v34, 5  ;;  %v7716_v13 = vrot.slane %v7714_v0, 4 }
 0x3f1   : > { %v14056_v22 = vpop.f32.mrf.mxu0  ;;  %9702 = vmatmul.msk.bf16.gmra.mxu2 %vm694_vm1, %v6826_v40  ;;  %v14065_v35 = vpop.f32.mrf.mxu1  ;;  %v14573_v40 = vld [vmem:[#allocation2_spill] sm:$0xff]  ;;  %v8231_v52 = vunpack.c.l.b16 %v8193_v31  ;;  %v14574_v31 = vld [vmem:[#allocation3_spill] sm:$0xff] }
 0x3f2   : > { %v7717_v45 = vor.u32 %v7716_v13, %v7712_v24 }
 0x3f3   : > { %9815 = vmatmul.msk.bf16.gmra.mxu3 %vm694_vm1, %v13882_v57  ;;  %v8248_v57 = vpack.c.b16 %v8231_v52, %v8230_v48  ;;  %v5890_v52 = vadd.f32 %v13928_v28, %v13939_v61  ;;  %v14113_v28 = vld [vmem:[%s10198_s30 + $0xd4] sm:$0x1] }
 0x3f4   : > { %9878 = vmatmul.msk.bf16.gmra.mxu0 %vm694_vm1, %v13856_v15  ;;  %v5152_v21 = vpop.f32.mrf.mxu2  ;;  %v9864_v15 = vld [vmem:[%s10198_s30 + $0xb4] sm:$0xf]  ;;  %v8263_v14 = vpop.permute.xlu2 %8262  ;;  %v7718_v39 = vrot.slane %v7717_v45, 4 }
 0x3f5   : > { %v5153_v6 = vadd.f32 %v5152_v21, %v14573_v40  ;;  %v7701_v47 = vshrl.u32 %v9864_v15, 16  ;;  %v7704_v44 = vshll.u32 %v9864_v15, 16  ;;  %v7722_v40 = vrot.slane %v7720_v2, 5 }
 0x3f6   : > { %v5542_v10 = vpop.f32.mrf.mxu3  ;;  %v14108_v2 = vadd.f32 %v13910_v3, %v5890_v52  ;;  %v7768_v3 = vshll.u32 %v14113_v28, 16 }
 0x3f7   : > { %v14079_v60 = vadd.f32 %v5537_v41, %v5153_v6  ;;  %v7703_v18 = vrot.slane %v7701_v47, 4  ;;  %v7706_v21 = vrot.slane %v7704_v44, 5  ;;  %8278 = vrot.lane.b32.xlu1 %v8248_v57, %s10141_s14  ;;  %v7723_v0 = vsel %vm10223_vm4, %v7718_v39, %v7722_v40  ;;  %v9870_v57 = vld [vmem:[%s10198_s30 + $0xcc] sm:$0xf]  ;;  %v14105_v47 = vld [vmem:[%s10198_s30 + $0xd0] sm:$0xf] }
 0x3f8   : > { %v14090_v41 = vpop.permute.xlu0 %7156  ;;  %14575 = vst [vmem:[#allocation16_spill] sm:$0xff] %v14108_v2  ;;  %v7749_v61 = vshrl.u32 %v9870_v57, 16  ;;  %v7758_v45 = vshll.u32 %v14105_v47, 16  ;;  %v7762_v40 = vshrl.u32 %v14105_v47, 16 }
 0x3f9   : > { %v14088_v16 = vpop.f32.mrf.mxu0  ;;  %v14092_v27 = vpop.f32.mrf.mxu1  ;;  %v7707_v6 = vor.u32 %v7706_v21, %v7703_v18  ;;  %v7800_v18 = vunpack.c.l.b16 %v7723_v0  ;;  %v7752_v21 = vshll.u32 %v9870_v57, 16  ;;  %v14576_v57 = vld [vmem:[#allocation5_spill] sm:$0xff] }
 0x3fa   : > { %v7760_v52 = vrot.slane %v7758_v45, 5 }
 0x3fb   : > { %v7708_v15 = vrot.slane %v7707_v6, 4 }
 0x3fc   : > { %v5154_v23 = vpop.f32.mrf.mxu2  ;;  %9927 = vmatmul.msk.bf16.gmra.mxu1 %vm694_vm1, %v8263_v14 }
 0x3fd   : > { %v5155_v48 = vadd.f32 %v5154_v23, %v14574_v31  ;;  %v7713_v13 = vsel %vm10223_vm4, %v7708_v15, %v7712_v24  ;;  %v7147_v23 = vpop.permute.xlu1 %7146  ;;  %v7751_v24 = vrot.slane %v7749_v61, 4  ;;  %v7754_v31 = vrot.slane %v7752_v21, 5 }
 0x3fe   : > { %v5544_v44 = vpop.f32.mrf.mxu3  ;;  %v7799_v14 = vunpack.c.l.b16 %v7713_v13  ;;  %v7764_v15 = vrot.slane %v7762_v40, 4  ;;  %v7770_v61 = vrot.slane %v7768_v3, 5  ;;  %v10033_v3 = vld [vmem:[%s10198_s30 + $0xc0] sm:$0xff] }
 0x3ff   : > { %v14099_v34 = vadd.f32 %v5539_v30, %v5155_v48  ;;  %v7755_v0 = vor.u32 %v7754_v31, %v7751_v24  ;;  %v7836_v24 = vpop.permute.xlu2 %7835 }
 0x400   : > { %v14121_v6 = vpop.permute.xlu0 %6841  ;;  %v7818_v39 = vpack.c.b16 %v7800_v18, %v7799_v14  ;;  %v7765_v2 = vor.u32 %v7764_v15, %v7760_v52  ;;  %v5891_v18 = vadd.f32 %v13955_v50, %v13971_v4 }
 0x401   : > { %v14115_v30 = vpop.f32.mrf.mxu0  ;;  %9703 = vmatmul.msk.bf16.gmra.mxu2 %vm694_vm1, %v6828_v9  ;;  %v14123_v48 = vpop.f32.mrf.mxu1  ;;  %v7756_v21 = vrot.slane %v7755_v0, 4 }
 0x402   : > { %7847 = vrot.lane.b32.xlu2 %v7818_v39, %s10141_s14  ;;  %v14134_v45 = vadd.f32 %v13932_v29, %v5891_v18  ;;  %v10132_v29 = vld [vmem:[%s10198_s30 + $0xc8] sm:$0x1] }
 0x403   : > { %9816 = vmatmul.msk.bf16.gmra.mxu3 %vm694_vm1, %v7147_v23  ;;  %v7761_v23 = vsel %vm10223_vm4, %v7756_v21, %v7760_v52  ;;  %v6764_v0 = vrot.slane %v10132_v29, 5  ;;  %v14578_v21 = vld [vmem:[#allocation6_spill] sm:$0xff] }
 0x404   : > { %9879 = vmatmul.msk.bf16.gmra.mxu0 %vm694_vm1, %v7834_v26  ;;  %v5157_v9 = vpop.f32.mrf.mxu2  ;;  %v7766_v26 = vrot.slane %v7765_v2, 4  ;;  %14577 = vst [vmem:[#allocation17_spill] sm:$0xff] %v14134_v45  ;;  %v7803_v50 = vunpack.c.l.b16 %v7761_v23  ;;  %v10131_v2 = vld [vmem:[%s10198_s30 + $0xc4] sm:$0xf] }
 0x405   : > { %v5158_v13 = vadd.f32 %v5157_v9, %v14576_v57  ;;  %v6761_v9 = vrot.slane %v10131_v2, 5  ;;  %v8196_v2 = vrot.slane %v14105_v47, 5 }
 0x406   : > { %v5547_v40 = vpop.f32.mrf.mxu3  ;;  %v7771_v39 = vsel %vm10223_vm4, %v7766_v26, %v7770_v61  ;;  %v5892_v61 = vadd.f32 %v13978_v17, %v13994_v12  ;;  %v9904_v12 = vld [vmem:[%s10198_s30 + $0xcc] sm:$0xe] }
 0x407   : > { %v14131_v14 = vadd.f32 %v5542_v10, %v5158_v13  ;;  %v7804_v4 = vunpack.c.l.b16 %v7771_v39  ;;  %v9680_v10 = vld [vmem:[%s10198_s30 + $0xc0] sm:$0xe]  ;;  %v6763_v42 = vrot.slane %v6761_v9, 4  ;;  %v9920_v29 = vrot.slane %v9904_v12, 9  ;;  %s10143_s30 = smov 4  }
 0x408   : > { %v14148_v13 = vpop.permute.xlu0 %8276  ;;  %v9696_v52 = vrot.slane %v9680_v10, 9 }
 0x409   : > { %v14138_v31 = vpop.f32.mrf.mxu0  ;;  %v14143_v15 = vpop.f32.mrf.mxu1  ;;  %v7820_v18 = vpack.c.b16 %v7804_v4, %v7803_v50  ;;  %v6765_v39 = vsel %vm10438_vm7, %v6763_v42, %v6764_v0 }
 0x40a   : > { %7160 = vrot.lane.b32.xlu2 %v10033_v3, %s10141_s14  ;;  %v6762_v26 = vsel %vm10438_vm7, %v9696_v52, %v6761_v9  ;;  %v14164_v3 = vadd.f32 %v13963_v32, %v5892_v61  ;;  %v6798_v10 = vunpack.c.l.b16 %v6765_v39  ;;  %v8198_v32 = vrot.slane %v8196_v2, 4  ;;  %v14579_v52 = vld [vmem:[#allocation26_spill] sm:$0xff] }
 0x40b   : > { %7851 = vrot.lane.b32.xlu1 %v7820_v18, %s10141_s14  ;;  %v6797_v50 = vunpack.c.l.b16 %v6762_v26  ;;  %v8197_v18 = vsel %vm10438_vm7, %v9920_v29, %v8196_v2 }
 0x40c   : > { %v5159_v57 = vpop.f32.mrf.mxu2  ;;  %9928 = vmatmul.msk.bf16.gmra.mxu1 %vm694_vm1, %v13930_v51  ;;  %v6832_v51 = vpop.permute.xlu1 %6831 }
 0x40d   : > { %v5160_v45 = vadd.f32 %v5159_v57, %v14578_v21  ;;  %v6814_v9 = vpack.c.b16 %v6798_v10, %v6797_v50  ;;  %v5893_v21 = vadd.f32 %v13999_v55, %v14021_v53  ;;  %v5894_v55 = vadd.f32 %v14026_v43, %v14051_v19  ;;  %v14581_v43 = vld [vmem:[#allocation4_spill] sm:$0xff] }
 0x40e   : > { %v5549_v4 = vpop.f32.mrf.mxu3 }
 0x40f   : > { %v14159_v23 = vadd.f32 %v5544_v44, %v5160_v45  ;;  %v8199_v44 = vrot.slane %v14113_v28, 5  ;;  %v7149_v45 = vpop.permute.xlu2 %7148  ;;  %v8232_v28 = vunpack.c.l.b16 %v8197_v18  ;;  %v14190_v26 = vadd.f32 %v13985_v62, %v5893_v21 }
 0x410   : > { %v14185_v42 = vpop.permute.xlu0 %7849  ;;  %v14202_v62 = vadd.f32 %v14009_v56, %v5894_v55  ;;  %v5895_v56 = vadd.f32 %v14056_v22, %v14079_v60  ;;  %v5896_v22 = vadd.f32 %v14088_v16, %v14099_v34 }
 0x411   : > { %v14166_v17 = vpop.f32.mrf.mxu0  ;;  %9704 = vmatmul.msk.bf16.gmra.mxu2 %vm694_vm1, %v13907_v36  ;;  %v14173_v0 = vpop.f32.mrf.mxu1  ;;  %v8200_v47 = vsel %vm10438_vm7, %v8198_v32, %v8199_v44  ;;  %v14580_v44 = vld [vmem:[#allocation11_spill] sm:$0xff] }
 0x412   : > { %6845 = vrot.lane.b32.xlu2 %v6814_v9, %s10141_s14 }
 0x413   : > { %9817 = vmatmul.msk.bf16.gmra.mxu3 %vm694_vm1, %v7149_v45 }
 0x414   : > { %9880 = vmatmul.msk.bf16.gmra.mxu0 %vm694_vm1, %v7836_v24  ;;  %v5162_v57 = vpop.f32.mrf.mxu2  ;;  %v8233_v24 = vunpack.c.l.b16 %v8200_v47  ;;  %v8267_v2 = vpop.permute.xlu1 %8266 }
 0x415   : > { %v5163_v36 = vadd.f32 %v5162_v57, %v14579_v52  ;;  %v14215_v52 = vadd.f32 %v14037_v58, %v5895_v56 }
 0x416   : > { %v7228_v39 = vpop.f32.mrf.mxu3  ;;  %v8249_v10 = vpack.c.b16 %v8233_v24, %v8232_v28 }
 0x417   : > { %v14187_v61 = vadd.f32 %v5547_v40, %v5163_v36  ;;  %v6834_v32 = vpop.permute.xlu2 %6833 }
 0x418   : > { %v14204_v40 = vpop.permute.xlu0 %7162 }
 0x419   : > { %v14192_v50 = vpop.f32.mrf.mxu0  ;;  %v8346_v12 = vpop.f32.mrf.mxu1 }
 0x41a   : > { %8280 = vrot.lane.b32.xlu2 %v8249_v10, %s10141_s14 }
 0x41c   : > { %v5164_v20 = vpop.f32.mrf.mxu2  ;;  %9929 = vmatmul.msk.bf16.gmra.mxu1 %vm694_vm1, %v8267_v2 }
 0x41d   : > { %v5165_v45 = vadd.f32 %v5164_v20, %v14580_v44 }
 0x41e   : > { %v7230_v9 = vpop.f32.mrf.mxu3 }
 0x41f   : > { %v14199_v53 = vadd.f32 %v5549_v4, %v5165_v45  ;;  %v8269_v10 = vpop.permute.xlu2 %8268 }
 0x420   : > { %v14217_v21 = vpop.permute.xlu0 %8461 }
 0x421   : > { %v7913_v29 = vpop.f32.mrf.mxu0  ;;  %9705 = vmatmul.msk.bf16.gmra.mxu2 %vm694_vm1, %v6832_v51  ;;  %v8348_v57 = vpop.f32.mrf.mxu1 }
 0x422   : > { %v7840_v51 = vpop.permute.xlu1 %7839 }
 0x423   : > { %9818 = vmatmul.msk.bf16.gmra.mxu3 %vm694_vm1, %v13983_v5 }
 0x424   : > { %9881 = vmatmul.msk.bf16.gmra.mxu0 %vm694_vm1, %v13961_v37  ;;  %v6907_v18 = vpop.f32.mrf.mxu2 }
 0x425   : > { %v6987_v19 = vadd.f32 %v6907_v18, %v14581_v43 }
 0x426   : > { %v7233_v36 = vpop.f32.mrf.mxu3 }
 0x427   : > { %v7308_v4 = vadd.f32 %v7228_v39, %v6987_v19  ;;  %v14225_v39 = vadd.f32 %v14065_v35, %v5896_v22 }
 0x429   : > { %v7993_v47 = vadd.f32 %v7913_v29, %v7308_v4  ;;  %v7915_v28 = vpop.f32.mrf.mxu0  ;;  %v8351_v24 = vpop.f32.mrf.mxu1 }
 0x42a   : > { %v7153_v29 = vpop.permute.xlu1 %7152 }
 0x42b   : > { %v8426_v37 = vadd.f32 %v8346_v12, %v7993_v47 }
 0x42c   : > { %v6909_v2 = vpop.f32.mrf.mxu2  ;;  %9930 = vmatmul.msk.bf16.gmra.mxu1 %vm694_vm1, %v8269_v10  ;;  %v7842_v4 = vpop.permute.xlu2 %7841  ;;  %v14582_v10 = vld [vmem:[#allocation7_spill] sm:$0xff] }
 0x42d   : > { %v6988_v20 = vadd.f32 %v6909_v2, %v13383_v54  ;;  %v8464_v5 = vadd.f32 %v14217_v21, %v8426_v37 }
 0x42e   : > { %v7235_v44 = vpop.f32.mrf.mxu3 }
 0x42f   : > { %v7309_v58 = vadd.f32 %v7230_v9, %v6988_v20  ;;  %v8496_v60 = vmax.f32 %v8464_v5, 0.0  ;;  %v5897_v9 = vadd.f32 %v14115_v30, %v14131_v14  ;;  %v5898_v30 = vadd.f32 %v14138_v31, %v14159_v23  ;;  %v14583_v23 = vld [vmem:[#allocation8_spill] sm:$0xff] }
 0x431   : > { %v7994_v45 = vadd.f32 %v7915_v28, %v7309_v58  ;;  %v7918_v12 = vpop.f32.mrf.mxu0  ;;  %9706 = vmatmul.msk.bf16.gmra.mxu2 %vm694_vm1, %v6834_v32  ;;  %v8528_v55 = vpack.c.bf16 %v8496_v60, %v8496_v60  ;;  %v8353_v54 = vpop.f32.mrf.mxu1  ;;  %v14236_v19 = vadd.f32 %v14092_v27, %v5897_v9 }
 0x432   : > { %v6838_v60 = vpop.permute.xlu1 %6837 }
 0x433   : > { %8592 = vrot.lane.b32.xlu1 %v8528_v55, %s10143_s30  ;;  %v8427_v18 = vadd.f32 %v8348_v57, %v7994_v45  ;;  %9819 = vmatmul.msk.bf16.gmra.mxu3 %vm694_vm1, %v7153_v29  ;;  %v5899_v55 = vadd.f32 %v14166_v17, %v14187_v61  ;;  %v5900_v17 = vadd.f32 %v14192_v50, %v14199_v53  ;;  %v14585_v53 = vld [vmem:[#allocation10_spill] sm:$0xff] }
 0x434   : > { %9882 = vmatmul.msk.bf16.gmra.mxu0 %vm694_vm1, %v7840_v51  ;;  %v6912_v16 = vpop.f32.mrf.mxu2  ;;  %v7155_v45 = vpop.permute.xlu2 %7154 }
 0x435   : > { %v6989_v34 = vadd.f32 %v6912_v16, %v13416_v33  ;;  %v8465_v35 = vadd.f32 %v14217_v21, %v8427_v18  ;;  %v14258_v18 = vadd.f32 %v14143_v15, %v5899_v55 }
 0x436   : > { %v7238_v56 = vpop.f32.mrf.mxu3 }
 0x437   : > { %v7310_v32 = vadd.f32 %v7233_v36, %v6989_v34  ;;  %v8497_v43 = vmax.f32 %v8465_v35, 0.0  ;;  %v14246_v36 = vadd.f32 %v14123_v48, %v5898_v30 }
 0x439   : > { %v7995_v57 = vadd.f32 %v7918_v12, %v7310_v32  ;;  %v7920_v47 = vpop.f32.mrf.mxu0  ;;  %v8529_v51 = vpack.c.bf16 %v8497_v43, %v8497_v43  ;;  %v8356_v33 = vpop.f32.mrf.mxu1 }
 0x43a   : > { %v8273_v43 = vpop.permute.xlu1 %8272 }
 0x43b   : > { %v8428_v28 = vadd.f32 %v8351_v24, %v7995_v57  ;;  %8594 = vrot.lane.b32.xlu2 %v8529_v51, %s10143_s30  ;;  %v14584_v57 = vld [vmem:[#allocation9_spill] sm:$0xff] }
 0x43c   : > { %v6914_v37 = vpop.f32.mrf.mxu2  ;;  %9931 = vmatmul.msk.bf16.gmra.mxu1 %vm694_vm1, %v14032_v11 }
 0x43d   : > { %v6990_v2 = vadd.f32 %v6914_v37, %v14582_v10  ;;  %v8466_v20 = vadd.f32 %v14217_v21, %v8428_v28 }
 0x43e   : > { %v7240_v24 = vpop.f32.mrf.mxu3 }
 0x43f   : > { %v7311_v27 = vadd.f32 %v7235_v44, %v6990_v2  ;;  %v8498_v14 = vmax.f32 %v8466_v20, 0.0 }
 0x441   : > { %v7996_v5 = vadd.f32 %v7920_v47, %v7311_v27  ;;  %v7923_v22 = vpop.f32.mrf.mxu0  ;;  %9707 = vmatmul.msk.bf16.gmra.mxu2 %vm694_vm1, %v14006_v49  ;;  %v8530_v58 = vpack.c.bf16 %v8498_v14, %v8498_v14  ;;  %v8358_v31 = vpop.f32.mrf.mxu1 }
 0x442   : > { %v6840_v2 = vpop.permute.xlu2 %6839 }
 0x443   : > { %v8429_v12 = vadd.f32 %v8353_v54, %v7996_v5  ;;  %8596 = vrot.lane.b32.xlu0 %v8530_v58, %s10143_s30  ;;  %9820 = vmatmul.msk.bf16.gmra.mxu3 %vm694_vm1, %v7155_v45 }
 0x444   : > { %9883 = vmatmul.msk.bf16.gmra.mxu0 %vm694_vm1, %v7842_v4  ;;  %v6917_v11 = vpop.f32.mrf.mxu2 }
 0x445   : > { %v6991_v44 = vadd.f32 %v6917_v11, %v14583_v23  ;;  %v8467_v48 = vadd.f32 %v14217_v21, %v8429_v12  ;;  %v14586_v23 = vld [vmem:[#allocation12_spill] sm:$0xff] }
 0x446   : > { %v7243_v54 = vpop.f32.mrf.mxu3 }
 0x447   : > { %v7312_v49 = vadd.f32 %v7238_v56, %v6991_v44  ;;  %v8499_v29 = vmax.f32 %v8467_v48, 0.0  ;;  %v14267_v56 = vadd.f32 %v14173_v0, %v5900_v17 }
 0x449   : > { %v7997_v16 = vadd.f32 %v7923_v22, %v7312_v49  ;;  %v7925_v34 = vpop.f32.mrf.mxu0  ;;  %v8531_v35 = vpack.c.bf16 %v8499_v29, %v8499_v29  ;;  %v8361_v32 = vpop.f32.mrf.mxu1 }
 0x44b   : > { %v8430_v9 = vadd.f32 %v8356_v33, %v7997_v16  ;;  %8598 = vrot.lane.b32.xlu1 %v8531_v35, %s10143_s30 }
 0x44c   : > { %v6919_v4 = vpop.f32.mrf.mxu2  ;;  %9932 = vmatmul.msk.bf16.gmra.mxu1 %vm694_vm1, %v8273_v43  ;;  %v7846_v22 = vpop.permute.xlu1 %7845  ;;  %v14587_v43 = vld [vmem:[#allocation13_spill] sm:$0xff] }
 0x44d   : > { %v6992_v47 = vadd.f32 %v6919_v4, %v14584_v57  ;;  %v8468_v51 = vadd.f32 %v14217_v21, %v8430_v9 }
 0x44e   : > { %v7245_v28 = vpop.f32.mrf.mxu3 }
 0x44f   : > { %v7313_v15 = vadd.f32 %v7240_v24, %v6992_v47  ;;  %v8500_v61 = vmax.f32 %v8468_v51, 0.0 }
 0x451   : > { %v7998_v33 = vadd.f32 %v7925_v34, %v7313_v15  ;;  %v7928_v37 = vpop.f32.mrf.mxu0  ;;  %9708 = vmatmul.msk.bf16.gmra.mxu2 %vm694_vm1, %v6838_v60  ;;  %v8532_v10 = vpack.c.bf16 %v8500_v61, %v8500_v61  ;;  %v8363_v30 = vpop.f32.mrf.mxu1 }
 0x453   : > { %v8431_v20 = vadd.f32 %v8358_v31, %v7998_v33  ;;  %8600 = vrot.lane.b32.xlu2 %v8532_v10, %s10143_s30  ;;  %9821 = vmatmul.msk.bf16.gmra.mxu3 %vm694_vm1, %v14090_v41 }
 0x454   : > { %9884 = vmatmul.msk.bf16.gmra.mxu0 %vm694_vm1, %v14062_v46  ;;  %v6922_v50 = vpop.f32.mrf.mxu2  ;;  %v8275_v46 = vpop.permute.xlu2 %8274 }
 0x455   : > { %v6993_v27 = vadd.f32 %v6922_v50, %v14585_v53  ;;  %v8469_v0 = vadd.f32 %v14217_v21, %v8431_v20  ;;  %v7159_v34 = vpop.permute.xlu1 %7158 }
 0x456   : > { %v7248_v5 = vpop.f32.mrf.mxu3 }
 0x457   : > { %v7314_v14 = vadd.f32 %v7243_v54, %v6993_v27  ;;  %v8501_v24 = vmax.f32 %v8469_v0, 0.0 }
 0x459   : > { %v7999_v58 = vadd.f32 %v7928_v37, %v7314_v14  ;;  %v7930_v60 = vpop.f32.mrf.mxu0  ;;  %v8533_v45 = vpack.c.bf16 %v8501_v24, %v8501_v24  ;;  %v8366_v31 = vpop.f32.mrf.mxu1 }
 0x45b   : > { %v8432_v12 = vadd.f32 %v8361_v32, %v7999_v58  ;;  %8602 = vrot.lane.b32.xlu0 %v8533_v45, %s10143_s30 }
 0x45c   : > { %v6924_v11 = vpop.f32.mrf.mxu2  ;;  %9933 = vmatmul.msk.bf16.gmra.mxu1 %vm694_vm1, %v8275_v46  ;;  %v7848_v15 = vpop.permute.xlu2 %7847 }
 0x45d   : > { %v6994_v44 = vadd.f32 %v6924_v11, %v14586_v23  ;;  %v8470_v48 = vadd.f32 %v14217_v21, %v8432_v12 }
 0x45e   : > { %v7250_v49 = vpop.f32.mrf.mxu3 }
 0x45f   : > { %v7315_v41 = vadd.f32 %v7245_v28, %v6994_v44  ;;  %v8502_v55 = vmax.f32 %v8470_v48, 0.0 }
 0x461   : > { %v8000_v29 = vadd.f32 %v7930_v60, %v7315_v41  ;;  %v7933_v54 = vpop.f32.mrf.mxu0  ;;  %9709 = vmatmul.msk.bf16.gmra.mxu2 %vm694_vm1, %v6840_v2  ;;  %v8534_v16 = vpack.c.bf16 %v8502_v55, %v8502_v55  ;;  %v8368_v9 = vpop.f32.mrf.mxu1 }
 0x463   : > { %v8433_v35 = vadd.f32 %v8363_v30, %v8000_v29  ;;  %8604 = vrot.lane.b32.xlu1 %v8534_v16, %s10143_s30  ;;  %9822 = vmatmul.msk.bf16.gmra.mxu3 %vm694_vm1, %v7159_v34 }
 0x464   : > { %9885 = vmatmul.msk.bf16.gmra.mxu0 %vm694_vm1, %v7846_v22  ;;  %v6927_v32 = vpop.f32.mrf.mxu2  ;;  %v7161_v22 = vpop.permute.xlu2 %7160 }
 0x465   : > { %v6995_v4 = vadd.f32 %v6927_v32, %v14587_v43  ;;  %v8471_v57 = vadd.f32 %v14217_v21, %v8433_v35 }
 0x466   : > { %v7253_v17 = vpop.f32.mrf.mxu3 }
 0x467   : > { %v7316_v47 = vadd.f32 %v7248_v5, %v6995_v4  ;;  %v8503_v51 = vmax.f32 %v8471_v57, 0.0  ;;  %v6844_v5 = vpop.permute.xlu1 %6843 }
 0x469   : > { %v8001_v61 = vadd.f32 %v7933_v54, %v7316_v47  ;;  %v7935_v28 = vpop.f32.mrf.mxu0  ;;  %v8535_v33 = vpack.c.bf16 %v8503_v51, %v8503_v51  ;;  %v8371_v10 = vpop.f32.mrf.mxu1 }
 0x46b   : > { %v8434_v37 = vadd.f32 %v8366_v31, %v8001_v61  ;;  %8606 = vrot.lane.b32.xlu2 %v8535_v33, %s10143_s30 }
 0x46c   : > { %v6929_v2 = vpop.f32.mrf.mxu2  ;;  %9934 = vmatmul.msk.bf16.gmra.mxu1 %vm694_vm1, %v14148_v13  ;;  %v6846_v32 = vpop.permute.xlu2 %6845 }
 0x46d   : > { %v6996_v20 = vadd.f32 %v6929_v2, %v13725_v63  ;;  %v8472_v30 = vadd.f32 %v14217_v21, %v8434_v37 }
 0x46e   : > { %v7255_v27 = vpop.f32.mrf.mxu3 }
 0x46f   : > { %v7317_v50 = vadd.f32 %v7250_v49, %v6996_v20  ;;  %v8504_v53 = vmax.f32 %v8472_v30, 0.0  ;;  %v8279_v41 = vpop.permute.xlu1 %8278  ;;  %v14588_v20 = vld [vmem:[#allocation24_spill] sm:$0xff] }
 0x471   : > { %v8002_v0 = vadd.f32 %v7935_v28, %v7317_v50  ;;  %v7938_v14 = vpop.f32.mrf.mxu0  ;;  %9710 = vmatmul.msk.bf16.gmra.mxu2 %vm694_vm1, %v14121_v6  ;;  %v8536_v24 = vpack.c.bf16 %v8504_v53, %v8504_v53  ;;  %v8373_v63 = vpop.f32.mrf.mxu1 }
 0x473   : > { %v8435_v58 = vadd.f32 %v8368_v9, %v8002_v0  ;;  %8608 = vrot.lane.b32.xlu0 %v8536_v24, %s10143_s30  ;;  %9823 = vmatmul.msk.bf16.gmra.mxu3 %vm694_vm1, %v7161_v22 }
 0x474   : > { %9886 = vmatmul.msk.bf16.gmra.mxu0 %vm694_vm1, %v7848_v15  ;;  %v6932_v60 = vpop.f32.mrf.mxu2 }
 0x475   : > { %v6997_v13 = vadd.f32 %v6932_v60, %v13754_v38  ;;  %v8473_v45 = vadd.f32 %v14217_v21, %v8435_v58 }
 0x476   : > { %v7258_v46 = vpop.f32.mrf.mxu3 }
 0x477   : > { %v7318_v12 = vadd.f32 %v7253_v17, %v6997_v13  ;;  %v8505_v31 = vmax.f32 %v8473_v45, 0.0 }
 0x479   : > { %v8003_v6 = vadd.f32 %v7938_v14, %v7318_v12  ;;  %v7940_v11 = vpop.f32.mrf.mxu0  ;;  %v8537_v23 = vpack.c.bf16 %v8505_v31, %v8505_v31  ;;  %v8376_v48 = vpop.f32.mrf.mxu1 }
 0x47b   : > { %v8436_v44 = vadd.f32 %v8371_v10, %v8003_v6  ;;  %8610 = vrot.lane.b32.xlu1 %v8537_v23, %s10143_s30  ;;  %v8281_v10 = vpop.permute.xlu2 %8280 }
 0x47c   : > { %v6934_v55 = vpop.f32.mrf.mxu2  ;;  %9935 = vmatmul.msk.bf16.gmra.mxu1 %vm694_vm1, %v8279_v41 }
 0x47d   : > { %v6998_v49 = vadd.f32 %v6934_v55, %v13778_v25  ;;  %v8474_v38 = vadd.f32 %v14217_v21, %v8436_v44  ;;  %v7852_v14 = vpop.permute.xlu1 %7851  ;;  %v14590_v55 = vld [vmem:[#allocation21_spill] sm:$0xff] }
 0x47e   : > { %v7260_v16 = vpop.f32.mrf.mxu3 }
 0x47f   : > { %v7319_v29 = vadd.f32 %v7255_v27, %v6998_v49  ;;  %v8506_v54 = vmax.f32 %v8474_v38, 0.0 }
 0x481   : > { %v8004_v34 = vadd.f32 %v7940_v11, %v7319_v29  ;;  %v7943_v35 = vpop.f32.mrf.mxu0  ;;  %9711 = vmatmul.msk.bf16.gmra.mxu2 %vm694_vm1, %v6844_v5  ;;  %v8538_v9 = vpack.c.bf16 %v8506_v54, %v8506_v54  ;;  %v8378_v4 = vpop.f32.mrf.mxu1 }
 0x483   : > { %v8437_v43 = vadd.f32 %v8373_v63, %v8004_v34  ;;  %8612 = vrot.lane.b32.xlu2 %v8538_v9, %s10143_s30  ;;  %9824 = vmatmul.msk.bf16.gmra.mxu3 %vm694_vm1, %v14204_v40  ;;  %v14589_v63 = vld [vmem:[#allocation19_spill] sm:$0xff] }
 0x484   : > { %9887 = vmatmul.msk.bf16.gmra.mxu0 %vm694_vm1, %v14185_v42  ;;  %v6937_v25 = vpop.f32.mrf.mxu2 }
 0x485   : > { %v6999_v57 = vadd.f32 %v6937_v25, %v13813_v59  ;;  %v8475_v47 = vadd.f32 %v14217_v21, %v8437_v43 }
 0x486   : > { %v7263_v15 = vpop.f32.mrf.mxu3 }
 0x487   : > { %v7320_v51 = vadd.f32 %v7258_v46, %v6999_v57  ;;  %v8507_v17 = vmax.f32 %v8475_v47, 0.0 }
 0x489   : > { %v8005_v61 = vadd.f32 %v7943_v35, %v7320_v51  ;;  %v7945_v28 = vpop.f32.mrf.mxu0  ;;  %v8539_v33 = vpack.c.bf16 %v8507_v17, %v8507_v17  ;;  %v8381_v2 = vpop.f32.mrf.mxu1 }
 0x48b   : > { %v8438_v37 = vadd.f32 %v8376_v48, %v8005_v61  ;;  %8614 = vrot.lane.b32.xlu0 %v8539_v33, %s10143_s30 }
 0x48c   : > { %v6939_v42 = vpop.f32.mrf.mxu2  ;;  %9936 = vmatmul.msk.bf16.gmra.mxu1 %vm694_vm1, %v8281_v10 }
 0x48d   : > { %v7000_v30 = vadd.f32 %v6939_v42, %v14588_v20  ;;  %v8476_v59 = vadd.f32 %v14217_v21, %v8438_v37  ;;  %v14591_v42 = vld [vmem:[#allocation14_spill] sm:$0xff] }
 0x48e   : > { %v7265_v53 = vpop.f32.mrf.mxu3 }
 0x48f   : > { %v7321_v40 = vadd.f32 %v7260_v16, %v7000_v30  ;;  %v8508_v50 = vmax.f32 %v8476_v59, 0.0 }
 0x491   : > { %v8006_v27 = vadd.f32 %v7945_v28, %v7321_v40  ;;  %v7948_v0 = vpop.f32.mrf.mxu0  ;;  %9712 = vmatmul.msk.bf16.gmra.mxu2 %vm694_vm1, %v6846_v32  ;;  %v8540_v24 = vpack.c.bf16 %v8508_v50, %v8508_v50  ;;  %v8383_v22 = vpop.f32.mrf.mxu1 }
 0x493   : > { %v8439_v5 = vadd.f32 %v8378_v4, %v8006_v27  ;;  %8616 = vrot.lane.b32.xlu1 %v8540_v24, %s10143_s30 }
 0x494   : > { %9888 = vmatmul.msk.bf16.gmra.mxu0 %vm694_vm1, %v7852_v14  ;;  %v6942_v58 = vpop.f32.mrf.mxu2 }
 0x495   : > { %v7001_v60 = vadd.f32 %v6942_v58, %v14589_v63  ;;  %v8595_v13 = vpop.permute.xlu2 %8594  ;;  %v8477_v45 = vadd.f32 %v14217_v21, %v8439_v5 }
 0x496   : > { %8690 = vst.msk [vmem:[%s12279_s29 + $0x4] sm:$0xf] %vm8688_vm9, %v8595_v13  ;;  %v7268_v46 = vpop.f32.mrf.mxu3 }
 0x497   : > { %v7322_v12 = vadd.f32 %v7263_v15, %v7001_v60  ;;  %v8509_v31 = vmax.f32 %v8477_v45, 0.0 }
 0x499   : > { %v8007_v6 = vadd.f32 %v7948_v0, %v7322_v12  ;;  %v7950_v11 = vpop.f32.mrf.mxu0  ;;  %v8541_v23 = vpack.c.bf16 %v8509_v31, %v8509_v31  ;;  %v8386_v48 = vpop.f32.mrf.mxu1 }
 0x49b   : > { %v8440_v44 = vadd.f32 %v8381_v2, %v8007_v6  ;;  %8618 = vrot.lane.b32.xlu2 %v8541_v23, %s10143_s30 }
 0x49c   : > { %v6944_v41 = vpop.f32.mrf.mxu2 }
 0x49d   : > { %v7002_v49 = vadd.f32 %v6944_v41, %v14590_v55  ;;  %v8478_v38 = vadd.f32 %v14217_v21, %v8440_v44 }
 0x49e   : > { %v7270_v16 = vpop.f32.mrf.mxu3 }
 0x49f   : > { %v7323_v29 = vadd.f32 %v7265_v53, %v7002_v49  ;;  %v8510_v54 = vmax.f32 %v8478_v38, 0.0 }
 0x4a1   : > { %v8008_v34 = vadd.f32 %v7950_v11, %v7323_v29  ;;  %v7953_v35 = vpop.f32.mrf.mxu0  ;;  %v8542_v9 = vpack.c.bf16 %v8510_v54, %v8510_v54  ;;  %v8388_v43 = vpop.f32.mrf.mxu1 }
 0x4a3   : > { %v8441_v32 = vadd.f32 %v8383_v22, %v8008_v34  ;;  %8620 = vrot.lane.b32.xlu0 %v8542_v9, %s10143_s30  ;;  %v14592_v22 = vld [vmem:[#allocation15_spill] sm:$0xff] }
 0x4a4   : > { %v6947_v4 = vpop.f32.mrf.mxu2 }
 0x4a5   : > { %v7003_v25 = vadd.f32 %v6947_v4, %v13974_v1  ;;  %v8593_v57 = vpop.permute.xlu1 %8592  ;;  %v8479_v47 = vadd.f32 %v14217_v21, %v8441_v32 }
 0x4a6   : > { %8689 = vst.msk [vmem:[%s12279_s29] sm:$0xf] %vm8688_vm9, %v8593_v57  ;;  %v7273_v15 = vpop.f32.mrf.mxu3 }
 0x4a7   : > { %v7324_v51 = vadd.f32 %v7268_v46, %v7003_v25  ;;  %v8511_v17 = vmax.f32 %v8479_v47, 0.0 }
 0x4a9   : > { %v8009_v61 = vadd.f32 %v7953_v35, %v7324_v51  ;;  %v7955_v28 = vpop.f32.mrf.mxu0  ;;  %v8543_v33 = vpack.c.bf16 %v8511_v17, %v8511_v17  ;;  %v8391_v10 = vpop.f32.mrf.mxu1 }
 0x4ab   : > { %v8442_v37 = vadd.f32 %v8386_v48, %v8009_v61  ;;  %8622 = vrot.lane.b32.xlu1 %v8543_v33, %s10143_s30 }
 0x4ac   : > { %v6949_v2 = vpop.f32.mrf.mxu2 }
 0x4ad   : > { %v7004_v20 = vadd.f32 %v6949_v2, %v14591_v42  ;;  %v8601_v1 = vpop.permute.xlu2 %8600  ;;  %v8480_v30 = vadd.f32 %v14217_v21, %v8442_v37  ;;  %v14593_v37 = vld [vmem:[#allocation16_spill] sm:$0xff] }
 0x4ae   : > { %8693 = vst.msk [vmem:[%s12279_s29 + $0x10] sm:$0xf] %vm8688_vm9, %v8601_v1  ;;  %v7275_v50 = vpop.f32.mrf.mxu3 }
 0x4af   : > { %v7325_v59 = vadd.f32 %v7270_v16, %v7004_v20  ;;  %v8512_v40 = vmax.f32 %v8480_v30, 0.0 }
 0x4b1   : > { %v8010_v53 = vadd.f32 %v7955_v28, %v7325_v59  ;;  %v7958_v27 = vpop.f32.mrf.mxu0  ;;  %v8544_v0 = vpack.c.bf16 %v8512_v40, %v8512_v40  ;;  %v8393_v24 = vpop.f32.mrf.mxu1 }
 0x4b3   : > { %v8443_v14 = vadd.f32 %v8388_v43, %v8010_v53  ;;  %8624 = vrot.lane.b32.xlu2 %v8544_v0, %s10143_s30  ;;  %v14594_v0 = vld [vmem:[#allocation17_spill] sm:$0xff] }
 0x4b4   : > { %v6952_v5 = vpop.f32.mrf.mxu2 }
 0x4b5   : > { %v7005_v58 = vadd.f32 %v6952_v5, %v14592_v22  ;;  %v8597_v63 = vpop.permute.xlu0 %8596  ;;  %v8481_v60 = vadd.f32 %v14217_v21, %v8443_v14 }
 0x4b6   : > { %8691 = vst.msk [vmem:[%s12279_s29 + $0x8] sm:$0xf] %vm8688_vm9, %v8597_v63  ;;  %v7278_v12 = vpop.f32.mrf.mxu3 }
 0x4b7   : > { %v7326_v13 = vadd.f32 %v7273_v15, %v7005_v58  ;;  %v8513_v45 = vmax.f32 %v8481_v60, 0.0 }
 0x4b9   : > { %v8011_v31 = vadd.f32 %v7958_v27, %v7326_v13  ;;  %v7960_v46 = vpop.f32.mrf.mxu0  ;;  %v8545_v6 = vpack.c.bf16 %v8513_v45, %v8513_v45  ;;  %v8396_v23 = vpop.f32.mrf.mxu1 }
 0x4bb   : > { %v8444_v11 = vadd.f32 %v8391_v10, %v8011_v31  ;;  %8626 = vrot.lane.b32.xlu0 %v8545_v6, %s10143_s30 }
 0x4bc   : > { %v6954_v44 = vpop.f32.mrf.mxu2 }
 0x4bd   : > { %v7006_v48 = vadd.f32 %v6954_v44, %v14054_v7  ;;  %v8599_v41 = vpop.permute.xlu1 %8598  ;;  %v8482_v55 = vadd.f32 %v14217_v21, %v8444_v11 }
 0x4be   : > { %8692 = vst.msk [vmem:[%s12279_s29 + $0xc] sm:$0xf] %vm8688_vm9, %v8599_v41  ;;  %v7280_v29 = vpop.f32.mrf.mxu3 }
 0x4bf   : > { %v7327_v49 = vadd.f32 %v7275_v50, %v7006_v48  ;;  %v8514_v38 = vmax.f32 %v8482_v55, 0.0 }
 0x4c1   : > { %v8012_v54 = vadd.f32 %v7960_v46, %v7327_v49  ;;  %v7963_v16 = vpop.f32.mrf.mxu0  ;;  %v8546_v34 = vpack.c.bf16 %v8514_v38, %v8514_v38  ;;  %v8398_v9 = vpop.f32.mrf.mxu1 }
 0x4c3   : > { %v8445_v35 = vadd.f32 %v8393_v24, %v8012_v54  ;;  %8628 = vrot.lane.b32.xlu1 %v8546_v34, %s10143_s30 }
 0x4c4   : > { %v6957_v32 = vpop.f32.mrf.mxu2 }
 0x4c5   : > { %v7007_v43 = vadd.f32 %v6957_v32, %v14086_v8  ;;  %v8607_v7 = vpop.permute.xlu2 %8606  ;;  %v8483_v4 = vadd.f32 %v14217_v21, %v8445_v35 }
 0x4c6   : > { %8696 = vst.msk [vmem:[%s12279_s29 + $0x1c] sm:$0xf] %vm8688_vm9, %v8607_v7  ;;  %v7283_v47 = vpop.f32.mrf.mxu3 }
 0x4c7   : > { %v7328_v25 = vadd.f32 %v7278_v12, %v7007_v43  ;;  %v8515_v57 = vmax.f32 %v8483_v4, 0.0 }
 0x4c9   : > { %v8013_v51 = vadd.f32 %v7963_v16, %v7328_v25  ;;  %v7965_v17 = vpop.f32.mrf.mxu0  ;;  %v8547_v15 = vpack.c.bf16 %v8515_v57, %v8515_v57  ;;  %v8401_v28 = vpop.f32.mrf.mxu1 }
 0x4cb   : > { %v8446_v61 = vadd.f32 %v8396_v23, %v8013_v51  ;;  %8630 = vrot.lane.b32.xlu2 %v8547_v15, %s10143_s30 }
 0x4cc   : > { %v6959_v33 = vpop.f32.mrf.mxu2 }
 0x4cd   : > { %v7008_v10 = vadd.f32 %v6959_v33, %v14593_v37  ;;  %v8603_v8 = vpop.permute.xlu0 %8602  ;;  %v8484_v2 = vadd.f32 %v14217_v21, %v8446_v61 }
 0x4ce   : > { %8694 = vst.msk [vmem:[%s12279_s29 + $0x14] sm:$0xf] %vm8688_vm9, %v8603_v8  ;;  %v7285_v1 = vpop.f32.mrf.mxu3 }
 0x4cf   : > { %v7329_v42 = vadd.f32 %v7280_v29, %v7008_v10  ;;  %v8516_v20 = vmax.f32 %v8484_v2, 0.0 }
 0x4d1   : > { %v8014_v30 = vadd.f32 %v7965_v17, %v7329_v42  ;;  %v7968_v59 = vpop.f32.mrf.mxu0  ;;  %v8548_v40 = vpack.c.bf16 %v8516_v20, %v8516_v20  ;;  %v8403_v53 = vpop.f32.mrf.mxu1 }
 0x4d3   : > { %v8447_v50 = vadd.f32 %v8398_v9, %v8014_v30  ;;  %8632 = vrot.lane.b32.xlu0 %v8548_v40, %s10143_s30 }
 0x4d4   : > { %v6962_v27 = vpop.f32.mrf.mxu2 }
 0x4d5   : > { %v7009_v14 = vadd.f32 %v6962_v27, %v14594_v0  ;;  %v8605_v24 = vpop.permute.xlu1 %8604  ;;  %v8485_v5 = vadd.f32 %v14217_v21, %v8447_v50 }
 0x4d6   : > { %8695 = vst.msk [vmem:[%s12279_s29 + $0x18] sm:$0xf] %vm8688_vm9, %v8605_v24  ;;  %v7288_v63 = vpop.f32.mrf.mxu3 }
 0x4d7   : > { %v7330_v22 = vadd.f32 %v7283_v47, %v7009_v14  ;;  %v8517_v58 = vmax.f32 %v8485_v5, 0.0 }
 0x4d9   : > { %v8015_v60 = vadd.f32 %v7968_v59, %v7330_v22  ;;  %v7970_v13 = vpop.f32.mrf.mxu0  ;;  %v8549_v45 = vpack.c.bf16 %v8517_v58, %v8517_v58  ;;  %v8406_v46 = vpop.f32.mrf.mxu1 }
 0x4db   : > { %v8448_v12 = vadd.f32 %v8401_v28, %v8015_v60  ;;  %8634 = vrot.lane.b32.xlu1 %v8549_v45, %s10143_s30 }
 0x4dc   : > { %v6964_v31 = vpop.f32.mrf.mxu2 }
 0x4dd   : > { %v7010_v6 = vadd.f32 %v6964_v31, %v14164_v3  ;;  %v8613_v11 = vpop.permute.xlu2 %8612  ;;  %v8486_v23 = vadd.f32 %v14217_v21, %v8448_v12 }
 0x4de   : > { %8699 = vst.msk [vmem:[%s12279_s29 + $0x28] sm:$0xf] %vm8688_vm9, %v8613_v11  ;;  %v7290_v38 = vpop.f32.mrf.mxu3 }
 0x4df   : > { %v7331_v44 = vadd.f32 %v7285_v1, %v7010_v6  ;;  %v8518_v48 = vmax.f32 %v8486_v23, 0.0 }
 0x4e1   : > { %v8016_v41 = vadd.f32 %v7970_v13, %v7331_v44  ;;  %v7973_v55 = vpop.f32.mrf.mxu0  ;;  %v8550_v49 = vpack.c.bf16 %v8518_v48, %v8518_v48  ;;  %v8408_v35 = vpop.f32.mrf.mxu1 }
 0x4e3   : > { %v8449_v29 = vadd.f32 %v8403_v53, %v8016_v41  ;;  %8636 = vrot.lane.b32.xlu2 %v8550_v49, %s10143_s30 }
 0x4e4   : > { %v6967_v54 = vpop.f32.mrf.mxu2 }
 0x4e5   : > { %v7011_v16 = vadd.f32 %v6967_v54, %v14190_v26  ;;  %v8609_v34 = vpop.permute.xlu0 %8608  ;;  %v8487_v3 = vadd.f32 %v14217_v21, %v8449_v29 }
 0x4e6   : > { %8697 = vst.msk [vmem:[%s12279_s29 + $0x20] sm:$0xf] %vm8688_vm9, %v8609_v34  ;;  %v7293_v47 = vpop.f32.mrf.mxu3 }
 0x4e7   : > { %v7332_v9 = vadd.f32 %v7288_v63, %v7011_v16  ;;  %v8519_v32 = vmax.f32 %v8487_v3, 0.0 }
 0x4e9   : > { %v8017_v43 = vadd.f32 %v7973_v55, %v7332_v9  ;;  %v7975_v7 = vpop.f32.mrf.mxu0  ;;  %v8551_v4 = vpack.c.bf16 %v8519_v32, %v8519_v32  ;;  %v8411_v28 = vpop.f32.mrf.mxu1 }
 0x4eb   : > { %v8450_v25 = vadd.f32 %v8406_v46, %v8017_v43  ;;  %8638 = vrot.lane.b32.xlu0 %v8551_v4, %s10143_s30 }
 0x4ec   : > { %v6969_v57 = vpop.f32.mrf.mxu2 }
 0x4ed   : > { %v7012_v51 = vadd.f32 %v6969_v57, %v14202_v62  ;;  %v8611_v26 = vpop.permute.xlu1 %8610  ;;  %v8488_v17 = vadd.f32 %v14217_v21, %v8450_v25 }
 0x4ee   : > { %8698 = vst.msk [vmem:[%s12279_s29 + $0x24] sm:$0xf] %vm8688_vm9, %v8611_v26  ;;  %v7295_v1 = vpop.f32.mrf.mxu3 }
 0x4ef   : > { %v7333_v15 = vadd.f32 %v7290_v38, %v7012_v51  ;;  %v8520_v61 = vmax.f32 %v8488_v17, 0.0 }
 0x4f1   : > { %v8018_v33 = vadd.f32 %v7975_v7, %v7333_v15  ;;  %v7978_v37 = vpop.f32.mrf.mxu0  ;;  %v8552_v10 = vpack.c.bf16 %v8520_v61, %v8520_v61  ;;  %v8413_v27 = vpop.f32.mrf.mxu1 }
 0x4f3   : > { %v8451_v8 = vadd.f32 %v8408_v35, %v8018_v33  ;;  %8640 = vrot.lane.b32.xlu1 %v8552_v10, %s10143_s30 }
 0x4f4   : > { %v6972_v2 = vpop.f32.mrf.mxu2 }
 0x4f5   : > { %v7013_v42 = vadd.f32 %v6972_v2, %v14215_v52  ;;  %v8619_v20 = vpop.permute.xlu2 %8618  ;;  %v8489_v62 = vadd.f32 %v14217_v21, %v8451_v8 }
 0x4f6   : > { %8702 = vst.msk [vmem:[%s12279_s29 + $0x34] sm:$0xf] %vm8688_vm9, %v8619_v20  ;;  %v7298_v63 = vpop.f32.mrf.mxu3 }
 0x4f7   : > { %v7334_v30 = vadd.f32 %v7293_v47, %v7013_v42  ;;  %v8521_v59 = vmax.f32 %v8489_v62, 0.0 }
 0x4f9   : > { %v8019_v40 = vadd.f32 %v7978_v37, %v7334_v30  ;;  %v7980_v50 = vpop.f32.mrf.mxu0  ;;  %v8553_v53 = vpack.c.bf16 %v8521_v59, %v8521_v59  ;;  %v8416_v31 = vpop.f32.mrf.mxu1 }
 0x4fb   : > { %v8452_v0 = vadd.f32 %v8411_v28, %v8019_v40  ;;  %8642 = vrot.lane.b32.xlu2 %v8553_v53, %s10143_s30 }
 0x4fc   : > { %v6974_v14 = vpop.f32.mrf.mxu2 }
 0x4fd   : > { %v7014_v24 = vadd.f32 %v6974_v14, %v14225_v39  ;;  %v8615_v52 = vpop.permute.xlu0 %8614  ;;  %v8490_v5 = vadd.f32 %v14217_v21, %v8452_v0 }
 0x4fe   : > { %8700 = vst.msk [vmem:[%s12279_s29 + $0x2c] sm:$0xf] %vm8688_vm9, %v8615_v52  ;;  %v7300_v55 = vpop.f32.mrf.mxu3 }
 0x4ff   : > { %v7335_v22 = vadd.f32 %v7295_v1, %v7014_v24  ;;  %v8522_v58 = vmax.f32 %v8490_v5, 0.0 }
 0x501   : > { %v8020_v60 = vadd.f32 %v7980_v50, %v7335_v22  ;;  %v8554_v13 = vpack.c.bf16 %v8522_v58, %v8522_v58  ;;  %v7983_v45 = vpop.f32.mrf.mxu0  ;;  %v8418_v34 = vpop.f32.mrf.mxu1 }
 0x503   : > { %v8453_v12 = vadd.f32 %v8413_v27, %v8020_v60  ;;  %8644 = vrot.lane.b32.xlu0 %v8554_v13, %s10143_s30 }
 0x504   : > { %v6977_v46 = vpop.f32.mrf.mxu2 }
 0x505   : > { %v7015_v6 = vadd.f32 %v6977_v46, %v14236_v19  ;;  %v8617_v39 = vpop.permute.xlu1 %8616  ;;  %v8491_v11 = vadd.f32 %v14217_v21, %v8453_v12 }
 0x506   : > { %8701 = vst.msk [vmem:[%s12279_s29 + $0x30] sm:$0xf] %vm8688_vm9, %v8617_v39  ;;  %v7303_v7 = vpop.f32.mrf.mxu3 }
 0x507   : > { %v7336_v23 = vadd.f32 %v7298_v63, %v7015_v6  ;;  %v8523_v44 = vmax.f32 %v8491_v11, 0.0 }
 0x509   : > { %v8021_v48 = vadd.f32 %v7983_v45, %v7336_v23  ;;  %v8555_v41 = vpack.c.bf16 %v8523_v44, %v8523_v44  ;;  %v7985_v38 = vpop.f32.mrf.mxu0  ;;  %v8421_v17 = vpop.f32.mrf.mxu1 }
 0x50b   : > { %v8454_v49 = vadd.f32 %v8416_v31, %v8021_v48  ;;  %8646 = vrot.lane.b32.xlu1 %v8555_v41, %s10143_s30 }
 0x50c   : > { %v6979_v29 = vpop.f32.mrf.mxu2 }
 0x50d   : > { %v7016_v54 = vadd.f32 %v6979_v29, %v14246_v36  ;;  %v8625_v16 = vpop.permute.xlu2 %8624  ;;  %v8492_v19 = vadd.f32 %v14217_v21, %v8454_v49 }
 0x50e   : > { %8705 = vst.msk [vmem:[%s12279_s29 + $0x40] sm:$0xf] %vm8688_vm9, %v8625_v16  ;;  %v7305_v8 = vpop.f32.mrf.mxu3 }
 0x50f   : > { %v7337_v3 = vadd.f32 %v7300_v55, %v7016_v54  ;;  %v8524_v35 = vmax.f32 %v8492_v19, 0.0 }
 0x511   : > { %v8022_v9 = vadd.f32 %v7985_v38, %v7337_v3  ;;  %v8556_v32 = vpack.c.bf16 %v8524_v35, %v8524_v35  ;;  %v7988_v47 = vpop.f32.mrf.mxu0  ;;  %v8423_v30 = vpop.f32.mrf.mxu1 }
 0x513   : > { %v8455_v43 = vadd.f32 %v8418_v34, %v8022_v9  ;;  %8648 = vrot.lane.b32.xlu2 %v8556_v32, %s10143_s30 }
 0x514   : > { %v6982_v4 = vpop.f32.mrf.mxu2 }
 0x515   : > { %v7017_v25 = vadd.f32 %v6982_v4, %v14258_v18  ;;  %v8621_v57 = vpop.permute.xlu0 %8620  ;;  %v8493_v36 = vadd.f32 %v14217_v21, %v8455_v43 }
 0x516   : > { %8703 = vst.msk [vmem:[%s12279_s29 + $0x38] sm:$0xf] %vm8688_vm9, %v8621_v57 }
 0x517   : > { %v7338_v51 = vadd.f32 %v7303_v7, %v7017_v25  ;;  %v8525_v26 = vmax.f32 %v8493_v36, 0.0 }
 0x519   : > { %v8023_v15 = vadd.f32 %v7988_v47, %v7338_v51  ;;  %v8557_v61 = vpack.c.bf16 %v8525_v26, %v8525_v26  ;;  %v7990_v20 = vpop.f32.mrf.mxu0 }
 0x51b   : > { %v8456_v28 = vadd.f32 %v8421_v17, %v8023_v15  ;;  %8650 = vrot.lane.b32.xlu0 %v8557_v61, %s10143_s30 }
 0x51c   : > { %v6984_v33 = vpop.f32.mrf.mxu2 }
 0x51d   : > { %v7018_v37 = vadd.f32 %v6984_v33, %v14267_v56  ;;  %v8623_v18 = vpop.permute.xlu1 %8622  ;;  %v8494_v10 = vadd.f32 %v14217_v21, %v8456_v28 }
 0x51e   : > { %8704 = vst.msk [vmem:[%s12279_s29 + $0x3c] sm:$0xf] %vm8688_vm9, %v8623_v18 }
 0x51f   : > { %v7339_v2 = vadd.f32 %v7305_v8, %v7018_v37  ;;  %v8526_v42 = vmax.f32 %v8494_v10, 0.0 }
 0x521   : > { %v8024_v62 = vadd.f32 %v7990_v20, %v7339_v2  ;;  %v8558_v1 = vpack.c.bf16 %v8526_v42, %v8526_v42 }
 0x523   : > { %v8457_v59 = vadd.f32 %v8423_v30, %v8024_v62  ;;  %8652 = vrot.lane.b32.xlu1 %v8558_v1, %s10143_s30 }
 0x525   : > { %v8631_v56 = vpop.permute.xlu2 %8630  ;;  %v8495_v40 = vadd.f32 %v14217_v21, %v8457_v59 }
 0x526   : > { %8708 = vst.msk [vmem:[%s12279_s29 + $0x4c] sm:$0xf] %vm8688_vm9, %v8631_v56 }
 0x527   : > { %v8527_v50 = vmax.f32 %v8495_v40, 0.0 }
 0x529   : > { %v8559_v53 = vpack.c.bf16 %v8527_v50, %v8527_v50 }
 0x52b   : > { %8654 = vrot.lane.b32.xlu2 %v8559_v53, %s10143_s30 }
 0x52d   : > { %v8627_v27 = vpop.permute.xlu0 %8626 }
 0x52e   : > { %8706 = vst.msk [vmem:[%s12279_s29 + $0x44] sm:$0xf] %vm8688_vm9, %v8627_v27 }
 0x535   : > { %v8629_v0 = vpop.permute.xlu1 %8628 }
 0x536   : > { %8707 = vst.msk [vmem:[%s12279_s29 + $0x48] sm:$0xf] %vm8688_vm9, %v8629_v0 }
 0x53d   : > { %v8637_v14 = vpop.permute.xlu2 %8636 }
 0x53e   : > { %8711 = vst.msk [vmem:[%s12279_s29 + $0x58] sm:$0xf] %vm8688_vm9, %v8637_v14 }
 0x545   : > { %v8633_v21 = vpop.permute.xlu0 %8632 }
 0x546   : > { %8709 = vst.msk [vmem:[%s12279_s29 + $0x50] sm:$0xf] %vm8688_vm9, %v8633_v21 }
 0x54d   : > { %v8635_v24 = vpop.permute.xlu1 %8634 }
 0x54e   : > { %8710 = vst.msk [vmem:[%s12279_s29 + $0x54] sm:$0xf] %vm8688_vm9, %v8635_v24 }
 0x555   : > { %v8643_v52 = vpop.permute.xlu2 %8642 }
 0x556   : > { %8714 = vst.msk [vmem:[%s12279_s29 + $0x64] sm:$0xf] %vm8688_vm9, %v8643_v52 }
 0x55d   : > { %v8639_v5 = vpop.permute.xlu0 %8638 }
 0x55e   : > { %8712 = vst.msk [vmem:[%s12279_s29 + $0x5c] sm:$0xf] %vm8688_vm9, %v8639_v5 }
 0x565   : > { %v8641_v22 = vpop.permute.xlu1 %8640 }
 0x566   : > { %8713 = vst.msk [vmem:[%s12279_s29 + $0x60] sm:$0xf] %vm8688_vm9, %v8641_v22 }
 0x56d   : > { %v8649_v58 = vpop.permute.xlu2 %8648 }
 0x56e   : > { %8717 = vst.msk [vmem:[%s12279_s29 + $0x70] sm:$0xf] %vm8688_vm9, %v8649_v58 }
 0x575   : > { %v8645_v63 = vpop.permute.xlu0 %8644 }
 0x576   : > { %8715 = vst.msk [vmem:[%s12279_s29 + $0x68] sm:$0xf] %vm8688_vm9, %v8645_v63 }
 0x57d   : > { %v8647_v60 = vpop.permute.xlu1 %8646 }
 0x57e   : > { %8716 = vst.msk [vmem:[%s12279_s29 + $0x6c] sm:$0xf] %vm8688_vm9, %v8647_v60 }
 0x585   : > { %v8655_v13 = vpop.permute.xlu2 %8654 }
 0x586   : > { %8720 = vst.msk [vmem:[%s12279_s29 + $0x7c] sm:$0xf] %vm8688_vm9, %v8655_v13 }
 0x58d   : > { %v8651_v45 = vpop.permute.xlu0 %8650 }
 0x58e   : > { %8718 = vst.msk [vmem:[%s12279_s29 + $0x74] sm:$0xf] %vm8688_vm9, %v8651_v45 }
 0x595   : > { %v8653_v12 = vpop.permute.xlu1 %8652 }
 0x596   : > { %8719 = vst.msk [vmem:[%s12279_s29 + $0x78] sm:$0xf] %vm8688_vm9, %v8653_v12 }
 0x597 PF: > { %s13_s12 = sadd.s32 1, %s10139_s12  }
 0x598   : > { %p10_p5 = scmp.ge.s32.totalorder %s13_s12, 4  }
 0x59a   :  { %12 = sbr.rel (!%p10_p5) target bundleno = 1 (0x1), region = 64 }

</bundles_post_ra>
